<compile_context>
chip_gen: v5e
topology: v5e:2x2
jax: 0.10.0
libtpu: 0.0.40
codegen_flags: <defaults>
</compile_context>

<pallas_src>
from functools import partial
from math import pi

import jax
import jax.numpy as jnp
import numpy as np
from jax.experimental import pallas as pl
from jax.experimental.pallas import tpu as pltpu


def _round_up(x, m):
    return ((x + m - 1) // m) * m


def _gabor_kernel(pts_ref, rows_ref, wlin_ref, bias_ref, out_ref, *,
                  wavelet_dim, use_cos, use_mxu, mxu_precision, feed_dtype):
    """Gabor wavelet + Linear + ReLU on one lane-dense tile of points."""
    W = wavelet_dim
    pts = pts_ref[...]                               # (4, TM): x, y, z, 1.0
    rows = rows_ref[...]                             # (3W, 4) coefficient table

    if use_mxu:
        # One MXU pass gives the rotated/affine terms for all 3W rows:
        #   rows[0:W]   . pts -> xs    = 2*omega_0*omega*exp(dilate) * x_rot
        #   rows[W:2W]  . pts -> denom = 1e-6 + 1 + z_rot
        #   rows[2W:3W] . pts -> gnum  = gcoef * (1 - z_rot)
        lin = jnp.dot(rows, pts, preferred_element_type=jnp.float32,
                      precision=mxu_precision)       # (3W, TM)
    else:
        # Fallback: same contraction as VPU broadcast mul-adds (pts row 3 == 1).
        lin = (rows[:, 0:1] * pts[0:1, :] + rows[:, 1:2] * pts[1:2, :]
               + rows[:, 2:3] * pts[2:3, :] + rows[:, 3:4] * pts[3:4, :])

    xs = lin[0 * W:1 * W, :]                         # (W, TM)
    denom = lin[1 * W:2 * W, :]
    gnum = lin[2 * W:3 * W, :]

    # EUP approximate reciprocal + one Newton-Raphson step (~1-2 ulp): keeps
    # the divide off the saturating VALU slots without losing the accuracy the
    # omega_0*omega-amplified phase needs.
    r = pl.reciprocal(denom, approx=True)
    inv_denom = r * (2.0 - denom * r)

    phase = xs * inv_denom
    freq_term = jnp.cos(phase) if use_cos else jnp.sin(phase)
    wav = freq_term * jnp.exp(gnum * inv_denom)      # (W, TM)

    # Final linear on the MXU with N = TM (lane-dense result) + bias + ReLU.
    y = jnp.dot(wlin_ref[...].astype(feed_dtype), wav.astype(feed_dtype),
                preferred_element_type=jnp.float32)  # (F, TM)
    out_ref[...] = jnp.maximum(y + bias_ref[...], 0.0).astype(out_ref.dtype)


def _rotation_rows(u, v, w):
    """Rows 0 and 2 of the W per-wavelet 3x3 rotation matrices."""
    W = u.shape[0]
    zeros = jnp.zeros((W,), jnp.float32)
    ones = jnp.ones((W,), jnp.float32)
    alpha = 2.0 * pi * u
    beta = jnp.arccos(jnp.clip(2.0 * v - 1.0, -1.0 + 1e-06, 1.0 - 1e-06))
    gamma = 2.0 * pi * w
    ca, cb, cg = jnp.cos(alpha), jnp.cos(beta), jnp.cos(gamma)
    sa, sb, sg = jnp.sin(alpha), jnp.sin(beta), jnp.sin(gamma)
    Rz_alpha = jnp.stack([jnp.stack([ca, -sa, zeros], 1),
                          jnp.stack([sa, ca, zeros], 1),
                          jnp.stack([zeros, zeros, ones], 1)], 1)
    Rx_beta = jnp.stack([jnp.stack([ones, zeros, zeros], 1),
                         jnp.stack([zeros, cb, -sb], 1),
                         jnp.stack([zeros, sb, cb], 1)], 1)
    Rz_gamma = jnp.stack([jnp.stack([cg, -sg, zeros], 1),
                          jnp.stack([sg, cg, zeros], 1),
                          jnp.stack([zeros, zeros, ones], 1)], 1)
    R = jnp.einsum("wij,wjk->wik",
                   jnp.einsum("wij,wjk->wik", Rz_gamma, Rx_beta), Rz_alpha)
    return R[:, 0, :], R[:, 2, :]                    # (W, 3) each


def _default_min_grid_steps():
    # v5e/v6e: single TensorCore -> the grid is a sequential loop; 2 steps is
    # enough for double-buffer pipelining.  v7x: 2 TCs/chip -> 2 tiles per core.
    try:
        kind = jax.devices()[0].device_kind.lower()
    except Exception:  # noqa: BLE001
        return 2
    return 4 if "v7" in kind else 2


def _vmem_limit_bytes(tm, W, F, out_itemsize):
    # Double-buffered pipeline blocks + small constant tables + live f32
    # intermediates in the body (lin + its slices + ~6 (W, TM) temporaries).
    dbuf = 2 * (4 * tm * 4 + F * tm * out_itemsize)
    tables = 2 * (3 * W * 4 * 4 + F * W * 4 + F * 4)
    live = 12 * W * tm * 4
    est = dbuf + tables + live
    return int(min(112 * 2 ** 20, max(32 * 2 ** 20, 2 * est)))


def spherical_gabor_layer(inp, params, *, omega_0, sigma_0, freq_enc_type,
                          tile_m=8192, min_grid_steps=None,
                          mxu_feed_dtype=jnp.float32, out_dtype=jnp.float32,
                          channel_major_output=False):
    """inp: (..., D>=3) float32. Returns (..., out_features) (or (F, ...) when
    channel_major_output=True, skipping the wrapper-side transpose HBM pass)."""
    omega = params["omega"].astype(jnp.float32)      # (1, W)
    sigma = params["sigma"].astype(jnp.float32)      # (1, W)
    dilate = params["dilate"].astype(jnp.float32)    # (1, W)
    u = params["u"].astype(jnp.float32)              # (W,)
    v = params["v"].astype(jnp.float32)
    w = params["w"].astype(jnp.float32)
    w_lin = params["w_lin"].astype(jnp.float32)      # (F, W)
    b_lin = params["b_lin"].astype(jnp.float32)      # (F,)

    W = omega.shape[1]
    F = w_lin.shape[0]

    # ---- glue: rotation rows + hoisted per-wavelet coefficients, folded into
    #      a single (3W, 4) row table for the in-kernel MXU contraction. ----
    r0, r2 = _rotation_rows(u, v, w)                 # (W, 3) each
    dil = jnp.exp(dilate)                            # (1, W)
    freq_coef = (2.0 * float(omega_0)) * omega * dil                 # (1, W)
    gauss_coef = (-4.0 * float(sigma_0)) * sigma * sigma * dil * dil  # (1, W)
    gcol = gauss_coef.reshape(W, 1)
    row_x = jnp.concatenate([freq_coef.reshape(W, 1) * r0,
                             jnp.zeros((W, 1), jnp.float32)], axis=1)      # -> xs
    row_d = jnp.concatenate([r2, jnp.full((W, 1), 1.0 + 1e-06, jnp.float32)],
                            axis=1)                                        # -> denom
    row_g = jnp.concatenate([-gcol * r2, gcol], axis=1)                    # -> gcoef*(1-z)
    rows = jnp.concatenate([row_x, row_d, row_g], axis=0)                  # (3W, 4)
    bias = b_lin.reshape(F, 1)                                             # (F, 1)

    # ---- flatten points, lane-dense (4, M) slab: xyz + constant ones row ----
    points = inp[..., 0:3].astype(jnp.float32)
    lead_shape = points.shape[:-1]
    M = int(np.prod(lead_shape)) if lead_shape else 1
    pts4 = jnp.concatenate([points.reshape(M, 3).T,
                            jnp.ones((1, M), jnp.float32)], axis=0)        # (4, M)

    # Tile size: as large as useful; only keep enough grid steps to pipeline
    # (and to shard across both TCs on v7x).  Ragged last block is handled by
    # Pallas boundary masking (per-lane compute, masked output write).
    assert tile_m % 128 == 0
    if min_grid_steps is None:
        min_grid_steps = _default_min_grid_steps()
    cap = max(128, _round_up(-(-M // min_grid_steps), 128))
    tm = min(tile_m, cap)
    grid = (pl.cdiv(M, tm),)

    out_itemsize = jnp.dtype(out_dtype).itemsize
    kernel_base = partial(_gabor_kernel, wavelet_dim=W,
                          use_cos=(freq_enc_type == "cos"),
                          feed_dtype=mxu_feed_dtype)

    def build(use_mxu, prec):
        return pl.pallas_call(
            partial(kernel_base, use_mxu=use_mxu, mxu_precision=prec),
            out_shape=jax.ShapeDtypeStruct((F, M), out_dtype),
            grid=grid,
            in_specs=[
                pl.BlockSpec((4, tm), lambda i: (0, i)),       # point slab (lane-dense)
                pl.BlockSpec((3 * W, 4), lambda i: (0, 0)),    # coefficient row table
                pl.BlockSpec((F, W), lambda i: (0, 0)),        # linear weight
                pl.BlockSpec((F, 1), lambda i: (0, 0)),        # linear bias
            ],
            out_specs=pl.BlockSpec((F, tm), lambda i: (0, i)),
            compiler_params=pltpu.CompilerParams(
                dimension_semantics=("parallel",),
                vmem_limit_bytes=_vmem_limit_bytes(tm, W, F, out_itemsize),
            ),
        )

    # Preferred: MXU contraction at HIGHEST precision (rotation error is
    # amplified by omega_0*omega in the phase).  Fall back to default-precision
    # MXU, then to the proven pure-VPU contraction, if Mosaic lowering of the
    # installed jax version rejects a form.  (Eager call -> lowering errors
    # surface here.)
    configs = ((True, jax.lax.Precision.HIGHEST), (True, None), (False, None))
    last_err = None
    out_t = None
    for use_mxu, prec in configs:
        try:
            out_t = build(use_mxu, prec)(pts4, rows, w_lin, bias)
            break
        except Exception as err:  # noqa: BLE001 - lowering/compile fallback only
            last_err = err
    if out_t is None:
        raise last_err

    if channel_major_output:
        return out_t.reshape(F, *lead_shape)
    # PyTorch layout parity (module semantics).  This transpose is an extra
    # un-overlapped HBM pass; fused consumers should use channel_major_output.
    return out_t.T.reshape(*lead_shape, F)


def _reference(inp, params, *, omega_0, sigma_0, freq_enc_type):
    """Pure-JAX mirror of the PyTorch forward for correctness checking."""
    W = params["omega"].shape[1]
    u, v, w = params["u"], params["v"], params["w"]
    zeros = jnp.zeros((W,)); ones = jnp.ones((W,))
    alpha = 2 * pi * u
    beta = jnp.arccos(jnp.clip(2 * v - 1, -1 + 1e-06, 1 - 1e-06))
    gamma = 2 * pi * w
    ca, cb, cg = jnp.cos(alpha), jnp.cos(beta), jnp.cos(gamma)
    sa, sb, sg = jnp.sin(alpha), jnp.sin(beta), jnp.sin(gamma)
    Rz_a = jnp.stack([jnp.stack([ca, -sa, zeros], 1),
                      jnp.stack([sa, ca, zeros], 1),
                      jnp.stack([zeros, zeros, ones], 1)], 1)
    Rx_b = jnp.stack([jnp.stack([ones, zeros, zeros], 1),
                      jnp.stack([zeros, cb, -sb], 1),
                      jnp.stack([zeros, sb, cb], 1)], 1)
    Rz_g = jnp.stack([jnp.stack([cg, -sg, zeros], 1),
                      jnp.stack([sg, cg, zeros], 1),
                      jnp.stack([zeros, zeros, ones], 1)], 1)
    R = jnp.einsum("wij,wjk->wik", jnp.einsum("wij,wjk->wik", Rz_g, Rx_b), Rz_a)
    pts = inp[..., 0:3]                              # (..., 3)
    rot = jnp.einsum("wij,...j->...wi", R, pts)      # (..., W, 3)
    x, z = rot[..., 0], rot[..., 2]
    dil = jnp.exp(params["dilate"])                  # (1, W)
    freq_arg = 2 * dil * x / (1e-06 + 1 + z)
    gauss_arg = 4 * dil * dil * (1 - z) / (1e-06 + 1 + z)
    phase = omega_0 * params["omega"] * freq_arg
    freq_term = jnp.cos(phase) if freq_enc_type == "cos" else jnp.sin(phase)
    gauss_term = jnp.exp(-params["sigma"] * params["sigma"] * sigma_0 * gauss_arg)
    out = freq_term * gauss_term
    y = out @ params["w_lin"].T + params["b_lin"]
    return jnp.maximum(y, 0.0)


if __name__ == "__main__":
    key = jax.random.PRNGKey(0)
    wavelet_dim = 32
    out_features = 16
    omega_0, sigma_0 = 30.0, 10.0
    freq_enc_type = "sin"

    ks = jax.random.split(key, 9)
    params = {
        "omega": jax.random.normal(ks[0], (1, wavelet_dim), jnp.float32),
        "sigma": jax.random.normal(ks[1], (1, wavelet_dim), jnp.float32),
        "dilate": jax.random.normal(ks[2], (1, wavelet_dim), jnp.float32),
        "u": jax.random.uniform(ks[3], (wavelet_dim,), jnp.float32),
        "v": jax.random.uniform(ks[4], (wavelet_dim,), jnp.float32),
        "w": jax.random.uniform(ks[5], (wavelet_dim,), jnp.float32),
        # nn.Linear default init ~ U(-1/sqrt(W), 1/sqrt(W)); deterministic here.
        "w_lin": jax.random.uniform(ks[6], (out_features, wavelet_dim),
                                    jnp.float32, -1.0 / wavelet_dim ** 0.5,
                                    1.0 / wavelet_dim ** 0.5),
        "b_lin": jax.random.uniform(ks[7], (out_features,), jnp.float32,
                                    -1.0 / wavelet_dim ** 0.5,
                                    1.0 / wavelet_dim ** 0.5),
    }

    # Input: (batch=2, n_points=256, 3) unit-sphere-ish coordinates.
    raw = jax.random.normal(ks[8], (2, 256, 3), jnp.float32)
    inp = raw / (jnp.linalg.norm(raw, axis=-1, keepdims=True) + 1e-08)

    out = spherical_gabor_layer(inp, params, omega_0=omega_0, sigma_0=sigma_0,
                                freq_enc_type=freq_enc_type)
    out = jax.block_until_ready(out)

    ref = _reference(inp, params, omega_0=omega_0, sigma_0=sigma_0,
                     freq_enc_type=freq_enc_type)
    # Slightly looser than 1e-4: the Newton-refined EUP reciprocal, the folded
    # per-wavelet coefficients, and the HIGHEST-precision MXU contraction each
    # differ from the exact-divide reference by a few ulp of phase, which
    # omega_0*omega can amplify for extreme parameter draws.
    np.testing.assert_allclose(np.asarray(out), np.asarray(ref),
                               rtol=5e-4, atol=5e-4)
    assert out.shape == (2, 256, out_features)
    print("KERNEL_OK")
</pallas_src>

<mosaic_0001>
module attributes {stable_mosaic.version = 11 : i64} {
  func.func @_gabor_kernel(%arg0: i32, %arg1: memref<4x256xf32, #tpu.memory_space<vmem>>, %arg2: memref<96x4xf32, #tpu.memory_space<vmem>>, %arg3: memref<16x32xf32, #tpu.memory_space<vmem>>, %arg4: memref<16x1xf32, #tpu.memory_space<vmem>>, %arg5: memref<16x256xf32, #tpu.memory_space<vmem>>) attributes {dimension_semantics = [#tpu.dimension_semantics<parallel>], iteration_bounds = array<i64: 2>, scalar_prefetch = 0 : i64, scratch_operands = 0 : i64, tpu.core_type = #tpu.core_type<tc>, window_params = [{transform_indices = @transform_0, window_bounds = array<i64: 4, 256>}, {pipeline_mode = #tpu.pipeline_mode<synchronous>, transform_indices = @transform_1, window_bounds = array<i64: 96, 4>}, {pipeline_mode = #tpu.pipeline_mode<synchronous>, transform_indices = @transform_2, window_bounds = array<i64: 16, 32>}, {pipeline_mode = #tpu.pipeline_mode<synchronous>, transform_indices = @transform_3, window_bounds = array<i64: 16, 1>}, {transform_indices = @transform_4, window_bounds = array<i64: 16, 256>}]} {
    %c0 = arith.constant 0 : index
    %c0_0 = arith.constant 0 : index
    %0 = vector.load %arg1[%c0, %c0_0] : memref<4x256xf32, #tpu.memory_space<vmem>>, vector<4x256xf32>
    %c0_1 = arith.constant 0 : index
    %c0_2 = arith.constant 0 : index
    %1 = vector.load %arg2[%c0_1, %c0_2] : memref<96x4xf32, #tpu.memory_space<vmem>>, vector<96x4xf32>
    %cst = arith.constant dense<0.000000e+00> : vector<96x256xf32>
    %2 = tpu.matmul %1, %0, %cst {dimension_numbers = #tpu.dot_dimension_numbers<[1], [0], [0], [1], [0, 0, 1, 1], [], []>, precision = #tpu.contract_precision<fp32>} : vector<96x4xf32>, vector<4x256xf32>, vector<96x256xf32> -> vector<96x256xf32>
    %3 = vector.extract_strided_slice %2 {offsets = [0, 0], sizes = [32, 256], strides = [1, 1]} : vector<96x256xf32> to vector<32x256xf32>
    %4 = vector.extract_strided_slice %2 {offsets = [32, 0], sizes = [32, 256], strides = [1, 1]} : vector<96x256xf32> to vector<32x256xf32>
    %5 = vector.extract_strided_slice %2 {offsets = [64, 0], sizes = [32, 256], strides = [1, 1]} : vector<96x256xf32> to vector<32x256xf32>
    %6 = tpu.reciprocal %4 {approx = true} : vector<32x256xf32> -> vector<32x256xf32>
    %7 = arith.mulf %4, %6 : vector<32x256xf32>
    %cst_3 = arith.constant 2.000000e+00 : f32
    %8 = vector.broadcast %cst_3 : f32 to vector<32x256xf32>
    %9 = arith.subf %8, %7 : vector<32x256xf32>
    %10 = arith.mulf %6, %9 : vector<32x256xf32>
    %11 = arith.mulf %3, %10 : vector<32x256xf32>
    %12 = math.sin %11 : vector<32x256xf32>
    %13 = arith.mulf %5, %10 : vector<32x256xf32>
    %14 = math.exp %13 : vector<32x256xf32>
    %15 = arith.mulf %12, %14 : vector<32x256xf32>
    %c0_4 = arith.constant 0 : index
    %c0_5 = arith.constant 0 : index
    %16 = vector.load %arg3[%c0_4, %c0_5] : memref<16x32xf32, #tpu.memory_space<vmem>>, vector<16x32xf32>
    %cst_6 = arith.constant dense<0.000000e+00> : vector<16x256xf32>
    %17 = tpu.matmul %16, %15, %cst_6 {dimension_numbers = #tpu.dot_dimension_numbers<[1], [0], [0], [1], [0, 0, 1, 1], [], []>} : vector<16x32xf32>, vector<32x256xf32>, vector<16x256xf32> -> vector<16x256xf32>
    %c0_7 = arith.constant 0 : index
    %c0_8 = arith.constant 0 : index
    %18 = vector.load %arg4[%c0_7, %c0_8] : memref<16x1xf32, #tpu.memory_space<vmem>>, vector<16x1xf32>
    %19 = vector.broadcast %18 : vector<16x1xf32> to vector<16x256xf32>
    %20 = arith.addf %17, %19 : vector<16x256xf32>
    %cst_9 = arith.constant 0.000000e+00 : f32
    %21 = vector.broadcast %cst_9 : f32 to vector<16x256xf32>
    %22 = arith.maximumf %20, %21 : vector<16x256xf32>
    %c0_10 = arith.constant 0 : index
    %c0_11 = arith.constant 0 : index
    %23 = vector.load %arg5[%c0_10, %c0_11] : memref<16x256xf32, #tpu.memory_space<vmem>>, vector<16x256xf32>
    tpu.vector_store %arg5[%c0_10, %c0_11], %22 {strides = array<i32>} : memref<16x256xf32, #tpu.memory_space<vmem>>, vector<16x256xf32>,
    return
  }
  func.func @transform_0(%arg0: i32) -> (i32, i32) {
    %c0_i32 = arith.constant 0 : i32
    %c0_i32_0 = arith.constant 0 : i32
    return %c0_i32, %arg0 : i32, i32
  }
  func.func @transform_1(%arg0: i32) -> (i32, i32) {
    %c0_i32 = arith.constant 0 : i32
    %c0_i32_0 = arith.constant 0 : i32
    %c0_i32_1 = arith.constant 0 : i32
    return %c0_i32, %c0_i32_0 : i32, i32
  }
  func.func @transform_2(%arg0: i32) -> (i32, i32) {
    %c0_i32 = arith.constant 0 : i32
    %c0_i32_0 = arith.constant 0 : i32
    %c0_i32_1 = arith.constant 0 : i32
    return %c0_i32, %c0_i32_0 : i32, i32
  }
  func.func @transform_3(%arg0: i32) -> (i32, i32) {
    %c0_i32 = arith.constant 0 : i32
    %c0_i32_0 = arith.constant 0 : i32
    %c0_i32_1 = arith.constant 0 : i32
    return %c0_i32, %c0_i32_0 : i32, i32
  }
  func.func @transform_4(%arg0: i32) -> (i32, i32) {
    %c0_i32 = arith.constant 0 : i32
    %c0_i32_0 = arith.constant 0 : i32
    return %c0_i32, %arg0 : i32, i32
  }
}

module attributes {stable_mosaic.version = 11 : i64} {
  func.func @_gabor_kernel(%arg0: i32, %arg1: memref<4x256xf32, #tpu.memory_space<vmem>>, %arg2: memref<96x4xf32, #tpu.memory_space<vmem>>, %arg3: memref<16x32xf32, #tpu.memory_space<vmem>>, %arg4: memref<16x1xf32, #tpu.memory_space<vmem>>, %arg5: memref<16x256xf32, #tpu.memory_space<vmem>>) attributes {dimension_semantics = [#tpu.dimension_semantics<parallel>], iteration_bounds = array<i64: 2>, scalar_prefetch = 0 : i64, scratch_operands = 0 : i64, tpu.core_type = #tpu.core_type<tc>, window_params = [{transform_indices = @transform_0, window_bounds = array<i64: 4, 256>}, {pipeline_mode = #tpu.pipeline_mode<synchronous>, transform_indices = @transform_1, window_bounds = array<i64: 96, 4>}, {pipeline_mode = #tpu.pipeline_mode<synchronous>, transform_indices = @transform_2, window_bounds = array<i64: 16, 32>}, {pipeline_mode = #tpu.pipeline_mode<synchronous>, transform_indices = @transform_3, window_bounds = array<i64: 16, 1>}, {transform_indices = @transform_4, window_bounds = array<i64: 16, 256>}]} {
    %c0 = arith.constant 0 : index
    %c0_0 = arith.constant 0 : index
    %0 = vector.load %arg1[%c0, %c0_0] : memref<4x256xf32, #tpu.memory_space<vmem>>, vector<4x256xf32>
    %c0_1 = arith.constant 0 : index
    %c0_2 = arith.constant 0 : index
    %1 = vector.load %arg2[%c0_1, %c0_2] : memref<96x4xf32, #tpu.memory_space<vmem>>, vector<96x4xf32>
    %cst = arith.constant dense<0.000000e+00> : vector<96x256xf32>
    %2 = tpu.matmul %1, %0, %cst {dimension_numbers = #tpu.dot_dimension_numbers<[1], [0], [0], [1], [0, 0, 1, 1], [], []>} : vector<96x4xf32>, vector<4x256xf32>, vector<96x256xf32> -> vector<96x256xf32>
    %3 = vector.extract_strided_slice %2 {offsets = [0, 0], sizes = [32, 256], strides = [1, 1]} : vector<96x256xf32> to vector<32x256xf32>
    %4 = vector.extract_strided_slice %2 {offsets = [32, 0], sizes = [32, 256], strides = [1, 1]} : vector<96x256xf32> to vector<32x256xf32>
    %5 = vector.extract_strided_slice %2 {offsets = [64, 0], sizes = [32, 256], strides = [1, 1]} : vector<96x256xf32> to vector<32x256xf32>
    %6 = tpu.reciprocal %4 {approx = true} : vector<32x256xf32> -> vector<32x256xf32>
    %7 = arith.mulf %4, %6 : vector<32x256xf32>
    %cst_3 = arith.constant 2.000000e+00 : f32
    %8 = vector.broadcast %cst_3 : f32 to vector<32x256xf32>
    %9 = arith.subf %8, %7 : vector<32x256xf32>
    %10 = arith.mulf %6, %9 : vector<32x256xf32>
    %11 = arith.mulf %3, %10 : vector<32x256xf32>
    %12 = math.sin %11 : vector<32x256xf32>
    %13 = arith.mulf %5, %10 : vector<32x256xf32>
    %14 = math.exp %13 : vector<32x256xf32>
    %15 = arith.mulf %12, %14 : vector<32x256xf32>
    %c0_4 = arith.constant 0 : index
    %c0_5 = arith.constant 0 : index
    %16 = vector.load %arg3[%c0_4, %c0_5] : memref<16x32xf32, #tpu.memory_space<vmem>>, vector<16x32xf32>
    %cst_6 = arith.constant dense<0.000000e+00> : vector<16x256xf32>
    %17 = tpu.matmul %16, %15, %cst_6 {dimension_numbers = #tpu.dot_dimension_numbers<[1], [0], [0], [1], [0, 0, 1, 1], [], []>} : vector<16x32xf32>, vector<32x256xf32>, vector<16x256xf32> -> vector<16x256xf32>
    %c0_7 = arith.constant 0 : index
    %c0_8 = arith.constant 0 : index
    %18 = vector.load %arg4[%c0_7, %c0_8] : memref<16x1xf32, #tpu.memory_space<vmem>>, vector<16x1xf32>
    %19 = vector.broadcast %18 : vector<16x1xf32> to vector<16x256xf32>
    %20 = arith.addf %17, %19 : vector<16x256xf32>
    %cst_9 = arith.constant 0.000000e+00 : f32
    %21 = vector.broadcast %cst_9 : f32 to vector<16x256xf32>
    %22 = arith.maximumf %20, %21 : vector<16x256xf32>
    %c0_10 = arith.constant 0 : index
    %c0_11 = arith.constant 0 : index
    %23 = vector.load %arg5[%c0_10, %c0_11] : memref<16x256xf32, #tpu.memory_space<vmem>>, vector<16x256xf32>
    tpu.vector_store %arg5[%c0_10, %c0_11], %22 {strides = array<i32>} : memref<16x256xf32, #tpu.memory_space<vmem>>, vector<16x256xf32>,
    return
  }
  func.func @transform_0(%arg0: i32) -> (i32, i32) {
    %c0_i32 = arith.constant 0 : i32
    %c0_i32_0 = arith.constant 0 : i32
    return %c0_i32, %arg0 : i32, i32
  }
  func.func @transform_1(%arg0: i32) -> (i32, i32) {
    %c0_i32 = arith.constant 0 : i32
    %c0_i32_0 = arith.constant 0 : i32
    %c0_i32_1 = arith.constant 0 : i32
    return %c0_i32, %c0_i32_0 : i32, i32
  }
  func.func @transform_2(%arg0: i32) -> (i32, i32) {
    %c0_i32 = arith.constant 0 : i32
    %c0_i32_0 = arith.constant 0 : i32
    %c0_i32_1 = arith.constant 0 : i32
    return %c0_i32, %c0_i32_0 : i32, i32
  }
  func.func @transform_3(%arg0: i32) -> (i32, i32) {
    %c0_i32 = arith.constant 0 : i32
    %c0_i32_0 = arith.constant 0 : i32
    %c0_i32_1 = arith.constant 0 : i32
    return %c0_i32, %c0_i32_0 : i32, i32
  }
  func.func @transform_4(%arg0: i32) -> (i32, i32) {
    %c0_i32 = arith.constant 0 : i32
    %c0_i32_0 = arith.constant 0 : i32
    return %c0_i32, %arg0 : i32, i32
  }
}

module attributes {stable_mosaic.version = 11 : i64} {
  func.func @_gabor_kernel(%arg0: i32, %arg1: memref<4x256xf32, #tpu.memory_space<vmem>>, %arg2: memref<96x4xf32, #tpu.memory_space<vmem>>, %arg3: memref<16x32xf32, #tpu.memory_space<vmem>>, %arg4: memref<16x1xf32, #tpu.memory_space<vmem>>, %arg5: memref<16x256xf32, #tpu.memory_space<vmem>>) attributes {dimension_semantics = [#tpu.dimension_semantics<parallel>], iteration_bounds = array<i64: 2>, scalar_prefetch = 0 : i64, scratch_operands = 0 : i64, tpu.core_type = #tpu.core_type<tc>, window_params = [{transform_indices = @transform_0, window_bounds = array<i64: 4, 256>}, {pipeline_mode = #tpu.pipeline_mode<synchronous>, transform_indices = @transform_1, window_bounds = array<i64: 96, 4>}, {pipeline_mode = #tpu.pipeline_mode<synchronous>, transform_indices = @transform_2, window_bounds = array<i64: 16, 32>}, {pipeline_mode = #tpu.pipeline_mode<synchronous>, transform_indices = @transform_3, window_bounds = array<i64: 16, 1>}, {transform_indices = @transform_4, window_bounds = array<i64: 16, 256>}]} {
    %c0 = arith.constant 0 : index
    %c0_0 = arith.constant 0 : index
    %0 = vector.load %arg1[%c0, %c0_0] : memref<4x256xf32, #tpu.memory_space<vmem>>, vector<4x256xf32>
    %c0_1 = arith.constant 0 : index
    %c0_2 = arith.constant 0 : index
    %1 = vector.load %arg2[%c0_1, %c0_2] : memref<96x4xf32, #tpu.memory_space<vmem>>, vector<96x4xf32>
    %2 = vector.extract_strided_slice %1 {offsets = [0, 0], sizes = [96, 1], strides = [1, 1]} : vector<96x4xf32> to vector<96x1xf32>
    %3 = vector.extract_strided_slice %0 {offsets = [0, 0], sizes = [1, 256], strides = [1, 1]} : vector<4x256xf32> to vector<1x256xf32>
    %4 = vector.broadcast %2 : vector<96x1xf32> to vector<96x256xf32>
    %5 = vector.broadcast %3 : vector<1x256xf32> to vector<96x256xf32>
    %6 = arith.mulf %4, %5 : vector<96x256xf32>
    %7 = vector.extract_strided_slice %1 {offsets = [0, 1], sizes = [96, 1], strides = [1, 1]} : vector<96x4xf32> to vector<96x1xf32>
    %8 = vector.extract_strided_slice %0 {offsets = [1, 0], sizes = [1, 256], strides = [1, 1]} : vector<4x256xf32> to vector<1x256xf32>
    %9 = vector.broadcast %7 : vector<96x1xf32> to vector<96x256xf32>
    %10 = vector.broadcast %8 : vector<1x256xf32> to vector<96x256xf32>
    %11 = arith.mulf %9, %10 : vector<96x256xf32>
    %12 = arith.addf %6, %11 : vector<96x256xf32>
    %13 = vector.extract_strided_slice %1 {offsets = [0, 2], sizes = [96, 1], strides = [1, 1]} : vector<96x4xf32> to vector<96x1xf32>
    %14 = vector.extract_strided_slice %0 {offsets = [2, 0], sizes = [1, 256], strides = [1, 1]} : vector<4x256xf32> to vector<1x256xf32>
    %15 = vector.broadcast %13 : vector<96x1xf32> to vector<96x256xf32>
    %16 = vector.broadcast %14 : vector<1x256xf32> to vector<96x256xf32>
    %17 = arith.mulf %15, %16 : vector<96x256xf32>
    %18 = arith.addf %12, %17 : vector<96x256xf32>
    %19 = vector.extract_strided_slice %1 {offsets = [0, 3], sizes = [96, 1], strides = [1, 1]} : vector<96x4xf32> to vector<96x1xf32>
    %20 = vector.extract_strided_slice %0 {offsets = [3, 0], sizes = [1, 256], strides = [1, 1]} : vector<4x256xf32> to vector<1x256xf32>
    %21 = vector.broadcast %19 : vector<96x1xf32> to vector<96x256xf32>
    %22 = vector.broadcast %20 : vector<1x256xf32> to vector<96x256xf32>
    %23 = arith.mulf %21, %22 : vector<96x256xf32>
    %24 = arith.addf %18, %23 : vector<96x256xf32>
    %25 = vector.extract_strided_slice %24 {offsets = [0, 0], sizes = [32, 256], strides = [1, 1]} : vector<96x256xf32> to vector<32x256xf32>
    %26 = vector.extract_strided_slice %24 {offsets = [32, 0], sizes = [32, 256], strides = [1, 1]} : vector<96x256xf32> to vector<32x256xf32>
    %27 = vector.extract_strided_slice %24 {offsets = [64, 0], sizes = [32, 256], strides = [1, 1]} : vector<96x256xf32> to vector<32x256xf32>
    %28 = tpu.reciprocal %26 {approx = true} : vector<32x256xf32> -> vector<32x256xf32>
    %29 = arith.mulf %26, %28 : vector<32x256xf32>
    %cst = arith.constant 2.000000e+00 : f32
    %30 = vector.broadcast %cst : f32 to vector<32x256xf32>
    %31 = arith.subf %30, %29 : vector<32x256xf32>
    %32 = arith.mulf %28, %31 : vector<32x256xf32>
    %33 = arith.mulf %25, %32 : vector<32x256xf32>
    %34 = math.sin %33 : vector<32x256xf32>
    %35 = arith.mulf %27, %32 : vector<32x256xf32>
    %36 = math.exp %35 : vector<32x256xf32>
    %37 = arith.mulf %34, %36 : vector<32x256xf32>
    %c0_3 = arith.constant 0 : index
    %c0_4 = arith.constant 0 : index
    %38 = vector.load %arg3[%c0_3, %c0_4] : memref<16x32xf32, #tpu.memory_space<vmem>>, vector<16x32xf32>
    %cst_5 = arith.constant dense<0.000000e+00> : vector<16x256xf32>
    %39 = tpu.matmul %38, %37, %cst_5 {dimension_numbers = #tpu.dot_dimension_numbers<[1], [0], [0], [1], [0, 0, 1, 1], [], []>} : vector<16x32xf32>, vector<32x256xf32>, vector<16x256xf32> -> vector<16x256xf32>
    %c0_6 = arith.constant 0 : index
    %c0_7 = arith.constant 0 : index
    %40 = vector.load %arg4[%c0_6, %c0_7] : memref<16x1xf32, #tpu.memory_space<vmem>>, vector<16x1xf32>
    %41 = vector.broadcast %40 : vector<16x1xf32> to vector<16x256xf32>
    %42 = arith.addf %39, %41 : vector<16x256xf32>
    %cst_8 = arith.constant 0.000000e+00 : f32
    %43 = vector.broadcast %cst_8 : f32 to vector<16x256xf32>
    %44 = arith.maximumf %42, %43 : vector<16x256xf32>
    %c0_9 = arith.constant 0 : index
    %c0_10 = arith.constant 0 : index
    %45 = vector.load %arg5[%c0_9, %c0_10] : memref<16x256xf32, #tpu.memory_space<vmem>>, vector<16x256xf32>
    tpu.vector_store %arg5[%c0_9, %c0_10], %44 {strides = array<i32>} : memref<16x256xf32, #tpu.memory_space<vmem>>, vector<16x256xf32>,
    return
  }
  func.func @transform_0(%arg0: i32) -> (i32, i32) {
    %c0_i32 = arith.constant 0 : i32
    %c0_i32_0 = arith.constant 0 : i32
    return %c0_i32, %arg0 : i32, i32
  }
  func.func @transform_1(%arg0: i32) -> (i32, i32) {
    %c0_i32 = arith.constant 0 : i32
    %c0_i32_0 = arith.constant 0 : i32
    %c0_i32_1 = arith.constant 0 : i32
    return %c0_i32, %c0_i32_0 : i32, i32
  }
  func.func @transform_2(%arg0: i32) -> (i32, i32) {
    %c0_i32 = arith.constant 0 : i32
    %c0_i32_0 = arith.constant 0 : i32
    %c0_i32_1 = arith.constant 0 : i32
    return %c0_i32, %c0_i32_0 : i32, i32
  }
  func.func @transform_3(%arg0: i32) -> (i32, i32) {
    %c0_i32 = arith.constant 0 : i32
    %c0_i32_0 = arith.constant 0 : i32
    %c0_i32_1 = arith.constant 0 : i32
    return %c0_i32, %c0_i32_0 : i32, i32
  }
  func.func @transform_4(%arg0: i32) -> (i32, i32) {
    %c0_i32 = arith.constant 0 : i32
    %c0_i32_0 = arith.constant 0 : i32
    return %c0_i32, %arg0 : i32, i32
  }
}

</mosaic_0001>

<bundles_post_ra>
// kernel: tpu_custom_call.1
= control target key start
LH: loop header
LB: loop body
LE: loop exit
PB: predicated region body
PF: predicated region fallthrough
CT: control target
= control target key end

     0   :  { %9 = vsyncpa [#allocation3], 0  ;;  %s4528_s0 = inlined_call_operand.vmem [shape: f32[4,512], index: 0, kind: input, shape index: {}]   ;;  %s4529_s1 = inlined_call_operand.vmem [shape: f32[96,4], index: 1, kind: input, shape index: {}]   ;;  %s4530_s2 = inlined_call_operand.vmem [shape: f32[16,32], index: 2, kind: input, shape index: {}]   ;;  %s4531_s3 = inlined_call_operand.vmem [shape: f32[16,1], index: 3, kind: input, shape index: {}]   ;;  %s4532_s4 = inlined_call_operand.hbm [shape: f32[16,512], index: 4, kind: output, shape index: {}]  }
   0x1   :  { %11 = vsyncpa [#allocation3 + $0x1], 0  ;;  %s2921_s15 = smov 0   ;;  %s2923_s16 = smov 0  }
   0x2   :  { %s2925_s17 = smov 0   ;;  %s2927_s18 = smov 0  }
   0x3 LB: > { %s2942_s19 = sadd.s32 4294967295, %s2884_s18   ;;  %s2697_s20 = sadd.s32 4294967294, %s2884_s18   ;;  %s2884_s18 = sphi %s2927_s18, %s4597_s18   ;;  %s2880_s17 = sphi %s2925_s17, %s4596_s17   ;;  %s2876_s16 = sphi %s2923_s16, %s4595_s16   ;;  %s2872_s15 = sphi %s2921_s15, %s4594_s15  }
   0x4   : > { %s2946_s21 = sadd.s32 1, %s2884_s18   ;;  %s113_s22 = sadd.s32 1, %s2880_s17 }
   0x5   : > { %s110_s23 = ssub.s32 %s2884_s18, %s2946_s21  ;;  %p123_p0 = scmp.ne.s32.totalorder %s2880_s17, %s2876_s16 }
   0x6   : > { %p111_p1 = scmp.eq.s32.totalorder %s110_s23, 0  ;;  %p124_p2 = scmp.eq.s32.totalorder %s2942_s19, 1 }
   0x7   : > { %p129_p3 = scmp.ne.s32.totalorder %s2876_s16, %s2872_s15  ;;  %p130_p4 = scmp.eq.s32.totalorder %s2697_s20, 1 }
   0x8   : > { %s2957_s24 = scalar_select %p111_p1, %s2880_s17, %s113_s22  }
   0x9   : > { %p2959_p5 = por %p124_p2, %p123_p0  ;;  %p2963_p6 = por %p130_p4, %p129_p3 }
   0xa   : > { %p2700_p7 = scmp.ge.s32.totalorder %s2884_s18, 1  ;;  %p166_p8 = scmp.lt.s32.totalorder %s2884_s18, 3 }
   0xc   : > { %p167_p9 = pnand %p2700_p7, %p166_p8 }
   0xe   : > { %170 = sbr.rel (%p167_p9) target bundleno = 852 (0x354), region = 36 }
  0x13   : > { %s2702_s27 = sshll.u32 %s2942_s19, 1  ;;  %v200_v0 = vld [vmem:[%s4529_s1] sm:$0xff]  ;;  %vm216_vm0 = vcmask 31744   ;;  %v211_v1 = vld [vmem:[%s4529_s1 + $0x58] sm:$0xff]  ;;  %v201_v6 = vld [vmem:[%s4529_s1 + $0x8] sm:$0xff]  ;;  %vm253_vm1 = vcmask 1043456  }
  0x14   : > { %p193_p10 = scmp.lt.s32.totalorder %s2702_s27, 3  ;;  %v218_v2 = vsel %vm216_vm0, %v200_v0, 0  ;;  %v251_v3 = vsel %vm216_vm0, %v211_v1, 0  ;;  %v221_v9 = vsel %vm216_vm0, %v201_v6, 0  ;;  %v202_v14 = vld [vmem:[%s4529_s1 + $0x10] sm:$0xff]  ;;  %v203_v26 = vld [vmem:[%s4529_s1 + $0x18] sm:$0xff] }
  0x15   : > { %v2978_v4 = vand.u32 4294901760, %v218_v2  ;;  %v2980_v5 = vand.u32 4294901760, %v251_v3  ;;  %v3001_v13 = vand.u32 4294901760, %v221_v9  ;;  %v224_v18 = vsel %vm216_vm0, %v202_v14, 0  ;;  %v204_v37 = vld [vmem:[%s4529_s1 + $0x20] sm:$0xff]  ;;  %v205_v44 = vld [vmem:[%s4529_s1 + $0x28] sm:$0xff] }
  0x16   : > { %s4599_s27 = smov (!%p193_p10, %s2702_s27), 3  ;;  %v3014_v20 = vand.u32 4294901760, %v224_v18  ;;  %v227_v31 = vsel %vm216_vm0, %v203_v26, 0  ;;  %v230_v40 = vsel %vm216_vm0, %v204_v37, 0  ;;  %v233_v47 = vsel %vm216_vm0, %v205_v44, 0  ;;  %v206_v51 = vld [vmem:[%s4529_s1 + $0x30] sm:$0xff] }
  0x17   : > { %v2986_v7 = vsub.f32 %v218_v2, %v2978_v4  ;;  %v2989_v8 = vsub.f32 %v251_v3, %v2980_v5  ;;  %s2703_s8 = sshll.u32 %s4599_s27, 2  ;;  %v3011_v17 = vsub.f32 %v221_v9, %v3001_v13  ;;  %v3040_v35 = vand.u32 4294901760, %v227_v31  ;;  %v207_v58 = vld [vmem:[%s4529_s1 + $0x38] sm:$0xff]  ;;  %v208_v1 = vld [vmem:[%s4529_s1 + $0x40] sm:$0xff]  ;;  %s189_s30 = sand.u32 1, %s2876_s16  }
  0x18   : > { %s196_s11 = scalar_lea.vmem %s4528_s0, %s2703_s8  ;;  %v3032_v29 = vsub.f32 %v224_v18, %v3014_v20  ;;  %v3060_v43 = vand.u32 4294901760, %v230_v40  ;;  %v3080_v50 = vand.u32 4294901760, %v233_v47  ;;  %v236_v54 = vsel %vm216_vm0, %v206_v51, 0  ;;  %s2701_s5 = sshll.u32 %s189_s30, 5 }
  0x19   : > { %v199_v10 = vld [vmem:[%s196_s11] sm:$0xff]  ;;  %v2996_v11 = vand.u32 4294901760, %v2986_v7  ;;  %v2999_v12 = vand.u32 4294901760, %v2989_v8  ;;  %v3022_v24 = vand.u32 4294901760, %v3011_v17  ;;  %v3050_v39 = vsub.f32 %v227_v31, %v3040_v35  ;;  %s191_s6 = scalar_lea.vmem [#allocation2], %s2701_s5  ;;  %s2737_s7 = sshll.u32 %s2942_s19, 4 }
  0x1a   : > { %213 = vst [vmem:[#allocation1] ss:$2 sm:$0xff] %v199_v10  ;;  %v3038_v34 = vand.u32 4294901760, %v3032_v29  ;;  %v3070_v46 = vsub.f32 %v230_v40, %v3060_v43  ;;  %v3090_v53 = vsub.f32 %v233_v47, %v3080_v50  ;;  %v3100_v57 = vand.u32 4294901760, %v236_v54  ;;  %s2631_s10 = scalar_lea.hbm %s4532_s4, %s2737_s7  ;;  %s2632_s11 = sshll.u32 %s191_s6, 4  ;;  %s2633_s11 = int_to_ptr.vmem [resolvable:$true] %s2632_s11 }
  0x1b   : > { %v278_v15 = vsub.f32 %v2986_v7, %v2996_v11  ;;  %v366_v16 = vsub.f32 %v2989_v8, %v2999_v12  ;;  %v286_v28 = vsub.f32 %v3011_v17, %v3022_v24  ;;  %v3058_v42 = vand.u32 4294901760, %v3050_v39  ;;  %s2634_s12 = sshll.u32 %s2631_s10, 4  ;;  %s2620_s13 = scalar_lea.sflag [#allocation3], %s189_s30  ;;  %s2635_s12 = int_to_ptr.hbm [resolvable:$true] %s2634_s12 }
  0x1c   : > { %v294_v38 = vsub.f32 %v3032_v29, %v3038_v34  ;;  %v3078_v49 = vand.u32 4294901760, %v3070_v46  ;;  %v3098_v56 = vand.u32 4294901760, %v3090_v53  ;;  %v3110_v60 = vsub.f32 %v236_v54, %v3100_v57  ;;  %s2836_s14 = sshra.s32 %s2635_s12, 4  ;;  %s2842_s23 = scalar_lea.hbm %s4532_s4, 64  ;;  %s2837_s14 = int_to_ptr.hbm [resolvable:$true] %s2836_s14 }
  0x1d   : > { %v3017_v22 = vand.u32 4294901760, %v278_v15  ;;  %v3019_v23 = vand.u32 4294901760, %v366_v16  ;;  %v3035_v33 = vand.u32 4294901760, %v286_v28  ;;  %v302_v45 = vsub.f32 %v3050_v39, %v3058_v42  ;;  %v209_v15 = vld [vmem:[%s4529_s1 + $0x48] sm:$0xff]  ;;  %s2838_s20 = scalar_lea.hbm %s2837_s14, 32  ;;  %p2843_p0 = scmp.lt.s32.totalorder %s2837_s14, %s4532_s4 }
  0x1e   : > { %v3055_v41 = vand.u32 4294901760, %v294_v38  ;;  %v310_v52 = vsub.f32 %v3070_v46, %v3078_v49  ;;  %v318_v59 = vsub.f32 %v3090_v53, %v3098_v56  ;;  %v239_v61 = vsel %vm216_vm0, %v207_v58, 0  ;;  %p2839_p11 = scmp.ne.s32.totalorder %s2837_s14, %s2838_s20  ;;  %p2844_p1 = scmp.lt.s32.totalorder %s2842_s23, %s2838_s20 }
  0x1f   : > { %v3075_v48 = vand.u32 4294901760, %v302_v45  ;;  %v3118_v63 = vand.u32 4294901760, %v3110_v60  ;;  %v3120_v0 = vand.u32 4294901760, %v239_v61  ;;  %v242_v6 = vsel %vm216_vm0, %v208_v1, 0 }
  0x20   : > { %v3095_v55 = vand.u32 4294901760, %v310_v52  ;;  %v3115_v62 = vand.u32 4294901760, %v318_v59  ;;  %v3140_v14 = vand.u32 4294901760, %v242_v6  ;;  %p2840_p12 = pnand %p2839_p11, %p2959_p5  ;;  %p2845_p2 = por %p2844_p1, %p2843_p0 }
  0x21   : > { %v214_v19 = vld.sshfl [vmem:[#allocation1] sm:$0xff pattern:$0x75316420]  ;;  %v326_v2 = vsub.f32 %v3110_v60, %v3118_v63  ;;  %v3130_v3 = vsub.f32 %v239_v61, %v3120_v0  ;;  %v215_v44 = vld.sshfl [vmem:[#allocation1 + $0x8] sm:$0xff pattern:$0x75316420] }
  0x22   : > { %v254_v21 = vsel %vm253_vm1, %v214_v19, 0  ;;  %v3150_v18 = vsub.f32 %v242_v6, %v3140_v14  ;;  %v245_v19 = vsel %vm216_vm0, %v209_v15, 0  ;;  %v256_v45 = vsel %vm253_vm1, %v215_v44, 0  ;;  %p2841_p13 = pneg %p2840_p12 }
  0x23   : > { %v273_v25 = vand.u32 4294901760, %v254_v21  ;;  %v3135_v9 = vand.u32 4294901760, %v326_v2  ;;  %v3138_v10 = vand.u32 4294901760, %v3130_v3  ;;  %v3160_v26 = vand.u32 4294901760, %v245_v19 }
  0x24   : > { %v760_v47 = vand.u32 4294901760, %v256_v45  ;;  %p2846_p3 = pnand %p2845_p2, %p2841_p13 }
  0x25   : > { %274 = vmatpush.msra.mxu0 %v273_v25  ;;  %2738 = vmatpush.msra.mxu2 %v273_v25  ;;  %v388_v27 = vsub.f32 %v254_v21, %v273_v25  ;;  %v334_v16 = vsub.f32 %v3130_v3, %v3138_v10 }
  0x26   : > { %280 = vmatmul.f32.vlgmr.msra.gmra.mxu0 %v3017_v22  ;;  %368 = vmatmul.f32.vlgmr.msra.gmra.mxu2 %v3019_v23  ;;  %v875_v54 = vsub.f32 %v256_v45, %v760_v47 }
  0x27   : > { %v389_v30 = vand.u32 4294901760, %v388_v27  ;;  %459 = vmatpush.msrb.mxu2 %v388_v27  ;;  %v3155_v21 = vand.u32 4294901760, %v334_v16 }
  0x28   : > { %v876_v59 = vand.u32 4294901760, %v875_v54 }
  0x29   : > { %v390_v32 = vsub.f32 %v388_v27, %v389_v30  ;;  %629 = vmatpush.msrb.mxu0 %v389_v30  ;;  %v210_v27 = vld [vmem:[%s4529_s1 + $0x50] sm:$0xff]  ;;  %v3170_v30 = vsub.f32 %v245_v19, %v3160_v26  ;;  %761 = vmatpush.msra.mxu2 %v760_v47 }
  0x2a   : > { %v248_v31 = vsel %vm216_vm0, %v210_v27, 0  ;;  %v877_v61 = vsub.f32 %v875_v54, %v876_v59 }
  0x2b   : > { %v391_v36 = vand.u32 4294901760, %v390_v32  ;;  %v3180_v37 = vand.u32 4294901760, %v248_v31  ;;  %946 = vmatpush.msra.mxu0 %v875_v54 }
  0x2c   : > { %v878_v2 = vand.u32 4294901760, %v877_v61 }
  0x2d   : > { %392 = vmatpush.msra.mxu1 %v391_v36  ;;  %2739 = vmatpush.msra.mxu3 %v391_v36  ;;  %v3178_v36 = vand.u32 4294901760, %v3170_v30  ;;  %v3187_v40 = vsub.f32 %v248_v31, %v3180_v37 }
  0x2e   : > { %288 = vmatmul.f32.gmra.mxu0 %v3035_v33  ;;  %394 = vmatmul.f32.vlgmr.msra.gmra.mxu1 %v2978_v4 }
  0x2f   : > { %438 = vmatmul.f32.vlgmr.msra.gmra.mxu3 %v2980_v5  ;;  %462 = vmatmul.f32.vlgmr.msrb.gmra.mxu2 %v2986_v7  ;;  %v350_v38 = vsub.f32 %v3170_v30, %v3178_v36  ;;  %v3195_v52 = vand.u32 4294901760, %v3187_v40 }
  0x30   : > { %537 = vmatpush.msrb.mxu3 %v273_v25  ;;  %695 = vmatpush.msrb.mxu1 %v273_v25  ;;  %v3158_v25 = vand.u32 4294901760, %v3150_v18 }
  0x31   : > { %v3192_v51 = vand.u32 4294901760, %v350_v38  ;;  %v358_v58 = vsub.f32 %v3187_v40, %v3195_v52  ;;  %1116 = vmatpush.msrb.mxu2 %v876_v59 }
  0x32   : > { %v342_v28 = vsub.f32 %v3150_v18, %v3158_v25  ;;  %1024 = vmatpush.msra.mxu1 %v760_v47  ;;  %879 = vmatpush.msra.mxu3 %v878_v2 }
  0x33   : > { %v3203_v1 = vand.u32 4294901760, %v358_v58 }
  0x34   : > { %v3175_v32 = vand.u32 4294901760, %v342_v28 }
  0x36   : > { %296 = vmatmul.f32.gmra.mxu0 %v3055_v41  ;;  %398 = vmatmul.f32.gmra.mxu1 %v3001_v13 }
  0x37   : > { %467 = vmatmul.f32.gmra.mxu2 %v3011_v17  ;;  %541 = vmatmul.f32.vlgmr.msrb.gmra.mxu3 %v2996_v11 }
  0x38   : > { %1182 = vmatpush.msrb.mxu3 %v760_v47 }
  0x3e   : > { %304 = vmatmul.f32.gmra.mxu0 %v3075_v48  ;;  %402 = vmatmul.f32.gmra.mxu1 %v3014_v20 }
  0x3f   : > { %472 = vmatmul.f32.gmra.mxu2 %v3032_v29  ;;  %547 = vmatmul.f32.gmra.mxu3 %v3022_v24 }
  0x46   : > { %312 = vmatmul.f32.gmra.mxu0 %v3095_v55  ;;  %406 = vmatmul.f32.gmra.mxu1 %v3040_v35 }
  0x47   : > { %477 = vmatmul.f32.gmra.mxu2 %v3050_v39  ;;  %553 = vmatmul.f32.gmra.mxu3 %v3038_v34 }
  0x4e   : > { %320 = vmatmul.f32.gmra.mxu0 %v3115_v62  ;;  %410 = vmatmul.f32.gmra.mxu1 %v3060_v43 }
  0x4f   : > { %482 = vmatmul.f32.gmra.mxu2 %v3070_v46  ;;  %559 = vmatmul.f32.gmra.mxu3 %v3058_v42 }
  0x56   : > { %328 = vmatmul.f32.gmra.mxu0 %v3135_v9  ;;  %414 = vmatmul.f32.gmra.mxu1 %v3080_v50 }
  0x57   : > { %487 = vmatmul.f32.gmra.mxu2 %v3090_v53  ;;  %565 = vmatmul.f32.gmra.mxu3 %v3078_v49 }
  0x5e   : > { %336 = vmatmul.f32.gmra.mxu0 %v3155_v21  ;;  %418 = vmatmul.f32.gmra.mxu1 %v3100_v57 }
  0x5f   : > { %492 = vmatmul.f32.gmra.mxu2 %v3110_v60  ;;  %571 = vmatmul.f32.gmra.mxu3 %v3098_v56 }
  0x66   : > { %344 = vmatmul.f32.gmra.mxu0 %v3175_v32  ;;  %422 = vmatmul.f32.gmra.mxu1 %v3120_v0 }
  0x67   : > { %497 = vmatmul.f32.gmra.mxu2 %v3130_v3  ;;  %577 = vmatmul.f32.gmra.mxu3 %v3118_v63 }
  0x6e   : > { %352 = vmatmul.f32.gmra.mxu0 %v3192_v51  ;;  %426 = vmatmul.f32.gmra.mxu1 %v3140_v14 }
  0x6f   : > { %502 = vmatmul.f32.gmra.mxu2 %v3150_v18  ;;  %583 = vmatmul.f32.gmra.mxu3 %v3138_v10 }
  0x76   : > { %360 = vmatmul.f32.gmra.mxu0 %v3203_v1  ;;  %430 = vmatmul.f32.gmra.mxu1 %v3160_v26 }
  0x77   : > { %507 = vmatmul.f32.gmra.mxu2 %v3170_v30  ;;  %589 = vmatmul.f32.gmra.mxu3 %v3158_v25 }
  0x7e   : > { %434 = vmatmul.f32.gmra.mxu1 %v3180_v37  ;;  %631 = vmatmul.f32.vlgmr.msrb.gmra.mxu0 %v2978_v4 }
  0x7f   : > { %512 = vmatmul.f32.gmra.mxu2 %v3187_v40  ;;  %595 = vmatmul.f32.gmra.mxu3 %v3178_v36 }
  0x86   : > { %635 = vmatmul.f32.gmra.mxu0 %v3001_v13  ;;  %697 = vmatmul.f32.vlgmr.msrb.gmra.mxu1 %v2978_v4 }
  0x87   : > { %517 = vmatmul.f32.gmra.mxu2 %v2989_v8  ;;  %601 = vmatmul.f32.gmra.mxu3 %v3195_v52 }
  0x8e   : > { %639 = vmatmul.f32.gmra.mxu0 %v3014_v20  ;;  %701 = vmatmul.f32.gmra.mxu1 %v3001_v13 }
  0x8f   : > { %607 = vmatmul.f32.gmra.mxu3 %v2999_v12  ;;  %767 = vmatmul.f32.vlgmr.msra.gmra.mxu2 %v3017_v22 }
  0x96   : > { %643 = vmatmul.f32.gmra.mxu0 %v3040_v35  ;;  %705 = vmatmul.f32.gmra.mxu1 %v3014_v20 }
  0x97   : > { %775 = vmatmul.f32.gmra.mxu2 %v3035_v33  ;;  %881 = vmatmul.f32.vlgmr.msra.gmra.mxu3 %v2978_v4 }
  0x9e   : > { %647 = vmatmul.f32.gmra.mxu0 %v3060_v43  ;;  %709 = vmatmul.f32.gmra.mxu1 %v3040_v35 }
  0x9f   : > { %783 = vmatmul.f32.gmra.mxu2 %v3055_v41  ;;  %885 = vmatmul.f32.gmra.mxu3 %v3001_v13 }
  0xa3   : > { %v281_v6 = vpop.f32.mrf.mxu0 }
  0xa6   : > { %651 = vmatmul.f32.gmra.mxu0 %v3080_v50  ;;  %713 = vmatmul.f32.gmra.mxu1 %v3060_v43 }
  0xa7   : > { %791 = vmatmul.f32.gmra.mxu2 %v3075_v48  ;;  %889 = vmatmul.f32.gmra.mxu3 %v3014_v20 }
  0xa9   : > { %v369_v22 = vpop.f32.mrf.mxu2 }
  0xab   : > { %v289_v33 = vpop.f32.mrf.mxu0  ;;  %v395_v15 = vpop.f32.mrf.mxu1 }
  0xac   : > { %v396_v16 = vadd.f32 %v395_v15, %v281_v6 }
  0xae   : > { %655 = vmatmul.f32.gmra.mxu0 %v3100_v57  ;;  %717 = vmatmul.f32.gmra.mxu1 %v3080_v50 }
  0xaf   : > { %799 = vmatmul.f32.gmra.mxu2 %v3095_v55  ;;  %893 = vmatmul.f32.gmra.mxu3 %v3040_v35 }
  0xb2   : > { %v439_v41 = vpop.f32.mrf.mxu3  ;;  %v463_v19 = vpop.f32.mrf.mxu2 }
  0xb3   : > { %v3237_v27 = vadd.f32 %v439_v41, %v369_v22  ;;  %v464_v28 = vadd.f32 %v463_v19, %v396_v16  ;;  %v297_v48 = vpop.f32.mrf.mxu0  ;;  %v399_v31 = vpop.f32.mrf.mxu1 }
  0xb4   : > { %v400_v38 = vadd.f32 %v399_v31, %v289_v33 }
  0xb6   : > { %659 = vmatmul.f32.gmra.mxu0 %v3120_v0  ;;  %721 = vmatmul.f32.gmra.mxu1 %v3100_v57 }
  0xb7   : > { %807 = vmatmul.f32.gmra.mxu2 %v3115_v62  ;;  %897 = vmatmul.f32.gmra.mxu3 %v3060_v43 }
  0xba   : > { %v468_v44 = vpop.f32.mrf.mxu2  ;;  %v542_v55 = vpop.f32.mrf.mxu3 }
  0xbb   : > { %v469_v45 = vadd.f32 %v468_v44, %v400_v38  ;;  %v3243_v47 = vadd.f32 %v542_v55, %v464_v28  ;;  %v305_v54 = vpop.f32.mrf.mxu0  ;;  %v403_v58 = vpop.f32.mrf.mxu1 }
  0xbc   : > { %v404_v59 = vadd.f32 %v403_v58, %v297_v48 }
  0xbe   : > { %663 = vmatmul.f32.gmra.mxu0 %v3140_v14  ;;  %725 = vmatmul.f32.gmra.mxu1 %v3120_v0 }
  0xbf   : > { %815 = vmatmul.f32.gmra.mxu2 %v3135_v9  ;;  %901 = vmatmul.f32.gmra.mxu3 %v3080_v50 }
  0xc2   : > { %v473_v61 = vpop.f32.mrf.mxu2  ;;  %v548_v62 = vpop.f32.mrf.mxu3 }
  0xc3   : > { %v474_v2 = vadd.f32 %v473_v61, %v404_v59  ;;  %v3249_v6 = vadd.f32 %v548_v62, %v469_v45  ;;  %v313_v22 = vpop.f32.mrf.mxu0  ;;  %v407_v33 = vpop.f32.mrf.mxu1 }
  0xc4   : > { %v408_v15 = vadd.f32 %v407_v33, %v305_v54 }
  0xc6   : > { %667 = vmatmul.f32.gmra.mxu0 %v3160_v26  ;;  %729 = vmatmul.f32.gmra.mxu1 %v3140_v14 }
  0xc7   : > { %823 = vmatmul.f32.gmra.mxu2 %v3155_v21  ;;  %905 = vmatmul.f32.gmra.mxu3 %v3100_v57 }
  0xca   : > { %v478_v16 = vpop.f32.mrf.mxu2  ;;  %v554_v9 = vpop.f32.mrf.mxu3 }
  0xcb   : > { %v3255_v41 = vadd.f32 %v478_v16, %v408_v15  ;;  %v3257_v19 = vadd.f32 %v554_v9, %v474_v2  ;;  %v321_v28 = vpop.f32.mrf.mxu0  ;;  %v411_v48 = vpop.f32.mrf.mxu1 }
  0xcc   : > { %v412_v31 = vadd.f32 %v411_v48, %v313_v22 }
  0xce   : > { %671 = vmatmul.f32.gmra.mxu0 %v3180_v37  ;;  %733 = vmatmul.f32.gmra.mxu1 %v3160_v26 }
  0xcf   : > { %831 = vmatmul.f32.gmra.mxu2 %v3175_v32  ;;  %909 = vmatmul.f32.gmra.mxu3 %v3120_v0 }
  0xd2   : > { %v483_v21 = vpop.f32.mrf.mxu2  ;;  %v3263_v38 = vpop.f32.mrf.mxu3 }
  0xd3   : > { %v484_v44 = vadd.f32 %v483_v21, %v412_v31  ;;  %v3265_v55 = vpop.f32.mrf.mxu0  ;;  %v415_v45 = vpop.f32.mrf.mxu1 }
  0xd4   : > { %v416_v54 = vadd.f32 %v415_v45, %v321_v28 }
  0xd6   : > { %675 = vmatmul.f32.gmra.mxu0 %v2980_v5  ;;  %737 = vmatmul.f32.gmra.mxu1 %v3180_v37 }
  0xd7   : > { %839 = vmatmul.f32.gmra.mxu2 %v3192_v51  ;;  %913 = vmatmul.f32.gmra.mxu3 %v3140_v14 }
  0xda   : > { %v488_v58 = vpop.f32.mrf.mxu2  ;;  %v566_v32 = vpop.f32.mrf.mxu3 }
  0xdb   : > { %v489_v59 = vadd.f32 %v488_v58, %v416_v54  ;;  %v3271_v61 = vadd.f32 %v566_v32, %v484_v44  ;;  %v3273_v62 = vpop.f32.mrf.mxu0  ;;  %v3275_v2 = vpop.f32.mrf.mxu1 }
  0xde   : > { %741 = vmatmul.f32.gmra.mxu1 %v2980_v5  ;;  %949 = vmatmul.f32.vlgmr.msra.gmra.mxu0 %v2986_v7 }
  0xdf   : > { %847 = vmatmul.f32.gmra.mxu2 %v3203_v1  ;;  %917 = vmatmul.f32.gmra.mxu3 %v3160_v26 }
  0xe2   : > { %v3281_v51 = vpop.f32.mrf.mxu2  ;;  %v572_v22 = vpop.f32.mrf.mxu3 }
  0xe3   : > { %v3283_v33 = vadd.f32 %v572_v22, %v489_v59  ;;  %v345_v15 = vpop.f32.mrf.mxu0  ;;  %v3285_v16 = vpop.f32.mrf.mxu1 }
  0xe6   : > { %954 = vmatmul.f32.gmra.mxu0 %v3011_v17  ;;  %1028 = vmatmul.f32.vlgmr.msra.gmra.mxu1 %v2996_v11 }
  0xe7   : > { %855 = vmatmul.f32.gmra.mxu2 %v3019_v23  ;;  %921 = vmatmul.f32.gmra.mxu3 %v3180_v37 }
  0xea   : > { %v3291_v7 = vpop.f32.mrf.mxu2  ;;  %v3293_v1 = vpop.f32.mrf.mxu3 }
  0xeb   : > { %v353_v9 = vpop.f32.mrf.mxu0  ;;  %v427_v28 = vpop.f32.mrf.mxu1 }
  0xec   : > { %v428_v48 = vadd.f32 %v427_v28, %v345_v15 }
  0xee   : > { %959 = vmatmul.f32.gmra.mxu0 %v3032_v29  ;;  %1034 = vmatmul.f32.gmra.mxu1 %v3022_v24 }
  0xef   : > { %925 = vmatmul.f32.gmra.mxu3 %v2980_v5  ;;  %1118 = vmatmul.f32.vlgmr.msrb.gmra.mxu2 %v2978_v4 }
  0xf2   : > { %v503_v11 = vpop.f32.mrf.mxu2  ;;  %v3299_v17 = vpop.f32.mrf.mxu3 }
  0xf3   : > { %v504_v23 = vadd.f32 %v503_v11, %v428_v48  ;;  %v361_v31 = vpop.f32.mrf.mxu0  ;;  %v431_v21 = vpop.f32.mrf.mxu1 }
  0xf4   : > { %v432_v44 = vadd.f32 %v431_v21, %v353_v9 }
  0xf6   : > { %964 = vmatmul.f32.gmra.mxu0 %v3050_v39  ;;  %1040 = vmatmul.f32.gmra.mxu1 %v3038_v34 }
  0xf7   : > { %1122 = vmatmul.f32.gmra.mxu2 %v3001_v13  ;;  %1184 = vmatmul.f32.vlgmr.msrb.gmra.mxu3 %v2978_v4 }
  0xfa   : > { %v508_v24 = vpop.f32.mrf.mxu2  ;;  %v590_v29 = vpop.f32.mrf.mxu3 }
  0xfb   : > { %v509_v45 = vadd.f32 %v508_v24, %v432_v44  ;;  %v3305_v54 = vadd.f32 %v590_v29, %v504_v23  ;;  %v435_v58 = vpop.f32.mrf.mxu1  ;;  %v3307_v32 = vpop.f32.mrf.mxu0 }
  0xfc   : > { %v436_v39 = vadd.f32 %v435_v58, %v361_v31 }
  0xfe   : > { %969 = vmatmul.f32.gmra.mxu0 %v3070_v46  ;;  %1046 = vmatmul.f32.gmra.mxu1 %v3058_v42 }
  0xff   : > { %1126 = vmatmul.f32.gmra.mxu2 %v3014_v20  ;;  %1188 = vmatmul.f32.gmra.mxu3 %v3001_v13 }
 0x102   : > { %v513_v34 = vpop.f32.mrf.mxu2  ;;  %v596_v59 = vpop.f32.mrf.mxu3 }
 0x103   : > { %v514_v4 = vadd.f32 %v513_v34, %v436_v39  ;;  %v3313_v22 = vadd.f32 %v596_v59, %v509_v45  ;;  %v3315_v15 = vpop.f32.mrf.mxu0  ;;  %v3317_v9 = vpop.f32.mrf.mxu1 }
 0x106   : > { %974 = vmatmul.f32.gmra.mxu0 %v3090_v53  ;;  %1052 = vmatmul.f32.gmra.mxu1 %v3078_v49 }
 0x107   : > { %1130 = vmatmul.f32.gmra.mxu2 %v3040_v35  ;;  %1192 = vmatmul.f32.gmra.mxu3 %v3014_v20 }
 0x10a   : > { %v518_v42 = vpop.f32.mrf.mxu2  ;;  %v602_v46 = vpop.f32.mrf.mxu3 }
 0x10b   : > { %v519_v13 = vadd.f32 %v518_v42, %v3237_v27  ;;  %v3324_v28 = vadd.f32 %v602_v46, %v514_v4  ;;  %v640_v48 = vpop.f32.mrf.mxu0  ;;  %v3326_v11 = vpop.f32.mrf.mxu1 }
 0x10c   : > { %v641_v23 = vadd.f32 %v640_v48, %v3257_v19 }
 0x10e   : > { %979 = vmatmul.f32.gmra.mxu0 %v3110_v60  ;;  %1058 = vmatmul.f32.gmra.mxu1 %v3098_v56 }
 0x10f   : > { %1134 = vmatmul.f32.gmra.mxu2 %v3060_v43  ;;  %1196 = vmatmul.f32.gmra.mxu3 %v3040_v35 }
 0x112   : > { %v608_v20 = vpop.f32.mrf.mxu3  ;;  %v768_v49 = vpop.f32.mrf.mxu2 }
 0x113   : > { %v3333_v53 = vadd.f32 %v608_v20, %v519_v13  ;;  %v3335_v27 = vpop.f32.mrf.mxu0  ;;  %v706_v31 = vpop.f32.mrf.mxu1 }
 0x114   : > { %v3337_v21 = vadd.f32 %v706_v31, %v641_v23 }
 0x116   : > { %984 = vmatmul.f32.gmra.mxu0 %v3130_v3  ;;  %1064 = vmatmul.f32.gmra.mxu1 %v3118_v63 }
 0x117   : > { %1138 = vmatmul.f32.gmra.mxu2 %v3080_v50  ;;  %1200 = vmatmul.f32.gmra.mxu3 %v3060_v43 }
 0x11a   : > { %v776_v56 = vpop.f32.mrf.mxu2  ;;  %v882_v60 = vpop.f32.mrf.mxu3 }
 0x11b   : > { %v3343_v35 = vadd.f32 %v882_v60, %v768_v49  ;;  %v648_v19 = vpop.f32.mrf.mxu0  ;;  %v3345_v44 = vpop.f32.mrf.mxu1 }
 0x11c   : > { %v649_v24 = vadd.f32 %v648_v19, %v3271_v61 }
 0x11e   : > { %989 = vmatmul.f32.gmra.mxu0 %v3150_v18  ;;  %1070 = vmatmul.f32.gmra.mxu1 %v3138_v10 }
 0x11f   : > { %1142 = vmatmul.f32.gmra.mxu2 %v3100_v57  ;;  %1204 = vmatmul.f32.gmra.mxu3 %v3080_v50  ;;  %v420_v50 = vadd.f32 %v3275_v2, %v3265_v55  ;;  %v424_v55 = vadd.f32 %v3285_v16, %v3273_v62  ;;  %v637_v62 = vadd.f32 %v3315_v15, %v3249_v6 }
 0x121   : > { %v494_v4 = vadd.f32 %v3281_v51, %v420_v50 }
 0x122   : > { %v784_v63 = vpop.f32.mrf.mxu2  ;;  %v886_v3 = vpop.f32.mrf.mxu3 }
 0x123   : > { %v3352_v43 = vadd.f32 %v886_v3, %v776_v56  ;;  %v652_v29 = vpop.f32.mrf.mxu0  ;;  %v714_v45 = vpop.f32.mrf.mxu1  ;;  %v579_v2 = vadd.f32 %v3293_v1, %v494_v4 }
 0x124   : > { %v653_v58 = vadd.f32 %v652_v29, %v3283_v33  ;;  %v715_v39 = vadd.f32 %v714_v45, %v649_v24 }
 0x126   : > { %2790 = vrcp.f32 %v715_v39  ;;  %994 = vmatmul.f32.gmra.mxu0 %v3170_v30  ;;  %1076 = vmatmul.f32.gmra.mxu1 %v3158_v25 }
 0x127   : > { %1146 = vmatmul.f32.gmra.mxu2 %v3120_v0  ;;  %1208 = vmatmul.f32.gmra.mxu3 %v3100_v57  ;;  %v633_v57 = vadd.f32 %v3307_v32, %v3243_v47 }
 0x129   : > { %v699_v51 = vadd.f32 %v3317_v9, %v633_v57  ;;  %v4548_v9 = vmov 0  }
 0x12a   : > { %v792_v10 = vpop.f32.mrf.mxu2  ;;  %v890_v18 = vpop.f32.mrf.mxu3  ;;  %2789 = vset.pattern.permute.xlu0 %v4548_v9 }
 0x12b   : > { %v3361_v61 = vadd.f32 %v890_v18, %v784_v63  ;;  %v656_v34 = vpop.f32.mrf.mxu0  ;;  %v718_v59 = vpop.f32.mrf.mxu1 }
 0x12c   : > { %v2791_v33 = vpop.eup %2790  ;;  %v719_v42 = vadd.f32 %v718_v59, %v653_v58  ;;  %v657_v13 = vadd.f32 %v656_v34, %v579_v2  ;;  %v561_v59 = vadd.f32 %v3263_v38, %v3255_v41 }
 0x12d   : > { %v1240_v30 = vmul.f32 %v2791_v33, %v715_v39 }
 0x12e   : > { %2792 = vrcp.f32 %v719_v42  ;;  %999 = vmatmul.f32.gmra.mxu0 %v3187_v40  ;;  %1082 = vmatmul.f32.gmra.mxu1 %v3178_v36 }
 0x12f   : > { %v1248_v25 = vsub.f32 2.0, %v1240_v30  ;;  %1150 = vmatmul.f32.gmra.mxu2 %v3140_v14  ;;  %1212 = vmatmul.f32.gmra.mxu3 %v3120_v0  ;;  %v499_v0 = vadd.f32 %v3291_v7, %v424_v55  ;;  %v703_v7 = vadd.f32 %v3326_v11, %v637_v62 }
 0x131   : > { %v1256_v46 = vmul.f32 %v2791_v33, %v1248_v25  ;;  %v585_v1 = vadd.f32 %v3299_v17, %v499_v0 }
 0x132   : > { %v800_v40 = vpop.f32.mrf.mxu2  ;;  %v894_v48 = vpop.f32.mrf.mxu3 }
 0x133   : > { %v3374_v36 = vadd.f32 %v894_v48, %v792_v10  ;;  %v660_v23 = vpop.f32.mrf.mxu0  ;;  %v722_v47 = vpop.f32.mrf.mxu1  ;;  %v3376_v32 = vmul.f32 %v1256_v46, %v699_v51 }
 0x134   : > { %v2793_v20 = vpop.eup %2792  ;;  %v723_v49 = vadd.f32 %v722_v47, %v657_v13  ;;  %v661_v60 = vadd.f32 %v660_v23, %v585_v1 }
 0x135   : > { %v1242_v31 = vmul.f32 %v2793_v20, %v719_v42  ;;  %v645_v42 = vadd.f32 %v3335_v27, %v561_v59  ;;  %v1275_v62 = vand.u32 2139095040, %v3376_v32 }
 0x136   : > { %2794 = vrcp.f32 %v723_v49  ;;  %1004 = vmatmul.f32.gmra.mxu0 %v2989_v8  ;;  %1088 = vmatmul.f32.gmra.mxu1 %v3195_v52 }
 0x137   : > { %v1250_v16 = vsub.f32 2.0, %v1242_v31  ;;  %1154 = vmatmul.f32.gmra.mxu2 %v3160_v26  ;;  %1216 = vmatmul.f32.gmra.mxu3 %v3140_v14 }
 0x139   : > { %v1258_v56 = vmul.f32 %v2793_v20, %v1250_v16 }
 0x13a   : > { %v808_v8 = vpop.f32.mrf.mxu2  ;;  %v898_v19 = vpop.f32.mrf.mxu3 }
 0x13b   : > { %v3388_v52 = vadd.f32 %v898_v19, %v800_v40  ;;  %v664_v24 = vpop.f32.mrf.mxu0  ;;  %v726_v6 = vpop.f32.mrf.mxu1  ;;  %v3390_v15 = vmul.f32 %v1258_v56, %v703_v7 }
 0x13c   : > { %v2795_v63 = vpop.eup %2794  ;;  %v665_v14 = vadd.f32 %v664_v24, %v3305_v54  ;;  %v727_v3 = vadd.f32 %v726_v6, %v661_v60 }
 0x13d   : > { %v1244_v17 = vmul.f32 %v2795_v63, %v723_v49  ;;  %v1585_v57 = vand.u32 2139095040, %v3390_v15 }
 0x13e   : > { %2796 = vrcp.f32 %v727_v3  ;;  %1094 = vmatmul.f32.gmra.mxu1 %v2999_v12 }
 0x13f   : > { %v1252_v29 = vsub.f32 2.0, %v1244_v17  ;;  %1158 = vmatmul.f32.gmra.mxu2 %v3180_v37  ;;  %1220 = vmatmul.f32.gmra.mxu3 %v3160_v26  ;;  %v1586_v48 = vshrl.u32 %v1585_v57, 23  ;;  %v4544_v57 = vmov 2102212464  }
 0x141   : > { %v3396_v11 = vmul.f32 %v2795_v63, %v1252_v29  ;;  %v2710_v1 = vadd.s32 4294967169, %v1586_v48 }
 0x142   : > { %v816_v45 = vpop.f32.mrf.mxu2  ;;  %v902_v58 = vpop.f32.mrf.mxu3 }
 0x143   : > { %v3398_v39 = vadd.f32 %v902_v58, %v808_v8  ;;  %v668_v50 = vpop.f32.mrf.mxu0  ;;  %v730_v10 = vpop.f32.mrf.mxu1  ;;  %v3402_v54 = vmul.f32 %v3396_v11, %v3337_v21  ;;  %v3445_v58 = vadd.s32 1, %v2710_v1 }
 0x144   : > { %v2797_v18 = vpop.eup %2796  ;;  %v669_v12 = vadd.f32 %v668_v50, %v3313_v22  ;;  %v731_v34 = vadd.f32 %v730_v10, %v665_v14  ;;  %v711_v22 = vadd.f32 %v3345_v44, %v645_v42 }
 0x145   : > { %v1246_v26 = vmul.f32 %v2797_v18, %v727_v3  ;;  %v1895_v33 = vand.u32 2139095040, %v3402_v54  ;;  %v4533_v41 = vand.u32 2147483647, %v3402_v54  ;;  %v3438_v3 = vshrl.u32 %v1275_v62, 23 }
 0x146   : > { %v3408_v4 = vmul.f32 %v1256_v46, %v731_v34  ;;  %v4546_v34 = vmov 683565275   ;;  %vm1593_vm11 = vcmp.gt.s32.totalorder %v3445_v58, 0 }
 0x147   : > { %v1254_v30 = vsub.f32 2.0, %v1246_v26  ;;  %1162 = vmatmul.f32.gmra.mxu2 %v2980_v5  ;;  %1224 = vmatmul.f32.gmra.mxu3 %v3180_v37  ;;  %v1896_v21 = vshrl.u32 %v1895_v33, 23  ;;  %v1899_v47 = vand.u32 8388607, %v4533_v41  ;;  %v4535_v33 = vmov 2475754826  }
 0x148   : > { %4552 = vst [vmem:[#allocation5_spill] sm:$0xff] %v3408_v4 }
 0x149   : > { %v2716_v25 = vadd.s32 4294967169, %v1896_v21  ;;  %v3415_v55 = vmul.f32 %v2797_v18, %v1254_v30  ;;  %v1900_v8 = vor.u32 8388608, %v1899_v47  ;;  %v4537_v30 = vmov 2131351028  }
 0x14a   : > { %v824_v38 = vpop.f32.mrf.mxu2  ;;  %v906_v2 = vpop.f32.mrf.mxu3 }
 0x14b   : > { %v3418_v51 = vadd.f32 %v906_v2, %v816_v45  ;;  %v672_v27 = vpop.f32.mrf.mxu0  ;;  %v734_v46 = vpop.f32.mrf.mxu1  ;;  %v1902_v13 = vadd.s32 1, %v2716_v25  ;;  %v3421_v40 = vmul.f32 %v3415_v55, %v711_v22  ;;  %v3447_v50 = vshll.u32 %v1900_v8, 8 }
 0x14c   : > { %v735_v37 = vadd.f32 %v734_v46, %v669_v12  ;;  %v673_v19 = vadd.f32 %v672_v27, %v3324_v28  ;;  %v4541_v28 = vand.u32 2147483647, %v3390_v15 }
 0x14d   : > { %vm1903_vm2 = vcmp.gt.s32.totalorder %v1902_v13, 0  ;;  %v4534_v44 = vand.u32 2147483647, %v3421_v40  ;;  %v2205_v23 = vand.u32 2139095040, %v3421_v40 }
 0x14e   : > { %v3427_v20 = vmul.f32 %v1258_v56, %v735_v37  ;;  %v1904_v0 = vsel %vm1903_vm2, %v1902_v13, 0 }
 0x14f   : > { %1228 = vmatmul.f32.gmra.mxu3 %v2980_v5  ;;  %v2206_v49 = vshrl.u32 %v2205_v23, 23  ;;  %v2209_v31 = vand.u32 8388607, %v4534_v44  ;;  %v3433_v16 = vand.u32 31, %v1904_v0  ;;  %v3450_v10 = vshrl.u32 %v1904_v0, 5 }
 0x151   : > { %v2722_v7 = vadd.s32 4294967169, %v2206_v49  ;;  %v2210_v60 = vor.u32 8388608, %v2209_v31  ;;  %v3441_v29 = vsub.s32 32, %v3433_v16  ;;  %v1909_v59 = vshll.u32 %v4546_v34, %v3433_v16 }
 0x152   : > { %v832_v24 = vpop.f32.mrf.mxu2  ;;  %v910_v56 = vpop.f32.mrf.mxu3  ;;  %v1912_v42 = vshll.u32 %v4535_v33, %v3433_v16  ;;  %v1915_v21 = vshll.u32 %v4537_v30, %v3433_v16  ;;  %v3463_v22 = vshll.u32 %v4544_v57, %v3433_v16  ;;  %vm1924_vm8 = vcmp.lt.s32.totalorder %v3450_v10, 1 }
 0x153   : > { %v3436_v6 = vadd.f32 %v910_v56, %v824_v38  ;;  %v676_v63 = vpop.f32.mrf.mxu0  ;;  %v738_v5 = vpop.f32.mrf.mxu1  ;;  %v2212_v14 = vadd.s32 1, %v2722_v7  ;;  %v3443_v45 = vshll.u32 %v2210_v60, 8  ;;  %v1910_v38 = vshrl.u32 %v4535_v33, %v3441_v29 }
 0x154   : > { %v739_v17 = vadd.f32 %v738_v5, %v673_v19  ;;  %v1913_v2 = vshrl.u32 %v4537_v30, %v3441_v29  ;;  %v1916_v37 = vshrl.u32 %v4544_v57, %v3441_v29  ;;  %v4539_v60 = vmov 920167782  }
 0x155   : > { %vm2213_vm3 = vcmp.gt.s32.totalorder %v2212_v14, 0  ;;  %v3467_v25 = vand.u32 65535, %v3443_v45  ;;  %v3476_v13 = vshrl.u32 %v3443_v45, 16  ;;  %vm1927_vm14 = vcmp.lt.s32.totalorder %v3450_v10, 4 }
 0x156   : > { %v3453_v18 = vmul.f32 %v3396_v11, %v739_v17  ;;  %v2214_v12 = vsel %vm2213_vm3, %v2212_v14, 0  ;;  %v677_v11 = vadd.f32 %v676_v63, %v3333_v53  ;;  %v4542_v14 = vmov 1326507024  }
 0x157   : > { %v2216_v26 = vand.u32 31, %v2214_v12  ;;  %v3473_v27 = vshrl.u32 %v2214_v12, 5  ;;  %v3494_v41 = vor.u32 %v1913_v2, %v1912_v42  ;;  %vm1926_vm15 = vcmp.lt.s32.totalorder %v3450_v10, 3 }
 0x158   : > { %vm1925_vm0 = vcmp.lt.s32.totalorder %v3450_v10, 2 }
 0x159   : > { %v2217_v46 = vsub.s32 32, %v2216_v26  ;;  %v2219_v23 = vshll.u32 %v4546_v34, %v2216_v26  ;;  %v2222_v47 = vshll.u32 %v4535_v33, %v2216_v26  ;;  %v2225_v0 = vshll.u32 %v4537_v30, %v2216_v26 }
 0x15a   : > { %v840_v48 = vpop.f32.mrf.mxu2  ;;  %v914_v53 = vpop.f32.mrf.mxu3  ;;  %v2228_v49 = vshll.u32 %v4544_v57, %v2216_v26  ;;  %v2231_v8 = vshll.u32 %v4539_v60, %v2216_v26  ;;  %vm2234_vm4 = vcmp.lt.s32.totalorder %v3473_v27, 1  ;;  %vm2237_vm5 = vcmp.lt.s32.totalorder %v3473_v27, 4 }
 0x15b   : > { %v3484_v31 = vadd.f32 %v914_v53, %v832_v24  ;;  %v742_v62 = vpop.f32.mrf.mxu1  ;;  %v2220_v1 = vshrl.u32 %v4535_v33, %v2217_v46  ;;  %v2223_v7 = vshrl.u32 %v4537_v30, %v2217_v46  ;;  %v950_v19 = vpop.f32.mrf.mxu0  ;;  %v2226_v63 = vshrl.u32 %v4544_v57, %v2217_v46 }
 0x15c   : > { %v743_v56 = vadd.f32 %v742_v62, %v677_v11  ;;  %v2229_v5 = vshrl.u32 %v4539_v60, %v2217_v46  ;;  %v2232_v17 = vshrl.u32 %v4542_v14, %v2217_v46  ;;  %v3492_v53 = vor.u32 %v1910_v38, %v1909_v59 }
 0x15d   : > { %v2221_v12 = vor.u32 %v2220_v1, %v2219_v23  ;;  %v2224_v24 = vor.u32 %v2223_v7, %v2222_v47  ;;  %v2227_v44 = vor.u32 %v2226_v63, %v2225_v0  ;;  %v951_v23 = vadd.f32 %v950_v19, %v3343_v35 }
 0x15e   : > { %v2230_v33 = vor.u32 %v2229_v5, %v2228_v49  ;;  %v2233_v30 = vor.u32 %v2232_v17, %v2231_v8  ;;  %v3501_v11 = vmul.f32 %v3415_v55, %v743_v56  ;;  %vm2236_vm6 = vcmp.lt.s32.totalorder %v3473_v27, 3 }
 0x15f   : > { %v2242_v26 = vsel %vm2234_vm4, %v2221_v12, %v2224_v24  ;;  %v2246_v42 = vsel %vm2234_vm4, %v2224_v24, %v2227_v44  ;;  %vm2235_vm7 = vcmp.lt.s32.totalorder %v3473_v27, 2  ;;  %v3512_v0 = vor.u32 %v1916_v37, %v1915_v21 }
 0x160   : > { %v2243_v59 = vsel %vm2237_vm5, %v2230_v33, 920167782  ;;  %v2247_v38 = vsel %vm2237_vm5, %v2233_v30, 1326507024  ;;  %v2239_v55 = vsel %vm2237_vm5, %v2227_v44, 2102212464  ;;  %v1919_v30 = vshrl.u32 %v4539_v60, %v3441_v29 }
 0x161   : > { %v2244_v2 = vsel %vm2236_vm6, %v2227_v44, %v2243_v59  ;;  %v2248_v47 = vsel %vm2236_vm6, %v2230_v33, %v2247_v38  ;;  %v2218_v21 = vshrl.u32 %v4546_v34, %v2217_v46  ;;  %v1921_v5 = vshll.u32 %v4539_v60, %v3433_v16 }
 0x162   : > { %v2245_v35 = vsel %vm2235_vm7, %v2242_v26, %v2244_v2  ;;  %v2249_v49 = vsel %vm2235_vm7, %v2246_v42, %v2248_v47  ;;  %v848_v62 = vpop.f32.mrf.mxu2  ;;  %v918_v1 = vpop.f32.mrf.mxu3  ;;  %v1922_v59 = vshrl.u32 %v4542_v14, %v3441_v29  ;;  %v2240_v46 = vsel %vm2236_vm6, %v2224_v24, %v2239_v55 }
 0x163   : > { %v2253_v7 = vand.u32 65535, %v2249_v49  ;;  %v2254_v8 = vshrl.u32 %v2249_v49, 16  ;;  %v2275_v19 = vand.u32 65535, %v2245_v35  ;;  %v2276_v56 = vshrl.u32 %v2245_v35, 16  ;;  %v955_v63 = vpop.f32.mrf.mxu0  ;;  %v1029_v33 = vpop.f32.mrf.mxu1 }
 0x164   : > { %v3521_v44 = vadd.f32 %v918_v1, %v840_v48  ;;  %v956_v37 = vadd.f32 %v955_v63, %v3352_v43  ;;  %v2238_v42 = vsel %vm2234_vm4, %v2218_v21, %v2221_v12  ;;  %v1030_v48 = vadd.f32 %v1029_v33, %v951_v23 }
 0x165   : > { %v2256_v17 = vmul.u32 %v2254_v8, %v3467_v25  ;;  %v2278_v26 = vmul.u32 %v2276_v56, %v3467_v25  ;;  %v2257_v43 = vmul.u32 %v2253_v7, %v3476_v13  ;;  %v2255_v16 = vmul.u32 %v2253_v7, %v3467_v25 }
 0x166   : > { %v2279_v2 = vmul.u32 %v2275_v19, %v3476_v13  ;;  %v2258_v35 = vmul.u32 %v2254_v8, %v3476_v13  ;;  %v2280_v49 = vmul.u32 %v2276_v56, %v3476_v13  ;;  %v2277_v1 = vmul.u32 %v2275_v19, %v3467_v25 }
 0x167   : > { %v2259_v38 = vshll.u32 %v2256_v17, 16  ;;  %v2281_v47 = vshll.u32 %v2278_v26, 16  ;;  %v1920_v12 = vor.u32 %v1919_v30, %v3463_v22  ;;  %v2261_v24 = vshll.u32 %v2257_v43, 16 }
 0x168   : > { %v1923_v23 = vor.u32 %v1922_v59, %v1921_v5  ;;  %v2283_v21 = vshll.u32 %v2279_v2, 16  ;;  %v1942_v27 = vshrl.u32 %v3447_v50, 16 }
 0x169   : > { %vm2263_vm9 = vc.u32 %v2255_v16, %v2259_v38  ;;  %v2265_v63 = vadd.s32 %v2259_v38, %v2255_v16  ;;  %vm2285_vm10 = vc.u32 %v2277_v1, %v2281_v47  ;;  %v2287_v60 = vadd.s32 %v2281_v47, %v2277_v1 }
 0x16a   : > { %v856_v55 = vpop.f32.mrf.mxu2  ;;  %v922_v33 = vpop.f32.mrf.mxu3  ;;  %v2264_v7 = vsel %vm2263_vm9, 1, %v4548_v9  ;;  %v2286_v22 = vsel %vm2285_vm10, 1, %v4548_v9  ;;  %v2260_v16 = vshrl.u32 %v2256_v17, 16  ;;  %v2262_v38 = vshrl.u32 %v2257_v43, 16 }
 0x16b   : > { %v3544_v8 = vadd.f32 %v922_v33, %v848_v62  ;;  %v960_v13 = vpop.f32.mrf.mxu0  ;;  %v1035_v56 = vpop.f32.mrf.mxu1  ;;  %v2266_v25 = vadd.s32 %v2264_v7, %v2258_v35  ;;  %vm2267_vm12 = vc.u32 %v2265_v63, %v2261_v24  ;;  %v2288_v59 = vadd.s32 %v2286_v22, %v2280_v49 }
 0x16c   : > { %v961_v30 = vadd.f32 %v960_v13, %v3361_v61  ;;  %v3548_v19 = vadd.f32 %v1035_v56, %v956_v37  ;;  %v2268_v5 = vsel %vm2267_vm12, 1, %v4548_v9  ;;  %vm2289_vm13 = vc.u32 %v2287_v60, %v2283_v21 }
 0x16d   : > { %4553 = vst [vmem:[#allocation6_spill] sm:$0xff] %v3544_v8  ;;  %v2270_v47 = vadd.s32 %v2268_v5, %v2266_v25  ;;  %v2282_v1 = vshrl.u32 %v2278_v26, 16  ;;  %v2290_v62 = vsel %vm2289_vm13, 1, %v4548_v9  ;;  %v1932_v35 = vsel %vm1924_vm8, %v3492_v53, %v3494_v41 }
 0x16e   : > { %v2292_v37 = vadd.s32 %v2290_v62, %v2288_v59  ;;  %v1933_v17 = vsel %vm1927_vm14, %v1920_v12, 920167782  ;;  %v2284_v43 = vshrl.u32 %v2279_v2, 16  ;;  %v1937_v49 = vsel %vm1927_vm14, %v1923_v23, 1326507024 }
 0x16f   : > { %v2271_v61 = vadd.s32 %v2270_v47, %v2260_v16  ;;  %v1934_v26 = vsel %vm1926_vm15, %v3512_v0, %v1933_v17  ;;  %v1936_v2 = vsel %vm1924_vm8, %v3494_v41, %v3512_v0  ;;  %v3574_v56 = vadd.s32 %v2287_v60, %v2283_v21 }
 0x170   : > { %v2293_v24 = vadd.s32 %v2292_v37, %v2282_v1  ;;  %v1935_v33 = vsel %vm1925_vm0, %v1932_v35, %v1934_v26  ;;  %v1938_v25 = vsel %vm1926_vm15, %v1920_v12, %v1937_v49  ;;  %v1941_v23 = vand.u32 65535, %v3447_v50 }
 0x171   : > { %v3566_v63 = vadd.s32 %v2271_v61, %v2262_v38  ;;  %v1966_v22 = vshrl.u32 %v1935_v33, 16  ;;  %v2241_v5 = vsel %vm2235_vm7, %v2238_v42, %v2240_v46  ;;  %v1939_v60 = vsel %vm1925_vm0, %v1936_v2, %v1938_v25 }
 0x172   : > { %v926_v7 = vpop.f32.mrf.mxu3  ;;  %v1119_v13 = vpop.f32.mrf.mxu2  ;;  %v2294_v1 = vadd.s32 %v2293_v24, %v2284_v43  ;;  %v1965_v12 = vand.u32 65535, %v1935_v33  ;;  %v1943_v42 = vand.u32 65535, %v1939_v60  ;;  %v1944_v46 = vshrl.u32 %v1939_v60, 16 }
 0x173   : > { %v3581_v59 = vadd.f32 %v926_v7, %v856_v55  ;;  %v1120_v16 = vadd.f32 %v1119_v13, %v1030_v48  ;;  %v3583_v38 = vpop.f32.mrf.mxu0  ;;  %v1041_v47 = vpop.f32.mrf.mxu1  ;;  %vm2297_vm1 = vc.u32 %v3566_v63, %v3574_v56  ;;  %v3593_v48 = vadd.s32 4294967169, %v3438_v3 }
 0x174   : > { %v3585_v62 = vadd.f32 %v1041_v47, %v961_v30  ;;  %v2298_v21 = vadd.s32 1, %v2294_v1  ;;  %v3598_v55 = vsel %vm1593_vm11, %v3445_v58, 0  ;;  %v2295_v30 = vmul.u32 %v3443_v45, %v2241_v5 }
 0x175   : > { %4554 = vst [vmem:[#allocation7_spill] sm:$0xff] %v3581_v59  ;;  %v1968_v35 = vmul.u32 %v1966_v22, %v1941_v23  ;;  %v1946_v37 = vmul.u32 %v1944_v46, %v1941_v23  ;;  %v1947_v17 = vmul.u32 %v1943_v42, %v1942_v27  ;;  %v3603_v43 = vand.u32 8388607, %v4541_v28 }
 0x176   : > { %v2299_v61 = vsel %vm2297_vm1, %v2298_v21, %v2294_v1  ;;  %v1967_v49 = vmul.u32 %v1965_v12, %v1941_v23  ;;  %v1969_v24 = vmul.u32 %v1965_v12, %v1942_v27  ;;  %v3606_v33 = vand.u32 31, %v3598_v55 }
 0x177   : > { %v2300_v26 = vadd.s32 %v2299_v61, %v2295_v30  ;;  %v1971_v3 = vshll.u32 %v1968_v35, 16  ;;  %v1945_v2 = vmul.u32 %v1943_v42, %v1941_v23  ;;  %v1949_v58 = vshll.u32 %v1946_v37, 16 }
 0x178   : > { %v1970_v7 = vmul.u32 %v1966_v22, %v1942_v27  ;;  %v1948_v5 = vmul.u32 %v1944_v46, %v1942_v27  ;;  %v1951_v47 = vshll.u32 %v1947_v17, 16  ;;  %v1973_v42 = vshll.u32 %v1969_v24, 16 }
 0x179   : > { %v2301_v25 = vadd.s32 536870912, %v2300_v26  ;;  %vm1975_vm2 = vc.u32 %v1967_v49, %v1971_v3  ;;  %vm1953_vm3 = vc.u32 %v1945_v2, %v1949_v58  ;;  %v1955_v12 = vadd.s32 %v1949_v58, %v1945_v2 }
 0x17a   : > { %v1123_v13 = vpop.f32.mrf.mxu2  ;;  %v1185_v45 = vpop.f32.mrf.mxu3  ;;  %v1954_v22 = vsel %vm1953_vm3, 1, %v4548_v9  ;;  %v1976_v27 = vsel %vm1975_vm2, 1, %v4548_v9  ;;  %v1977_v46 = vadd.s32 %v1971_v3, %v1967_v49  ;;  %v1950_v58 = vshrl.u32 %v1946_v37, 16 }
 0x17b   : > { %v1124_v1 = vadd.f32 %v1123_v13, %v3548_v19  ;;  %v3609_v60 = vadd.f32 %v1185_v45, %v1120_v16  ;;  %v970_v21 = vpop.f32.mrf.mxu0  ;;  %v3611_v30 = vpop.f32.mrf.mxu1  ;;  %v3614_v23 = vshrl.u32 %v2301_v25, 30  ;;  %v1956_v28 = vadd.s32 %v1954_v22, %v1948_v5 }
 0x17c   : > { %4556 = vst [vmem:[#allocation9_spill] sm:$0xff] %v3611_v30  ;;  %v971_v61 = vadd.f32 %v970_v21, %v3388_v52  ;;  %vm1957_vm4 = vc.u32 %v1955_v12, %v1951_v47  ;;  %v1908_v16 = vshrl.u32 %v4546_v34, %v3441_v29  ;;  %v1978_v2 = vadd.s32 %v1976_v27, %v1970_v7 }
 0x17d   : > { %4555 = vst [vmem:[#allocation8_spill] sm:$0xff] %v3609_v60  ;;  %v2303_v19 = vshll.u32 %v3614_v23, 30  ;;  %v1958_v13 = vsel %vm1957_vm4, 1, %v4548_v9  ;;  %v1929_v52 = vsel %vm1927_vm14, %v3512_v0, 2102212464  ;;  %vm1979_vm5 = vc.u32 %v1977_v46, %v1973_v42 }
 0x17e   : > { %v1960_v45 = vadd.s32 %v1958_v13, %v1956_v28  ;;  %v3626_v25 = vsub.s32 32, %v3606_v33  ;;  %v1928_v49 = vsel %vm1924_vm8, %v1908_v16, %v3492_v53  ;;  %v1980_v29 = vsel %vm1979_vm5, 1, %v4548_v9 }
 0x17f   : > { %v3628_v5 = vsub.s32 %v2300_v26, %v2303_v19  ;;  %v1952_v3 = vshrl.u32 %v1947_v17, 16  ;;  %v1972_v47 = vshrl.u32 %v1968_v35, 16  ;;  %v1982_v21 = vadd.s32 %v1980_v29, %v1978_v2 }
 0x180   : > { %v1961_v7 = vadd.s32 %v1960_v45, %v1950_v58  ;;  %v1930_v37 = vsel %vm1926_vm15, %v3494_v41, %v1929_v52  ;;  %v1974_v26 = vshrl.u32 %v1969_v24, 16  ;;  %v3648_v58 = vadd.s32 %v1977_v46, %v1973_v42 }
 0x181   : > { %vm2305_vm6 = vcmp.lt.s32.totalorder %v3628_v5, 0  ;;  %v2306_v28 = vsub.s32 0, %v3628_v5  ;;  %v1983_v35 = vadd.s32 %v1982_v21, %v1972_v47  ;;  %v3651_v41 = vadd.s32 1, %v3593_v48 }
 0x182   : > { %v1127_v12 = vpop.f32.mrf.mxu2  ;;  %v1189_v0 = vpop.f32.mrf.mxu3  ;;  %v3642_v19 = vadd.s32 %v1961_v7, %v1952_v3  ;;  %v3656_v52 = vshrl.u32 %v3598_v55, 5  ;;  %v1599_v48 = vshll.u32 %v4546_v34, %v3606_v33  ;;  %v1606_v10 = vshrl.u32 %v4544_v57, %v3626_v25 }
 0x183   : > { %v1128_v22 = vadd.f32 %v1127_v12, %v3585_v62  ;;  %v3640_v53 = vadd.f32 %v1189_v0, %v1124_v1  ;;  %v975_v27 = vpop.f32.mrf.mxu0  ;;  %v1053_v17 = vpop.f32.mrf.mxu1  ;;  %v2307_v2 = vsel %vm2305_vm6, %v2306_v28, %v3628_v5  ;;  %v1931_v62 = vsel %vm1925_vm0, %v1928_v49, %v1930_v37 }
 0x184   : > { %v976_v16 = vadd.f32 %v975_v27, %v3398_v39  ;;  %v3645_v13 = vadd.f32 %v1053_v17, %v971_v61  ;;  %v2308_v24 = vclz %v2307_v2  ;;  %v1984_v1 = vadd.s32 %v1983_v35, %v1974_v26 }
 0x185   : > { %4557 = vst [vmem:[#allocation10_spill] sm:$0xff] %v3640_v53  ;;  %vm1987_vm7 = vc.u32 %v3642_v19, %v3648_v58  ;;  %v1590_v39 = vor.u32 8388608, %v3603_v43  ;;  %v4558_v61 = vmov 2131351028   ;;  %v2296_v55 = vadd.s32 %v3574_v56, %v3566_v63 }
 0x186   : > { %v1603_v42 = vshrl.u32 %v4558_v61, %v3626_v25  ;;  %v2723_v46 = vadd.s32 4294967294, %v2308_v24  ;;  %v1988_v45 = vadd.s32 1, %v1984_v1  ;;  %v1985_v49 = vmul.u32 %v3447_v50, %v1931_v62 }
 0x187   : > { %v4559_v29 = vmov 2475754826   ;;  %v1612_v43 = vshrl.u32 %v4542_v14, %v3626_v25  ;;  %v1605_v47 = vshll.u32 %v4558_v61, %v3606_v33  ;;  %v4560_v21 = vmov 920167782  }
 0x188   : > { %v1602_v3 = vshll.u32 %v4559_v29, %v3606_v33  ;;  %vm2724_vm8 = vcmp.lt.s32.totalorder %v2723_v46, 0  ;;  %v1989_v7 = vsel %vm1987_vm7, %v1988_v45, %v1984_v1  ;;  %v1609_v12 = vshrl.u32 %v4560_v21, %v3626_v25 }
 0x189   : > { %v2311_v63 = vsel %vm2724_vm8, 0, %v2723_v46  ;;  %v1990_v56 = vadd.s32 %v1989_v7, %v1985_v49  ;;  %v1611_v37 = vshll.u32 %v4560_v21, %v3606_v33  ;;  %v3688_v2 = vor.u32 %v1606_v10, %v1605_v47 }
 0x18a   : > { %v3678_v0 = vpop.f32.mrf.mxu2  ;;  %v1193_v28 = vpop.f32.mrf.mxu3  ;;  %v3680_v50 = vor.u32 %v1603_v42, %v1602_v3  ;;  %v2312_v35 = vsub.s32 32, %v2311_v63  ;;  %v1608_v24 = vshll.u32 %v4544_v57, %v3606_v33  ;;  %v2316_v1 = vsub.s32 4294967266, %v2311_v63 }
 0x18b   : > { %4561 = vst [vmem:[#allocation11_spill] sm:$0xff] %v3678_v0  ;;  %v3684_v26 = vadd.f32 %v1193_v28, %v1128_v22  ;;  %v3686_v27 = vpop.f32.mrf.mxu0  ;;  %v1059_v17 = vpop.f32.mrf.mxu1  ;;  %v1991_v46 = vadd.s32 536870912, %v1990_v56  ;;  %v1613_v45 = vor.u32 %v1612_v43, %v1611_v37  ;;  %v2326_v49 = vsub.s32 4, %v3614_v23 }
 0x18c   : > { %v1060_v62 = vadd.f32 %v1059_v17, %v976_v16  ;;  %v2314_v42 = vshrl.u32 %v2296_v55, %v2312_v35  ;;  %v1600_v22 = vshrl.u32 %v4559_v29, %v3626_v25  ;;  %v1610_v3 = vor.u32 %v1609_v12, %v1608_v24 }
 0x18d   : > { %4562 = vst [vmem:[#allocation12_spill] sm:$0xff] %v3684_v26  ;;  %v2313_v7 = vshll.u32 %v3628_v5, %v2311_v63  ;;  %v2317_v28 = vadd.s32 127, %v2316_v1  ;;  %v3696_v14 = vshrl.u32 %v1991_v46, 30  ;;  %vm1614_vm9 = vcmp.lt.s32.totalorder %v3656_v52, 1 }
 0x18e   : > { %vm2204_vm10 = vcmp.lt.s32.totalorder %v3421_v40, 0  ;;  %vm1616_vm11 = vcmp.lt.s32.totalorder %v3656_v52, 3  ;;  %vm1617_vm12 = vcmp.lt.s32.totalorder %v3656_v52, 4  ;;  %v1626_v33 = vsel %vm1614_vm9, %v3680_v50, %v3688_v2 }
 0x18f   : > { %v2315_v16 = vor.u32 %v2314_v42, %v2313_v7  ;;  %v2318_v10 = vshll.u32 %v2317_v28, 23  ;;  %v1993_v5 = vshll.u32 %v3696_v14, 30  ;;  %v1627_v55 = vsel %vm1617_vm12, %v1613_v45, 1326507024 }
 0x190   : > { %v2327_v43 = vsel %vm2204_vm10, %v2326_v49, %v3614_v23  ;;  %v3712_v47 = vor.u32 %v1600_v22, %v1599_v48  ;;  %vm1615_vm13 = vcmp.lt.s32.totalorder %v3656_v52, 2  ;;  %v1628_v12 = vsel %vm1616_vm11, %v1610_v3, %v1627_v55 }
 0x191   : > { %v2319_v17 = vor.u32 4788187, %v2318_v10  ;;  %v3719_v35 = vsub.s32 %v1990_v56, %v1993_v5  ;;  %v1629_v24 = vsel %vm1615_vm13, %v1626_v33, %v1628_v12  ;;  %v3723_v1 = vshll.u32 %v1590_v39, 8 }
 0x192   : > { %v1135_v63 = vpop.f32.mrf.mxu2  ;;  %v3717_v37 = vpop.f32.mrf.mxu3  ;;  %vm1283_vm14 = vcmp.gt.s32.totalorder %v3651_v41, 0  ;;  %v1623_v45 = vsel %vm1617_vm12, %v1610_v3, 920167782  ;;  %v4564_v42 = vand.u32 2147483647, %v3421_v40  ;;  %v2322_v39 = vcvt.s32.f32 %v2315_v16 }
 0x193   : > { %4563 = vst [vmem:[#allocation13_spill] sm:$0xff] %v3717_v37  ;;  %v1136_v23 = vadd.f32 %v1135_v63, %v3645_v13  ;;  %v3727_v48 = vpop.f32.mrf.mxu0  ;;  %v3729_v46 = vpop.f32.mrf.mxu1  ;;  %v2320_v49 = vand.u32 2147483647, %v2319_v17  ;;  %vm1995_vm0 = vcmp.lt.s32.totalorder %v3719_v35, 0  ;;  %v1996_v22 = vsub.s32 0, %v3719_v35 }
 0x194   : > { %vm3735_vm15 = vcmp.le.f32.partialorder %v4564_v42, 0.7853982  ;;  %v1622_v3 = vsel %vm1614_vm9, %v3712_v47, %v3680_v50  ;;  %v1633_v7 = vand.u32 65535, %v1629_v24  ;;  %v1624_v33 = vsel %vm1616_vm11, %v3688_v2, %v1623_v45 }
 0x195   : > { %v2329_v13 = vsel %vm3735_vm15, 0, %v2327_v43  ;;  %v2323_v28 = vmul.f32 %v2322_v39, %v2320_v49  ;;  %v3751_v16 = vand.u32 65535, %v3723_v1  ;;  %v1634_v10 = vshrl.u32 %v1629_v24, 16 }
 0x196   : > { %v1997_v5 = vsel %vm1995_vm0, %v1996_v22, %v3719_v35  ;;  %v3755_v55 = vshrl.u32 %v3723_v1, 16  ;;  %v3763_v17 = vsel %vm1283_vm14, %v3651_v41, 0  ;;  %v2346_v45 = vadd.s32 3, %v2329_v13 }
 0x197   : > { %v2324_v43 = vxor.u32 2147483648, %v2323_v28  ;;  %v1998_v12 = vclz %v1997_v5  ;;  %v3758_v63 = vmul.u32 %v1634_v10, %v3751_v16  ;;  %v3767_v42 = vsel %vm1615_vm13, %v1622_v3, %v1624_v33 }
 0x198   : > { %v3770_v24 = vmul.u32 %v1633_v7, %v3755_v55  ;;  %v1986_v5 = vadd.s32 %v3648_v58, %v3642_v19  ;;  %v1635_v59 = vmul.u32 %v1633_v7, %v3751_v16  ;;  %v1656_v58 = vshrl.u32 %v3767_v42, 16 }
 0x199   : > { %v2325_v22 = vsel %vm2204_vm10, %v2324_v43, %v2323_v28  ;;  %v2717_v57 = vadd.s32 4294967294, %v1998_v12  ;;  %v1639_v41 = vshll.u32 %v3758_v63, 16  ;;  %v1638_v7 = vmul.u32 %v1634_v10, %v3755_v55 }
 0x19a   : > { %v1139_v49 = vpop.f32.mrf.mxu2  ;;  %v1201_v39 = vpop.f32.mrf.mxu3  ;;  %v3784_v33 = vsel %vm3735_vm15, %v3421_v40, %v2325_v22  ;;  %v2532_v53 = vmul.f32 1.442695, %v3501_v11  ;;  %vm1894_vm4 = vcmp.lt.s32.totalorder %v3402_v54, 0  ;;  %vm2345_vm8 = vweird.f32 %v3421_v40 }
 0x19b   : > { %v1140_v34 = vadd.f32 %v1139_v49, %v1060_v62  ;;  %v3777_v13 = vadd.f32 %v1201_v39, %v1136_v23  ;;  %v990_v9 = vpop.f32.mrf.mxu0  ;;  %v3779_v3 = vpop.f32.mrf.mxu1  ;;  %v2330_v19 = vmul.f32 %v3784_v33, %v3784_v33  ;;  %vm2718_vm1 = vcmp.lt.s32.totalorder %v2717_v57, 0 }
 0x19c   : > { %v991_v28 = vadd.f32 %v990_v9, %v3484_v31  ;;  %v2001_v62 = vsel %vm2718_vm1, 0, %v2717_v57  ;;  %v1641_v23 = vshll.u32 %v3770_v24, 16  ;;  %vm1643_vm2 = vc.u32 %v1635_v59, %v1639_v41 }
 0x19d   : > { %v1645_v43 = vadd.s32 %v1639_v41, %v1635_v59  ;;  %v2331_v12 = vmul.f32 -0.001358992, %v2330_v19  ;;  %v2338_v49 = vmul.f32 -0.00019511016, %v2330_v19  ;;  %v2002_v56 = vsub.s32 32, %v2001_v62 }
 0x19e   : > { %v1655_v39 = vand.u32 65535, %v3767_v42  ;;  %v2006_v22 = vsub.s32 4294967266, %v2001_v62  ;;  %v4567_v9 = vmov 0   ;;  %v3796_v57 = vmul.u32 %v1656_v58, %v3751_v16 }
 0x19f   : > { %v1644_v31 = vsel %vm1643_vm2, 1, %v4567_v9  ;;  %vm1647_vm3 = vc.u32 %v1645_v43, %v1641_v23  ;;  %v2332_v4 = vadd.f32 0.041655596, %v2331_v12  ;;  %v2339_v8 = vadd.f32 0.008332121, %v2338_v49 }
 0x1a0   : > { %v2004_v26 = vshrl.u32 %v1986_v5, %v2002_v56  ;;  %v3799_v59 = vand.u32 3, %v2346_v45  ;;  %v2003_v42 = vshll.u32 %v3719_v35, %v2001_v62  ;;  %v2007_v41 = vadd.s32 127, %v2006_v22 }
 0x1a1   : > { %v2333_v10 = vmul.f32 %v2332_v4, %v2330_v19  ;;  %v2340_v37 = vmul.f32 %v2339_v8, %v2330_v19  ;;  %v1646_v0 = vadd.s32 %v1644_v31, %v1638_v7  ;;  %v1648_v23 = vsel %vm1647_vm3, 1, %v4567_v9 }
 0x1a2   : > { %v1205_v60 = vpop.f32.mrf.mxu3  ;;  %v2005_v49 = vor.u32 %v2004_v26, %v2003_v42  ;;  %v2008_v56 = vshll.u32 %v2007_v41, 23  ;;  %v3807_v11 = vmul.u32 %v1655_v39, %v3755_v55  ;;  %v4568_v4 = vand.u32 2147483647, %v3402_v54 }
 0x1a3   : > { %v3804_v43 = vadd.f32 %v1205_v60, %v1140_v34  ;;  %v995_v5 = vpop.f32.mrf.mxu0  ;;  %v1077_v12 = vpop.f32.mrf.mxu1  ;;  %v2334_v35 = vadd.f32 -0.4999988, %v2333_v10  ;;  %v1661_v34 = vshll.u32 %v3796_v57, 16  ;;  %2798 = vpow2.f32 %v2532_v53 }
 0x1a4   : > { %v996_v45 = vadd.f32 %v995_v5, %v3521_v44  ;;  %v3810_v30 = vadd.f32 %v1077_v12, %v991_v28  ;;  %vm3814_vm5 = vcmp.le.f32.partialorder %v4568_v4, 0.7853982  ;;  %v2341_v60 = vadd.f32 -0.16666654, %v2340_v37 }
 0x1a5   : > { %v2009_v26 = vor.u32 4788187, %v2008_v56  ;;  %v4571_v62 = vmov 683565275   ;;  %v2335_v7 = vmul.f32 %v2334_v35, %v2330_v19  ;;  %vm2349_vm6 = vcmp.eq.s32.totalorder %v3799_v59, 0 }
 0x1a6   : > { %v1598_v22 = vshrl.u32 %v4571_v62, %v3626_v25  ;;  %v2016_v44 = vsub.s32 4, %v3696_v14  ;;  %v1657_v28 = vmul.u32 %v1655_v39, %v3751_v16  ;;  %v1660_v31 = vmul.u32 %v1656_v58, %v3755_v55 }
 0x1a7   : > { %v2342_v42 = vmul.f32 %v2341_v60, %v2330_v19  ;;  %vm2348_vm7 = vcmp.lt.s32.totalorder %v3799_v59, 2  ;;  %v2010_v41 = vand.u32 2147483647, %v2009_v26  ;;  %v2012_v10 = vcvt.s32.f32 %v2005_v49 }
 0x1a8   : > { %v1650_v53 = vadd.s32 %v1648_v23, %v1646_v0  ;;  %v2336_v37 = vadd.f32 1.0, %v2335_v7  ;;  %v1663_v25 = vshll.u32 %v3807_v11, 16  ;;  %vm1665_vm10 = vc.u32 %v1657_v28, %v1661_v34 }
 0x1a9   : > { %v1667_v5 = vadd.s32 %v1661_v34, %v1657_v28  ;;  %v2343_v12 = vadd.f32 1.0, %v2342_v42  ;;  %v2013_v56 = vmul.f32 %v2012_v10, %v2010_v41  ;;  %v1640_v35 = vshrl.u32 %v3758_v63, 16  ;;  %v2799_v58 = vpop.eup %2798 }
 0x1aa   : > { %v1666_v16 = vsel %vm1665_vm10, 1, %v4567_v9  ;;  %v2017_v55 = vsel %vm1894_vm4, %v2016_v44, %v3696_v14  ;;  %v1619_v0 = vsel %vm1617_vm12, %v3688_v2, 2102212464  ;;  %v2353_v49 = vxor.u32 2147483648, %v2336_v37 }
 0x1ab   : > { %v1668_v19 = vadd.s32 %v1666_v16, %v1660_v31  ;;  %vm1669_vm14 = vc.u32 %v1667_v5, %v1663_v25  ;;  %v1083_v39 = vpop.f32.mrf.mxu1  ;;  %v2344_v23 = vmul.f32 %v2343_v12, %v3784_v33  ;;  %v2014_v4 = vxor.u32 2147483648, %v2013_v56 }
 0x1ac   : > { %v1651_v34 = vadd.s32 %v1650_v53, %v1640_v35  ;;  %v3837_v63 = vadd.f32 %v1083_v39, %v996_v45  ;;  %vm2352_vm15 = vcmp.eq.s32.totalorder %v3799_v59, 2  ;;  %v1618_v14 = vsel %vm1614_vm9, %v1598_v22, %v3712_v47 }
 0x1ad   : > { %v1670_v60 = vsel %vm1669_vm14, 1, %v4567_v9  ;;  %v2350_v2 = vxor.u32 2147483648, %v2344_v23  ;;  %v2015_v26 = vsel %vm1894_vm4, %v2014_v4, %v2013_v56  ;;  %v2019_v33 = vsel %vm3814_vm5, 0, %v2017_v55 }
 0x1ae   : > { %v1642_v7 = vshrl.u32 %v3770_v24, 16  ;;  %v2018_v45 = vsel %vm3814_vm5, %v3402_v54, %v2015_v26  ;;  %v1620_v44 = vsel %vm1616_vm11, %v3680_v50, %v1619_v0  ;;  %v1662_v47 = vshrl.u32 %v3796_v57, 16 }
 0x1af   : > { %v1672_v22 = vadd.s32 %v1670_v60, %v1668_v19  ;;  %v2351_v28 = vsel %vm2349_vm6, %v2336_v37, %v2350_v2  ;;  %v2354_v31 = vsel %vm2352_vm15, %v2353_v49, %v2344_v23  ;;  %v2020_v42 = vmul.f32 %v2018_v45, %v2018_v45 }
 0x1b0   : > { %v3858_v41 = vadd.s32 %v1651_v34, %v1642_v7  ;;  %v2355_v24 = vsel %vm2348_vm7, %v2351_v28, %v2354_v31  ;;  %v2036_v10 = vadd.s32 3, %v2019_v33  ;;  %v1664_v8 = vshrl.u32 %v3807_v11, 16 }
 0x1b1   : > { %v1673_v53 = vadd.s32 %v1672_v22, %v1662_v47  ;;  %v2356_v50 = vsel %vm2345_vm8, nan, %v2355_v24  ;;  %v2021_v12 = vmul.f32 -0.001358992, %v2020_v42  ;;  %v2028_v57 = vmul.f32 -0.00019511016, %v2020_v42 }
 0x1b2   : > { %v3865_v56 = vadd.s32 %v1667_v5, %v1663_v25  ;;  %v1286_v37 = vand.u32 31, %v3763_v17  ;;  %v2542_v35 = vmul.f32 %v2799_v58, %v2356_v50  ;;  %v1621_v16 = vsel %vm1615_vm13, %v1618_v14, %v1620_v44 }
 0x1b3   : > { %v1674_v55 = vadd.s32 %v1673_v53, %v1664_v8  ;;  %v2022_v59 = vadd.f32 0.041655596, %v2021_v12  ;;  %v2029_v0 = vadd.f32 0.008332121, %v2028_v57  ;;  %v2528_v11 = vmul.f32 1.442695, %v3453_v18 }
 0x1b4   : > { %vm1677_vm9 = vc.u32 %v3858_v41, %v3865_v56  ;;  %2577 = vmatpush.msrb.mxu0 %v2542_v35  ;;  %v2037_v25 = vand.u32 3, %v2036_v10  ;;  %v1675_v5 = vmul.u32 %v3723_v1, %v1621_v16  ;;  %v3874_v23 = vsub.s32 32, %v1286_v37 }
 0x1b5   : > { %v1678_v40 = vadd.s32 1, %v1674_v55  ;;  %v2023_v19 = vmul.f32 %v2022_v59, %v2020_v42  ;;  %v2030_v39 = vmul.f32 %v2029_v0, %v2020_v42  ;;  %v1272_v52 = vand.u32 2147483647, %v3376_v32 }
 0x1b6   : > { %v3878_v14 = vshrl.u32 %v3763_v17, 5  ;;  %2800 = vpow2.f32 %v2528_v11  ;;  %vm2038_vm11 = vcmp.lt.s32.totalorder %v2037_v25, 2  ;;  %vm2039_vm12 = vcmp.eq.s32.totalorder %v2037_v25, 0 }
 0x1b7   : > { %v1679_v58 = vsel %vm1677_vm9, %v1678_v40, %v1674_v55  ;;  %v2024_v49 = vadd.f32 -0.4999988, %v2023_v19  ;;  %v2031_v4 = vadd.f32 -0.16666654, %v2030_v39  ;;  %vm2035_vm13 = vweird.f32 %v3402_v54 }
 0x1b8   : > { %v1680_v34 = vadd.s32 %v1679_v58, %v1675_v5  ;;  %v1279_v1 = vand.u32 8388607, %v1272_v52  ;;  %v1290_v26 = vshrl.u32 %v4559_v29, %v3874_v23  ;;  %v1293_v33 = vshrl.u32 %v4558_v61, %v3874_v23 }
 0x1b9   : > { %v2025_v18 = vmul.f32 %v2024_v49, %v2020_v42  ;;  %v2032_v60 = vmul.f32 %v2031_v4, %v2020_v42  ;;  %v1299_v17 = vshrl.u32 %v4560_v21, %v3874_v23  ;;  %v4572_v22 = vmov 2102212464  }
 0x1ba   : > { %v1681_v2 = vadd.s32 536870912, %v1680_v34  ;;  %v1296_v28 = vshrl.u32 %v4572_v22, %v3874_v23  ;;  %v1289_v31 = vshll.u32 %v4571_v62, %v1286_v37  ;;  %v1292_v42 = vshll.u32 %v4559_v29, %v1286_v37 }
 0x1bb   : > { %v2026_v7 = vadd.f32 1.0, %v2025_v18  ;;  %v2033_v44 = vadd.f32 1.0, %v2032_v60  ;;  %v1298_v24 = vshll.u32 %v4572_v22, %v1286_v37  ;;  %v4573_v10 = vmov 1326507024  }
 0x1bc   : > { %v3889_v47 = vshrl.u32 %v1681_v2, 30  ;;  %v1302_v8 = vshrl.u32 %v4573_v10, %v3874_v23  ;;  %v1295_v57 = vshll.u32 %v4558_v61, %v1286_v37  ;;  %v2801_v35 = vpop.eup %2800  ;;  %v3900_v16 = vor.u32 %v1290_v26, %v1289_v31 }
 0x1bd   : > { %v2034_v53 = vmul.f32 %v2033_v44, %v2018_v45  ;;  %v2043_v50 = vxor.u32 2147483648, %v2026_v7  ;;  %v3902_v55 = vor.u32 %v1293_v33, %v1292_v42  ;;  %v1300_v59 = vor.u32 %v1299_v17, %v1298_v24 }
 0x1be   : > { %v1683_v12 = vshll.u32 %v3889_v47, 30  ;;  %v1301_v0 = vshll.u32 %v4560_v21, %v1286_v37  ;;  %vm2042_vm0 = vcmp.eq.s32.totalorder %v2037_v25, 2  ;;  %v1297_v19 = vor.u32 %v1296_v28, %v1295_v57 }
 0x1bf   : > { %v2040_v11 = vxor.u32 2147483648, %v2034_v53  ;;  %v1280_v39 = vor.u32 8388608, %v1279_v1  ;;  %vm1304_vm1 = vcmp.lt.s32.totalorder %v3878_v14, 1  ;;  %vm1307_vm2 = vcmp.lt.s32.totalorder %v3878_v14, 4 }
 0x1c0   : > { %v1684_v40 = vsub.s32 %v1680_v34, %v1683_v12  ;;  %v1303_v5 = vor.u32 %v1302_v8, %v1301_v0  ;;  %v2044_v58 = vsel %vm2042_vm0, %v2043_v50, %v2034_v53  ;;  %vm1305_vm4 = vcmp.lt.s32.totalorder %v3878_v14, 2 }
 0x1c1   : > { %v2041_v45 = vsel %vm2039_vm12, %v2026_v7, %v2040_v11  ;;  %v1312_v37 = vsel %vm1304_vm1, %v3900_v16, %v3902_v55  ;;  %v1313_v34 = vsel %vm1307_vm2, %v1300_v59, 920167782  ;;  %vm1306_vm5 = vcmp.lt.s32.totalorder %v3878_v14, 3 }
 0x1c2   : > { %vm1685_vm3 = vcmp.lt.s32.totalorder %v1684_v40, 0  ;;  %v1686_v49 = vsub.s32 0, %v1684_v40  ;;  %v2045_v4 = vsel %vm2038_vm11, %v2041_v45, %v2044_v58  ;;  %v1316_v25 = vsel %vm1304_vm1, %v3902_v55, %v1297_v19 }
 0x1c3   : > { %v2046_v18 = vsel %vm2035_vm13, nan, %v2045_v4  ;;  %v1314_v26 = vsel %vm1306_vm5, %v1297_v19, %v1313_v34  ;;  %v1317_v33 = vsel %vm1307_vm2, %v1303_v5, 1326507024  ;;  %v3930_v44 = vshll.u32 %v1280_v39, 8 }
 0x1c4   : > { %v1687_v60 = vsel %vm1685_vm3, %v1686_v49, %v1684_v40  ;;  %v2540_v2 = vmul.f32 %v2801_v35, %v2046_v18  ;;  %v1315_v17 = vsel %vm1305_vm4, %v1312_v37, %v1314_v26  ;;  %v1318_v7 = vsel %vm1306_vm5, %v1300_v59, %v1317_v33 }
 0x1c5   : > { %v1688_v1 = vclz %v1687_v60  ;;  %v1319_v28 = vsel %vm1305_vm4, %v1316_v25, %v1318_v7  ;;  %v1345_v42 = vand.u32 65535, %v1315_v17  ;;  %v1346_v24 = vshrl.u32 %v1315_v17, 16 }
 0x1c6   : > { %2578 = vmatpush.msrb.mxu0 %v2540_v2  ;;  %v1323_v31 = vand.u32 65535, %v1319_v28  ;;  %v1321_v53 = vand.u32 65535, %v3930_v44  ;;  %v1322_v50 = vshrl.u32 %v3930_v44, 16  ;;  %v1324_v12 = vshrl.u32 %v1319_v28, 16 }
 0x1c7   : > { %v2711_v54 = vadd.s32 4294967294, %v1688_v1  ;;  %v1676_v57 = vadd.s32 %v3865_v56, %v3858_v41  ;;  %v1309_v4 = vsel %vm1307_vm2, %v1297_v19, 2102212464  ;;  %vm1584_vm15 = vcmp.lt.s32.totalorder %v3390_v15, 0 }
 0x1c8   : > { %v1326_v11 = vmul.u32 %v1324_v12, %v1321_v53  ;;  %v1327_v39 = vmul.u32 %v1323_v31, %v1322_v50  ;;  %v1348_v58 = vmul.u32 %v1346_v24, %v1321_v53  ;;  %v1349_v49 = vmul.u32 %v1345_v42, %v1322_v50 }
 0x1c9   : > { %vm2712_vm6 = vcmp.lt.s32.totalorder %v2711_v54, 0  ;;  %v1325_v37 = vmul.u32 %v1323_v31, %v1321_v53  ;;  %v1328_v25 = vmul.u32 %v1324_v12, %v1322_v50  ;;  %v1347_v56 = vmul.u32 %v1345_v42, %v1321_v53  ;;  %v1143_v42 = vpop.f32.mrf.mxu2 }
 0x1ca   : > { %v1691_v8 = vsel %vm2712_vm6, 0, %v2711_v54  ;;  %v1329_v34 = vshll.u32 %v1326_v11, 16  ;;  %v1351_v2 = vshll.u32 %v1348_v58, 16  ;;  %v1331_v1 = vshll.u32 %v1327_v39, 16 }
 0x1cb   : > { %v1692_v35 = vsub.s32 32, %v1691_v8  ;;  %v1696_v59 = vsub.s32 4294967266, %v1691_v8  ;;  %v1693_v0 = vshll.u32 %v1684_v40, %v1691_v8  ;;  %v1350_v33 = vmul.u32 %v1346_v24, %v1322_v50 }
 0x1cc   : > { %vm1333_vm7 = vc.u32 %v1325_v37, %v1329_v34  ;;  %v1335_v41 = vadd.s32 %v1329_v34, %v1325_v37  ;;  %v1353_v17 = vshll.u32 %v1349_v49, 16  ;;  %vm1355_vm10 = vc.u32 %v1347_v56, %v1351_v2  ;;  %v1209_v37 = vpop.f32.mrf.mxu3 }
 0x1cd   : > { %v1694_v5 = vshrl.u32 %v1676_v57, %v1692_v35  ;;  %v1697_v45 = vadd.s32 127, %v1696_v59  ;;  %v1334_v26 = vsel %vm1333_vm7, 1, %v4567_v9  ;;  %v1357_v7 = vadd.s32 %v1351_v2, %v1347_v56 }
 0x1ce   : > { %v1336_v54 = vadd.s32 %v1334_v26, %v1328_v25  ;;  %vm1337_vm8 = vc.u32 %v1335_v41, %v1331_v1  ;;  %v1356_v8 = vsel %vm1355_vm10, 1, %v4567_v9  ;;  %v1330_v12 = vshrl.u32 %v1326_v11, 16 }
 0x1cf   : > { %v1695_v18 = vor.u32 %v1694_v5, %v1693_v0  ;;  %v1698_v60 = vshll.u32 %v1697_v45, 23  ;;  %v1338_v31 = vsel %vm1337_vm8, 1, %v4567_v9  ;;  %v1358_v35 = vadd.s32 %v1356_v8, %v1350_v33 }
 0x1d0   : > { %v1340_v57 = vadd.s32 %v1338_v31, %v1336_v54  ;;  %vm1359_vm14 = vc.u32 %v1357_v7, %v1353_v17  ;;  %v1288_v24 = vshrl.u32 %v4571_v62, %v3874_v23  ;;  %v1332_v59 = vshrl.u32 %v1327_v39, 16 }
 0x1d1   : > { %v1699_v40 = vor.u32 4788187, %v1698_v60  ;;  %v1702_v28 = vcvt.s32.f32 %v1695_v18  ;;  %v1360_v50 = vsel %vm1359_vm14, 1, %v4567_v9  ;;  %v1352_v5 = vshrl.u32 %v1348_v58, 16 }
 0x1d2   : > { %v1341_v0 = vadd.s32 %v1340_v57, %v1330_v12  ;;  %v1362_v45 = vadd.s32 %v1360_v50, %v1358_v35  ;;  %v1308_v11 = vsel %vm1304_vm1, %v1288_v24, %v3900_v16  ;;  %v1310_v18 = vsel %vm1306_vm5, %v3902_v55, %v1309_v4 }
 0x1d3   : > { %v1700_v19 = vand.u32 2147483647, %v1699_v40  ;;  %v1354_v23 = vshrl.u32 %v1349_v49, 16  ;;  %v4574_v39 = vand.u32 2147483647, %v3390_v15  ;;  %v3963_v16 = vadd.s32 %v1357_v7, %v1353_v17 }
 0x1d4   : > { %v3953_v60 = vadd.s32 %v1341_v0, %v1332_v59  ;;  %v1363_v25 = vadd.s32 %v1362_v45, %v1352_v5  ;;  %v1706_v1 = vsub.s32 4, %v3889_v47  ;;  %v1311_v49 = vsel %vm1305_vm4, %v1308_v11, %v1310_v18 }
 0x1d5   : > { %v1703_v53 = vmul.f32 %v1702_v28, %v1700_v19  ;;  %vm3957_vm9 = vcmp.le.f32.partialorder %v4574_v39, 0.7853982  ;;  %v981_v56 = vadd.f32 %v3686_v27, %v3418_v51  ;;  %v1365_v17 = vmul.u32 %v3930_v44, %v1311_v49  ;;  %v1147_v28 = vpop.f32.mrf.mxu2  ;;  %v1213_v44 = vpop.f32.mrf.mxu3 }
 0x1d6   : > { %v1364_v4 = vadd.s32 %v1363_v25, %v1354_v23  ;;  %vm1367_vm11 = vc.u32 %v3953_v60, %v3963_v16  ;;  %v986_v54 = vadd.f32 %v3727_v48, %v3436_v6  ;;  %v1707_v14 = vsel %vm1584_vm15, %v1706_v1, %v3889_v47 }
 0x1d7   : > { %v1704_v34 = vxor.u32 2147483648, %v1703_v53  ;;  %v1066_v7 = vadd.f32 %v3729_v46, %v981_v56  ;;  %v2524_v51 = vmul.f32 1.442695, %v3427_v20  ;;  %v1709_v6 = vsel %vm3957_vm9, 0, %v1707_v14 }
 0x1d8   : > { %v1368_v40 = vadd.s32 1, %v1364_v4  ;;  %v1072_v27 = vadd.f32 %v3779_v3, %v986_v54  ;;  %v1726_v5 = vadd.s32 3, %v1709_v6  ;;  %vm1725_vm2 = vweird.f32 %v3390_v15 }
 0x1d9   : > { %v1705_v2 = vsel %vm1584_vm15, %v1704_v34, %v1703_v53  ;;  %v1144_v57 = vadd.f32 %v1143_v42, %v1066_v7  ;;  %2802 = vpow2.f32 %v2524_v51  ;;  %vm1274_vm4 = vcmp.lt.s32.totalorder %v3376_v32, 0 }
 0x1da   : > { %v1708_v55 = vsel %vm3957_vm9, %v3390_v15, %v1705_v2  ;;  %v1369_v19 = vsel %vm1367_vm11, %v1368_v40, %v1364_v4  ;;  %v1148_v53 = vadd.f32 %v1147_v28, %v1072_v27  ;;  %2804 = vrcp.f32 %v3777_v13 }
 0x1db   : > { %v1710_v41 = vmul.f32 %v1708_v55, %v1708_v55  ;;  %v1370_v12 = vadd.s32 %v1369_v19, %v1365_v17  ;;  %v1210_v24 = vadd.f32 %v1209_v37, %v1144_v57  ;;  %2806 = vrcp.f32 %v3804_v43  ;;  %v4577_v57 = vld [vmem:[#allocation9_spill] sm:$0xff] }
 0x1dc   : > { %v1214_v0 = vadd.f32 %v1213_v44, %v1148_v53  ;;  %v1727_v37 = vand.u32 3, %v1726_v5  ;;  %v1366_v15 = vadd.s32 %v3963_v16, %v3953_v60  ;;  %vm1273_vm5 = vcmp.le.f32.partialorder %v1272_v52, 0.7853982 }
 0x1dd   : > { %v1711_v26 = vmul.f32 -0.001358992, %v1710_v41  ;;  %v1718_v33 = vmul.f32 -0.00019511016, %v1710_v41  ;;  %v1371_v35 = vadd.s32 536870912, %v1370_v12  ;;  %2808 = vrcp.f32 %v1210_v24  ;;  %v1151_v17 = vpop.f32.mrf.mxu2 }
 0x1de   : > { %2810 = vrcp.f32 %v1214_v0  ;;  %vm1729_vm13 = vcmp.eq.s32.totalorder %v1727_v37, 0  ;;  %vm1732_vm0 = vcmp.eq.s32.totalorder %v1727_v37, 2  ;;  %vm1728_vm1 = vcmp.lt.s32.totalorder %v1727_v37, 2 }
 0x1df   : > { %v1712_v31 = vadd.f32 0.041655596, %v1711_v26  ;;  %v1719_v8 = vadd.f32 0.008332121, %v1718_v33  ;;  %v3986_v59 = vshrl.u32 %v1371_v35, 30  ;;  %v2803_v39 = vpop.eup %2802  ;;  %v1152_v5 = vadd.f32 %v1151_v17, %v3810_v30 }
 0x1e0   : > { %v2805_v58 = vpop.eup %2804  ;;  %vm1415_vm6 = vweird.f32 %v3376_v32 }
 0x1e1   : > { %v1713_v48 = vmul.f32 %v1712_v31, %v1710_v41  ;;  %v1720_v46 = vmul.f32 %v1719_v8, %v1710_v41  ;;  %v1373_v42 = vshll.u32 %v3986_v59, 30  ;;  %v2807_v49 = vpop.eup %2806  ;;  %v1241_v7 = vmul.f32 %v2805_v58, %v3777_v13 }
 0x1e2   : > { %v1243_v19 = vmul.f32 %v2807_v49, %v3804_v43 }
 0x1e3   : > { %v1714_v47 = vadd.f32 -0.4999988, %v1713_v48  ;;  %v1721_v50 = vadd.f32 -0.16666654, %v1720_v46  ;;  %v1374_v11 = vsub.s32 %v1370_v12, %v1373_v42  ;;  %v966_v12 = vadd.f32 %v3583_v38, %v3374_v36  ;;  %v4579_v36 = vld [vmem:[#allocation13_spill] sm:$0xff] }
 0x1e4   : > { %v1249_v46 = vsub.f32 2.0, %v1241_v7  ;;  %v1251_v35 = vsub.f32 2.0, %v1243_v19  ;;  %v1089_v7 = vpop.f32.mrf.mxu1 }
 0x1e5   : > { %v1715_v20 = vmul.f32 %v1714_v47, %v1710_v41  ;;  %v1722_v3 = vmul.f32 %v1721_v50, %v1710_v41  ;;  %vm1375_vm12 = vcmp.lt.s32.totalorder %v1374_v11, 0  ;;  %v1376_v25 = vsub.s32 0, %v1374_v11  ;;  %v2809_v41 = vpop.eup %2808  ;;  %v1155_v16 = vpop.f32.mrf.mxu2 }
 0x1e6   : > { %v2811_v26 = vpop.eup %2810  ;;  %v1245_v28 = vmul.f32 %v2809_v41, %v1210_v24  ;;  %v1048_v44 = vadd.f32 %v4577_v57, %v966_v12  ;;  %v4578_v24 = vld [vmem:[#allocation11_spill] sm:$0xff]  ;;  %v1259_v42 = vmul.f32 %v2807_v49, %v1251_v35 }
 0x1e7   : > { %v1716_v45 = vadd.f32 1.0, %v1715_v20  ;;  %v1723_v34 = vadd.f32 1.0, %v1722_v3  ;;  %v1377_v1 = vsel %vm1375_vm12, %v1376_v25, %v1374_v11  ;;  %v1247_v31 = vmul.f32 %v2811_v26, %v1214_v0  ;;  %v1217_v20 = vpop.f32.mrf.mxu3 }
 0x1e8   : > { %v1378_v4 = vclz %v1377_v1  ;;  %v1253_v43 = vsub.f32 2.0, %v1245_v28  ;;  %v1132_v47 = vadd.f32 %v4578_v24, %v1048_v44  ;;  %v1257_v3 = vmul.f32 %v2805_v58, %v1249_v46  ;;  %v4581_v1 = vld [vmem:[#allocation10_spill] sm:$0xff] }
 0x1e9   : > { %v1724_v18 = vmul.f32 %v1723_v34, %v1708_v55  ;;  %v1733_v23 = vxor.u32 2147483648, %v1716_v45  ;;  %v1255_v53 = vsub.f32 2.0, %v1247_v31  ;;  %v1396_v25 = vsub.s32 4, %v3986_v59 }
 0x1ea   : > { %v2705_v55 = vadd.s32 4294967294, %v1378_v4  ;;  %v1198_v38 = vadd.f32 %v4579_v36, %v1132_v47  ;;  %v4010_v30 = vmul.f32 %v1259_v42, %v4581_v1  ;;  %v4582_v4 = vld [vmem:[#allocation12_spill] sm:$0xff] }
 0x1eb   : > { %v1730_v2 = vxor.u32 2147483648, %v1724_v18  ;;  %v1734_v40 = vsel %vm1732_vm0, %v1733_v23, %v1724_v18  ;;  %v4002_v34 = vmul.f32 %v2811_v26, %v1255_v53  ;;  %v1156_v18 = vadd.f32 %v1155_v16, %v3837_v63  ;;  %v4585_v16 = vld [vmem:[#allocation7_spill] sm:$0xff] }
 0x1ec   : > { %vm2706_vm3 = vcmp.lt.s32.totalorder %v2705_v55, 0  ;;  %v1218_v23 = vadd.f32 %v1217_v20, %v1152_v5  ;;  %v1397_v26 = vsel %vm1274_vm4, %v1396_v25, %v3986_v59  ;;  %v4583_v59 = vld [vmem:[#allocation6_spill] sm:$0xff] }
 0x1ed   : > { %v1731_v56 = vsel %vm1729_vm13, %v1716_v45, %v1730_v2  ;;  %v1381_v8 = vsel %vm2706_vm3, 0, %v2705_v55  ;;  %v1261_v45 = vmul.f32 %v2809_v41, %v1253_v43  ;;  %v4018_v41 = vmul.f32 %v4002_v34, %v1198_v38 }
 0x1ee   : > { %v1735_v33 = vsel %vm1728_vm1, %v1731_v56, %v1734_v40  ;;  %v1382_v51 = vsub.s32 32, %v1381_v8  ;;  %v1386_v27 = vsub.s32 4294967266, %v1381_v8  ;;  %v1383_v6 = vshll.u32 %v1374_v11, %v1381_v8  ;;  %v1000_v40 = vpop.f32.mrf.mxu0 }
 0x1ef   : > { %v1736_v54 = vsel %vm1725_vm2, nan, %v1735_v33  ;;  %v4013_v56 = vmul.f32 %v1261_v45, %v4582_v4  ;;  %v4015_v49 = vmul.f32 %v1257_v3, %v1218_v23  ;;  %v2360_v33 = vand.u32 2139095040, %v4018_v41 }
 0x1f0   : > { %v2538_v14 = vmul.f32 %v2803_v39, %v1736_v54  ;;  %v1384_v13 = vshrl.u32 %v1366_v15, %v1382_v51  ;;  %v1387_v48 = vadd.s32 127, %v1386_v27  ;;  %v4580_v39 = vld [vmem:[#allocation8_spill] sm:$0xff]  ;;  %v1221_v54 = vpop.f32.mrf.mxu3  ;;  %v1159_v15 = vpop.f32.mrf.mxu2  ;;  %v1001_v27 = vadd.f32 %v1000_v40, %v4583_v59 }
 0x1f1   : > { %v4007_v2 = vmul.f32 %v1257_v3, %v4580_v39  ;;  %v1222_v28 = vadd.f32 %v1221_v54, %v1156_v18  ;;  %v2361_v31 = vshrl.u32 %v2360_v33, 23  ;;  %v1740_v33 = vand.u32 2139095040, %v4010_v30 }
 0x1f2   : > { %2579 = vmatpush.msrb.mxu0 %v2538_v14  ;;  %v1385_v50 = vor.u32 %v1384_v13, %v1383_v6  ;;  %v1388_v0 = vshll.u32 %v1387_v48, 23  ;;  %v1399_v14 = vsel %vm1273_vm5, 0, %v1397_v26  ;;  %v1090_v52 = vadd.f32 %v1089_v7, %v1001_v27  ;;  %v4584_v48 = vld [vmem:[#allocation5_spill] sm:$0xff] }
 0x1f3   : > { %v4026_v51 = vmul.f32 %v1259_v42, %v1222_v28  ;;  %v1416_v57 = vadd.s32 3, %v1399_v14  ;;  %v2725_v13 = vadd.s32 4294967169, %v2361_v31  ;;  %v2520_v46 = vmul.f32 1.442695, %v4584_v48 }
 0x1f4   : > { %v1389_v60 = vor.u32 4788187, %v1388_v0  ;;  %v1392_v37 = vcvt.s32.f32 %v1385_v50  ;;  %v1160_v47 = vadd.f32 %v1159_v15, %v1090_v52  ;;  %v2357_v0 = vand.u32 2147483647, %v4018_v41 }
 0x1f5   : > { %v1417_v24 = vand.u32 3, %v1416_v57  ;;  %2812 = vpow2.f32 %v2520_v46  ;;  %v1430_v4 = vand.u32 2139095040, %v4007_v2 }
 0x1f6   : > { %v1390_v11 = vand.u32 2147483647, %v1389_v60  ;;  %v1005_v53 = vpop.f32.mrf.mxu0  ;;  %v2367_v60 = vadd.s32 1, %v2725_v13  ;;  %v2364_v18 = vand.u32 8388607, %v2357_v0 }
 0x1f7   : > { %v1006_v20 = vadd.f32 %v1005_v53, %v4585_v16  ;;  %vm1418_vm7 = vcmp.lt.s32.totalorder %v1417_v24, 2  ;;  %vm1419_vm10 = vcmp.eq.s32.totalorder %v1417_v24, 0  ;;  %vm1422_vm14 = vcmp.eq.s32.totalorder %v1417_v24, 2 }
 0x1f8   : > { %v1393_v58 = vmul.f32 %v1392_v37, %v1390_v11  ;;  %v1225_v50 = vpop.f32.mrf.mxu3  ;;  %v1095_v11 = vpop.f32.mrf.mxu1  ;;  %vm2368_vm8 = vcmp.gt.s32.totalorder %v2367_v60, 0  ;;  %v2365_v7 = vor.u32 8388608, %v2364_v18 }
 0x1f9   : > { %v1226_v5 = vadd.f32 %v1225_v50, %v1160_v47  ;;  %v1163_v39 = vpop.f32.mrf.mxu2  ;;  %v2369_v1 = vsel %vm2368_vm8, %v2367_v60, 0  ;;  %vm4142_vm8 = vcmp.le.f32.partialorder %v2357_v0, 0.7853982 }
 0x1fa   : > { %v1394_v63 = vxor.u32 2147483648, %v1393_v58  ;;  %v4040_v14 = vshrl.u32 %v2369_v1, 5  ;;  %v4068_v24 = vshll.u32 %v2365_v7, 8 }
 0x1fb   : > { %v4033_v37 = vmul.f32 %v1261_v45, %v1226_v5  ;;  %v2050_v45 = vand.u32 2139095040, %v4013_v56  ;;  %v2813_v28 = vpop.eup %2812  ;;  %v1741_v5 = vshrl.u32 %v1740_v33, 23 }
 0x1fc   : > { %v1395_v55 = vsel %vm1274_vm4, %v1394_v63, %v1393_v58  ;;  %v1096_v58 = vadd.f32 %v1095_v11, %v1006_v20  ;;  %v2371_v63 = vand.u32 31, %v2369_v1  ;;  %vm2389_vm15 = vcmp.lt.s32.totalorder %v4040_v14, 1 }
 0x1fd   : > { %v1398_v17 = vsel %vm1273_vm5, %v3376_v32, %v1395_v55  ;;  %v2051_v60 = vshrl.u32 %v2050_v45, 23  ;;  %vm2392_vm9 = vcmp.lt.s32.totalorder %v4040_v14, 4  ;;  %vm2391_vm11 = vcmp.lt.s32.totalorder %v4040_v14, 3 }
 0x1fe   : > { %v1400_v19 = vmul.f32 %v1398_v17, %v1398_v17  ;;  %v1164_v55 = vadd.f32 %v1163_v39, %v1096_v58  ;;  %v2377_v15 = vshll.u32 %v4559_v29, %v2371_v63  ;;  %v2380_v27 = vshll.u32 %v4558_v61, %v2371_v63 }
 0x1ff   : > { %v2383_v52 = vshll.u32 %v4572_v22, %v2371_v63  ;;  %v2386_v50 = vshll.u32 %v4560_v21, %v2371_v63  ;;  %v1431_v11 = vshrl.u32 %v1430_v4, 23  ;;  %vm2390_vm12 = vcmp.lt.s32.totalorder %v4040_v14, 2 }
 0x200   : > { %v1401_v8 = vmul.f32 -0.001358992, %v1400_v19  ;;  %v1408_v12 = vmul.f32 -0.00019511016, %v1400_v19  ;;  %v1229_v54 = vpop.f32.mrf.mxu3  ;;  %v2406_v58 = vand.u32 65535, %v4068_v24  ;;  %v2407_v4 = vshrl.u32 %v4068_v24, 16 }
 0x202   : > { %v1402_v44 = vadd.f32 0.041655596, %v1401_v8  ;;  %v1409_v6 = vadd.f32 0.008332121, %v1408_v12  ;;  %v2374_v12 = vshll.u32 %v4571_v62, %v2371_v63 }
 0x204   : > { %v1403_v35 = vmul.f32 %v1402_v44, %v1400_v19  ;;  %v1410_v43 = vmul.f32 %v1409_v6, %v1400_v19  ;;  %v1230_v6 = vadd.f32 %v1229_v54, %v1164_v55 }
 0x206   : > { %v1404_v36 = vadd.f32 -0.4999988, %v1403_v35  ;;  %v1411_v38 = vadd.f32 -0.16666654, %v1410_v43 }
 0x208   : > { %v1405_v3 = vmul.f32 %v1404_v36, %v1400_v19  ;;  %v1412_v42 = vmul.f32 %v1411_v38, %v1400_v19  ;;  %v4042_v19 = vsub.s32 32, %v2371_v63 }
 0x20a   : > { %v1406_v23 = vadd.f32 1.0, %v1405_v3  ;;  %v1413_v25 = vadd.f32 1.0, %v1412_v42  ;;  %v2378_v59 = vshrl.u32 %v4558_v61, %v4042_v19  ;;  %v2381_v57 = vshrl.u32 %v4572_v22, %v4042_v19 }
 0x20b   : > { %v2384_v13 = vshrl.u32 %v4560_v21, %v4042_v19  ;;  %v2387_v36 = vshrl.u32 %v4573_v10, %v4042_v19  ;;  %v4082_v42 = vmul.f32 %v4002_v34, %v1230_v6 }
 0x20c   : > { %v1414_v40 = vmul.f32 %v1413_v25, %v1398_v17  ;;  %v1423_v26 = vxor.u32 2147483648, %v1406_v23  ;;  %v2375_v17 = vshrl.u32 %v4559_v29, %v4042_v19  ;;  %v4060_v35 = vor.u32 %v2378_v59, %v2377_v15 }
 0x20d   : > { %v2382_v43 = vor.u32 %v2381_v57, %v2380_v27  ;;  %v2385_v47 = vor.u32 %v2384_v13, %v2383_v52  ;;  %v2388_v16 = vor.u32 %v2387_v36, %v2386_v50  ;;  %v2713_v25 = vadd.s32 4294967169, %v1741_v5 }
 0x20e   : > { %v1420_v31 = vxor.u32 2147483648, %v1414_v40  ;;  %v1424_v8 = vsel %vm1422_vm14, %v1423_v26, %v1414_v40  ;;  %v4058_v46 = vor.u32 %v2375_v17, %v2374_v12  ;;  %v2719_v26 = vadd.s32 4294967169, %v2051_v60 }
 0x20f   : > { %v2398_v20 = vsel %vm2392_vm9, %v2385_v47, 920167782  ;;  %v2401_v3 = vsel %vm2389_vm15, %v4060_v35, %v2382_v43 }
 0x210   : > { %v1421_v44 = vsel %vm1419_vm10, %v1406_v23, %v1420_v31  ;;  %v2397_v32 = vsel %vm2389_vm15, %v4058_v46, %v4060_v35  ;;  %v2399_v18 = vsel %vm2391_vm11, %v2382_v43, %v2398_v20  ;;  %v2402_v23 = vsel %vm2392_vm9, %v2388_v16, 1326507024 }
 0x211   : > { %v1425_v48 = vsel %vm1418_vm7, %v1421_v44, %v1424_v8  ;;  %v2400_v39 = vsel %vm2390_vm12, %v2397_v32, %v2399_v18  ;;  %v2403_v1 = vsel %vm2391_vm11, %v2385_v47, %v2402_v23  ;;  %v2707_v31 = vadd.s32 4294967169, %v1431_v11 }
 0x212   : > { %v1426_v53 = vsel %vm1415_vm6, nan, %v1425_v48  ;;  %v2404_v34 = vsel %vm2390_vm12, %v2401_v3, %v2403_v1  ;;  %v2430_v63 = vand.u32 65535, %v2400_v39  ;;  %v2431_v40 = vshrl.u32 %v2400_v39, 16 }
 0x213   : > { %v2536_v38 = vmul.f32 %v2813_v28, %v1426_v53  ;;  %v2408_v33 = vand.u32 65535, %v2404_v34  ;;  %v2409_v45 = vshrl.u32 %v2404_v34, 16  ;;  %v1747_v8 = vadd.s32 1, %v2713_v25 }
 0x214   : > { %v2433_v55 = vmul.u32 %v2431_v40, %v2406_v58  ;;  %v2434_v54 = vmul.u32 %v2430_v63, %v2407_v4  ;;  %v2432_v12 = vmul.u32 %v2430_v63, %v2406_v58  ;;  %v2057_v17 = vadd.s32 1, %v2719_v26 }
 0x215   : > { %2580 = vmatpush.msrb.mxu0 %v2536_v38  ;;  %v2411_v7 = vmul.u32 %v2409_v45, %v2406_v58  ;;  %v2412_v28 = vmul.u32 %v2408_v33, %v2407_v4  ;;  %v2410_v59 = vmul.u32 %v2408_v33, %v2406_v58  ;;  %v2435_v57 = vmul.u32 %v2431_v40, %v2407_v4 }
 0x216   : > { %v2436_v15 = vshll.u32 %v2433_v55, 16  ;;  %v2413_v44 = vmul.u32 %v2409_v45, %v2407_v4  ;;  %v2438_v6 = vshll.u32 %v2434_v54, 16  ;;  %v2394_v47 = vsel %vm2392_vm9, %v2382_v43, 2102212464 }
 0x217   : > { %v2414_v27 = vshll.u32 %v2411_v7, 16  ;;  %v2416_v48 = vshll.u32 %v2412_v28, 16  ;;  %v2373_v38 = vshrl.u32 %v4571_v62, %v4042_v19  ;;  %v2437_v32 = vshrl.u32 %v2433_v55, 16 }
 0x218   : > { %vm2440_vm13 = vc.u32 %v2432_v12, %v2436_v15  ;;  %v2442_v52 = vadd.s32 %v2436_v15, %v2432_v12  ;;  %v1737_v3 = vand.u32 2147483647, %v4010_v30  ;;  %v2395_v11 = vsel %vm2391_vm11, %v4060_v35, %v2394_v47 }
 0x219   : > { %vm2418_vm0 = vc.u32 %v2410_v59, %v2414_v27  ;;  %v2420_v13 = vadd.s32 %v2414_v27, %v2410_v59  ;;  %v2441_v53 = vsel %vm2440_vm13, 1, %v4567_v9  ;;  %v2393_v43 = vsel %vm2389_vm15, %v2373_v38, %v4058_v46 }
 0x21a   : > { %v2419_v50 = vsel %vm2418_vm0, 1, %v4567_v9  ;;  %v2443_v36 = vadd.s32 %v2441_v53, %v2435_v57  ;;  %vm2444_vm1 = vc.u32 %v2442_v52, %v2438_v6  ;;  %v2415_v18 = vshrl.u32 %v2411_v7, 16 }
 0x21b   : > { %v2421_v5 = vadd.s32 %v2419_v50, %v2413_v44  ;;  %vm2422_vm2 = vc.u32 %v2420_v13, %v2416_v48  ;;  %v2445_v60 = vsel %vm2444_vm1, 1, %v4567_v9  ;;  %v2439_v23 = vshrl.u32 %v2434_v54, 16 }
 0x21c   : > { %v2423_v16 = vsel %vm2422_vm2, 1, %v4567_v9  ;;  %v2447_v20 = vadd.s32 %v2445_v60, %v2443_v36  ;;  %v1437_v39 = vadd.s32 1, %v2707_v31  ;;  %v2417_v1 = vshrl.u32 %v2412_v28, 16 }
 0x21d   : > { %v2425_v19 = vadd.s32 %v2423_v16, %v2421_v5  ;;  %vm1748_vm3 = vcmp.gt.s32.totalorder %v1747_v8, 0  ;;  %v2396_v34 = vsel %vm2390_vm12, %v2393_v43, %v2395_v11  ;;  %v1744_v63 = vand.u32 8388607, %v1737_v3 }
 0x21e   : > { %v2448_v25 = vadd.s32 %v2447_v20, %v2437_v32  ;;  %vm2058_vm4 = vcmp.gt.s32.totalorder %v2057_v17, 0  ;;  %v2446_v40 = vadd.s32 %v2442_v52, %v2438_v6  ;;  %vm1438_vm5 = vcmp.gt.s32.totalorder %v1437_v39, 0 }
 0x21f   : > { %v2426_v58 = vadd.s32 %v2425_v19, %v2415_v18  ;;  %v1749_v35 = vsel %vm1748_vm3, %v1747_v8, 0  ;;  %v2450_v33 = vmul.u32 %v4068_v24, %v2396_v34  ;;  %v2059_v45 = vsel %vm2058_vm4, %v2057_v17, 0 }
 0x220   : > { %v2449_v4 = vadd.s32 %v2448_v25, %v2439_v23  ;;  %v2047_v54 = vand.u32 2147483647, %v4013_v56  ;;  %v1745_v7 = vor.u32 8388608, %v1744_v63  ;;  %v1751_v28 = vand.u32 31, %v1749_v35 }
 0x221   : > { %v2427_v46 = vadd.s32 %v2426_v58, %v2417_v1  ;;  %v4120_v12 = vsel %vm1438_vm5, %v1437_v39, 0  ;;  %v2061_v15 = vand.u32 31, %v2059_v45  ;;  %v2534_v59 = vmul.f32 1.442695, %v4082_v42 }
 0x222   : > { %v2453_v26 = vadd.s32 1, %v2449_v4  ;;  %v2054_v31 = vand.u32 8388607, %v2047_v54  ;;  %v4123_v57 = vshll.u32 %v1745_v7, 8  ;;  %v4126_v17 = vand.u32 31, %v4120_v12 }
 0x223   : > { %vm2452_vm6 = vc.u32 %v2427_v46, %v2446_v40  ;;  %v4128_v44 = vshrl.u32 %v1749_v35, 5  ;;  %v4130_v6 = vsub.s32 32, %v1751_v28  ;;  %vm2359_vm7 = vcmp.lt.s32.totalorder %v4018_v41, 0 }
 0x224   : > { %v2454_v55 = vsel %vm2452_vm6, %v2453_v26, %v2449_v4  ;;  %v2055_v8 = vor.u32 8388608, %v2054_v31  ;;  %v4133_v52 = vshrl.u32 %v2059_v45, 5  ;;  %v2062_v13 = vsub.s32 32, %v2061_v15 }
 0x225   : > { %v2455_v14 = vadd.s32 %v2454_v55, %v2450_v33  ;;  %2814 = vpow2.f32 %v2534_v59  ;;  %v2451_v42 = vadd.s32 %v2446_v40, %v2427_v46  ;;  %v4138_v50 = vand.u32 65535, %v4123_v57 }
 0x226   : > { %v4135_v47 = vshll.u32 %v2055_v8, 8  ;;  %v1754_v5 = vshll.u32 %v4571_v62, %v1751_v28  ;;  %v1757_v60 = vshll.u32 %v4559_v29, %v1751_v28  ;;  %v4149_v16 = vshrl.u32 %v4123_v57, 16 }
 0x227   : > { %v2456_v27 = vadd.s32 536870912, %v2455_v14  ;;  %v1755_v32 = vshrl.u32 %v4559_v29, %v4130_v6  ;;  %v4154_v20 = vshll.u32 %v4558_v61, %v1751_v28  ;;  %v4157_v43 = vshll.u32 %v4572_v22, %v1751_v28 }
 0x228   : > { %v4160_v0 = vshll.u32 %v4560_v21, %v1751_v28  ;;  %v1758_v18 = vshrl.u32 %v4558_v61, %v4130_v6  ;;  %v1761_v19 = vshrl.u32 %v4572_v22, %v4130_v6  ;;  %v4169_v25 = vand.u32 65535, %v4135_v47 }
 0x229   : > { %v2457_v24 = vshrl.u32 %v2456_v27, 30  ;;  %v4172_v39 = vshrl.u32 %v4135_v47, 16  ;;  %v1764_v1 = vshrl.u32 %v4560_v21, %v4130_v6  ;;  %v2064_v4 = vshll.u32 %v4571_v62, %v2061_v15 }
 0x22a   : > { %v2067_v63 = vshll.u32 %v4559_v29, %v2061_v15  ;;  %v2070_v46 = vshll.u32 %v4558_v61, %v2061_v15  ;;  %v2065_v26 = vshrl.u32 %v4559_v29, %v2062_v13  ;;  %v2068_v35 = vshrl.u32 %v4558_v61, %v2062_v13 }
 0x22b   : > { %v2458_v48 = vshll.u32 %v2457_v24, 30  ;;  %v2481_v53 = vsub.s32 4, %v2457_v24  ;;  %v4176_v58 = vpop.eup %2814  ;;  %v2073_v33 = vshll.u32 %v4572_v22, %v2061_v15  ;;  %v2071_v45 = vshrl.u32 %v4572_v22, %v2062_v13 }
 0x22c   : > { %v2074_v55 = vshrl.u32 %v4560_v21, %v2062_v13  ;;  %v2076_v7 = vshll.u32 %v4560_v21, %v2061_v15  ;;  %v2066_v31 = vor.u32 %v2065_v26, %v2064_v4  ;;  %v2069_v59 = vor.u32 %v2068_v35, %v2067_v63 }
 0x22d   : > { %v2459_v38 = vsub.s32 %v2455_v14, %v2458_v48  ;;  %v2482_v23 = vsel %vm2359_vm7, %v2481_v53, %v2457_v24  ;;  %v2077_v14 = vshrl.u32 %v4573_v10, %v2062_v13  ;;  %v4188_v27 = vor.u32 %v1755_v32, %v1754_v5 }
 0x22e   : > { %v2072_v8 = vor.u32 %v2071_v45, %v2070_v46  ;;  %v2075_v24 = vor.u32 %v2074_v55, %v2073_v33  ;;  %v4190_v53 = vor.u32 %v1758_v18, %v1757_v60  ;;  %vm2082_vm15 = vcmp.lt.s32.totalorder %v4133_v52, 4 }
 0x22f   : > { %vm2460_vm10 = vcmp.lt.s32.totalorder %v2459_v38, 0  ;;  %v2461_v11 = vsub.s32 0, %v2459_v38  ;;  %v2078_v48 = vor.u32 %v2077_v14, %v2076_v7  ;;  %v4197_v15 = vshrl.u32 %v4573_v10, %v4130_v6 }
 0x230   : > { %vm2079_vm9 = vcmp.lt.s32.totalorder %v4133_v52, 1  ;;  %vm2081_vm11 = vcmp.lt.s32.totalorder %v4133_v52, 3  ;;  %v2088_v5 = vsel %vm2082_vm15, %v2075_v24, 920167782  ;;  %v2084_v60 = vsel %vm2082_vm15, %v2072_v8, 2102212464 }
 0x231   : > { %v2462_v34 = vsel %vm2460_vm10, %v2461_v11, %v2459_v38  ;;  %v2484_v11 = vsel %vm4142_vm8, 0, %v2482_v23  ;;  %v2087_v18 = vsel %vm2079_vm9, %v2066_v31, %v2069_v59  ;;  %v2063_v63 = vshrl.u32 %v4571_v62, %v2062_v13 }
 0x232   : > { %v2463_v40 = vclz %v2462_v34  ;;  %v2089_v23 = vsel %vm2081_vm11, %v2072_v8, %v2088_v5  ;;  %v2091_v46 = vsel %vm2079_vm9, %v2069_v59, %v2072_v8  ;;  %vm2080_vm12 = vcmp.lt.s32.totalorder %v4133_v52, 2 }
 0x233   : > { %v2083_v45 = vsel %vm2079_vm9, %v2063_v63, %v2066_v31  ;;  %v2085_v55 = vsel %vm2081_vm11, %v2069_v59, %v2084_v60  ;;  %v2090_v7 = vsel %vm2080_vm12, %v2087_v18, %v2089_v23  ;;  %v4214_v31 = vor.u32 %v1761_v19, %v4154_v20 }
 0x234   : > { %v2726_v28 = vadd.s32 4294967294, %v2463_v40  ;;  %v2092_v40 = vsel %vm2082_vm15, %v2078_v48, 1326507024  ;;  %vm1769_vm13 = vcmp.lt.s32.totalorder %v4128_v44, 1  ;;  %v4223_v60 = vsel %vm2080_vm12, %v2083_v45, %v2085_v55 }
 0x235   : > { %v2093_v13 = vsel %vm2081_vm11, %v2075_v24, %v2092_v40  ;;  %v1768_v24 = vor.u32 %v4197_v15, %v4160_v0  ;;  %vm1772_vm0 = vcmp.lt.s32.totalorder %v4128_v44, 4  ;;  %vm1771_vm1 = vcmp.lt.s32.totalorder %v4128_v44, 3 }
 0x236   : > { %vm2727_vm14 = vcmp.lt.s32.totalorder %v2726_v28, 0  ;;  %v2094_v8 = vsel %vm2080_vm12, %v2091_v46, %v2093_v13  ;;  %vm1770_vm2 = vcmp.lt.s32.totalorder %v4128_v44, 2 }
 0x237   : > { %v2466_v34 = vsel %vm2727_vm14, 0, %v2726_v28  ;;  %v2099_v48 = vshrl.u32 %v2094_v8, 16  ;;  %vm2500_vm14 = vweird.f32 %v4018_v41 }
 0x238   : > { %v2467_v32 = vsub.s32 32, %v2466_v34  ;;  %v2471_v4 = vsub.s32 4294967266, %v2466_v34  ;;  %v2468_v26 = vshll.u32 %v2459_v38, %v2466_v34  ;;  %v2120_v38 = vand.u32 65535, %v2090_v7 }
 0x239   : > { %v2121_v34 = vshrl.u32 %v2090_v7, 16  ;;  %v2101_v18 = vmul.u32 %v2099_v48, %v4169_v25  ;;  %v2103_v52 = vmul.u32 %v2099_v48, %v4172_v39 }
 0x23a   : > { %v2469_v35 = vshrl.u32 %v2451_v42, %v2467_v32  ;;  %v2472_v33 = vadd.s32 127, %v2471_v4  ;;  %v2098_v42 = vand.u32 65535, %v2094_v8  ;;  %v2124_v59 = vmul.u32 %v2120_v38, %v4172_v39 }
 0x23b   : > { %v1765_v32 = vor.u32 %v1764_v1, %v4157_v43  ;;  %v2501_v4 = vadd.s32 3, %v2484_v11  ;;  %v2122_v43 = vmul.u32 %v2120_v38, %v4169_v25  ;;  %v2123_v1 = vmul.u32 %v2121_v34, %v4169_v25 }
 0x23c   : > { %v2470_v14 = vor.u32 %v2469_v35, %v2468_v26  ;;  %v2473_v28 = vshll.u32 %v2472_v33, 23  ;;  %v2102_v20 = vmul.u32 %v2098_v42, %v4172_v39  ;;  %v2100_v0 = vmul.u32 %v2098_v42, %v4169_v25 }
 0x23d   : > { %v2104_v11 = vshll.u32 %v2101_v18, 16  ;;  %v2125_v15 = vmul.u32 %v2121_v34, %v4172_v39  ;;  %v2105_v46 = vshrl.u32 %v2101_v18, 16  ;;  %v2126_v40 = vshll.u32 %v2123_v1, 16 }
 0x23e   : > { %v2474_v5 = vor.u32 4788187, %v2473_v28  ;;  %v2477_v63 = vcvt.s32.f32 %v2470_v14  ;;  %v2128_v26 = vshll.u32 %v2124_v59, 16  ;;  %v2106_v35 = vshll.u32 %v2102_v20, 16 }
 0x23f   : > { %v2107_v33 = vshrl.u32 %v2102_v20, 16  ;;  %vm2108_vm3 = vc.u32 %v2100_v0, %v2104_v11  ;;  %v2110_v45 = vadd.s32 %v2104_v11, %v2100_v0  ;;  %vm2130_vm4 = vc.u32 %v2122_v43, %v2126_v40 }
 0x240   : > { %v2475_v19 = vand.u32 2147483647, %v2474_v5  ;;  %v2109_v7 = vsel %vm2108_vm3, 1, %v4567_v9  ;;  %v2132_v25 = vadd.s32 %v2126_v40, %v2122_v43  ;;  %v2127_v14 = vshrl.u32 %v2123_v1, 16 }
 0x241   : > { %v2111_v13 = vadd.s32 %v2109_v7, %v2103_v52  ;;  %vm2112_vm5 = vc.u32 %v2110_v45, %v2106_v35  ;;  %v2131_v39 = vsel %vm2130_vm4, 1, %v4567_v9  ;;  %v1777_v5 = vsel %vm1769_vm13, %v4188_v27, %v4190_v53 }
 0x242   : > { %v2478_v23 = vmul.f32 %v2477_v63, %v2475_v19  ;;  %v2113_v8 = vsel %vm2112_vm5, 1, %v4567_v9  ;;  %v2133_v38 = vadd.s32 %v2131_v39, %v2125_v15  ;;  %vm2134_vm6 = vc.u32 %v2132_v25, %v2128_v26 }
 0x243   : > { %v2115_v48 = vadd.s32 %v2113_v8, %v2111_v13  ;;  %v2135_v34 = vsel %vm2134_vm6, 1, %v4567_v9  ;;  %v2129_v20 = vshrl.u32 %v2124_v59, 16  ;;  %v1778_v63 = vsel %vm1772_vm0, %v1765_v32, 920167782 }
 0x244   : > { %v2479_v55 = vxor.u32 2147483648, %v2478_v23  ;;  %v2137_v19 = vadd.s32 %v2135_v34, %v2133_v38  ;;  %v1779_v36 = vsel %vm1771_vm1, %v4214_v31, %v1778_v63  ;;  %v1781_v1 = vsel %vm1769_vm13, %v4190_v53, %v4214_v31 }
 0x245   : > { %v2116_v43 = vadd.s32 %v2115_v48, %v2105_v46  ;;  %v1782_v0 = vsel %vm1772_vm0, %v1768_v24, 1326507024  ;;  %v1780_v15 = vsel %vm1770_vm2, %v1777_v5, %v1779_v36  ;;  %v4263_v46 = vadd.s32 %v2132_v25, %v2128_v26 }
 0x246   : > { %v2480_v28 = vsel %vm2359_vm7, %v2479_v55, %v2478_v23  ;;  %v2138_v59 = vadd.s32 %v2137_v19, %v2127_v14  ;;  %v1783_v40 = vsel %vm1771_vm1, %v1765_v32, %v1782_v0  ;;  %v1811_v35 = vshrl.u32 %v1780_v15, 16 }
 0x247   : > { %v2483_v42 = vsel %vm4142_vm8, %v4018_v41, %v2480_v28  ;;  %v4261_v23 = vadd.s32 %v2116_v43, %v2107_v33  ;;  %v1784_v24 = vsel %vm1770_vm2, %v1781_v1, %v1783_v40  ;;  %v2502_v13 = vand.u32 3, %v2501_v4 }
 0x248   : > { %v2485_v18 = vmul.f32 %v2483_v42, %v2483_v42  ;;  %v2139_v7 = vadd.s32 %v2138_v59, %v2129_v20  ;;  %v1788_v14 = vand.u32 65535, %v1784_v24  ;;  %v1789_v39 = vshrl.u32 %v1784_v24, 16 }
 0x249   : > { %vm2142_vm7 = vc.u32 %v4261_v23, %v4263_v46  ;;  %v1753_v25 = vshrl.u32 %v4571_v62, %v4130_v6  ;;  %v2140_v32 = vmul.u32 %v4135_v47, %v4223_v60  ;;  %v1810_v48 = vand.u32 65535, %v1780_v15 }
 0x24a   : > { %v2486_v52 = vmul.f32 -0.001358992, %v2485_v18  ;;  %v2493_v11 = vmul.f32 -0.00019511016, %v2485_v18  ;;  %v2143_v26 = vadd.s32 1, %v2139_v7  ;;  %v1791_v8 = vmul.u32 %v1789_v39, %v4138_v50 }
 0x24b   : > { %v1792_v38 = vmul.u32 %v1788_v14, %v4149_v16  ;;  %v1813_v20 = vmul.u32 %v1811_v35, %v4138_v50  ;;  %vm2504_vm8 = vcmp.eq.s32.totalorder %v2502_v13, 0  ;;  %v1790_v63 = vmul.u32 %v1788_v14, %v4138_v50 }
 0x24c   : > { %v2487_v45 = vadd.f32 0.041655596, %v2486_v52  ;;  %v2494_v55 = vadd.f32 0.008332121, %v2493_v11  ;;  %v2144_v5 = vsel %vm2142_vm7, %v2143_v26, %v2139_v7  ;;  %v1794_v43 = vshll.u32 %v1791_v8, 16 }
 0x24d   : > { %v2145_v19 = vadd.s32 %v2144_v5, %v2140_v32  ;;  %vm2503_vm10 = vcmp.lt.s32.totalorder %v2502_v13, 2  ;;  %v1793_v47 = vmul.u32 %v1789_v39, %v4149_v16  ;;  %v1796_v60 = vshll.u32 %v1792_v38, 16 }
 0x24e   : > { %v2488_v33 = vmul.f32 %v2487_v45, %v2485_v18  ;;  %v2495_v28 = vmul.f32 %v2494_v55, %v2485_v18  ;;  %vm1798_vm15 = vc.u32 %v1790_v63, %v1794_v43  ;;  %v1800_v0 = vadd.s32 %v1794_v43, %v1790_v63 }
 0x24f   : > { %v2146_v1 = vadd.s32 536870912, %v2145_v19  ;;  %v1814_v52 = vmul.u32 %v1810_v48, %v4149_v16  ;;  %v1799_v15 = vsel %vm1798_vm15, 1, %v4567_v9  ;;  %v1816_v40 = vshll.u32 %v1813_v20, 16 }
 0x250   : > { %v2489_v4 = vadd.f32 -0.4999988, %v2488_v33  ;;  %v2496_v34 = vadd.f32 -0.16666654, %v2495_v28  ;;  %vm2507_vm9 = vcmp.eq.s32.totalorder %v2502_v13, 2  ;;  %v1801_v55 = vadd.s32 %v1799_v15, %v1793_v47 }
 0x251   : > { %v2147_v45 = vshrl.u32 %v2146_v1, 30  ;;  %vm1802_vm11 = vc.u32 %v1800_v0, %v1796_v60  ;;  %v1812_v14 = vmul.u32 %v1810_v48, %v4138_v50  ;;  %v1795_v33 = vshrl.u32 %v1791_v8, 16 }
 0x252   : > { %v2490_v36 = vmul.f32 %v2489_v4, %v2485_v18  ;;  %v2497_v6 = vmul.f32 %v2496_v34, %v2485_v18  ;;  %v1803_v24 = vsel %vm1802_vm11, 1, %v4567_v9  ;;  %v1815_v26 = vmul.u32 %v1811_v35, %v4149_v16 }
 0x253   : > { %v2148_v39 = vshll.u32 %v2147_v45, 30  ;;  %v1805_v28 = vadd.s32 %v1803_v24, %v1801_v55  ;;  %v1818_v4 = vshll.u32 %v1814_v52, 16  ;;  %vm1820_vm12 = vc.u32 %v1812_v14, %v1816_v40 }
 0x254   : > { %v2491_v11 = vadd.f32 1.0, %v2490_v36  ;;  %v2498_v59 = vadd.f32 1.0, %v2497_v6  ;;  %v1822_v34 = vadd.s32 %v1816_v40, %v1812_v14  ;;  %v1821_v43 = vsel %vm1820_vm12, 1, %v4567_v9 }
 0x255   : > { %v2149_v63 = vsub.s32 %v2145_v19, %v2148_v39  ;;  %v1806_v48 = vadd.s32 %v1805_v28, %v1795_v33  ;;  %v1823_v8 = vadd.s32 %v1821_v43, %v1815_v26  ;;  %v1773_v36 = vsel %vm1769_vm13, %v1753_v25, %v4188_v27 }
 0x256   : > { %v2499_v18 = vmul.f32 %v2498_v59, %v2483_v42  ;;  %v2508_v7 = vxor.u32 2147483648, %v2491_v11  ;;  %v1774_v42 = vsel %vm1772_vm0, %v4214_v31, 2102212464  ;;  %vm1824_vm3 = vc.u32 %v1822_v34, %v1818_v4 }
 0x257   : > { %vm2150_vm4 = vcmp.lt.s32.totalorder %v2149_v63, 0  ;;  %v2151_v35 = vsub.s32 0, %v2149_v63  ;;  %v1775_v31 = vsel %vm1771_vm1, %v4190_v53, %v1774_v42  ;;  %v1797_v6 = vshrl.u32 %v1792_v38, 16 }
 0x258   : > { %v2505_v32 = vxor.u32 2147483648, %v2499_v18  ;;  %v2509_v5 = vsel %vm2507_vm9, %v2508_v7, %v2499_v18  ;;  %v1825_v47 = vsel %vm1824_vm3, 1, %v4567_v9  ;;  %v1817_v1 = vshrl.u32 %v1813_v20, 16 }
 0x259   : > { %v2152_v13 = vsel %vm2150_vm4, %v2151_v35, %v2149_v63  ;;  %v1827_v0 = vadd.s32 %v1825_v47, %v1823_v8  ;;  %v4303_v59 = vadd.s32 %v1806_v48, %v1797_v6  ;;  %v4306_v27 = vsub.s32 32, %v4126_v17 }
 0x25a   : > { %v2506_v50 = vsel %vm2504_vm8, %v2491_v11, %v2505_v32  ;;  %v2153_v11 = vclz %v2152_v13  ;;  %v2171_v41 = vsub.s32 4, %v2147_v45  ;;  %v1819_v25 = vshrl.u32 %v1814_v52, 16 }
 0x25b   : > { %v2510_v16 = vsel %vm2503_vm10, %v2506_v50, %v2509_v5  ;;  %v1828_v15 = vadd.s32 %v1827_v0, %v1817_v1  ;;  %v1776_v53 = vsel %vm1770_vm2, %v1773_v36, %v1775_v31  ;;  %v4310_v38 = vadd.s32 %v1822_v34, %v1818_v4 }
 0x25c   : > { %v2511_v19 = vsel %vm2500_vm14, nan, %v2510_v16  ;;  %v2720_v40 = vadd.s32 4294967294, %v2153_v11  ;;  %v4314_v20 = vshrl.u32 %v4120_v12, 5  ;;  %vm2049_vm13 = vcmp.lt.s32.totalorder %v4013_v56, 0 }
 0x25d   : > { %v2543_v60 = vmul.f32 %v4176_v58, %v2511_v19  ;;  %v1427_v58 = vand.u32 2147483647, %v4007_v2  ;;  %v1829_v55 = vadd.s32 %v1828_v15, %v1819_v25  ;;  %vm4319_vm0 = vcmp.le.f32.partialorder %v2047_v54, 0.7853982 }
 0x25e   : > { %v2141_v44 = vadd.s32 %v4263_v46, %v4261_v23  ;;  %vm2721_vm1 = vcmp.lt.s32.totalorder %v2720_v40, 0  ;;  %vm1832_vm2 = vc.u32 %v4303_v59, %v4310_v38  ;;  %v2172_v12 = vsel %vm2049_vm13, %v2171_v41, %v2147_v45 }
 0x25f   : > { %2600 = vmatpush.msrb.mxu1 %v2543_v60  ;;  %v2156_v52 = vsel %vm2721_vm1, 0, %v2720_v40  ;;  %v1830_v7 = vmul.u32 %v4123_v57, %v1776_v53  ;;  %v1833_v24 = vadd.s32 1, %v1829_v55  ;;  %v1434_v54 = vand.u32 8388607, %v1427_v58 }
 0x260   : > { %v2157_v14 = vsub.s32 32, %v2156_v52  ;;  %v2161_v39 = vsub.s32 4294967266, %v2156_v52  ;;  %v1445_v33 = vshrl.u32 %v4559_v29, %v4306_v27  ;;  %v1447_v46 = vshll.u32 %v4559_v29, %v4126_v17 }
 0x261   : > { %v1834_v23 = vsel %vm1832_vm2, %v1833_v24, %v1829_v55  ;;  %v1448_v28 = vshrl.u32 %v4558_v61, %v4306_v27  ;;  %v1451_v45 = vshrl.u32 %v4572_v22, %v4306_v27  ;;  %v2158_v57 = vshll.u32 %v2149_v63, %v2156_v52 }
 0x262   : > { %v2159_v26 = vshrl.u32 %v2141_v44, %v2157_v14  ;;  %v2162_v32 = vadd.s32 127, %v2161_v39  ;;  %v1835_v4 = vadd.s32 %v1834_v23, %v1830_v7  ;;  %v1450_v34 = vshll.u32 %v4558_v61, %v4126_v17 }
 0x263   : > { %v1454_v5 = vshrl.u32 %v4560_v21, %v4306_v27  ;;  %v1456_v42 = vshll.u32 %v4560_v21, %v4126_v17  ;;  %v1457_v29 = vshrl.u32 %v4573_v10, %v4306_v27  ;;  %v1453_v63 = vshll.u32 %v4572_v22, %v4126_v17 }
 0x264   : > { %v2160_v43 = vor.u32 %v2159_v26, %v2158_v57  ;;  %v2163_v50 = vshll.u32 %v2162_v32, 23  ;;  %v1836_v48 = vadd.s32 536870912, %v1835_v4  ;;  %v1444_v8 = vshll.u32 %v4571_v62, %v4126_v17 }
 0x265   : > { %v4352_v16 = vor.u32 %v1448_v28, %v1447_v46  ;;  %v4354_v61 = vor.u32 %v1451_v45, %v1450_v34  ;;  %v1458_v35 = vor.u32 %v1457_v29, %v1456_v42  ;;  %v2174_v21 = vsel %vm4319_vm0, 0, %v2172_v12 }
 0x266   : > { %v2164_v36 = vor.u32 4788187, %v2163_v50  ;;  %v4358_v19 = vshrl.u32 %v1836_v48, 30  ;;  %v1455_v10 = vor.u32 %v1454_v5, %v1453_v63  ;;  %v1435_v31 = vor.u32 8388608, %v1434_v54 }
 0x267   : > { %v4360_v6 = vor.u32 %v1445_v33, %v1444_v8  ;;  %vm1459_vm5 = vcmp.lt.s32.totalorder %v4314_v20, 1  ;;  %v2167_v47 = vcvt.s32.f32 %v2160_v43  ;;  %vm1462_vm6 = vcmp.lt.s32.totalorder %v4314_v20, 4 }
 0x268   : > { %v2165_v22 = vand.u32 2147483647, %v2164_v36  ;;  %v1838_v17 = vshll.u32 %v4358_v19, 30  ;;  %v2530_v60 = vmul.f32 1.442695, %v4033_v37  ;;  %v2191_v13 = vadd.s32 3, %v2174_v21 }
 0x269   : > { %v1471_v1 = vsel %vm1459_vm5, %v4352_v16, %v4354_v61  ;;  %v1472_v0 = vsel %vm1462_vm6, %v1458_v35, 1326507024  ;;  %vm1461_vm7 = vcmp.lt.s32.totalorder %v4314_v20, 3  ;;  %v1468_v25 = vsel %vm1462_vm6, %v1455_v10, 920167782 }
 0x26a   : > { %v2168_v11 = vmul.f32 %v2167_v47, %v2165_v22  ;;  %v1839_v41 = vsub.s32 %v1835_v4, %v1838_v17  ;;  %vm1460_vm8 = vcmp.lt.s32.totalorder %v4314_v20, 2  ;;  %v1467_v37 = vsel %vm1459_vm5, %v4360_v6, %v4352_v16 }
 0x26b   : > { %v1473_v15 = vsel %vm1461_vm7, %v1455_v10, %v1472_v0  ;;  %v4382_v40 = vshll.u32 %v1435_v31, 8  ;;  %v1469_v52 = vsel %vm1461_vm7, %v4354_v61, %v1468_v25  ;;  %2816 = vpow2.f32 %v2530_v60 }
 0x26c   : > { %v2169_v53 = vxor.u32 2147483648, %v2168_v11  ;;  %vm1840_vm10 = vcmp.lt.s32.totalorder %v1839_v41, 0  ;;  %v1841_v55 = vsub.s32 0, %v1839_v41  ;;  %v1474_v44 = vsel %vm1460_vm8, %v1471_v1, %v1473_v15 }
 0x26d   : > { %v1476_v12 = vand.u32 65535, %v4382_v40  ;;  %v1478_v7 = vand.u32 65535, %v1474_v44  ;;  %v1479_v24 = vshrl.u32 %v1474_v44, 16  ;;  %v1477_v23 = vshrl.u32 %v4382_v40, 16 }
 0x26e   : > { %v2170_v14 = vsel %vm2049_vm13, %v2169_v53, %v2168_v11  ;;  %v1842_v39 = vsel %vm1840_vm10, %v1841_v55, %v1839_v41  ;;  %v1470_v45 = vsel %vm1460_vm8, %v1467_v37, %v1469_v52  ;;  %v4404_v57 = vand.u32 3, %v2191_v13 }
 0x26f   : > { %v4395_v54 = vsel %vm4319_vm0, %v4013_v56, %v2170_v14  ;;  %v1843_v33 = vclz %v1842_v39  ;;  %v4398_v46 = vmul.u32 %v1479_v24, %v1476_v12  ;;  %v4406_v32 = vmul.u32 %v1478_v7, %v1477_v23 }
 0x270   : > { %v2175_v28 = vmul.f32 %v4395_v54, %v4395_v54  ;;  %v1831_v5 = vadd.s32 %v4310_v38, %v4303_v59  ;;  %v1480_v42 = vmul.u32 %v1478_v7, %v1476_v12  ;;  %v1483_v29 = vmul.u32 %v1479_v24, %v1477_v23 }
 0x271   : > { %v2714_v26 = vadd.s32 4294967294, %v1843_v33  ;;  %v1484_v18 = vshll.u32 %v4398_v46, 16  ;;  %v1500_v43 = vand.u32 65535, %v1470_v45  ;;  %v1501_v50 = vshrl.u32 %v1470_v45, 16  ;;  %v4413_v31 = vpop.eup %2816 }
 0x272   : > { %v2176_v4 = vmul.f32 -0.001358992, %v2175_v28  ;;  %v2183_v34 = vmul.f32 -0.00019511016, %v2175_v28  ;;  %v1486_v21 = vshll.u32 %v4406_v32, 16  ;;  %vm2193_vm11 = vcmp.lt.s32.totalorder %v4404_v57, 2 }
 0x273   : > { %vm2715_vm14 = vcmp.lt.s32.totalorder %v2714_v26, 0  ;;  %vm1488_vm15 = vc.u32 %v1480_v42, %v1484_v18  ;;  %v1490_v59 = vadd.s32 %v1484_v18, %v1480_v42  ;;  %v1503_v1 = vmul.u32 %v1501_v50, %v1476_v12 }
 0x274   : > { %v2177_v48 = vadd.f32 0.041655596, %v2176_v4  ;;  %v2184_v63 = vadd.f32 0.008332121, %v2183_v34  ;;  %v1846_v8 = vsel %vm2715_vm14, 0, %v2714_v26  ;;  %v1489_v10 = vsel %vm1488_vm15, 1, %v4567_v9 }
 0x275   : > { %v1847_v35 = vsub.s32 32, %v1846_v8  ;;  %v1851_v36 = vsub.s32 4294967266, %v1846_v8  ;;  %v1491_v38 = vadd.s32 %v1489_v10, %v1483_v29  ;;  %v1848_v17 = vshll.u32 %v1839_v41, %v1846_v8 }
 0x276   : > { %v2178_v22 = vmul.f32 %v2177_v48, %v2175_v28  ;;  %v2185_v47 = vmul.f32 %v2184_v63, %v2175_v28  ;;  %vm1492_vm9 = vc.u32 %v1490_v59, %v1486_v21  ;;  %v1504_v25 = vmul.u32 %v1500_v43, %v1477_v23 }
 0x277   : > { %v1849_v60 = vshrl.u32 %v1831_v5, %v1847_v35  ;;  %v1852_v13 = vadd.s32 127, %v1851_v36  ;;  %v1493_v53 = vsel %vm1492_vm9, 1, %v4567_v9  ;;  %v1506_v55 = vshll.u32 %v1503_v1, 16 }
 0x278   : > { %v2179_v0 = vadd.f32 -0.4999988, %v2178_v22  ;;  %v2186_v11 = vadd.f32 -0.16666654, %v2185_v47  ;;  %vm1739_vm12 = vcmp.lt.s32.totalorder %v4010_v30, 0  ;;  %v1495_v7 = vadd.s32 %v1493_v53, %v1491_v38 }
 0x279   : > { %v1850_v37 = vor.u32 %v1849_v60, %v1848_v17  ;;  %v1853_v15 = vshll.u32 %v1852_v13, 23  ;;  %v1502_v41 = vmul.u32 %v1500_v43, %v1476_v12  ;;  %vm2190_vm3 = vweird.f32 %v4013_v56 }
 0x27a   : > { %v2180_v44 = vmul.f32 %v2179_v0, %v2175_v28  ;;  %v2187_v52 = vmul.f32 %v2186_v11, %v2175_v28  ;;  %vm2194_vm4 = vcmp.eq.s32.totalorder %v4404_v57, 0  ;;  %vm4422_vm13 = vcmp.le.f32.partialorder %v1737_v3, 0.7853982 }
 0x27b   : > { %v1854_v14 = vor.u32 4788187, %v1853_v15  ;;  %v1485_v39 = vshrl.u32 %v4398_v46, 16  ;;  %v1505_v33 = vmul.u32 %v1501_v50, %v1477_v23  ;;  %v1857_v26 = vcvt.s32.f32 %v1850_v37 }
 0x27c   : > { %v2181_v28 = vadd.f32 1.0, %v2180_v44  ;;  %v2188_v45 = vadd.f32 1.0, %v2187_v52  ;;  %vm1510_vm0 = vc.u32 %v1502_v41, %v1506_v55  ;;  %v1508_v12 = vshll.u32 %v1504_v25, 16 }
 0x27d   : > { %v1855_v18 = vand.u32 2147483647, %v1854_v14  ;;  %v1511_v4 = vsel %vm1510_vm0, 1, %v4567_v9  ;;  %v1512_v34 = vadd.s32 %v1506_v55, %v1502_v41  ;;  %v1496_v3 = vadd.s32 %v1495_v7, %v1485_v39 }
 0x27e   : > { %v2189_v5 = vmul.f32 %v2188_v45, %v4395_v54  ;;  %v2198_v42 = vxor.u32 2147483648, %v2181_v28  ;;  %v1513_v29 = vadd.s32 %v1511_v4, %v1505_v33  ;;  %v1443_v48 = vshrl.u32 %v4571_v62, %v4306_v27 }
 0x27f   : > { %v1858_v43 = vmul.f32 %v1857_v26, %v1855_v18  ;;  %v1464_v23 = vsel %vm1462_vm6, %v4354_v61, 2102212464  ;;  %vm1514_vm1 = vc.u32 %v1512_v34, %v1508_v12  ;;  %vm2197_vm2 = vcmp.eq.s32.totalorder %v4404_v57, 2 }
 0x280   : > { %v2195_v46 = vxor.u32 2147483648, %v2189_v5  ;;  %v1487_v50 = vshrl.u32 %v4406_v32, 16  ;;  %v1515_v63 = vsel %vm1514_vm1, 1, %v4567_v9  ;;  %v1463_v8 = vsel %vm1459_vm5, %v1443_v48, %v4360_v6 }
 0x281   : > { %v1859_v54 = vxor.u32 2147483648, %v1858_v43  ;;  %v1507_v35 = vshrl.u32 %v1503_v1, 16  ;;  %v1517_v36 = vadd.s32 %v1515_v63, %v1513_v29  ;;  %v2199_v27 = vsel %vm2197_vm2, %v2198_v42, %v2189_v5 }
 0x282   : > { %v2196_v62 = vsel %vm2194_vm4, %v2181_v28, %v2195_v46  ;;  %v1465_v61 = vsel %vm1461_vm7, %v4352_v16, %v1464_v23  ;;  %v1497_v21 = vadd.s32 %v1496_v3, %v1487_v50  ;;  %v1509_v10 = vshrl.u32 %v1504_v25, 16 }
 0x283   : > { %v2200_v32 = vsel %vm2193_vm11, %v2196_v62, %v2199_v27  ;;  %v1860_v9 = vsel %vm1739_vm12, %v1859_v54, %v1858_v43  ;;  %v1518_v22 = vadd.s32 %v1517_v36, %v1507_v35  ;;  %v1861_v47 = vsub.s32 4, %v4358_v19 }
 0x284   : > { %v2201_v6 = vsel %vm2190_vm3, nan, %v2200_v32  ;;  %v1863_v59 = vsel %vm4422_vm13, %v4010_v30, %v1860_v9  ;;  %v1516_v38 = vadd.s32 %v1512_v34, %v1508_v12  ;;  %v1466_v57 = vsel %vm1460_vm8, %v1463_v8, %v1465_v61 }
 0x285   : > { %v2541_v16 = vmul.f32 %v4413_v31, %v2201_v6  ;;  %v1865_v17 = vmul.f32 %v1863_v59, %v1863_v59  ;;  %v1519_v60 = vadd.s32 %v1518_v22, %v1509_v10  ;;  %v1862_v0 = vsel %vm1739_vm12, %v1861_v47, %v4358_v19 }
 0x286   : > { %vm1522_vm5 = vc.u32 %v1497_v21, %v1516_v38  ;;  %v1520_v11 = vmul.u32 %v4382_v40, %v1466_v57  ;;  %v1864_v20 = vsel %vm4422_vm13, 0, %v1862_v0  ;;  %v2526_v39 = vmul.f32 1.442695, %v4026_v51  ;;  %v2546_v57 = vld [vmem:[%s4531_s3] sm:$0xff] }
 0x287   : > { %2601 = vmatpush.msrb.mxu1 %v2541_v16  ;;  %v1866_v13 = vmul.f32 -0.001358992, %v1865_v17  ;;  %v1873_v1 = vmul.f32 -0.00019511016, %v1865_v17  ;;  %v1523_v56 = vadd.s32 1, %v1519_v60  ;;  %v1881_v41 = vadd.s32 3, %v1864_v20  ;;  %2550 = vperm.xlu0 %2789, %v2546_v57  }
 0x288   : > { %2818 = vpow2.f32 %v2526_v39  ;;  %vm1880_vm14 = vweird.f32 %v4010_v30  ;;  %v1521_v63 = vadd.s32 %v1516_v38, %v1497_v21  ;;  %v2544_v30 = vld [vmem:[%s4530_s2] sm:$0xff]  ;;  %vm2558_vm9 = vcmask 261120   ;;  %v2545_v21 = vld [vmem:[%s4530_s2 + $0x8] sm:$0xff] }
 0x289   : > { %v1867_v25 = vadd.f32 0.041655596, %v1866_v13  ;;  %v1874_v37 = vadd.f32 0.008332121, %v1873_v1  ;;  %v1524_v15 = vsel %vm1522_vm5, %v1523_v56, %v1519_v60  ;;  %v1882_v26 = vand.u32 3, %v1881_v41  ;;  %2728 = vmatmul.msk.f32.vlgmr.msrb.gmra.mxu0 %vm2558_vm9, %v2544_v30 }
 0x28a   : > { %v1525_v31 = vadd.s32 %v1524_v15, %v1520_v11  ;;  %vm1429_vm11 = vcmp.lt.s32.totalorder %v4007_v2, 0  ;;  %vm4476_vm12 = vcmp.le.f32.partialorder %v1427_v58, 0.7853982  ;;  %vm1570_vm0 = vweird.f32 %v4007_v2 }
 0x28b   : > { %v1868_v53 = vmul.f32 %v1867_v25, %v1865_v17  ;;  %v1875_v55 = vmul.f32 %v1874_v37, %v1865_v17  ;;  %vm1884_vm7 = vcmp.eq.s32.totalorder %v1882_v26, 0  ;;  %vm1887_vm8 = vcmp.eq.s32.totalorder %v1882_v26, 2  ;;  %v2547_v37 = vld [vmem:[%s4531_s3 + $0x8] sm:$0xff] }
 0x28c   : > { %v1526_v44 = vadd.s32 536870912, %v1525_v31  ;;  %vm1883_vm10 = vcmp.lt.s32.totalorder %v1882_v26, 2 }
 0x28d   : > { %v1869_v52 = vadd.f32 -0.4999988, %v1868_v53  ;;  %v1876_v7 = vadd.f32 -0.16666654, %v1875_v55  ;;  %v2522_v53 = vmul.f32 1.442695, %v4015_v49 }
 0x28e   : > { %v1527_v14 = vshrl.u32 %v1526_v44, 30  ;;  %v2819_v43 = vpop.eup %2818 }
 0x28f   : > { %v1870_v33 = vmul.f32 %v1869_v52, %v1865_v17  ;;  %v1877_v19 = vmul.f32 %v1876_v7, %v1865_v17  ;;  %2555 = vperm.xlu0 %2789, %v2547_v37   ;;  %2820 = vpow2.f32 %v2522_v53 }
 0x290   : > { %v1528_v28 = vshll.u32 %v1527_v14, 30  ;;  %v1551_v38 = vsub.s32 4, %v1527_v14 }
 0x291   : > { %v1871_v40 = vadd.f32 1.0, %v1870_v33  ;;  %v1878_v45 = vadd.f32 1.0, %v1877_v19  ;;  %2729 = vmatmul.msk.f32.gmra.mxu0 %vm2558_vm9, %v2545_v21 }
 0x292   : > { %v1529_v18 = vsub.s32 %v1525_v31, %v1528_v28  ;;  %v1552_v58 = vsel %vm1429_vm11, %v1551_v38, %v1527_v14 }
 0x293   : > { %v1879_v12 = vmul.f32 %v1878_v45, %v1863_v59  ;;  %v1888_v24 = vxor.u32 2147483648, %v1871_v40  ;;  %v1554_v0 = vsel %vm4476_vm12, 0, %v1552_v58 }
 0x294   : > { %vm1530_vm6 = vcmp.lt.s32.totalorder %v1529_v18, 0  ;;  %v1531_v4 = vsub.s32 0, %v1529_v18  ;;  %v1571_v20 = vadd.s32 3, %v1554_v0 }
 0x295   : > { %v1885_v34 = vxor.u32 2147483648, %v1879_v12  ;;  %v1889_v3 = vsel %vm1887_vm8, %v1888_v24, %v1879_v12  ;;  %v2821_v45 = vpop.eup %2820 }
 0x296   : > { %v1532_v5 = vsel %vm1530_vm6, %v1531_v4, %v1529_v18  ;;  %v1572_v41 = vand.u32 3, %v1571_v20 }
 0x297   : > { %v1886_v42 = vsel %vm1884_vm7, %v1871_v40, %v1885_v34  ;;  %v1533_v51 = vclz %v1532_v5 }
 0x298   : > { %v1890_v29 = vsel %vm1883_vm10, %v1886_v42, %v1889_v3  ;;  %vm1574_vm3 = vcmp.eq.s32.totalorder %v1572_v41, 0  ;;  %vm1577_vm4 = vcmp.eq.s32.totalorder %v1572_v41, 2  ;;  %vm1573_vm13 = vcmp.lt.s32.totalorder %v1572_v41, 2 }
 0x299   : > { %v1891_v48 = vsel %vm1880_vm14, nan, %v1890_v29  ;;  %v2708_v23 = vadd.s32 4294967294, %v1533_v51 }
 0x29a   : > { %v2539_v46 = vmul.f32 %v2819_v43, %v1891_v48 }
 0x29b   : > { %vm2709_vm15 = vcmp.lt.s32.totalorder %v2708_v23, 0 }
 0x29c   : > { %2602 = vmatpush.msrb.mxu1 %v2539_v46  ;;  %v1536_v50 = vsel %vm2709_vm15, 0, %v2708_v23 }
 0x29d   : > { %v1537_v54 = vsub.s32 32, %v1536_v50  ;;  %v1541_v8 = vsub.s32 4294967266, %v1536_v50  ;;  %v1538_v35 = vshll.u32 %v1529_v18, %v1536_v50 }
 0x29f   : > { %v1539_v36 = vshrl.u32 %v1521_v63, %v1537_v54  ;;  %v1542_v62 = vadd.s32 127, %v1541_v8 }
 0x2a1   : > { %v1540_v27 = vor.u32 %v1539_v36, %v1538_v35  ;;  %v1543_v61 = vshll.u32 %v1542_v62, 23 }
 0x2a3   : > { %v1544_v32 = vor.u32 4788187, %v1543_v61  ;;  %v1547_v10 = vcvt.s32.f32 %v1540_v27 }
 0x2a5   : > { %v1545_v9 = vand.u32 2147483647, %v1544_v32 }
 0x2a7   : > { %v1548_v22 = vmul.f32 %v1547_v10, %v1545_v9 }
 0x2a9   : > { %v1549_v6 = vxor.u32 2147483648, %v1548_v22 }
 0x2ab   : > { %v1550_v59 = vsel %vm1429_vm11, %v1549_v6, %v1548_v22 }
 0x2ac   : > { %v1553_v16 = vsel %vm4476_vm12, %v4007_v2, %v1550_v59 }
 0x2ad   : > { %v1555_v17 = vmul.f32 %v1553_v16, %v1553_v16 }
 0x2af   : > { %v1556_v60 = vmul.f32 -0.001358992, %v1555_v17  ;;  %v1563_v13 = vmul.f32 -0.00019511016, %v1555_v17 }
 0x2b1   : > { %v1557_v1 = vadd.f32 0.041655596, %v1556_v60  ;;  %v1564_v56 = vadd.f32 0.008332121, %v1563_v13 }
 0x2b3   : > { %v1558_v11 = vmul.f32 %v1557_v1, %v1555_v17  ;;  %v1565_v25 = vmul.f32 %v1564_v56, %v1555_v17 }
 0x2b5   : > { %v1559_v15 = vadd.f32 -0.4999988, %v1558_v11  ;;  %v1566_v31 = vadd.f32 -0.16666654, %v1565_v25 }
 0x2b7   : > { %v1560_v55 = vmul.f32 %v1559_v15, %v1555_v17  ;;  %v1567_v44 = vmul.f32 %v1566_v31, %v1555_v17 }
 0x2b9   : > { %v1561_v52 = vadd.f32 1.0, %v1560_v55  ;;  %v1568_v7 = vadd.f32 1.0, %v1567_v44 }
 0x2bb   : > { %v1569_v14 = vmul.f32 %v1568_v7, %v1553_v16  ;;  %v1578_v39 = vxor.u32 2147483648, %v1561_v52 }
 0x2bd   : > { %v1575_v33 = vxor.u32 2147483648, %v1569_v14  ;;  %v1579_v28 = vsel %vm1577_vm4, %v1578_v39, %v1569_v14 }
 0x2bf   : > { %v1576_v19 = vsel %vm1574_vm3, %v1561_v52, %v1575_v33 }
 0x2c0   : > { %v1580_v40 = vsel %vm1573_vm13, %v1576_v19, %v1579_v28 }
 0x2c1   : > { %v1581_v49 = vsel %vm1570_vm0, nan, %v1580_v40 }
 0x2c2   : > { %v2537_v26 = vmul.f32 %v2821_v45, %v1581_v49 }
 0x2c4   : > { %2603 = vmatpush.msrb.mxu1 %v2537_v26 }
 0x2c5   : > { %2730 = vmatmul.msk.f32.vlgmr.msrb.gmra.mxu1 %vm2558_vm9, %v2544_v30 }
 0x2cd   : > { %2731 = vmatmul.msk.f32.gmra.mxu1 %vm2558_vm9, %v2545_v21 }
 0x2f9   : > { %v2551_v18 = vpop.permute.xlu0 %2550 }
 0x301   : > { %v2556_v34 = vpop.permute.xlu0 %2555 }
 0x306   : > { %v2582_v12 = vpop.f32.mrf.mxu0 }
 0x307   : > { %v2583_v24 = vadd.f32 %v2582_v12, %v2551_v18 }
 0x309   : > { %v2611_v4 = vmax.f32 %v2583_v24, 0.0 }
 0x30b   : > { %2615 = vst [vmem:[%s191_s6] sm:$0xff] %v2611_v4 }
 0x30e   : > { %v2585_v2 = vpop.f32.mrf.mxu0 }
 0x30f   : > { %v2586_v5 = vadd.f32 %v2585_v2, %v2556_v34 }
 0x311   : > { %v2613_v42 = vmax.f32 %v2586_v5, 0.0 }
 0x313   : > { %2617 = vst [vmem:[%s191_s6 + $0x10] sm:$0xff] %v2613_v42 }
 0x342   : > { %v2605_v3 = vpop.f32.mrf.mxu1 }
 0x343   : > { %v2606_v51 = vadd.f32 %v2605_v3, %v2551_v18 }
 0x345   : > { %v2612_v29 = vmax.f32 %v2606_v51, 0.0 }
 0x347   : > { %2616 = vst [vmem:[%s191_s6 + $0x8] sm:$0xff] %v2612_v29 }
 0x34a   : > { %v2608_v43 = vpop.f32.mrf.mxu1 }
 0x34b   : > { %v2609_v48 = vadd.f32 %v2608_v43, %v2556_v34 }
 0x34d   : > { %v2614_v23 = vmax.f32 %v2609_v48, 0.0 }
 0x34f   : > { %2618 = vst [vmem:[%s191_s6 + $0x18] sm:$0xff] %v2614_v23 }
 0x350   : > { %2849 = shalt.err (!%p2846_p3)
}
 0x351   : > { %s2893_s29 = smov 256   ;;  %s2894_s30 = smov 512  }
 0x352   : > { %s2895_s5 = smov 16  }
 0x353   : > { %2740 = dma.vmem_to_hbm [thread:$0]  (%p2959_p5), %s2633_s11, 512, %s2635_s12, %s2620_s13, %s2893_s29, %s2894_s30, %s2895_s5  }
 0x354 PF: > { %p2746_p4 = scmp.ge.s32.totalorder %s2884_s18, 2  ;;  %s2649_s6 = sand.u32 1, %s2872_s15  }
 0x355   : > { %s2650_s7 = scalar_lea.sflag [#allocation3], %s2649_s6 }
 0x356   : > { %p2743_p7 = pnand %p2746_p4, %p2963_p6 }
 0x358   : > { %p2744_p8 = pneg %p2743_p7 }
 0x35a   : > { %2867 = dma.done.wait (%p2744_p8), %s2650_s7, 512  }
 0x35b   : > { %2869 = vsyncadd (%p2744_p8), %s2650_s7, 4294966784  ;;  %p14_p9 = scmp.ge.s32.totalorder %s2946_s21, 4   ;;  %s4594_s15 = smov %s2876_s16 }
 0x35c   : > { %s4595_s16 = smov %s2880_s17  ;;  %s4596_s17 = smov %s2957_s24 }
 0x35d   : > { %s4597_s18 = smov %s2946_s21  ;;  %16 = sbr.rel (!%p14_p9) target bundleno = 3 (0x3), region = 71 }
 0x362   :  { %2656 = vsyncpa [#allocation3], 1 }
 0x363   :  { %2658 = vsyncpa [#allocation3 + $0x1], 1 }

// kernel: tpu_custom_call.1
= control target key start
LH: loop header
LB: loop body
LE: loop exit
PB: predicated region body
PF: predicated region fallthrough
CT: control target
= control target key end

     0   :  { %9 = vsyncpa [#allocation3], 0  ;;  %s3386_s0 = inlined_call_operand.vmem [shape: f32[4,512], index: 0, kind: input, shape index: {}]   ;;  %s3387_s1 = inlined_call_operand.vmem [shape: f32[96,4], index: 1, kind: input, shape index: {}]   ;;  %s3388_s2 = inlined_call_operand.vmem [shape: f32[16,32], index: 2, kind: input, shape index: {}]   ;;  %s3389_s3 = inlined_call_operand.vmem [shape: f32[16,1], index: 3, kind: input, shape index: {}]   ;;  %s3390_s4 = inlined_call_operand.hbm [shape: f32[16,512], index: 4, kind: output, shape index: {}]  }
   0x1   :  { %11 = vsyncpa [#allocation3 + $0x1], 0  ;;  %s2079_s15 = smov 0   ;;  %s2081_s16 = smov 0  }
   0x2   :  { %s2083_s17 = smov 0   ;;  %s2085_s18 = smov 0  }
   0x3 LB: > { %s2100_s19 = sadd.s32 4294967295, %s2042_s18   ;;  %s1829_s20 = sadd.s32 4294967294, %s2042_s18   ;;  %s2042_s18 = sphi %s2085_s18, %s3453_s18   ;;  %s2038_s17 = sphi %s2083_s17, %s3452_s17   ;;  %s2034_s16 = sphi %s2081_s16, %s3451_s16   ;;  %s2030_s15 = sphi %s2079_s15, %s3450_s15  }
   0x4   : > { %s2104_s21 = sadd.s32 1, %s2042_s18   ;;  %s113_s22 = sadd.s32 1, %s2038_s17 }
   0x5   : > { %s110_s23 = ssub.s32 %s2042_s18, %s2104_s21  ;;  %p123_p0 = scmp.ne.s32.totalorder %s2038_s17, %s2034_s16 }
   0x6   : > { %p111_p1 = scmp.eq.s32.totalorder %s110_s23, 0  ;;  %p124_p2 = scmp.eq.s32.totalorder %s2100_s19, 1 }
   0x7   : > { %p129_p3 = scmp.ne.s32.totalorder %s2034_s16, %s2030_s15  ;;  %p130_p4 = scmp.eq.s32.totalorder %s1829_s20, 1 }
   0x8   : > { %s2115_s24 = scalar_select %p111_p1, %s2038_s17, %s113_s22  }
   0x9   : > { %p2117_p5 = por %p124_p2, %p123_p0  ;;  %p2121_p6 = por %p130_p4, %p129_p3 }
   0xa   : > { %p1832_p7 = scmp.ge.s32.totalorder %s2042_s18, 1  ;;  %p166_p8 = scmp.lt.s32.totalorder %s2042_s18, 3 }
   0xc   : > { %p167_p9 = pnand %p1832_p7, %p166_p8 }
   0xe   : > { %170 = sbr.rel (%p167_p9) target bundleno = 694 (0x2b6), region = 36 }
  0x13   : > { %s1834_s27 = sshll.u32 %s2100_s19, 1  ;;  %vm253_vm0 = vcmask 1043456   ;;  %v200_v1 = vld [vmem:[%s3387_s1] sm:$0xff]  ;;  %vm216_vm1 = vcmask 31744   ;;  %v207_v4 = vld [vmem:[%s3387_s1 + $0x38] sm:$0xff]  ;;  %v201_v5 = vld [vmem:[%s3387_s1 + $0x8] sm:$0xff] }
  0x14   : > { %p193_p10 = scmp.lt.s32.totalorder %s1834_s27, 3  ;;  %v208_v6 = vld [vmem:[%s3387_s1 + $0x40] sm:$0xff]  ;;  %v202_v7 = vld [vmem:[%s3387_s1 + $0x10] sm:$0xff]  ;;  %v209_v8 = vld [vmem:[%s3387_s1 + $0x48] sm:$0xff]  ;;  %v3391_v50 = vmov 1326507024  }
  0x15   : > { %v203_v9 = vld [vmem:[%s3387_s1 + $0x18] sm:$0xff]  ;;  %v210_v10 = vld [vmem:[%s3387_s1 + $0x50] sm:$0xff]  ;;  %v204_v11 = vld [vmem:[%s3387_s1 + $0x20] sm:$0xff]  ;;  %v3393_v54 = vmov 920167782   ;;  %s189_s30 = sand.u32 1, %s2034_s16  }
  0x16   : > { %s3455_s27 = smov (!%p193_p10, %s1834_s27), 3  ;;  %v211_v12 = vld [vmem:[%s3387_s1 + $0x58] sm:$0xff]  ;;  %v205_v13 = vld [vmem:[%s3387_s1 + $0x28] sm:$0xff]  ;;  %v206_v14 = vld [vmem:[%s3387_s1 + $0x30] sm:$0xff]  ;;  %v3405_v58 = vmov 2131351028  }
  0x17   : > { %s1835_s28 = sshll.u32 %s3455_s27, 2  ;;  %v2047_v60 = vmov 2102212464   ;;  %s1895_s7 = sshll.u32 %s2100_s19, 4 }
  0x18   : > { %s196_s5 = scalar_lea.vmem %s3386_s0, %s1835_s28  ;;  %s1763_s10 = scalar_lea.hbm %s3390_s4, %s1895_s7 }
  0x19   : > { %v199_v0 = vld [vmem:[%s196_s5] sm:$0xff]  ;;  %s1833_s5 = sshll.u32 %s189_s30, 5  ;;  %s1766_s12 = sshll.u32 %s1763_s10, 4  ;;  %s1767_s12 = int_to_ptr.hbm [resolvable:$true] %s1766_s12 }
  0x1a   : > { %213 = vst [vmem:[#allocation1] ss:$2 sm:$0xff] %v199_v0  ;;  %s191_s6 = scalar_lea.vmem [#allocation2], %s1833_s5  ;;  %s1752_s13 = scalar_lea.sflag [#allocation3], %s189_s30 }
  0x1b   : > { %s1764_s11 = sshll.u32 %s191_s6, 4  ;;  %s1994_s14 = sshra.s32 %s1767_s12, 4  ;;  %s1765_s11 = int_to_ptr.vmem [resolvable:$true] %s1764_s11  ;;  %s1995_s14 = int_to_ptr.hbm [resolvable:$true] %s1994_s14 }
  0x1c   : > { %s1996_s20 = scalar_lea.hbm %s1995_s14, 32  ;;  %s2000_s23 = scalar_lea.hbm %s3390_s4, 64 }
  0x1d   : > { %p1997_p11 = scmp.ne.s32.totalorder %s1995_s14, %s1996_s20  ;;  %p2001_p0 = scmp.lt.s32.totalorder %s1995_s14, %s3390_s4 }
  0x1e   : > { %p2002_p1 = scmp.lt.s32.totalorder %s2000_s23, %s1996_s20 }
  0x1f   : > { %p1998_p12 = pnand %p1997_p11, %p2117_p5 }
  0x20   : > { %p2003_p2 = por %p2002_p1, %p2001_p0 }
  0x21   : > { %v214_v2 = vld.sshfl [vmem:[#allocation1] sm:$0xff pattern:$0x75316420]  ;;  %v215_v3 = vld.sshfl [vmem:[#allocation1 + $0x8] sm:$0xff pattern:$0x75316420]  ;;  %p1999_p13 = pneg %p1998_p12 }
  0x22   : > { %1836 = vmatpush.msk.msra.mxu0 %vm253_vm0, %v214_v2  ;;  %1849 = vmatpush.msk.msra.mxu1 %vm253_vm0, %v215_v3 }
  0x23   : > { %1837 = vmatmul.msk.f32.vlgmr.msra.gmra.mxu0 %vm216_vm1, %v200_v1  ;;  %1850 = vmatmul.msk.f32.vlgmr.msra.gmra.mxu1 %vm216_vm1, %v200_v1  ;;  %p2004_p3 = pnand %p2003_p2, %p1999_p13 }
  0x24   : > { %1896 = vmatpush.msk.msra.mxu2 %vm253_vm0, %v214_v2  ;;  %1897 = vmatpush.msk.msra.mxu3 %vm253_vm0, %v215_v3  ;;  %v3397_v3 = vmov 2475754826  }
  0x25   : > { %1844 = vmatmul.msk.f32.vlgmr.msra.gmra.mxu2 %vm216_vm1, %v207_v4  ;;  %1857 = vmatmul.msk.f32.vlgmr.msra.gmra.mxu3 %vm216_vm1, %v207_v4 }
  0x2b   : > { %1838 = vmatmul.msk.f32.gmra.mxu0 %vm216_vm1, %v201_v5  ;;  %1851 = vmatmul.msk.f32.gmra.mxu1 %vm216_vm1, %v201_v5 }
  0x2d   : > { %1845 = vmatmul.msk.f32.gmra.mxu2 %vm216_vm1, %v208_v6  ;;  %1858 = vmatmul.msk.f32.gmra.mxu3 %vm216_vm1, %v208_v6 }
  0x33   : > { %1839 = vmatmul.msk.f32.gmra.mxu0 %vm216_vm1, %v202_v7  ;;  %1852 = vmatmul.msk.f32.gmra.mxu1 %vm216_vm1, %v202_v7 }
  0x35   : > { %1846 = vmatmul.msk.f32.gmra.mxu2 %vm216_vm1, %v209_v8  ;;  %1859 = vmatmul.msk.f32.gmra.mxu3 %vm216_vm1, %v209_v8 }
  0x3b   : > { %1840 = vmatmul.msk.f32.gmra.mxu0 %vm216_vm1, %v203_v9  ;;  %1853 = vmatmul.msk.f32.gmra.mxu1 %vm216_vm1, %v203_v9  ;;  %v3401_v9 = vmov 683565275  }
  0x3d   : > { %1847 = vmatmul.msk.f32.gmra.mxu2 %vm216_vm1, %v210_v10  ;;  %1860 = vmatmul.msk.f32.gmra.mxu3 %vm216_vm1, %v210_v10 }
  0x43   : > { %1841 = vmatmul.msk.f32.gmra.mxu0 %vm216_vm1, %v204_v11  ;;  %1854 = vmatmul.msk.f32.gmra.mxu1 %vm216_vm1, %v204_v11 }
  0x45   : > { %1848 = vmatmul.msk.f32.gmra.mxu2 %vm216_vm1, %v211_v12  ;;  %1861 = vmatmul.msk.f32.gmra.mxu3 %vm216_vm1, %v211_v12 }
  0x4b   : > { %1842 = vmatmul.msk.f32.gmra.mxu0 %vm216_vm1, %v205_v13  ;;  %1855 = vmatmul.msk.f32.gmra.mxu1 %vm216_vm1, %v205_v13 }
  0x53   : > { %1843 = vmatmul.msk.f32.gmra.mxu0 %vm216_vm1, %v206_v14  ;;  %1856 = vmatmul.msk.f32.gmra.mxu1 %vm216_vm1, %v206_v14 }
  0xa0   : > { %v2191_v15 = vpop.f32.mrf.mxu0  ;;  %v2193_v16 = vpop.f32.mrf.mxu1 }
  0xa8   : > { %v2195_v17 = vpop.f32.mrf.mxu0  ;;  %v2197_v18 = vpop.f32.mrf.mxu1 }
  0xa9   : > { %v296_v19 = vpop.f32.mrf.mxu2  ;;  %v349_v20 = vpop.f32.mrf.mxu3 }
  0xaa   : > { %1948 = vrcp.f32 %v296_v19 }
  0xab   : > { %1950 = vrcp.f32 %v349_v20 }
  0xb0   : > { %v1949_v21 = vpop.eup %1948  ;;  %v2199_v22 = vpop.f32.mrf.mxu0 }
  0xb1   : > { %v2201_v23 = vpop.f32.mrf.mxu1  ;;  %v1951_v24 = vpop.eup %1950  ;;  %v378_v25 = vmul.f32 %v1949_v21, %v296_v19 }
  0xb2   : > { %v379_v26 = vmul.f32 %v1951_v24, %v349_v20  ;;  %v299_v0 = vpop.f32.mrf.mxu2  ;;  %v352_v14 = vpop.f32.mrf.mxu3 }
  0xb3   : > { %v386_v27 = vsub.f32 2.0, %v378_v25 }
  0xb4   : > { %v387_v28 = vsub.f32 2.0, %v379_v26 }
  0xb5   : > { %v2203_v29 = vmul.f32 %v1949_v21, %v386_v27 }
  0xb6   : > { %v2205_v30 = vmul.f32 %v1951_v24, %v387_v28 }
  0xb8   : > { %v284_v31 = vpop.f32.mrf.mxu0 }
  0xb9   : > { %v337_v32 = vpop.f32.mrf.mxu1  ;;  %v2208_v33 = vmul.f32 %v2203_v29, %v284_v31 }
  0xba   : > { %v2211_v34 = vmul.f32 %v2205_v30, %v337_v32 }
  0xbb   : > { %v1337_v35 = vand.u32 2139095040, %v2208_v33  ;;  %v1334_v45 = vand.u32 2147483647, %v2208_v33 }
  0xbc   : > { %v1492_v37 = vand.u32 2139095040, %v2211_v34  ;;  %v1489_v56 = vand.u32 2147483647, %v2211_v34 }
  0xbd   : > { %v1338_v36 = vshrl.u32 %v1337_v35, 23  ;;  %v1341_v48 = vand.u32 8388607, %v1334_v45 }
  0xbe   : > { %v1493_v40 = vshrl.u32 %v1492_v37, 23  ;;  %v2246_v12 = vand.u32 8388607, %v1489_v56 }
  0xbf   : > { %v1880_v38 = vadd.s32 4294967169, %v1338_v36  ;;  %v1342_v53 = vor.u32 8388608, %v1341_v48 }
  0xc0   : > { %v1883_v42 = vadd.s32 4294967169, %v1493_v40  ;;  %v287_v44 = vpop.f32.mrf.mxu0  ;;  %v1497_v28 = vor.u32 8388608, %v2246_v12 }
  0xc1   : > { %v1344_v39 = vadd.s32 1, %v1880_v38  ;;  %v340_v49 = vpop.f32.mrf.mxu1  ;;  %1952 = vrcp.f32 %v287_v44  ;;  %v2242_v11 = vshll.u32 %v1342_v53, 8 }
  0xc2   : > { %v1499_v46 = vadd.s32 1, %v1883_v42  ;;  %1954 = vrcp.f32 %v340_v49 }
  0xc3   : > { %vm1345_vm2 = vcmp.gt.s32.totalorder %v1344_v39, 0  ;;  %v2267_v37 = vand.u32 65535, %v2242_v11  ;;  %v2270_v38 = vshrl.u32 %v2242_v11, 16 }
  0xc4   : > { %v1346_v41 = vsel %vm1345_vm2, %v1344_v39, 0  ;;  %vm1500_vm3 = vcmp.gt.s32.totalorder %v1499_v46, 0 }
  0xc5   : > { %v1348_v43 = vand.u32 31, %v1346_v41  ;;  %v1501_v52 = vsel %vm1500_vm3, %v1499_v46, 0  ;;  %v2224_v57 = vshrl.u32 %v1346_v41, 5 }
  0xc6   : > { %v2234_v2 = vand.u32 31, %v1501_v52  ;;  %v2273_v39 = vshrl.u32 %v1501_v52, 5  ;;  %v302_v52 = vpop.f32.mrf.mxu2 }
  0xc7   : > { %v2216_v47 = vsub.s32 32, %v1348_v43  ;;  %v1363_v55 = vshll.u32 %v3393_v54, %v1348_v43  ;;  %v1354_v5 = vshll.u32 %v3397_v3, %v1348_v43  ;;  %v1357_v6 = vshll.u32 %v3405_v58, %v1348_v43  ;;  %v1953_v8 = vpop.eup %1952 }
  0xc8   : > { %v2232_v63 = vpop.f32.mrf.mxu0  ;;  %v1360_v7 = vshll.u32 %v2047_v60, %v1348_v43  ;;  %v1351_v10 = vshll.u32 %v3401_v9, %v1348_v43  ;;  %v1955_v13 = vpop.eup %1954  ;;  %vm1369_vm4 = vcmp.lt.s32.totalorder %v2224_v57, 4  ;;  %v2256_v26 = vsub.s32 32, %v2234_v2 }
  0xc9   : > { %v1364_v51 = vshrl.u32 %v3391_v50, %v2216_v47  ;;  %v1355_v59 = vshrl.u32 %v3405_v58, %v2216_v47  ;;  %v1358_v61 = vshrl.u32 %v2047_v60, %v2216_v47  ;;  %v1361_v62 = vshrl.u32 %v3393_v54, %v2216_v47  ;;  %v343_v32 = vpop.f32.mrf.mxu1 }
  0xca   : > { %v1352_v4 = vshrl.u32 %v3397_v3, %v2216_v47  ;;  %v372_v27 = vmul.f32 %v1953_v8, %v287_v44  ;;  %vm1366_vm5 = vcmp.lt.s32.totalorder %v2224_v57, 1  ;;  %vm1368_vm6 = vcmp.lt.s32.totalorder %v2224_v57, 3 }
  0xcb   : > { %v1365_v1 = vor.u32 %v1364_v51, %v1363_v55  ;;  %v2248_v19 = vor.u32 %v1355_v59, %v1354_v5  ;;  %v1359_v20 = vor.u32 %v1358_v61, %v1357_v6  ;;  %v1362_v21 = vor.u32 %v1361_v62, %v1360_v7  ;;  %v355_v7 = vpop.f32.mrf.mxu3 }
  0xcc   : > { %v2253_v25 = vor.u32 %v1352_v4, %v1351_v10  ;;  %v373_v31 = vmul.f32 %v1955_v13, %v340_v49  ;;  %vm1367_vm7 = vcmp.lt.s32.totalorder %v2224_v57, 2  ;;  %v380_v40 = vsub.f32 2.0, %v372_v27 }
  0xcd   : > { %v1379_v24 = vsel %vm1369_vm4, %v1365_v1, 1326507024  ;;  %v1378_v35 = vsel %vm1366_vm5, %v2248_v19, %v1359_v20  ;;  %v1509_v43 = vshll.u32 %v3397_v3, %v2234_v2  ;;  %v1519_v44 = vshrl.u32 %v3391_v50, %v2256_v26 }
  0xce   : > { %v1380_v36 = vsel %vm1368_vm6, %v1362_v21, %v1379_v24  ;;  %v381_v41 = vsub.f32 2.0, %v373_v31  ;;  %v1374_v42 = vsel %vm1366_vm5, %v2253_v25, %v2248_v19  ;;  %1956 = vrcp.f32 %v2232_v63 }
  0xcf   : > { %v1375_v48 = vsel %vm1369_vm4, %v1362_v21, 920167782  ;;  %v2288_v49 = vsel %vm1367_vm7, %v1378_v35, %v1380_v36  ;;  %v1510_v51 = vshrl.u32 %v3405_v58, %v2256_v26  ;;  %v388_v53 = vmul.f32 %v1953_v8, %v380_v40 }
  0xd0   : > { %v293_v46 = vpop.f32.mrf.mxu0  ;;  %v1513_v55 = vshrl.u32 %v2047_v60, %v2256_v26  ;;  %v1518_v59 = vshll.u32 %v3393_v54, %v2234_v2  ;;  %v389_v61 = vmul.f32 %v1955_v13, %v381_v41  ;;  %1958 = vrcp.f32 %v343_v32 }
  0xd1   : > { %v1516_v62 = vshrl.u32 %v3393_v54, %v2256_v26  ;;  %v2299_v1 = vmul.f32 %v388_v53, %v2191_v15  ;;  %v2301_v4 = vmul.f32 %v388_v53, %v299_v0  ;;  %1960 = vrcp.f32 %v293_v46  ;;  %v346_v40 = vpop.f32.mrf.mxu1 }
  0xd2   : > { %v1386_v5 = vshrl.u32 %v2288_v49, 16  ;;  %v1520_v6 = vor.u32 %v1519_v44, %v1518_v59  ;;  %v2305_v8 = vmul.f32 %v389_v61, %v2193_v16  ;;  %v2307_v10 = vmul.f32 %v389_v61, %v352_v14 }
  0xd3   : > { %3411 = vst [vmem:[#allocation5_spill] sm:$0xff] %v2299_v1  ;;  %v1376_v13 = vsel %vm1368_vm6, %v1359_v20, %v1375_v48  ;;  %v1507_v21 = vshrl.u32 %v3397_v3, %v2256_v26  ;;  %v1512_v15 = vshll.u32 %v3405_v58, %v2234_v2  ;;  %v1515_v0 = vshll.u32 %v2047_v60, %v2234_v2 }
  0xd4   : > { %3412 = vst [vmem:[#allocation6_spill] sm:$0xff] %v2301_v4  ;;  %v1957_v24 = vpop.eup %1956  ;;  %v1350_v27 = vshrl.u32 %v3401_v9, %v2216_v47  ;;  %v1506_v16 = vshll.u32 %v3401_v9, %v2234_v2  ;;  %v2321_v14 = vor.u32 %v1510_v51, %v1509_v43  ;;  %vm1524_vm8 = vcmp.lt.s32.totalorder %v2273_v39, 4 }
  0xd5   : > { %3413 = vst [vmem:[#allocation7_spill] sm:$0xff] %v2305_v8  ;;  %v1514_v31 = vor.u32 %v1513_v55, %v1512_v15  ;;  %v1517_v35 = vor.u32 %v1516_v62, %v1515_v0  ;;  %v374_v36 = vmul.f32 %v1957_v24, %v2232_v63  ;;  %v3399_v41 = vmov 0   ;;  %v305_v62 = vpop.f32.mrf.mxu2 }
  0xd6   : > { %3414 = vst [vmem:[#allocation8_spill] sm:$0xff] %v2307_v10  ;;  %1947 = vset.pattern.permute.xlu0 %v3399_v41  ;;  %v1959_v44 = vpop.eup %1958  ;;  %v1371_v48 = vsel %vm1369_vm4, %v1359_v20, 2102212464  ;;  %v2330_v47 = vsel %vm1367_vm7, %v1374_v42, %v1376_v13  ;;  %v2335_v2 = vmul.u32 %v1386_v5, %v2267_v37  ;;  %v1534_v63 = vsel %vm1524_vm8, %v1520_v6, 1326507024 }
  0xd7   : > { %v1961_v43 = vpop.eup %1960  ;;  %v1385_v51 = vand.u32 65535, %v2288_v49  ;;  %v1508_v53 = vor.u32 %v1507_v21, %v1506_v16  ;;  %v382_v55 = vsub.f32 2.0, %v374_v36  ;;  %v375_v59 = vmul.f32 %v1959_v44, %v343_v32 }
  0xd8   : > { %vm1521_vm9 = vcmp.lt.s32.totalorder %v2273_v39, 1  ;;  %vm1523_vm10 = vcmp.lt.s32.totalorder %v2273_v39, 3  ;;  %v376_v20 = vmul.f32 %v1961_v43, %v293_v46  ;;  %1962 = vrcp.f32 %v346_v40 }
  0xd9   : > { %v1533_v42 = vsel %vm1521_vm9, %v2321_v14, %v1514_v31  ;;  %v1535_v61 = vsel %vm1523_vm10, %v1517_v35, %v1534_v63  ;;  %v390_v6 = vmul.f32 %v1957_v24, %v382_v55  ;;  %v383_v13 = vsub.f32 2.0, %v375_v59  ;;  %v358_v55 = vpop.f32.mrf.mxu3 }
  0xda   : > { %v1391_v21 = vshll.u32 %v2335_v2, 16  ;;  %v1408_v32 = vshrl.u32 %v2330_v47, 16  ;;  %v1530_v15 = vsel %vm1524_vm8, %v1517_v35, 920167782  ;;  %v384_v0 = vsub.f32 2.0, %v376_v20 }
  0xdb   : > { %vm1522_vm11 = vcmp.lt.s32.totalorder %v2273_v39, 2  ;;  %v2353_v46 = vmul.f32 %v390_v6, %v2195_v17  ;;  %v2355_v16 = vmul.f32 %v390_v6, %v302_v52  ;;  %v391_v36 = vmul.f32 %v1959_v44, %v383_v13 }
  0xdc   : > { %v1387_v63 = vmul.u32 %v1385_v51, %v2267_v37  ;;  %v2360_v24 = vsel %vm1522_vm11, %v1533_v42, %v1535_v61  ;;  %v392_v59 = vmul.f32 %v1961_v43, %v384_v0  ;;  %v2363_v50 = vmul.u32 %v1385_v51, %v2270_v38 }
  0xdd   : > { %3415 = vst [vmem:[#allocation9_spill] sm:$0xff] %v2355_v16  ;;  %v1370_v35 = vsel %vm1366_vm5, %v1350_v27, %v2253_v25  ;;  %v1529_v17 = vsel %vm1521_vm9, %v1508_v53, %v2321_v14  ;;  %v1531_v52 = vsel %vm1523_vm10, %v1514_v31, %v1530_v15  ;;  %v2375_v44 = vshll.u32 %v1497_v28, 8  ;;  %v308_v0 = vpop.f32.mrf.mxu2 }
  0xde   : > { %v1963_v20 = vpop.eup %1962  ;;  %v1372_v43 = vsel %vm1368_vm6, %v2248_v19, %v1371_v48  ;;  %vm1395_vm12 = vc.u32 %v1387_v63, %v1391_v21  ;;  %v1397_v51 = vadd.s32 %v1391_v21, %v1387_v63  ;;  %v2381_v25 = vmul.f32 %v391_v36, %v2197_v18 }
  0xdf   : > { %v2384_v27 = vmul.u32 %v1408_v32, %v2267_v37  ;;  %v1505_v42 = vshrl.u32 %v3401_v9, %v2256_v26  ;;  %v1541_v12 = vshrl.u32 %v2360_v24, 16  ;;  %v2389_v28 = vmul.f32 %v391_v36, %v355_v7 }
  0xe0   : > { %v1526_v61 = vsel %vm1524_vm8, %v1514_v31, 2102212464  ;;  %v2395_v19 = vsel %vm1522_vm11, %v1529_v17, %v1531_v52  ;;  %v2397_v48 = vmul.f32 %v392_v59, %v305_v62  ;;  %v1393_v18 = vshll.u32 %v2363_v50, 16 }
  0xe1   : > { %3416 = vst [vmem:[#allocation10_spill] sm:$0xff] %v2389_v28  ;;  %v2402_v6 = vsel %vm1367_vm7, %v1370_v35, %v1372_v43  ;;  %v2405_v26 = vand.u32 65535, %v2375_v44  ;;  %v377_v7 = vmul.f32 %v1963_v20, %v346_v40  ;;  %v1396_v13 = vsel %vm1395_vm12, 1, %v3399_v41 }
  0xe2   : > { %v1390_v31 = vmul.u32 %v1386_v5, %v2270_v38  ;;  %v1407_v21 = vand.u32 65535, %v2330_v47  ;;  %v1525_v62 = vsel %vm1521_vm9, %v1505_v42, %v1508_v53  ;;  %vm1399_vm13 = vc.u32 %v1397_v51, %v1393_v18  ;;  %v361_v42 = vpop.f32.mrf.mxu3 }
  0xe3   : > { %v1527_v57 = vsel %vm1523_vm10, %v2321_v14, %v1526_v61  ;;  %v2418_v15 = vmul.u32 %v1541_v12, %v2405_v26  ;;  %v1563_v40 = vshrl.u32 %v2395_v19, 16  ;;  %v385_v36 = vsub.f32 2.0, %v377_v7 }
  0xe4   : > { %v1427_v49 = vmul.u32 %v2242_v11, %v2402_v6  ;;  %v1539_v5 = vshrl.u32 %v2375_v44, 16  ;;  %v1398_v47 = vadd.s32 %v1396_v13, %v1390_v31  ;;  %v1413_v53 = vshll.u32 %v2384_v27, 16 }
  0xe5   : > { %v1412_v63 = vmul.u32 %v1408_v32, %v2270_v38  ;;  %v1540_v35 = vand.u32 65535, %v2360_v24  ;;  %v393_v14 = vmul.f32 %v1963_v20, %v385_v36  ;;  %v1400_v17 = vsel %vm1399_vm13, 1, %v3399_v41 }
  0xe6   : > { %v2430_v52 = vsel %vm1522_vm11, %v1525_v62, %v1527_v57  ;;  %v407_v43 = vand.u32 2139095040, %v2299_v1  ;;  %v1650_v51 = vmul.f32 %v2203_v29, %v308_v0  ;;  %v1409_v61 = vmul.u32 %v1407_v21, %v2267_v37 }
  0xe7   : > { %v1546_v18 = vshll.u32 %v2418_v15, 16  ;;  %v1562_v32 = vand.u32 65535, %v2395_v19  ;;  %v2438_v24 = vmul.u32 %v1563_v40, %v2405_v26  ;;  %v2441_v20 = vmul.f32 %v392_v59, %v2199_v22 }
  0xe8   : > { %v2443_v39 = vmul.f32 %v393_v14, %v358_v55  ;;  %v1402_v7 = vadd.s32 %v1400_v17, %v1398_v47  ;;  %v1411_v13 = vmul.u32 %v1407_v21, %v2270_v38  ;;  %vm1417_vm14 = vc.u32 %v1409_v61, %v1413_v53 }
  0xe9   : > { %v1542_v29 = vmul.u32 %v1540_v35, %v2405_v26  ;;  %v1567_v31 = vmul.u32 %v1563_v40, %v1539_v5  ;;  %v1651_v37 = vmul.f32 %v2205_v30, %v361_v42  ;;  %v2449_v62 = vmul.f32 %v393_v14, %v2201_v23 }
  0xea   : > { %3417 = vst [vmem:[#allocation11_spill] sm:$0xff] %v2443_v39  ;;  %v1545_v19 = vmul.u32 %v1541_v12, %v1539_v5  ;;  %v408_v57 = vshrl.u32 %v407_v43, 23  ;;  %v2451_v0 = vmul.f32 1.442695, %v1650_v51  ;;  %v1392_v22 = vshrl.u32 %v2335_v2, 16 }
  0xeb   : > { %vm1550_vm15 = vc.u32 %v1542_v29, %v1546_v18  ;;  %v717_v55 = vand.u32 2139095040, %v2353_v46  ;;  %v1027_v38 = vand.u32 2139095040, %v2441_v20  ;;  %v1418_v59 = vsel %vm1417_vm14, 1, %v3399_v41 }
  0xec   : > { %v1403_v21 = vadd.s32 %v1402_v7, %v1392_v22  ;;  %v1415_v40 = vshll.u32 %v1411_v13, 16  ;;  %v1419_v36 = vadd.s32 %v1413_v53, %v1409_v61  ;;  %v1420_v30 = vadd.s32 %v1418_v59, %v1412_v63 }
  0xed   : > { %v1552_v47 = vadd.s32 %v1546_v18, %v1542_v29  ;;  %v2457_v23 = vmul.f32 1.442695, %v1651_v37  ;;  %v1182_v12 = vand.u32 2139095040, %v2449_v62  ;;  %v1544_v14 = vmul.u32 %v1540_v35, %v1539_v5 }
  0xee   : > { %v1862_v17 = vadd.s32 4294967169, %v408_v57  ;;  %v1394_v2 = vshrl.u32 %v2363_v50, 16  ;;  %vm1421_vm0 = vc.u32 %v1419_v36, %v1415_v40  ;;  %v1551_v43 = vsel %vm1550_vm15, 1, %v3399_v41 }
  0xef   : > { %v718_v51 = vshrl.u32 %v717_v55, 23  ;;  %v1028_v42 = vshrl.u32 %v1027_v38, 23  ;;  %v1422_v54 = vsel %vm1421_vm0, 1, %v3399_v41  ;;  %v1548_v7 = vshll.u32 %v1544_v14, 16 }
  0xf0   : > { %v2463_v22 = vadd.s32 %v1403_v21, %v1394_v2  ;;  %v1414_v53 = vshrl.u32 %v2384_v27, 16  ;;  %v1424_v63 = vadd.s32 %v1422_v54, %v1420_v30  ;;  %v1553_v61 = vadd.s32 %v1551_v43, %v1545_v19 }
  0xf1   : > { %v1183_v18 = vshrl.u32 %v1182_v12, 23  ;;  %vm1554_vm1 = vc.u32 %v1552_v47, %v1548_v7  ;;  %v1566_v35 = vmul.u32 %v1562_v32, %v1539_v5  ;;  %v1568_v29 = vshll.u32 %v2438_v24, 16 }
  0xf2   : > { %v1416_v50 = vshrl.u32 %v1411_v13, 16  ;;  %v1425_v37 = vadd.s32 %v1424_v63, %v1414_v53  ;;  %v1555_v57 = vsel %vm1554_vm1, 1, %v3399_v41  ;;  %v1564_v55 = vmul.u32 %v1562_v32, %v2405_v26 }
  0xf3   : > { %v1874_v38 = vadd.s32 4294967169, %v1028_v42  ;;  %v2469_v59 = vadd.s32 %v1419_v36, %v1415_v40  ;;  %v1547_v21 = vshrl.u32 %v2418_v15, 16  ;;  %v1557_v2 = vadd.s32 %v1555_v57, %v1553_v61 }
  0xf4   : > { %v1426_v27 = vadd.s32 %v1425_v37, %v1416_v50  ;;  %v1570_v54 = vshll.u32 %v1566_v35, 16  ;;  %vm1572_vm2 = vc.u32 %v1564_v55, %v1568_v29  ;;  %v1574_v19 = vadd.s32 %v1568_v29, %v1564_v55 }
  0xf5   : > { %v1877_v30 = vadd.s32 4294967169, %v1183_v18  ;;  %vm1429_vm3 = vc.u32 %v2463_v22, %v2469_v59  ;;  %v1558_v5 = vadd.s32 %v1557_v2, %v1547_v21  ;;  %v1573_v13 = vsel %vm1572_vm2, 1, %v3399_v41 }
  0xf6   : > { %v872_v47 = vand.u32 2139095040, %v2381_v25  ;;  %v1430_v26 = vadd.s32 1, %v1426_v27  ;;  %v1575_v32 = vadd.s32 %v1573_v13, %v1567_v31  ;;  %vm1576_vm4 = vc.u32 %v1574_v19, %v1570_v54 }
  0xf7   : > { %v562_v40 = vand.u32 2139095040, %v2305_v8  ;;  %v1868_v15 = vadd.s32 4294967169, %v718_v51  ;;  %v1549_v36 = vshrl.u32 %v1544_v14, 16  ;;  %v1577_v12 = vsel %vm1576_vm4, 1, %v3399_v41 }
  0xf8   : > { %vm1336_vm5 = vcmp.lt.s32.totalorder %v2208_v33, 0  ;;  %v1034_v43 = vadd.s32 1, %v1874_v38  ;;  %v1431_v42 = vsel %vm1429_vm3, %v1430_v26, %v1426_v27  ;;  %v1569_v7 = vshrl.u32 %v2438_v24, 16 }
  0xf9   : > { %v1579_v53 = vadd.s32 %v1577_v12, %v1575_v32  ;;  %v414_v63 = vadd.s32 1, %v1862_v17  ;;  %v1189_v61 = vadd.s32 1, %v1877_v30  ;;  %vm2482_vm6 = vcmp.le.f32.partialorder %v1334_v45, 0.7853982 }
  0xfa   : > { %v1432_v14 = vadd.s32 %v1431_v42, %v1427_v49  ;;  %v1559_v51 = vadd.s32 %v1558_v5, %v1549_v36  ;;  %v873_v18 = vshrl.u32 %v872_v47, 23  ;;  %v1571_v29 = vshrl.u32 %v1566_v35, 16 }
  0xfb   : > { %v1580_v50 = vadd.s32 %v1579_v53, %v1569_v7  ;;  %v3396_v37 = vand.u32 2147483647, %v2441_v20  ;;  %v1582_v24 = vmul.u32 %v2375_v44, %v2430_v52  ;;  %v724_v17 = vadd.s32 1, %v1868_v15 }
  0xfc   : > { %v1433_v57 = vadd.s32 536870912, %v1432_v14  ;;  %v1578_v55 = vadd.s32 %v1574_v19, %v1570_v54  ;;  %1964 = vpow2.f32 %v2451_v0  ;;  %vm1035_vm7 = vcmp.gt.s32.totalorder %v1034_v43, 0 }
  0xfd   : > { %v1581_v45 = vadd.s32 %v1580_v50, %v1571_v29  ;;  %v1031_v11 = vand.u32 8388607, %v3396_v37  ;;  %v563_v6 = vshrl.u32 %v562_v40, 23  ;;  %vm1190_vm8 = vcmp.gt.s32.totalorder %v1189_v61, 0 }
  0xfe   : > { %v1434_v49 = vshrl.u32 %v1433_v57, 30  ;;  %vm1584_vm9 = vc.u32 %v1559_v51, %v1578_v55  ;;  %vm415_vm10 = vcmp.gt.s32.totalorder %v414_v63, 0  ;;  %v1871_v35 = vadd.s32 4294967169, %v873_v18 }
  0xff   : > { %1966 = vpow2.f32 %v2457_v23  ;;  %v1585_v38 = vadd.s32 1, %v1581_v45  ;;  %vm725_vm11 = vcmp.gt.s32.totalorder %v724_v17, 0  ;;  %v1036_v44 = vsel %vm1035_vm7, %v1034_v43, 0 }
 0x100   : > { %v1435_v52 = vshll.u32 %v1434_v49, 30  ;;  %v1458_v21 = vsub.s32 4, %v1434_v49  ;;  %v1191_v2 = vsel %vm1190_vm8, %v1189_v61, 0  ;;  %v1032_v27 = vor.u32 8388608, %v1031_v11 }
 0x101   : > { %v1586_v0 = vsel %vm1584_vm9, %v1585_v38, %v1581_v45  ;;  %v3395_v54 = vand.u32 2147483647, %v2449_v62  ;;  %vm1491_vm12 = vcmp.lt.s32.totalorder %v2211_v34, 0  ;;  %v2498_v19 = vadd.s32 4294967169, %v563_v6 }
 0x102   : > { %v2500_v30 = vsub.s32 %v1432_v14, %v1435_v52  ;;  %v1459_v5 = vsel %vm1336_vm5, %v1458_v21, %v1434_v49  ;;  %v1587_v23 = vadd.s32 %v1586_v0, %v1582_v24  ;;  %v2504_v13 = vpop.eup %1964  ;;  %v2507_v47 = vsel %vm415_vm10, %v414_v63, 0 }
 0x103   : > { %v2509_v26 = vsel %vm725_vm11, %v724_v17, 0  ;;  %v1038_v32 = vand.u32 31, %v1036_v44  ;;  %v1461_v40 = vsel %vm2482_vm6, 0, %v1459_v5  ;;  %v2513_v15 = vand.u32 31, %v1191_v2 }
 0x104   : > { %vm1437_vm13 = vcmp.lt.s32.totalorder %v2500_v30, 0  ;;  %v1438_v36 = vsub.s32 0, %v2500_v30  ;;  %v1588_v12 = vadd.s32 536870912, %v1587_v23  ;;  %v2519_v42 = vadd.s32 1, %v1871_v35 }
 0x105   : > { %v2517_v43 = vpop.eup %1966  ;;  %v2522_v7 = vmul.f32 1.442695, %v2397_v48  ;;  %vm2526_vm14 = vcmp.le.f32.partialorder %v1489_v56, 0.7853982  ;;  %v2530_v63 = vshll.u32 %v1032_v27, 8  ;;  %v2537_v14 = vand.u32 31, %v2509_v26 }
 0x106   : > { %v2534_v61 = vand.u32 8388607, %v3395_v54  ;;  %v1439_v18 = vsel %vm1437_vm13, %v1438_v36, %v2500_v30  ;;  %v1478_v29 = vadd.s32 3, %v1461_v40  ;;  %v1589_v48 = vshrl.u32 %v1588_v12, 30 }
 0x107   : > { %v2540_v50 = vshrl.u32 %v1036_v44, 5  ;;  %v1039_v24 = vsub.s32 32, %v1038_v32  ;;  %v1428_v56 = vadd.s32 %v2469_v59, %v2463_v22  ;;  %v1440_v17 = vclz %v1439_v18 }
 0x108   : > { %v2544_v57 = vshrl.u32 %v1191_v2, 5  ;;  %v2547_v45 = vsub.s32 32, %v2513_v15  ;;  %v1583_v11 = vadd.s32 %v1578_v55, %v1559_v51  ;;  %v1590_v6 = vshll.u32 %v1589_v48, 30 }
 0x109   : > { %v1881_v49 = vadd.s32 4294967294, %v1440_v17  ;;  %v1613_v35 = vsub.s32 4, %v1589_v48  ;;  %v2550_v38 = vand.u32 65535, %v2530_v63  ;;  %v2553_v52 = vand.u32 3, %v1478_v29 }
 0x10a   : > { %v1591_v21 = vsub.s32 %v1587_v23, %v1590_v6  ;;  %v1041_v22 = vshll.u32 %v3401_v9, %v1038_v32  ;;  %v2557_v59 = vshrl.u32 %v2530_v63, 16  ;;  %v1044_v55 = vshll.u32 %v3397_v3, %v1038_v32 }
 0x10b   : > { %vm1882_vm15 = vcmp.lt.s32.totalorder %v1881_v49, 0  ;;  %v1614_v51 = vsel %vm1491_vm12, %v1613_v35, %v1589_v48  ;;  %v1047_v2 = vshll.u32 %v3405_v58, %v1038_v32  ;;  %v1042_v5 = vshrl.u32 %v3397_v3, %v1039_v24 }
 0x10c   : > { %v1443_v0 = vsel %vm1882_vm15, 0, %v1881_v49  ;;  %vm1592_vm0 = vcmp.lt.s32.totalorder %v1591_v21, 0  ;;  %v1593_v27 = vsub.s32 0, %v1591_v21  ;;  %v1040_v36 = vshrl.u32 %v3401_v9, %v1039_v24 }
 0x10d   : > { %v1444_v40 = vsub.s32 32, %v1443_v0  ;;  %v1448_v23 = vsub.s32 4294967266, %v1443_v0  ;;  %v1048_v12 = vshrl.u32 %v2047_v60, %v1039_v24  ;;  %v1616_v29 = vsel %vm2526_vm14, 0, %v1614_v51 }
 0x10e   : > { %v1594_v18 = vsel %vm1592_vm0, %v1593_v27, %v1591_v21  ;;  %v1045_v48 = vshrl.u32 %v3405_v58, %v1039_v24  ;;  %v3422_v17 = vmov 920167782   ;;  %v1445_v49 = vshll.u32 %v2500_v30, %v1443_v0 }
 0x10f   : > { %v1051_v6 = vshrl.u32 %v3422_v17, %v1039_v24  ;;  %v1446_v35 = vshrl.u32 %v1428_v56, %v1444_v40  ;;  %v1449_v54 = vadd.s32 127, %v1448_v23  ;;  %v1595_v37 = vclz %v1594_v18 }
 0x110   : > { %v1043_v44 = vor.u32 %v1042_v5, %v1041_v22  ;;  %v1050_v3 = vshll.u32 %v2047_v60, %v1038_v32  ;;  %v1053_v41 = vshll.u32 %v3422_v17, %v1038_v32  ;;  %v3423_v9 = vmov 1326507024  }
 0x111   : > { %v1054_v10 = vshrl.u32 %v3423_v9, %v1039_v24  ;;  %v1447_v27 = vor.u32 %v1446_v35, %v1445_v49  ;;  %v1450_v4 = vshll.u32 %v1449_v54, 23  ;;  %v1884_v28 = vadd.s32 4294967294, %v1595_v37 }
 0x112   : > { %v1049_v51 = vor.u32 %v1048_v12, %v1047_v2  ;;  %v1633_v8 = vadd.s32 3, %v1616_v29  ;;  %v1046_v58 = vor.u32 %v1045_v48, %v1044_v55  ;;  %v1052_v16 = vor.u32 %v1051_v6, %v1050_v3 }
 0x113   : > { %v1055_v1 = vor.u32 %v1054_v10, %v1053_v41  ;;  %v1451_v39 = vor.u32 4788187, %v1450_v4  ;;  %vm1885_vm1 = vcmp.lt.s32.totalorder %v1884_v28, 0  ;;  %vm1056_vm2 = vcmp.lt.s32.totalorder %v2540_v50, 1 }
 0x114   : > { %vm1057_vm3 = vcmp.lt.s32.totalorder %v2540_v50, 2  ;;  %v1454_v30 = vcvt.s32.f32 %v1447_v27  ;;  %v1598_v56 = vsel %vm1885_vm1, 0, %v1884_v28  ;;  %vm1058_vm4 = vcmp.lt.s32.totalorder %v2540_v50, 3 }
 0x115   : > { %vm1059_vm7 = vcmp.lt.s32.totalorder %v2540_v50, 4  ;;  %v1452_v32 = vand.u32 2147483647, %v1451_v39  ;;  %v1599_v54 = vsub.s32 32, %v1598_v56  ;;  %v1603_v37 = vsub.s32 4294967266, %v1598_v56 }
 0x116   : > { %v1061_v24 = vsel %vm1059_vm7, %v1049_v51, 2102212464  ;;  %v1600_v22 = vshll.u32 %v1591_v21, %v1598_v56  ;;  %v1064_v3 = vsel %vm1056_vm2, %v1043_v44, %v1046_v58  ;;  %v1065_v4 = vsel %vm1059_vm7, %v1052_v16, 920167782 }
 0x117   : > { %v1069_v10 = vsel %vm1059_vm7, %v1055_v1, 1326507024  ;;  %v1455_v41 = vmul.f32 %v1454_v30, %v1452_v32  ;;  %v1601_v55 = vshrl.u32 %v1583_v11, %v1599_v54  ;;  %v1604_v2 = vadd.s32 127, %v1603_v37 }
 0x118   : > { %v1068_v28 = vsel %vm1056_vm2, %v1046_v58, %v1049_v51  ;;  %v1060_v0 = vsel %vm1056_vm2, %v1040_v36, %v1043_v44  ;;  %v1062_v39 = vsel %vm1058_vm4, %v1046_v58, %v1061_v24  ;;  %v1066_v21 = vsel %vm1058_vm4, %v1049_v51, %v1065_v4 }
 0x119   : > { %v1070_v5 = vsel %vm1058_vm4, %v1052_v16, %v1069_v10  ;;  %v1456_v40 = vxor.u32 2147483648, %v1455_v41  ;;  %v1602_v1 = vor.u32 %v1601_v55, %v1600_v22  ;;  %v1605_v23 = vshll.u32 %v1604_v2, 23 }
 0x11a   : > { %v1067_v11 = vsel %vm1057_vm3, %v1064_v3, %v1066_v21  ;;  %v2592_v12 = vand.u32 3, %v1633_v8  ;;  %v1071_v44 = vsel %vm1057_vm3, %v1068_v28, %v1070_v5  ;;  %v2600_v16 = vsel %vm1057_vm3, %v1060_v0, %v1062_v39 }
 0x11b   : > { %v1097_v36 = vand.u32 65535, %v1067_v11  ;;  %v1098_v18 = vshrl.u32 %v1067_v11, 16  ;;  %v1457_v58 = vsel %vm1336_vm5, %v1456_v40, %v1455_v41  ;;  %v1606_v29 = vor.u32 4788187, %v1605_v23 }
 0x11c   : > { %v1075_v48 = vand.u32 65535, %v1071_v44  ;;  %v2605_v6 = vsel %vm2482_vm6, %v2208_v33, %v1457_v58  ;;  %v1076_v8 = vshrl.u32 %v1071_v44, 16  ;;  %v3424_v35 = vmov 683565275  }
 0x11d   : > { %v2608_v49 = vmul.u32 %v1098_v18, %v2550_v38  ;;  %v2612_v27 = vshll.u32 %v3424_v35, %v2513_v15  ;;  %v1462_v51 = vmul.f32 %v2605_v6, %v2605_v6  ;;  %v1607_v50 = vand.u32 2147483647, %v1606_v29 }
 0x11e   : > { %v1609_v30 = vcvt.s32.f32 %v1602_v1  ;;  %v1079_v56 = vmul.u32 %v1075_v48, %v2557_v59  ;;  %v1077_v32 = vmul.u32 %v1075_v48, %v2550_v38  ;;  %v1078_v31 = vmul.u32 %v1076_v8, %v2550_v38 }
 0x11f   : > { %v1080_v54 = vmul.u32 %v1076_v8, %v2557_v59  ;;  %v1099_v37 = vmul.u32 %v1097_v36, %v2550_v38  ;;  %v1463_v24 = vmul.f32 -0.001358992, %v1462_v51  ;;  %v1470_v22 = vmul.f32 -0.00019511016, %v1462_v51 }
 0x120   : > { %v1610_v3 = vmul.f32 %v1609_v30, %v1607_v50  ;;  %v2622_v4 = vmul.u32 %v1097_v36, %v2557_v59  ;;  %v1081_v10 = vshll.u32 %v1078_v31, 16  ;;  %v1083_v41 = vshll.u32 %v1079_v56, 16 }
 0x121   : > { %v1102_v55 = vmul.u32 %v1098_v18, %v2557_v59  ;;  %v1103_v2 = vshll.u32 %v2608_v49, 16  ;;  %v1464_v28 = vadd.f32 0.041655596, %v1463_v24  ;;  %v1471_v0 = vadd.f32 0.008332121, %v1470_v22 }
 0x122   : > { %v1611_v39 = vxor.u32 2147483648, %v1610_v3  ;;  %v1082_v21 = vshrl.u32 %v1078_v31, 16  ;;  %v1084_v5 = vshrl.u32 %v1079_v56, 16  ;;  %vm1085_vm5 = vc.u32 %v1077_v32, %v1081_v10 }
 0x123   : > { %v1087_v40 = vadd.s32 %v1081_v10, %v1077_v32  ;;  %v1104_v38 = vshrl.u32 %v2608_v49, 16  ;;  %v1465_v1 = vmul.f32 %v1464_v28, %v1462_v51  ;;  %v1472_v23 = vmul.f32 %v1471_v0, %v1462_v51 }
 0x124   : > { %v1612_v11 = vsel %vm1491_vm12, %v1611_v39, %v1610_v3  ;;  %v3425_v44 = vmov 0   ;;  %vm1107_vm8 = vc.u32 %v1099_v37, %v1103_v2  ;;  %vm1484_vm9 = vcmp.eq.s32.totalorder %v2553_v52, 2 }
 0x125   : > { %v1086_v36 = vsel %vm1085_vm5, 1, %v3425_v44  ;;  %v2633_v59 = vsel %vm2526_vm14, %v2211_v34, %v1612_v11  ;;  %vm1089_vm6 = vc.u32 %v1087_v40, %v1083_v41  ;;  %v1466_v58 = vadd.f32 -0.4999988, %v1465_v1 }
 0x126   : > { %v1088_v18 = vadd.s32 %v1086_v36, %v1080_v54  ;;  %v1473_v29 = vadd.f32 -0.16666654, %v1472_v23  ;;  %v1617_v48 = vmul.f32 %v2633_v59, %v2633_v59  ;;  %v1090_v8 = vsel %vm1089_vm6, 1, %v3425_v44 }
 0x127   : > { %vm1481_vm10 = vcmp.eq.s32.totalorder %v2553_v52, 0  ;;  %v1105_v50 = vshll.u32 %v2622_v4, 16  ;;  %v1108_v53 = vsel %vm1107_vm8, 1, %v3425_v44  ;;  %v1109_v30 = vadd.s32 %v1103_v2, %v1099_v37 }
 0x128   : > { %v1092_v49 = vadd.s32 %v1090_v8, %v1088_v18  ;;  %v1467_v56 = vmul.f32 %v1466_v58, %v1462_v51  ;;  %v1474_v32 = vmul.f32 %v1473_v29, %v1462_v51  ;;  %vm1480_vm11 = vcmp.lt.s32.totalorder %v2553_v52, 2 }
 0x129   : > { %v1618_v31 = vmul.f32 -0.001358992, %v1617_v48  ;;  %v1625_v54 = vmul.f32 -0.00019511016, %v1617_v48  ;;  %vm1477_vm12 = vweird.f32 %v2208_v33  ;;  %v1110_v22 = vadd.s32 %v1108_v53, %v1102_v55 }
 0x12a   : > { %v1093_v24 = vadd.s32 %v1092_v49, %v1082_v21  ;;  %vm1111_vm13 = vc.u32 %v1109_v30, %v1105_v50  ;;  %v3426_v3 = vmov 2475754826   ;;  %v1468_v41 = vadd.f32 1.0, %v1467_v56 }
 0x12b   : > { %v1197_v10 = vshrl.u32 %v3426_v3, %v2547_v45  ;;  %v1475_v28 = vadd.f32 1.0, %v1474_v32  ;;  %v1619_v0 = vadd.f32 0.041655596, %v1618_v31  ;;  %v1626_v39 = vadd.f32 0.008332121, %v1625_v54 }
 0x12c   : > { %v2646_v40 = vadd.s32 %v1093_v24, %v1084_v5  ;;  %v1106_v51 = vshrl.u32 %v2622_v4, 16  ;;  %v1112_v37 = vsel %vm1111_vm13, 1, %v3425_v44  ;;  %v2650_v2 = vadd.s32 %v1109_v30, %v1105_v50 }
 0x12d   : > { %v1476_v1 = vmul.f32 %v1475_v28, %v2605_v6  ;;  %v1485_v21 = vxor.u32 2147483648, %v1468_v41  ;;  %v1620_v55 = vmul.f32 %v1619_v0, %v1617_v48  ;;  %v1627_v23 = vmul.f32 %v1626_v39, %v1617_v48 }
 0x12e   : > { %v1114_v11 = vadd.s32 %v1112_v37, %v1110_v22  ;;  %v2654_v36 = vor.u32 %v1197_v10, %v2612_v27  ;;  %v1199_v18 = vshll.u32 %v3426_v3, %v2513_v15  ;;  %v3427_v5 = vmov 2131351028  }
 0x12f   : > { %v1200_v58 = vshrl.u32 %v3427_v5, %v2547_v45  ;;  %v1482_v4 = vxor.u32 2147483648, %v1476_v1  ;;  %v1621_v29 = vadd.f32 -0.4999988, %v1620_v55  ;;  %v1628_v8 = vadd.f32 -0.16666654, %v1627_v23 }
 0x130   : > { %vm1119_vm14 = vc.u32 %v2646_v40, %v2650_v2  ;;  %v1486_v6 = vsel %vm1484_vm9, %v1485_v21, %v1476_v1  ;;  %vm1636_vm15 = vcmp.eq.s32.totalorder %v2592_v12, 0  ;;  %v1115_v49 = vadd.s32 %v1114_v11, %v1104_v38 }
 0x131   : > { %v2665_v27 = vor.u32 %v1200_v58, %v1199_v18  ;;  %v1202_v50 = vshll.u32 %v3427_v5, %v2513_v15  ;;  %v1483_v53 = vsel %vm1481_vm10, %v1468_v41, %v1482_v4  ;;  %v1622_v30 = vmul.f32 %v1621_v29, %v1617_v48 }
 0x132   : > { %v1629_v56 = vmul.f32 %v1628_v8, %v1617_v48  ;;  %vm1635_vm0 = vcmp.lt.s32.totalorder %v2592_v12, 2  ;;  %v1203_v32 = vshrl.u32 %v2047_v60, %v2547_v45  ;;  %vm880_vm1 = vcmp.gt.s32.totalorder %v2519_v42, 0 }
 0x133   : > { %v1487_v38 = vsel %vm1480_vm11, %v1483_v53, %v1486_v6  ;;  %v1116_v31 = vadd.s32 %v1115_v49, %v1106_v51  ;;  %v1205_v54 = vshll.u32 %v2047_v60, %v2513_v15  ;;  %v1206_v24 = vshrl.u32 %v3422_v17, %v2547_v45 }
 0x134   : > { %v1488_v48 = vsel %vm1477_vm12, nan, %v1487_v38  ;;  %v1623_v22 = vadd.f32 1.0, %v1622_v30  ;;  %v1630_v10 = vadd.f32 1.0, %v1629_v56  ;;  %v1208_v41 = vshll.u32 %v3422_v17, %v2513_v15 }
 0x135   : > { %v1674_v28 = vmul.f32 %v2504_v13, %v1488_v48  ;;  %v1120_v0 = vadd.s32 1, %v1116_v31  ;;  %v1207_v52 = vor.u32 %v1206_v24, %v1205_v54  ;;  %v1209_v39 = vshrl.u32 %v3423_v9, %v2547_v45 }
 0x136   : > { %v1631_v51 = vmul.f32 %v1630_v10, %v2633_v59  ;;  %v1640_v37 = vxor.u32 2147483648, %v1623_v22  ;;  %v1117_v1 = vmul.u32 %v2530_v63, %v2600_v16  ;;  %v1204_v33 = vor.u32 %v1203_v32, %v1202_v50 }
 0x137   : > { %1709 = vmatpush.msrb.mxu2 %v1674_v28  ;;  %vm1639_vm2 = vcmp.eq.s32.totalorder %v2592_v12, 2  ;;  %v1121_v15 = vsel %vm1119_vm14, %v1120_v0, %v1116_v31  ;;  %v1210_v13 = vor.u32 %v1209_v39, %v1208_v41  ;;  %vm1211_vm3 = vcmp.lt.s32.totalorder %v2544_v57, 1 }
 0x138   : > { %v1637_v21 = vxor.u32 2147483648, %v1631_v51  ;;  %v1122_v55 = vadd.s32 %v1121_v15, %v1117_v1  ;;  %vm1212_vm4 = vcmp.lt.s32.totalorder %v2544_v57, 2  ;;  %vm1214_vm7 = vcmp.lt.s32.totalorder %v2544_v57, 4 }
 0x139   : > { %v1641_v59 = vsel %vm1639_vm2, %v1640_v37, %v1631_v51  ;;  %vm1213_vm5 = vcmp.lt.s32.totalorder %v2544_v57, 3  ;;  %v1219_v63 = vsel %vm1211_vm3, %v2654_v36, %v2665_v27  ;;  %v1220_v16 = vsel %vm1214_vm7, %v1207_v52, 920167782 }
 0x13a   : > { %v1638_v23 = vsel %vm1636_vm15, %v1623_v22, %v1637_v21  ;;  %v1123_v11 = vadd.s32 536870912, %v1122_v55  ;;  %v1221_v18 = vsel %vm1213_vm5, %v1204_v33, %v1220_v16  ;;  %v1223_v58 = vsel %vm1211_vm3, %v2665_v27, %v1204_v33 }
 0x13b   : > { %vm1632_vm6 = vweird.f32 %v2211_v34  ;;  %v1642_v4 = vsel %vm1635_vm0, %v1638_v23, %v1641_v59  ;;  %v1222_v29 = vsel %vm1212_vm4, %v1219_v63, %v1221_v18  ;;  %v1224_v8 = vsel %vm1214_vm7, %v1210_v13, 1326507024 }
 0x13c   : > { %v1643_v6 = vsel %vm1632_vm6, nan, %v1642_v4  ;;  %v2719_v49 = vshrl.u32 %v1123_v11, 30  ;;  %v1225_v50 = vsel %vm1213_vm5, %v1207_v52, %v1224_v8  ;;  %v3428_v53 = vor.u32 8388608, %v2534_v61 }
 0x13d   : > { %v2728_v34 = vadd.s32 1, %v2498_v19  ;;  %v1675_v12 = vmul.f32 %v2517_v43, %v1643_v6  ;;  %v1226_v56 = vsel %vm1212_vm4, %v1223_v58, %v1225_v50  ;;  %v1253_v32 = vshrl.u32 %v1222_v29, 16 }
 0x13e   : > { %v2725_v30 = vshll.u32 %v3428_v53, 8  ;;  %v2734_v38 = vand.u32 31, %v2507_v47  ;;  %v2739_v31 = vsel %vm880_vm1, %v2519_v42, 0  ;;  %1968 = vpow2.f32 %v2522_v7 }
 0x13f   : > { %v1125_v61 = vshll.u32 %v2719_v49, 30  ;;  %1732 = vmatpush.msrb.mxu3 %v1675_v12  ;;  %v1230_v54 = vand.u32 65535, %v1226_v56  ;;  %v1231_v24 = vshrl.u32 %v1226_v56, 16  ;;  %v2746_v48 = vshrl.u32 %v2509_v26, 5 }
 0x140   : > { %v1228_v19 = vand.u32 65535, %v2725_v30  ;;  %v1229_v43 = vshrl.u32 %v2725_v30, 16  ;;  %v2749_v22 = vsub.s32 32, %v2537_v14  ;;  %v1216_v42 = vsel %vm1214_vm7, %v1204_v33, 2102212464 }
 0x141   : > { %v1126_v10 = vsub.s32 %v1122_v55, %v1125_v61  ;;  %v1195_v7 = vshrl.u32 %v3424_v35, %v2547_v45  ;;  %v2756_v52 = vand.u32 31, %v2739_v31  ;;  %v1252_v26 = vand.u32 65535, %v1222_v29 }
 0x142   : > { %v1233_v41 = vmul.u32 %v1231_v24, %v1228_v19  ;;  %v1234_v28 = vmul.u32 %v1230_v54, %v1229_v43  ;;  %v1255_v0 = vmul.u32 %v1253_v32, %v1228_v19  ;;  %v1217_v37 = vsel %vm1213_vm5, %v2665_v27, %v1216_v42 }
 0x143   : > { %vm1127_vm8 = vcmp.lt.s32.totalorder %v1126_v10, 0  ;;  %v1128_v39 = vsub.s32 0, %v1126_v10  ;;  %v1215_v51 = vsel %vm1211_vm3, %v1195_v7, %v2654_v36  ;;  %v1232_v1 = vmul.u32 %v1230_v54, %v1228_v19 }
 0x144   : > { %v1236_v33 = vshll.u32 %v1233_v41, 16  ;;  %v2764_v45 = vpop.eup %1968  ;;  %vm1026_vm9 = vcmp.lt.s32.totalorder %v2441_v20, 0  ;;  %v1235_v13 = vmul.u32 %v1231_v24, %v1229_v43  ;;  %v1238_v21 = vshll.u32 %v1234_v28, 16 }
 0x145   : > { %v1129_v15 = vsel %vm1127_vm8, %v1128_v39, %v1126_v10  ;;  %v3429_v55 = vand.u32 2147483647, %v2441_v20  ;;  %v1258_v16 = vshll.u32 %v1255_v0, 16  ;;  %v2775_v27 = vsel %vm1212_vm4, %v1215_v51, %v1217_v37 }
 0x146   : > { %v1130_v36 = vclz %v1129_v15  ;;  %vm1240_vm11 = vc.u32 %v1232_v1, %v1236_v33  ;;  %v1242_v63 = vadd.s32 %v1236_v33, %v1232_v1  ;;  %v1254_v11 = vmul.u32 %v1252_v26, %v1228_v19 }
 0x147   : > { %vm2769_vm10 = vcmp.le.f32.partialorder %v3429_v55, 0.7853982  ;;  %v1241_v23 = vsel %vm1240_vm11, 1, %v3425_v44  ;;  %v1256_v18 = vmul.u32 %v1252_v26, %v1229_v43  ;;  %v1148_v4 = vsub.s32 4, %v2719_v49 }
 0x148   : > { %v1875_v58 = vadd.s32 4294967294, %v1130_v36  ;;  %v1243_v29 = vadd.s32 %v1241_v23, %v1235_v13  ;;  %vm1244_vm12 = vc.u32 %v1242_v63, %v1238_v21  ;;  %v1237_v8 = vshrl.u32 %v1233_v41, 16 }
 0x149   : > { %v1245_v6 = vsel %vm1244_vm12, 1, %v3425_v44  ;;  %v1257_v50 = vmul.u32 %v1253_v32, %v1229_v43  ;;  %vm1262_vm13 = vc.u32 %v1254_v11, %v1258_v16  ;;  %v1264_v12 = vadd.s32 %v1258_v16, %v1254_v11 }
 0x14a   : > { %vm1876_vm14 = vcmp.lt.s32.totalorder %v1875_v58, 0  ;;  %v1247_v53 = vadd.s32 %v1245_v6, %v1243_v29  ;;  %v1263_v57 = vsel %vm1262_vm13, 1, %v3425_v44  ;;  %v1118_v56 = vadd.s32 %v2650_v2, %v2646_v40 }
 0x14b   : > { %v1133_v61 = vsel %vm1876_vm14, 0, %v1875_v58  ;;  %v1260_v19 = vshll.u32 %v1256_v18, 16  ;;  %v1265_v54 = vadd.s32 %v1263_v57, %v1257_v50  ;;  %v1149_v7 = vsel %vm1026_vm9, %v1148_v4, %v2719_v49 }
 0x14c   : > { %v1134_v24 = vsub.s32 32, %v1133_v61  ;;  %v1138_v42 = vsub.s32 4294967266, %v1133_v61  ;;  %v1248_v41 = vadd.s32 %v1247_v53, %v1237_v8  ;;  %v1239_v32 = vshrl.u32 %v1234_v28, 16 }
 0x14d   : > { %vm1266_vm15 = vc.u32 %v1264_v12, %v1260_v19  ;;  %v1272_v43 = vmul.u32 %v2725_v30, %v2775_v27  ;;  %v714_v39 = vand.u32 2147483647, %v2353_v46  ;;  %v1135_v26 = vshll.u32 %v1126_v10, %v1133_v61 }
 0x14e   : > { %v1136_v51 = vshrl.u32 %v1118_v56, %v1134_v24  ;;  %v1139_v40 = vadd.s32 127, %v1138_v42  ;;  %v1267_v2 = vsel %vm1266_vm15, 1, %v3425_v44  ;;  %v1151_v37 = vsel %vm2769_vm10, 0, %v1149_v7 }
 0x14f   : > { %v2792_v1 = vadd.s32 %v1248_v41, %v1239_v32  ;;  %v1259_v33 = vshrl.u32 %v1255_v0, 16  ;;  %v1269_v49 = vadd.s32 %v1267_v2, %v1265_v54  ;;  %v1261_v13 = vshrl.u32 %v1256_v18, 16 }
 0x150   : > { %v1137_v15 = vor.u32 %v1136_v51, %v1135_v26  ;;  %v1140_v28 = vshll.u32 %v1139_v40, 23  ;;  %v2794_v21 = vadd.s32 %v1264_v12, %v1260_v19  ;;  %v721_v10 = vand.u32 8388607, %v714_v39 }
 0x151   : > { %v1270_v30 = vadd.s32 %v1269_v49, %v1259_v33  ;;  %v731_v55 = vshll.u32 %v3424_v35, %v2537_v14  ;;  %v735_v36 = vshrl.u32 %v3427_v5, %v2749_v22  ;;  %v732_v0 = vshrl.u32 %v3426_v3, %v2749_v22 }
 0x152   : > { %v1141_v63 = vor.u32 4788187, %v1140_v28  ;;  %v734_v16 = vshll.u32 %v3426_v3, %v2537_v14  ;;  %v738_v27 = vshrl.u32 %v2047_v60, %v2749_v22  ;;  %v1144_v23 = vcvt.s32.f32 %v1137_v15 }
 0x153   : > { %v1271_v11 = vadd.s32 %v1270_v30, %v1261_v13  ;;  %vm1274_vm0 = vc.u32 %v2792_v1, %v2794_v21  ;;  %v737_v18 = vshll.u32 %v3427_v5, %v2537_v14  ;;  %v740_v29 = vshll.u32 %v2047_v60, %v2537_v14 }
 0x154   : > { %v1142_v58 = vand.u32 2147483647, %v1141_v63  ;;  %v736_v4 = vor.u32 %v735_v36, %v734_v16  ;;  %v741_v8 = vshrl.u32 %v3422_v17, %v2749_v22  ;;  %v743_v53 = vshll.u32 %v3422_v17, %v2537_v14 }
 0x155   : > { %v1275_v6 = vadd.s32 1, %v1271_v11  ;;  %v739_v50 = vor.u32 %v738_v27, %v737_v18  ;;  %v744_v57 = vshrl.u32 %v3423_v9, %v2749_v22  ;;  %v1168_v56 = vadd.s32 3, %v1151_v37 }
 0x156   : > { %v1145_v12 = vmul.f32 %v1144_v23, %v1142_v58  ;;  %v733_v61 = vor.u32 %v732_v0, %v731_v55  ;;  %v742_v19 = vor.u32 %v741_v8, %v740_v29  ;;  %v722_v24 = vor.u32 8388608, %v721_v10 }
 0x157   : > { %v1276_v54 = vsel %vm1274_vm0, %v1275_v6, %v1271_v11  ;;  %v745_v42 = vor.u32 %v744_v57, %v743_v53  ;;  %vm746_vm1 = vcmp.lt.s32.totalorder %v2746_v48, 1  ;;  %vm747_vm2 = vcmp.lt.s32.totalorder %v2746_v48, 2 }
 0x158   : > { %v1146_v7 = vxor.u32 2147483648, %v1145_v12  ;;  %v1277_v41 = vadd.s32 %v1276_v54, %v1272_v43  ;;  %vm749_vm3 = vcmp.lt.s32.totalorder %v2746_v48, 4  ;;  %vm748_vm4 = vcmp.lt.s32.totalorder %v2746_v48, 3 }
 0x159   : > { %v755_v14 = vsel %vm749_vm3, %v742_v19, 920167782  ;;  %v758_v32 = vsel %vm746_vm1, %v736_v4, %v739_v50  ;;  %v759_v26 = vsel %vm749_vm3, %v745_v42, 1326507024  ;;  %v754_v43 = vsel %vm746_vm1, %v733_v61, %v736_v4 }
 0x15a   : > { %v1147_v51 = vsel %vm1026_vm9, %v1146_v7, %v1145_v12  ;;  %v1278_v40 = vadd.s32 536870912, %v1277_v41  ;;  %v760_v2 = vsel %vm748_vm4, %v742_v19, %v759_v26  ;;  %v756_v33 = vsel %vm748_vm4, %v739_v50, %v755_v14 }
 0x15b   : > { %v2839_v37 = vsel %vm2769_vm10, %v2441_v20, %v1147_v51  ;;  %v761_v49 = vsel %vm747_vm2, %v758_v32, %v760_v2  ;;  %v2845_v15 = vshll.u32 %v722_v24, 8  ;;  %v730_v55 = vshrl.u32 %v3424_v35, %v2749_v22 }
 0x15c   : > { %v1152_v28 = vmul.f32 %v2839_v37, %v2839_v37  ;;  %v1279_v13 = vshrl.u32 %v1278_v40, 30  ;;  %v765_v30 = vand.u32 65535, %v761_v49  ;;  %v766_v10 = vshrl.u32 %v761_v49, 16 }
 0x15d   : > { %v751_v59 = vsel %vm749_vm3, %v739_v50, 2102212464  ;;  %v2854_v36 = vand.u32 65535, %v2845_v15  ;;  %v2857_v63 = vshrl.u32 %v2845_v15, 16  ;;  %v757_v23 = vsel %vm747_vm2, %v754_v43, %v756_v33 }
 0x15e   : > { %v1153_v0 = vmul.f32 -0.001358992, %v1152_v28  ;;  %v1160_v16 = vmul.f32 -0.00019511016, %v1152_v28  ;;  %v1280_v27 = vshll.u32 %v1279_v13, 30  ;;  %v2862_v11 = vsub.s32 32, %v2756_v52 }
 0x15f   : > { %v2864_v18 = vand.u32 3, %v1168_v56  ;;  %v768_v22 = vmul.u32 %v766_v10, %v2854_v36  ;;  %v2868_v58 = vmul.u32 %v765_v30, %v2857_v63  ;;  %vm1181_vm7 = vcmp.lt.s32.totalorder %v2449_v62, 0 }
 0x160   : > { %v1154_v29 = vadd.f32 0.041655596, %v1153_v0  ;;  %v1161_v8 = vadd.f32 0.008332121, %v1160_v16  ;;  %v2871_v6 = vsub.s32 %v1277_v41, %v1280_v27  ;;  %v750_v50 = vsel %vm746_vm1, %v730_v55, %v733_v61 }
 0x161   : > { %v752_v53 = vsel %vm748_vm4, %v736_v4, %v751_v59  ;;  %v767_v57 = vmul.u32 %v765_v30, %v2854_v36  ;;  %v771_v12 = vshll.u32 %v768_v22, 16  ;;  %v788_v56 = vshrl.u32 %v757_v23, 16 }
 0x162   : > { %v1155_v19 = vmul.f32 %v1154_v29, %v1152_v28  ;;  %v1162_v54 = vmul.f32 %v1161_v8, %v1152_v28  ;;  %vm1282_vm5 = vcmp.lt.s32.totalorder %v2871_v6, 0  ;;  %v1283_v24 = vsub.s32 0, %v2871_v6 }
 0x163   : > { %v770_v42 = vmul.u32 %v766_v10, %v2857_v63  ;;  %v773_v7 = vshll.u32 %v2868_v58, 16  ;;  %vm775_vm6 = vc.u32 %v767_v57, %v771_v12  ;;  %v777_v41 = vadd.s32 %v771_v12, %v767_v57  ;;  %v3435_v10 = vld [vmem:[#allocation11_spill] sm:$0xff] }
 0x164   : > { %v1156_v61 = vadd.f32 -0.4999988, %v1155_v19  ;;  %v1163_v14 = vadd.f32 -0.16666654, %v1162_v54  ;;  %v1284_v4 = vsel %vm1282_vm5, %v1283_v24, %v2871_v6  ;;  %v776_v32 = vsel %vm775_vm6, 1, %v3425_v44 }
 0x165   : > { %v1285_v26 = vclz %v1284_v4  ;;  %v1303_v51 = vsub.s32 4, %v1279_v13  ;;  %v778_v40 = vadd.s32 %v776_v32, %v770_v42  ;;  %vm779_vm8 = vc.u32 %v777_v41, %v773_v7 }
 0x166   : > { %v1157_v43 = vmul.f32 %v1156_v61, %v1152_v28  ;;  %v1164_v2 = vmul.f32 %v1163_v14, %v1152_v28  ;;  %vm1170_vm9 = vcmp.lt.s32.totalorder %v2864_v18, 2  ;;  %v780_v33 = vsel %vm779_vm8, 1, %v3425_v44 }
 0x167   : > { %v787_v49 = vand.u32 65535, %v757_v23  ;;  %vm1167_vm10 = vweird.f32 %v2441_v20  ;;  %vm1171_vm11 = vcmp.eq.s32.totalorder %v2864_v18, 0  ;;  %vm1174_vm12 = vcmp.eq.s32.totalorder %v2864_v18, 2 }
 0x168   : > { %v3432_v30 = vand.u32 2147483647, %v2449_v62  ;;  %v1273_v28 = vadd.s32 %v2794_v21, %v2792_v1  ;;  %v1878_v55 = vadd.s32 4294967294, %v1285_v26  ;;  %v1158_v59 = vadd.f32 1.0, %v1157_v43 }
 0x169   : > { %v1165_v0 = vadd.f32 1.0, %v1164_v2  ;;  %v782_v16 = vadd.s32 %v780_v33, %v778_v40  ;;  %v790_v27 = vmul.u32 %v788_v56, %v2854_v36  ;;  %v1304_v23 = vsel %vm1181_vm7, %v1303_v51, %v1279_v13 }
 0x16a   : > { %vm2891_vm13 = vcmp.le.f32.partialorder %v3432_v30, 0.7853982  ;;  %vm1879_vm14 = vcmp.lt.s32.totalorder %v1878_v55, 0  ;;  %v2902_v29 = vsel %vm747_vm2, %v750_v50, %v752_v53  ;;  %v772_v8 = vshrl.u32 %v768_v22, 16 }
 0x16b   : > { %v1166_v57 = vmul.f32 %v1165_v0, %v2839_v37  ;;  %v1175_v12 = vxor.u32 2147483648, %v1158_v59  ;;  %v1288_v19 = vsel %vm1879_vm14, 0, %v1878_v55  ;;  %v791_v1 = vmul.u32 %v787_v49, %v2857_v63 }
 0x16c   : > { %v1289_v21 = vsub.s32 32, %v1288_v19  ;;  %v1293_v54 = vsub.s32 4294967266, %v1288_v19  ;;  %v774_v24 = vshrl.u32 %v2868_v58, 16  ;;  %v793_v42 = vshll.u32 %v790_v27, 16 }
 0x16d   : > { %v1172_v7 = vxor.u32 2147483648, %v1166_v57  ;;  %v783_v41 = vadd.s32 %v782_v16, %v772_v8  ;;  %v789_v13 = vmul.u32 %v787_v49, %v2854_v36  ;;  %v792_v48 = vmul.u32 %v788_v56, %v2857_v63 }
 0x16e   : > { %v1176_v22 = vsel %vm1174_vm12, %v1175_v12, %v1166_v57  ;;  %v1290_v37 = vshll.u32 %v2871_v6, %v1288_v19  ;;  %v1291_v50 = vshrl.u32 %v1273_v28, %v1289_v21  ;;  %v1294_v53 = vadd.s32 127, %v1293_v54 }
 0x16f   : > { %v1173_v61 = vsel %vm1171_vm11, %v1158_v59, %v1172_v7  ;;  %v795_v14 = vshll.u32 %v791_v1, 16  ;;  %vm797_vm15 = vc.u32 %v789_v13, %v793_v42  ;;  %v799_v58 = vadd.s32 %v793_v42, %v789_v13 }
 0x170   : > { %v1177_v4 = vsel %vm1170_vm9, %v1173_v61, %v1176_v22  ;;  %v1292_v32 = vor.u32 %v1291_v50, %v1290_v37  ;;  %v1295_v36 = vshll.u32 %v1294_v53, 23  ;;  %v798_v63 = vsel %vm797_vm15, 1, %v3425_v44 }
 0x171   : > { %vm570_vm0 = vcmp.gt.s32.totalorder %v2728_v34, 0  ;;  %v1178_v6 = vsel %vm1167_vm10, nan, %v1177_v4  ;;  %v1306_v56 = vsel %vm2891_vm13, 0, %v1304_v23  ;;  %v800_v26 = vadd.s32 %v798_v63, %v792_v48 }
 0x172   : > { %vm801_vm1 = vc.u32 %v799_v58, %v795_v14  ;;  %v1672_v51 = vmul.f32 %v2764_v45, %v1178_v6  ;;  %v1296_v40 = vor.u32 4788187, %v1295_v36  ;;  %v2923_v43 = vadd.s32 %v783_v41, %v774_v24 }
 0x173   : > { %v802_v18 = vsel %vm801_vm1, 1, %v3425_v44  ;;  %v2927_v2 = vshrl.u32 %v2739_v31, 5  ;;  %v794_v33 = vshrl.u32 %v790_v27, 16  ;;  %v869_v20 = vand.u32 2147483647, %v2381_v25 }
 0x174   : > { %v804_v49 = vadd.s32 %v802_v18, %v800_v26  ;;  %1710 = vmatpush.msrb.mxu2 %v1672_v51  ;;  %v1297_v30 = vand.u32 2147483647, %v1296_v40  ;;  %v1299_v28 = vcvt.s32.f32 %v1292_v32  ;;  %v1323_v55 = vadd.s32 3, %v1306_v56 }
 0x175   : > { %v2930_v59 = vadd.s32 %v799_v58, %v795_v14  ;;  %v796_v0 = vshrl.u32 %v791_v1, 16  ;;  %v807_v16 = vmul.u32 %v2845_v15, %v2902_v29  ;;  %v876_v23 = vand.u32 8388607, %v869_v20 }
 0x176   : > { %v805_v45 = vadd.s32 %v804_v49, %v794_v33  ;;  %v1300_v31 = vmul.f32 %v1299_v28, %v1297_v30  ;;  %v887_v27 = vshrl.u32 %v3426_v3, %v2862_v11  ;;  %v890_v8 = vshrl.u32 %v3427_v5, %v2862_v11 }
 0x177   : > { %vm809_vm2 = vc.u32 %v2923_v43, %v2930_v59  ;;  %v886_v12 = vshll.u32 %v3424_v35, %v2756_v52  ;;  %v889_v15 = vshll.u32 %v3426_v3, %v2756_v52  ;;  %v893_v29 = vshrl.u32 %v2047_v60, %v2862_v11 }
 0x178   : > { %v806_v57 = vadd.s32 %v805_v45, %v796_v0  ;;  %v1301_v19 = vxor.u32 2147483648, %v1300_v31  ;;  %v892_v1 = vshll.u32 %v3427_v5, %v2756_v52  ;;  %v895_v21 = vshll.u32 %v2047_v60, %v2756_v52 }
 0x179   : > { %v896_v54 = vshrl.u32 %v3422_v17, %v2862_v11  ;;  %v877_v42 = vor.u32 8388608, %v876_v23  ;;  %v898_v7 = vshll.u32 %v3422_v17, %v2756_v52  ;;  %v899_v41 = vshrl.u32 %v3423_v9, %v2862_v11 }
 0x17a   : > { %v810_v24 = vadd.s32 1, %v806_v57  ;;  %v1302_v13 = vsel %vm1181_vm7, %v1301_v19, %v1300_v31  ;;  %v888_v48 = vor.u32 %v887_v27, %v886_v12  ;;  %v2960_v22 = vor.u32 %v890_v8, %v889_v15 }
 0x17b   : > { %v897_v37 = vor.u32 %v896_v54, %v895_v21  ;;  %v2965_v50 = vsel %vm2891_vm13, %v2449_v62, %v1302_v13  ;;  %v894_v52 = vor.u32 %v893_v29, %v892_v1  ;;  %v900_v61 = vor.u32 %v899_v41, %v898_v7 }
 0x17c   : > { %v811_v53 = vsel %vm809_vm2, %v810_v24, %v806_v57  ;;  %v2973_v14 = vsel %vm570_vm0, %v2728_v34, 0  ;;  %v1307_v58 = vmul.f32 %v2965_v50, %v2965_v50  ;;  %vm904_vm3 = vcmp.lt.s32.totalorder %v2927_v2, 4 }
 0x17d   : > { %v812_v4 = vadd.s32 %v811_v53, %v807_v16  ;;  %v1662_v32 = vmul.f32 1.442695, %v3435_v10  ;;  %v2979_v36 = vand.u32 3, %v1323_v55  ;;  %vm901_vm4 = vcmp.lt.s32.totalorder %v2927_v2, 1 }
 0x17e   : > { %v910_v63 = vsel %vm904_vm3, %v897_v37, 920167782  ;;  %v1308_v6 = vmul.f32 -0.001358992, %v1307_v58  ;;  %v1315_v56 = vmul.f32 -0.00019511016, %v1307_v58  ;;  %v909_v34 = vsel %vm901_vm4, %v888_v48, %v2960_v22 }
 0x17f   : > { %v813_v26 = vadd.s32 536870912, %v812_v4  ;;  %vm903_vm7 = vcmp.lt.s32.totalorder %v2927_v2, 3  ;;  %v914_v40 = vsel %vm904_vm3, %v900_v61, 1326507024  ;;  %v2992_v18 = vshll.u32 %v877_v42, 8 }
 0x180   : > { %v911_v51 = vsel %vm903_vm7, %v894_v52, %v910_v63  ;;  %v1309_v33 = vadd.f32 0.041655596, %v1308_v6  ;;  %v1316_v49 = vadd.f32 0.008332121, %v1315_v56  ;;  %v913_v28 = vsel %vm901_vm4, %v2960_v22, %v894_v52 }
 0x181   : > { %v814_v30 = vshrl.u32 %v813_v26, 30  ;;  %v2998_v55 = vsub.s32 32, %v2734_v38  ;;  %1970 = vpow2.f32 %v1662_v32  ;;  %vm902_vm5 = vcmp.lt.s32.totalorder %v2927_v2, 2 }
 0x182   : > { %v915_v0 = vsel %vm903_vm7, %v897_v37, %v914_v40  ;;  %v1310_v45 = vmul.f32 %v1309_v33, %v1307_v58  ;;  %v1317_v16 = vmul.f32 %v1316_v49, %v1307_v58  ;;  %vm716_vm6 = vcmp.lt.s32.totalorder %v2353_v46, 0 }
 0x183   : > { %v815_v23 = vshll.u32 %v814_v30, 30  ;;  %v3006_v31 = vsel %vm902_vm5, %v909_v34, %v911_v51  ;;  %v885_v27 = vshrl.u32 %v3424_v35, %v2862_v11  ;;  %v906_v8 = vsel %vm904_vm3, %v894_v52, 2102212464 }
 0x184   : > { %v916_v57 = vsel %vm902_vm5, %v913_v28, %v915_v0  ;;  %v918_v12 = vand.u32 65535, %v2992_v18  ;;  %v1311_v15 = vadd.f32 -0.4999988, %v1310_v45  ;;  %v1318_v29 = vadd.f32 -0.16666654, %v1317_v16 }
 0x185   : > { %vm1329_vm8 = vcmp.eq.s32.totalorder %v2979_v36, 2  ;;  %v3016_v19 = vsub.s32 %v812_v4, %v815_v23  ;;  %v919_v1 = vshrl.u32 %v2992_v18, 16  ;;  %vm1326_vm9 = vcmp.eq.s32.totalorder %v2979_v36, 0 }
 0x186   : > { %v920_v21 = vand.u32 65535, %v916_v57  ;;  %v921_v11 = vshrl.u32 %v916_v57, 16  ;;  %v942_v54 = vand.u32 65535, %v3006_v31  ;;  %v943_v24 = vshrl.u32 %v3006_v31, 16 }
 0x187   : > { %v1312_v42 = vmul.f32 %v1311_v15, %v1307_v58  ;;  %v1319_v7 = vmul.f32 %v1318_v29, %v1307_v58  ;;  %vm1325_vm10 = vcmp.lt.s32.totalorder %v2979_v36, 2  ;;  %vm817_vm11 = vcmp.lt.s32.totalorder %v3016_v19, 0  ;;  %v1971_v13 = vpop.eup %1970 }
 0x188   : > { %v818_v41 = vsub.s32 0, %v3016_v19  ;;  %vm1322_vm12 = vweird.f32 %v2449_v62  ;;  %v808_v37 = vadd.s32 %v2930_v59, %v2923_v43  ;;  %v838_v53 = vsub.s32 4, %v814_v30 }
 0x189   : > { %v905_v52 = vsel %vm901_vm4, %v885_v27, %v888_v48  ;;  %v923_v61 = vmul.u32 %v921_v11, %v918_v12  ;;  %v1313_v4 = vadd.f32 1.0, %v1312_v42  ;;  %v1320_v10 = vadd.f32 1.0, %v1319_v7 }
 0x18a   : > { %v819_v58 = vsel %vm817_vm11, %v818_v41, %v3016_v19  ;;  %v924_v32 = vmul.u32 %v920_v21, %v919_v1  ;;  %v907_v6 = vsel %vm903_vm7, %v2960_v22, %v906_v8  ;;  %v945_v26 = vmul.u32 %v943_v24, %v918_v12 }
 0x18b   : > { %v820_v63 = vclz %v819_v58  ;;  %v926_v56 = vshll.u32 %v923_v61, 16  ;;  %v1321_v34 = vmul.f32 %v1320_v10, %v2965_v50  ;;  %v1330_v43 = vxor.u32 2147483648, %v1313_v4 }
 0x18c   : > { %v922_v59 = vmul.u32 %v920_v21, %v918_v12  ;;  %v944_v51 = vmul.u32 %v942_v54, %v918_v12  ;;  %v839_v48 = vsel %vm716_vm6, %v838_v53, %v814_v30  ;;  %v925_v33 = vmul.u32 %v921_v11, %v919_v1 }
 0x18d   : > { %v1869_v40 = vadd.s32 4294967294, %v820_v63  ;;  %v946_v49 = vmul.u32 %v942_v54, %v919_v1  ;;  %v1327_v28 = vxor.u32 2147483648, %v1321_v34  ;;  %v928_v0 = vshll.u32 %v924_v32, 16 }
 0x18e   : > { %vm930_vm13 = vc.u32 %v922_v59, %v926_v56  ;;  %v932_v45 = vadd.s32 %v926_v56, %v922_v59  ;;  %v1331_v22 = vsel %vm1329_vm8, %v1330_v43, %v1321_v34  ;;  %v948_v50 = vshll.u32 %v945_v26, 16  ;;  %v3438_v43 = vld [vmem:[#allocation5_spill] sm:$0xff] }
 0x18f   : > { %vm1870_vm14 = vcmp.lt.s32.totalorder %v1869_v40, 0  ;;  %v931_v16 = vsel %vm930_vm13, 1, %v3425_v44  ;;  %v1328_v23 = vsel %vm1326_vm9, %v1313_v4, %v1327_v28  ;;  %v927_v12 = vshrl.u32 %v923_v61, 16 }
 0x190   : > { %v823_v31 = vsel %vm1870_vm14, 0, %v1869_v40  ;;  %v933_v27 = vadd.s32 %v931_v16, %v925_v33  ;;  %vm934_vm15 = vc.u32 %v932_v45, %v928_v0  ;;  %v1332_v30 = vsel %vm1325_vm10, %v1328_v23, %v1331_v22 }
 0x191   : > { %v824_v8 = vsub.s32 32, %v823_v31  ;;  %v828_v57 = vsub.s32 4294967266, %v823_v31  ;;  %v1333_v15 = vsel %vm1322_vm12, nan, %v1332_v30  ;;  %v825_v29 = vshll.u32 %v3016_v19, %v823_v31 }
 0x192   : > { %v929_v21 = vshrl.u32 %v924_v32, 16  ;;  %v935_v11 = vsel %vm934_vm15, 1, %v3425_v44  ;;  %v1673_v54 = vmul.f32 %v1971_v13, %v1333_v15  ;;  %v947_v53 = vmul.u32 %v943_v24, %v919_v1 }
 0x193   : > { %v826_v42 = vshrl.u32 %v808_v37, %v824_v8  ;;  %v829_v7 = vadd.s32 127, %v828_v57  ;;  %v937_v41 = vadd.s32 %v935_v11, %v933_v27  ;;  %v950_v4 = vshll.u32 %v946_v49, 16 }
 0x194   : > { %vm952_vm0 = vc.u32 %v944_v51, %v948_v50  ;;  %v954_v36 = vadd.s32 %v948_v50, %v944_v51  ;;  %1733 = vmatpush.msrb.mxu3 %v1673_v54  ;;  %vm3051_vm1 = vcmp.le.f32.partialorder %v714_v39, 0.7853982  ;;  %v908_v13 = vsel %vm902_vm5, %v905_v52, %v907_v6 }
 0x195   : > { %v827_v10 = vor.u32 %v826_v42, %v825_v29  ;;  %v830_v58 = vshll.u32 %v829_v7, 23  ;;  %v938_v61 = vadd.s32 %v937_v41, %v927_v12  ;;  %v953_v62 = vsel %vm952_vm0, 1, %v3425_v44 }
 0x196   : > { %v955_v37 = vadd.s32 %v953_v62, %v947_v53  ;;  %vm956_vm2 = vc.u32 %v954_v36, %v950_v4  ;;  %v841_v24 = vsel %vm3051_vm1, 0, %v839_v48  ;;  %v3063_v56 = vshrl.u32 %v2507_v47, 5 }
 0x197   : > { %v831_v1 = vor.u32 4788187, %v830_v58  ;;  %v3059_v32 = vadd.s32 %v938_v61, %v929_v21  ;;  %v957_v63 = vsel %vm956_vm2, 1, %v3425_v44  ;;  %v949_v39 = vshrl.u32 %v945_v26, 16 }
 0x198   : > { %v959_v34 = vadd.s32 %v957_v63, %v955_v37  ;;  %v404_v59 = vand.u32 2147483647, %v3438_v43  ;;  %v3067_v2 = vand.u32 31, %v2973_v14  ;;  %v834_v6 = vcvt.s32.f32 %v827_v10 }
 0x199   : > { %v832_v52 = vand.u32 2147483647, %v831_v1  ;;  %v3069_v51 = vadd.s32 %v954_v36, %v950_v4  ;;  %v858_v40 = vadd.s32 3, %v841_v24  ;;  %v951_v48 = vshrl.u32 %v946_v49, 16  ;;  %v3439_v4 = vld [vmem:[#allocation9_spill] sm:$0xff] }
 0x19a   : > { %v960_v33 = vadd.s32 %v959_v34, %v949_v39  ;;  %v962_v28 = vmul.u32 %v2992_v18, %v908_v13  ;;  %v422_v47 = vshrl.u32 %v3426_v3, %v2998_v55  ;;  %v425_v26 = vshrl.u32 %v3427_v5, %v2998_v55 }
 0x19b   : > { %v835_v0 = vmul.f32 %v834_v6, %v832_v52  ;;  %vm964_vm3 = vc.u32 %v3059_v32, %v3069_v51  ;;  %v411_v22 = vand.u32 8388607, %v404_v59  ;;  %v421_v49 = vshll.u32 %v3424_v35, %v2734_v38 }
 0x19c   : > { %v961_v45 = vadd.s32 %v960_v33, %v951_v48  ;;  %v428_v18 = vshrl.u32 %v2047_v60, %v2998_v55  ;;  %v424_v50 = vshll.u32 %v3426_v3, %v2734_v38  ;;  %v430_v23 = vshll.u32 %v2047_v60, %v2734_v38 }
 0x19d   : > { %v836_v16 = vxor.u32 2147483648, %v835_v0  ;;  %v431_v31 = vshrl.u32 %v3422_v17, %v2998_v55  ;;  %v427_v30 = vshll.u32 %v3427_v5, %v2734_v38  ;;  %v433_v8 = vshll.u32 %v3422_v17, %v2734_v38 }
 0x19e   : > { %v965_v27 = vadd.s32 1, %v961_v45  ;;  %v434_v57 = vshrl.u32 %v3423_v9, %v2998_v55  ;;  %v423_v15 = vor.u32 %v422_v47, %v421_v49  ;;  %v3098_v29 = vor.u32 %v425_v26, %v424_v50 }
 0x19f   : > { %v837_v12 = vsel %vm716_vm6, %v836_v16, %v835_v0  ;;  %v432_v21 = vor.u32 %v431_v31, %v430_v23  ;;  %v429_v38 = vor.u32 %v428_v18, %v427_v30  ;;  %v412_v53 = vor.u32 8388608, %v411_v22 }
 0x1a0   : > { %v3103_v11 = vsel %vm3051_vm1, %v2353_v46, %v837_v12  ;;  %v966_v54 = vsel %vm964_vm3, %v965_v27, %v961_v45  ;;  %v435_v42 = vor.u32 %v434_v57, %v433_v8  ;;  %vm439_vm4 = vcmp.lt.s32.totalorder %v3063_v56, 4 }
 0x1a1   : > { %v842_v7 = vmul.f32 %v3103_v11, %v3103_v11  ;;  %v967_v41 = vadd.s32 %v966_v54, %v962_v28  ;;  %v1656_v36 = vmul.f32 1.442695, %v3439_v4  ;;  %v3112_v10 = vand.u32 3, %v858_v40 }
 0x1a2   : > { %vm436_vm7 = vcmp.lt.s32.totalorder %v3063_v56, 1  ;;  %v445_v58 = vsel %vm439_vm4, %v432_v21, 920167782  ;;  %vm438_vm5 = vcmp.lt.s32.totalorder %v3063_v56, 3  ;;  %v449_v24 = vsel %vm439_vm4, %v435_v42, 1326507024 }
 0x1a3   : > { %v843_v61 = vmul.f32 -0.001358992, %v842_v7  ;;  %v850_v62 = vmul.f32 -0.00019511016, %v842_v7  ;;  %v968_v19 = vadd.s32 536870912, %v967_v41  ;;  %v444_v13 = vsel %vm436_vm7, %v423_v15, %v3098_v29 }
 0x1a4   : > { %v446_v37 = vsel %vm438_vm5, %v429_v38, %v445_v58  ;;  %v448_v1 = vsel %vm436_vm7, %v3098_v29, %v429_v38  ;;  %v3130_v52 = vshll.u32 %v412_v53, 8  ;;  %v3133_v6 = vsub.s32 32, %v3067_v2 }
 0x1a5   : > { %v844_v63 = vadd.f32 0.041655596, %v843_v61  ;;  %v851_v39 = vadd.f32 0.008332121, %v850_v62  ;;  %v3128_v34 = vshrl.u32 %v968_v19, 30  ;;  %vm437_vm6 = vcmp.lt.s32.totalorder %v3063_v56, 2 }
 0x1a6   : > { %v450_v40 = vsel %vm438_vm5, %v432_v21, %v449_v24  ;;  %v3141_v0 = vsel %vm437_vm6, %v444_v13, %v446_v37  ;;  %1972 = vpow2.f32 %v1656_v36  ;;  %v420_v47 = vshrl.u32 %v3424_v35, %v2998_v55 }
 0x1a7   : > { %v845_v48 = vmul.f32 %v844_v63, %v842_v7  ;;  %v852_v33 = vmul.f32 %v851_v39, %v842_v7  ;;  %v970_v28 = vshll.u32 %v3128_v34, 30  ;;  %v441_v26 = vsel %vm439_vm4, %v429_v38, 2102212464 }
 0x1a8   : > { %v451_v45 = vsel %vm437_vm6, %v448_v1, %v450_v40  ;;  %vm864_vm8 = vcmp.eq.s32.totalorder %v3112_v10, 2  ;;  %v453_v16 = vand.u32 65535, %v3130_v52  ;;  %vm861_vm9 = vcmp.eq.s32.totalorder %v3112_v10, 0 }
 0x1a9   : > { %v846_v22 = vadd.f32 -0.4999988, %v845_v48  ;;  %v853_v49 = vadd.f32 -0.16666654, %v852_v33  ;;  %v3150_v18 = vsub.s32 %v967_v41, %v970_v28  ;;  %v454_v50 = vshrl.u32 %v3130_v52, 16 }
 0x1aa   : > { %v455_v23 = vand.u32 65535, %v451_v45  ;;  %v456_v55 = vshrl.u32 %v451_v45, 16  ;;  %v478_v31 = vshrl.u32 %v3141_v0, 16  ;;  %vm860_vm10 = vcmp.lt.s32.totalorder %v3112_v10, 2 }
 0x1ab   : > { %v847_v27 = vmul.f32 %v846_v22, %v842_v7  ;;  %v854_v30 = vmul.f32 %v853_v49, %v842_v7  ;;  %vm972_vm11 = vcmp.lt.s32.totalorder %v3150_v18, 0  ;;  %v973_v8 = vsub.s32 0, %v3150_v18 }
 0x1ac   : > { %vm857_vm12 = vweird.f32 %v2353_v46  ;;  %v963_v57 = vadd.s32 %v3069_v51, %v3059_v32  ;;  %v440_v12 = vsel %vm436_vm7, %v420_v47, %v423_v15  ;;  %v458_v21 = vmul.u32 %v456_v55, %v453_v16  ;;  %v1973_v53 = vpop.eup %1972 }
 0x1ad   : > { %v477_v54 = vand.u32 65535, %v3141_v0  ;;  %v848_v38 = vadd.f32 1.0, %v847_v27  ;;  %v855_v42 = vadd.f32 1.0, %v854_v30  ;;  %v974_v7 = vsel %vm972_vm11, %v973_v8, %v3150_v18 }
 0x1ae   : > { %v459_v41 = vmul.u32 %v455_v23, %v454_v50  ;;  %v975_v4 = vclz %v974_v7  ;;  %v442_v36 = vsel %vm438_vm5, %v3098_v29, %v441_v26  ;;  %v461_v58 = vshll.u32 %v458_v21, 16 }
 0x1af   : > { %v480_v61 = vmul.u32 %v478_v31, %v453_v16  ;;  %v856_v32 = vmul.f32 %v855_v42, %v3103_v11  ;;  %v865_v51 = vxor.u32 2147483648, %v848_v38  ;;  %v993_v15 = vsub.s32 4, %v3128_v34 }
 0x1b0   : > { %v457_v62 = vmul.u32 %v455_v23, %v453_v16  ;;  %v1872_v19 = vadd.s32 4294967294, %v975_v4  ;;  %v460_v13 = vmul.u32 %v456_v55, %v454_v50  ;;  %v479_v37 = vmul.u32 %v477_v54, %v453_v16 }
 0x1b1   : > { %v481_v1 = vmul.u32 %v477_v54, %v454_v50  ;;  %v862_v24 = vxor.u32 2147483648, %v856_v32  ;;  %v463_v63 = vshll.u32 %v459_v41, 16  ;;  %v866_v40 = vsel %vm864_vm8, %v865_v51, %v856_v32  ;;  %v3440_v51 = vld [vmem:[#allocation7_spill] sm:$0xff] }
 0x1b2   : > { %vm465_vm13 = vc.u32 %v457_v62, %v461_v58  ;;  %v467_v39 = vadd.s32 %v461_v58, %v457_v62  ;;  %vm1873_vm14 = vcmp.lt.s32.totalorder %v1872_v19, 0  ;;  %v483_v48 = vshll.u32 %v480_v61, 16 }
 0x1b3   : > { %v466_v29 = vsel %vm465_vm13, 1, %v3425_v44  ;;  %v863_v11 = vsel %vm861_vm9, %v848_v38, %v862_v24  ;;  %v978_v33 = vsel %vm1873_vm14, 0, %v1872_v19  ;;  %v462_v45 = vshrl.u32 %v458_v21, 16 }
 0x1b4   : > { %v468_v28 = vadd.s32 %v466_v29, %v460_v13  ;;  %vm469_vm15 = vc.u32 %v467_v39, %v463_v63  ;;  %v867_v0 = vsel %vm860_vm10, %v863_v11, %v866_v40  ;;  %v979_v47 = vsub.s32 32, %v978_v33 }
 0x1b5   : > { %v983_v26 = vsub.s32 4294967266, %v978_v33  ;;  %v868_v22 = vsel %vm857_vm12, nan, %v867_v0  ;;  %v980_v49 = vshll.u32 %v3150_v18, %v978_v33  ;;  %v464_v16 = vshrl.u32 %v459_v41, 16 }
 0x1b6   : > { %v470_v23 = vsel %vm469_vm15, 1, %v3425_v44  ;;  %v1670_v55 = vmul.f32 %v1973_v53, %v868_v22  ;;  %v981_v27 = vshrl.u32 %v963_v57, %v979_v47  ;;  %v482_v54 = vmul.u32 %v478_v31, %v454_v50 }
 0x1b7   : > { %v984_v30 = vadd.s32 127, %v983_v26  ;;  %v472_v8 = vadd.s32 %v470_v23, %v468_v28  ;;  %v485_v38 = vshll.u32 %v481_v1, 16  ;;  %vm487_vm0 = vc.u32 %v479_v37, %v483_v48 }
 0x1b8   : > { %v489_v10 = vadd.s32 %v483_v48, %v479_v37  ;;  %1711 = vmatpush.msrb.mxu2 %v1670_v55  ;;  %v982_v42 = vor.u32 %v981_v27, %v980_v49  ;;  %v488_v46 = vsel %vm487_vm0, 1, %v3425_v44  ;;  %vm871_vm1 = vcmp.lt.s32.totalorder %v2381_v25, 0 }
 0x1b9   : > { %v985_v7 = vshll.u32 %v984_v30, 23  ;;  %v473_v21 = vadd.s32 %v472_v8, %v462_v45  ;;  %v443_v18 = vsel %vm437_vm6, %v440_v12, %v442_v36  ;;  %v490_v41 = vadd.s32 %v488_v46, %v482_v54 }
 0x1ba   : > { %vm491_vm2 = vc.u32 %v489_v10, %v485_v38  ;;  %v994_v50 = vsel %vm871_vm1, %v993_v15, %v3128_v34  ;;  %v3193_v4 = vshrl.u32 %v2973_v14, 5  ;;  %v484_v58 = vshrl.u32 %v480_v61, 16 }
 0x1bb   : > { %v986_v57 = vor.u32 4788187, %v985_v7  ;;  %v3189_v31 = vadd.s32 %v473_v21, %v464_v16  ;;  %v492_v53 = vsel %vm491_vm2, 1, %v3425_v44  ;;  %v559_v62 = vand.u32 2147483647, %v3440_v51  ;;  %v3443_v16 = vld [vmem:[#allocation10_spill] sm:$0xff] }
 0x1bc   : > { %v494_v32 = vadd.s32 %v492_v53, %v490_v41  ;;  %vm3198_vm3 = vcmp.le.f32.partialorder %v869_v20, 0.7853982  ;;  %v989_v36 = vcvt.s32.f32 %v982_v42  ;;  %v3202_v34 = vadd.s32 %v489_v10, %v485_v38 }
 0x1bd   : > { %v987_v12 = vand.u32 2147483647, %v986_v57  ;;  %v996_v15 = vsel %vm3198_vm3, 0, %v994_v50  ;;  %v486_v19 = vshrl.u32 %v481_v1, 16  ;;  %v497_v61 = vmul.u32 %v3130_v52, %v443_v18 }
 0x1be   : > { %v495_v14 = vadd.s32 %v494_v32, %v484_v58  ;;  %vm499_vm4 = vc.u32 %v3189_v31, %v3202_v34  ;;  %v577_v20 = vshrl.u32 %v3426_v3, %v3133_v6  ;;  %v580_v37 = vshrl.u32 %v3427_v5, %v3133_v6 }
 0x1bf   : > { %v990_v13 = vmul.f32 %v989_v36, %v987_v12  ;;  %v566_v63 = vand.u32 8388607, %v559_v62  ;;  %v576_v1 = vshll.u32 %v3424_v35, %v3067_v2  ;;  %v583_v52 = vshrl.u32 %v2047_v60, %v3133_v6 }
 0x1c0   : > { %v496_v24 = vadd.s32 %v495_v14, %v486_v19  ;;  %v579_v40 = vshll.u32 %v3426_v3, %v3067_v2  ;;  %v585_v29 = vshll.u32 %v2047_v60, %v3067_v2  ;;  %v586_v48 = vshrl.u32 %v3422_v17, %v3133_v6 }
 0x1c1   : > { %v991_v39 = vxor.u32 2147483648, %v990_v13  ;;  %v582_v33 = vshll.u32 %v3427_v5, %v3067_v2  ;;  %v588_v28 = vshll.u32 %v3422_v17, %v3067_v2  ;;  %v589_v0 = vshrl.u32 %v3423_v9, %v3133_v6 }
 0x1c2   : > { %v500_v11 = vadd.s32 1, %v496_v24  ;;  %v3233_v3 = vor.u32 %v577_v20, %v576_v1  ;;  %v3235_v26 = vor.u32 %v580_v37, %v579_v40  ;;  %v587_v60 = vor.u32 %v586_v48, %v585_v29 }
 0x1c3   : > { %v992_v47 = vsel %vm871_vm1, %v991_v39, %v990_v13  ;;  %v3243_v17 = vor.u32 %v583_v52, %v582_v33  ;;  %v590_v2 = vor.u32 %v589_v0, %v588_v28  ;;  %v567_v49 = vor.u32 8388608, %v566_v63 }
 0x1c4   : > { %v995_v45 = vsel %vm3198_vm3, %v2381_v25, %v992_v47  ;;  %v501_v5 = vsel %vm499_vm4, %v500_v11, %v496_v24  ;;  %vm594_vm7 = vcmp.lt.s32.totalorder %v3193_v4, 4  ;;  %v1658_v23 = vmul.f32 1.442695, %v3443_v16 }
 0x1c5   : > { %v997_v9 = vmul.f32 %v995_v45, %v995_v45  ;;  %v502_v22 = vadd.s32 %v501_v5, %v497_v61  ;;  %v1013_v55 = vadd.s32 3, %v996_v15  ;;  %vm591_vm5 = vcmp.lt.s32.totalorder %v3193_v4, 1 }
 0x1c6   : > { %v600_v27 = vsel %vm594_vm7, %v587_v60, 920167782  ;;  %vm593_vm6 = vcmp.lt.s32.totalorder %v3193_v4, 3  ;;  %v599_v38 = vsel %vm591_vm5, %v3233_v3, %v3235_v26  ;;  %v603_v42 = vsel %vm591_vm5, %v3235_v26, %v3243_v17 }
 0x1c7   : > { %v998_v30 = vmul.f32 -0.001358992, %v997_v9  ;;  %v1005_v8 = vmul.f32 -0.00019511016, %v997_v9  ;;  %v503_v54 = vadd.s32 536870912, %v502_v22  ;;  %v601_v10 = vsel %vm593_vm6, %v3243_v17, %v600_v27 }
 0x1c8   : > { %v604_v7 = vsel %vm594_vm7, %v590_v2, 1326507024  ;;  %v3266_v41 = vshll.u32 %v567_v49, 8  ;;  %vm592_vm8 = vcmp.lt.s32.totalorder %v3193_v4, 2  ;;  %1974 = vpow2.f32 %v1658_v23 }
 0x1c9   : > { %v999_v21 = vadd.f32 0.041655596, %v998_v30  ;;  %v1006_v46 = vadd.f32 0.008332121, %v1005_v8  ;;  %v3264_v18 = vshrl.u32 %v503_v54, 30  ;;  %v605_v57 = vsel %vm593_vm6, %v587_v60, %v604_v7 }
 0x1ca   : > { %v602_v32 = vsel %vm592_vm8, %v599_v38, %v601_v10  ;;  %v1014_v56 = vand.u32 3, %v1013_v55  ;;  %v606_v12 = vsel %vm592_vm8, %v603_v42, %v605_v57  ;;  %v608_v14 = vand.u32 65535, %v3266_v41 }
 0x1cb   : > { %v1000_v50 = vmul.f32 %v999_v21, %v997_v9  ;;  %v1007_v53 = vmul.f32 %v1006_v46, %v997_v9  ;;  %v505_v58 = vshll.u32 %v3264_v18, 30  ;;  %v609_v61 = vshrl.u32 %v3266_v41, 16 }
 0x1cc   : > { %v610_v13 = vand.u32 65535, %v606_v12  ;;  %v611_v20 = vshrl.u32 %v606_v12, 16  ;;  %v633_v37 = vshrl.u32 %v602_v32, 16  ;;  %vm1012_vm10 = vweird.f32 %v2381_v25 }
 0x1cd   : > { %v1001_v36 = vadd.f32 -0.4999988, %v1000_v50  ;;  %v1008_v15 = vadd.f32 -0.16666654, %v1007_v53  ;;  %v506_v19 = vsub.s32 %v502_v22, %v505_v58  ;;  %vm1015_vm11 = vcmp.lt.s32.totalorder %v1014_v56, 2 }
 0x1ce   : > { %v613_v52 = vmul.u32 %v611_v20, %v608_v14  ;;  %v632_v39 = vand.u32 65535, %v602_v32  ;;  %v614_v11 = vmul.u32 %v610_v13, %v609_v61  ;;  %v1975_v33 = vpop.eup %1974  ;;  %vm1016_vm12 = vcmp.eq.s32.totalorder %v1014_v56, 0 }
 0x1cf   : > { %v1002_v24 = vmul.f32 %v1001_v36, %v997_v9  ;;  %v1009_v63 = vmul.f32 %v1008_v15, %v997_v9  ;;  %vm507_vm9 = vcmp.lt.s32.totalorder %v506_v19, 0  ;;  %v508_v1 = vsub.s32 0, %v506_v19 }
 0x1d0   : > { %v616_v0 = vshll.u32 %v613_v52, 16  ;;  %v635_v47 = vmul.u32 %v633_v37, %v608_v14  ;;  %vm1019_vm13 = vcmp.eq.s32.totalorder %v1014_v56, 2  ;;  %v612_v2 = vmul.u32 %v610_v13, %v608_v14 }
 0x1d1   : > { %v1003_v40 = vadd.f32 1.0, %v1002_v24  ;;  %v1010_v29 = vadd.f32 1.0, %v1009_v63  ;;  %v509_v48 = vsel %vm507_vm9, %v508_v1, %v506_v19  ;;  %v498_v9 = vadd.s32 %v3202_v34, %v3189_v31 }
 0x1d2   : > { %v510_v28 = vclz %v509_v48  ;;  %v615_v49 = vmul.u32 %v611_v20, %v609_v61  ;;  %v636_v16 = vmul.u32 %v632_v39, %v609_v61  ;;  %v618_v55 = vshll.u32 %v614_v11, 16 }
 0x1d3   : > { %v1011_v60 = vmul.f32 %v1010_v29, %v995_v45  ;;  %v1020_v5 = vxor.u32 2147483648, %v1003_v40  ;;  %vm620_vm14 = vc.u32 %v612_v2, %v616_v0  ;;  %v622_v27 = vadd.s32 %v616_v0, %v612_v2 }
 0x1d4   : > { %v1863_v22 = vadd.s32 4294967294, %v510_v28  ;;  %v621_v8 = vsel %vm620_vm14, 1, %v3425_v44  ;;  %v638_v54 = vshll.u32 %v635_v47, 16  ;;  %v634_v7 = vmul.u32 %v632_v39, %v608_v14 }
 0x1d5   : > { %v1017_v23 = vxor.u32 2147483648, %v1011_v60  ;;  %v1021_v30 = vsel %vm1019_vm13, %v1020_v5, %v1011_v60  ;;  %v623_v10 = vadd.s32 %v621_v8, %v615_v49  ;;  %vm624_vm0 = vc.u32 %v622_v27, %v618_v55 }
 0x1d6   : > { %vm1864_vm15 = vcmp.lt.s32.totalorder %v1863_v22, 0  ;;  %v617_v57 = vshrl.u32 %v613_v52, 16  ;;  %v625_v50 = vsel %vm624_vm0, 1, %v3425_v44  ;;  %v637_v36 = vmul.u32 %v633_v37, %v609_v61 }
 0x1d7   : > { %v1018_v45 = vsel %vm1016_vm12, %v1003_v40, %v1017_v23  ;;  %v513_v38 = vsel %vm1864_vm15, 0, %v1863_v22  ;;  %v627_v12 = vadd.s32 %v625_v50, %v623_v10  ;;  %v640_v15 = vshll.u32 %v636_v16, 16 }
 0x1d8   : > { %v1022_v42 = vsel %vm1015_vm11, %v1018_v45, %v1021_v30  ;;  %v514_v31 = vsub.s32 32, %v513_v38  ;;  %v518_v34 = vsub.s32 4294967266, %v513_v38  ;;  %v515_v46 = vshll.u32 %v506_v19, %v513_v38 }
 0x1d9   : > { %v1023_v21 = vsel %vm1012_vm10, nan, %v1022_v42  ;;  %vm642_vm1 = vc.u32 %v634_v7, %v638_v54  ;;  %v644_v13 = vadd.s32 %v638_v54, %v634_v7  ;;  %v628_v24 = vadd.s32 %v627_v12, %v617_v57 }
 0x1da   : > { %v1671_v53 = vmul.f32 %v1975_v33, %v1023_v21  ;;  %v516_v58 = vshrl.u32 %v498_v9, %v514_v31  ;;  %v519_v32 = vadd.s32 127, %v518_v34  ;;  %v643_v14 = vsel %vm642_vm1, 1, %v3425_v44  ;;  %v3446_v34 = vld [vmem:[#allocation6_spill] sm:$0xff] }
 0x1db   : > { %v575_v25 = vshrl.u32 %v3424_v35, %v3133_v6  ;;  %v596_v19 = vsel %vm594_vm7, %v3243_v17, 2102212464  ;;  %v645_v63 = vadd.s32 %v643_v14, %v637_v36  ;;  %vm646_vm2 = vc.u32 %v644_v13, %v640_v15 }
 0x1dc   : > { %1734 = vmatpush.msrb.mxu3 %v1671_v53  ;;  %v517_v56 = vor.u32 %v516_v58, %v515_v46  ;;  %v520_v20 = vshll.u32 %v519_v32, 23  ;;  %v619_v61 = vshrl.u32 %v614_v11, 16  ;;  %v647_v37 = vsel %vm646_vm2, 1, %v3425_v44 }
 0x1dd   : > { %v595_v52 = vsel %vm591_vm5, %v575_v25, %v3233_v3  ;;  %v639_v39 = vshrl.u32 %v635_v47, 16  ;;  %v649_v40 = vadd.s32 %v647_v37, %v645_v63  ;;  %v597_v35 = vsel %vm593_vm6, %v3235_v26, %v596_v19 }
 0x1de   : > { %v521_v1 = vor.u32 4788187, %v520_v20  ;;  %v524_v48 = vcvt.s32.f32 %v517_v56  ;;  %v629_v6 = vadd.s32 %v628_v24, %v619_v61  ;;  %v641_v17 = vshrl.u32 %v636_v16, 16 }
 0x1df   : > { %v650_v33 = vadd.s32 %v649_v40, %v639_v39  ;;  %v648_v0 = vadd.s32 %v644_v13, %v640_v15  ;;  %v598_v44 = vsel %vm592_vm8, %v595_v52, %v597_v35  ;;  %vm406_vm4 = vcmp.lt.s32.totalorder %v3438_v43, 0 }
 0x1e0   : > { %v522_v29 = vand.u32 2147483647, %v521_v1  ;;  %vm3305_vm7 = vcmp.le.f32.partialorder %v404_v59, 0.7853982  ;;  %v652_v5 = vmul.u32 %v3266_v41, %v598_v44  ;;  %v528_v2 = vsub.s32 4, %v3264_v18  ;;  %v1677_v44 = vld [vmem:[%s3388_s2 + $0x8] sm:$0xff] }
 0x1e1   : > { %v651_v11 = vadd.s32 %v650_v33, %v641_v17  ;;  %vm654_vm3 = vc.u32 %v629_v6, %v648_v0  ;;  %v1652_v7 = vmul.f32 1.442695, %v3446_v34  ;;  %vm547_vm6 = vweird.f32 %v3438_v43  ;;  %v1676_v17 = vld [vmem:[%s3388_s2] sm:$0xff] }
 0x1e2   : > { %v525_v28 = vmul.f32 %v524_v48, %v522_v29  ;;  %v529_v59 = vsel %vm406_vm4, %v528_v2, %v3264_v18  ;;  %v653_v19 = vadd.s32 %v648_v0, %v629_v6  ;;  %vm1690_vm12 = vcmask 261120  }
 0x1e3   : > { %v655_v3 = vadd.s32 1, %v651_v11  ;;  %v531_v41 = vsel %vm3305_vm7, 0, %v529_v59  ;;  %1976 = vpow2.f32 %v1652_v7  ;;  %vm561_vm13 = vcmp.lt.s32.totalorder %v3440_v51, 0 }
 0x1e4   : > { %v526_v60 = vxor.u32 2147483648, %v525_v28  ;;  %v548_v21 = vadd.s32 3, %v531_v41  ;;  %vm3332_vm14 = vcmp.le.f32.partialorder %v559_v62, 0.7853982  ;;  %v3449_v41 = vld [vmem:[#allocation8_spill] sm:$0xff]  ;;  %vm702_vm2 = vweird.f32 %v3440_v51 }
 0x1e5   : > { %v656_v9 = vsel %vm654_vm3, %v655_v3, %v651_v11 }
 0x1e6   : > { %v527_v26 = vsel %vm406_vm4, %v526_v60, %v525_v28  ;;  %v657_v49 = vadd.s32 %v656_v9, %v652_v5  ;;  %v549_v32 = vand.u32 3, %v548_v21  ;;  %v1678_v5 = vld [vmem:[%s3389_s3] sm:$0xff] }
 0x1e7   : > { %v530_v4 = vsel %vm3305_vm7, %v3438_v43, %v527_v26  ;;  %1682 = vperm.xlu0 %1947, %v1678_v5  }
 0x1e8   : > { %v532_v22 = vmul.f32 %v530_v4, %v530_v4  ;;  %v658_v55 = vadd.s32 536870912, %v657_v49  ;;  %vm551_vm8 = vcmp.eq.s32.totalorder %v549_v32, 0  ;;  %vm554_vm9 = vcmp.eq.s32.totalorder %v549_v32, 2 }
 0x1e9   : > { %vm550_vm11 = vcmp.lt.s32.totalorder %v549_v32, 2  ;;  %v1977_v61 = vpop.eup %1976 }
 0x1ea   : > { %v533_v16 = vmul.f32 -0.001358992, %v532_v22  ;;  %v540_v23 = vmul.f32 -0.00019511016, %v532_v22  ;;  %v3315_v8 = vshrl.u32 %v658_v55, 30  ;;  %v1679_v55 = vld [vmem:[%s3389_s3 + $0x8] sm:$0xff] }
 0x1ec   : > { %v534_v27 = vadd.f32 0.041655596, %v533_v16  ;;  %v541_v30 = vadd.f32 0.008332121, %v540_v23  ;;  %v660_v38 = vshll.u32 %v3315_v8, 30  ;;  %v683_v3 = vsub.s32 4, %v3315_v8 }
 0x1ee   : > { %v535_v54 = vmul.f32 %v534_v27, %v532_v22  ;;  %v542_v45 = vmul.f32 %v541_v30, %v532_v22  ;;  %v661_v31 = vsub.s32 %v657_v49, %v660_v38 }
 0x1ef   : > { %1687 = vperm.xlu0 %1947, %v1679_v55  }
 0x1f0   : > { %v536_v10 = vadd.f32 -0.4999988, %v535_v54  ;;  %v543_v42 = vadd.f32 -0.16666654, %v542_v45  ;;  %vm662_vm5 = vcmp.lt.s32.totalorder %v661_v31, 0  ;;  %v663_v18 = vsub.s32 0, %v661_v31 }
 0x1f1   : > { %v1654_v54 = vmul.f32 1.442695, %v3449_v41 }
 0x1f2   : > { %v537_v46 = vmul.f32 %v536_v10, %v532_v22  ;;  %v544_v57 = vmul.f32 %v543_v42, %v532_v22  ;;  %v664_v58 = vsel %vm662_vm5, %v663_v18, %v661_v31 }
 0x1f3   : > { %v665_v12 = vclz %v664_v58  ;;  %1978 = vpow2.f32 %v1654_v54 }
 0x1f4   : > { %v538_v50 = vadd.f32 1.0, %v537_v46  ;;  %v545_v53 = vadd.f32 1.0, %v544_v57 }
 0x1f5   : > { %v1866_v13 = vadd.s32 4294967294, %v665_v12 }
 0x1f6   : > { %v546_v36 = vmul.f32 %v545_v53, %v530_v4  ;;  %v555_v15 = vxor.u32 2147483648, %v538_v50  ;;  %v684_v4 = vsel %vm561_vm13, %v683_v3, %v3315_v8 }
 0x1f7   : > { %vm1867_vm10 = vcmp.lt.s32.totalorder %v1866_v13, 0  ;;  %v686_v49 = vsel %vm3332_vm14, 0, %v684_v4 }
 0x1f8   : > { %v552_v56 = vxor.u32 2147483648, %v546_v36  ;;  %v556_v24 = vsel %vm554_vm9, %v555_v15, %v546_v36  ;;  %v668_v14 = vsel %vm1867_vm10, 0, %v1866_v13  ;;  %v703_v30 = vadd.s32 3, %v686_v49 }
 0x1f9   : > { %v669_v63 = vsub.s32 32, %v668_v14  ;;  %v673_v1 = vsub.s32 4294967266, %v668_v14  ;;  %v670_v39 = vshll.u32 %v661_v31, %v668_v14  ;;  %v1979_v18 = vpop.eup %1978 }
 0x1fa   : > { %v553_v20 = vsel %vm551_vm8, %v538_v50, %v552_v56  ;;  %v704_v42 = vand.u32 3, %v703_v30 }
 0x1fb   : > { %v557_v25 = vsel %vm550_vm11, %v553_v20, %v556_v24  ;;  %v671_v40 = vshrl.u32 %v653_v19, %v669_v63  ;;  %v674_v29 = vadd.s32 127, %v673_v1 }
 0x1fc   : > { %v558_v37 = vsel %vm547_vm6, nan, %v557_v25  ;;  %vm706_vm15 = vcmp.eq.s32.totalorder %v704_v42, 0  ;;  %vm709_vm0 = vcmp.eq.s32.totalorder %v704_v42, 2  ;;  %vm705_vm1 = vcmp.lt.s32.totalorder %v704_v42, 2 }
 0x1fd   : > { %v1668_v52 = vmul.f32 %v1977_v61, %v558_v37  ;;  %v672_v48 = vor.u32 %v671_v40, %v670_v39  ;;  %v675_v43 = vshll.u32 %v674_v29, 23 }
 0x1ff   : > { %1712 = vmatpush.msrb.mxu2 %v1668_v52  ;;  %v676_v35 = vor.u32 4788187, %v675_v43  ;;  %v679_v28 = vcvt.s32.f32 %v672_v48 }
 0x200   : > { %1886 = vmatmul.msk.f32.vlgmr.msrb.gmra.mxu2 %vm1690_vm12, %v1676_v17 }
 0x201   : > { %v677_v33 = vand.u32 2147483647, %v676_v35 }
 0x203   : > { %v680_v6 = vmul.f32 %v679_v28, %v677_v33 }
 0x205   : > { %v681_v0 = vxor.u32 2147483648, %v680_v6 }
 0x207   : > { %v682_v60 = vsel %vm561_vm13, %v681_v0, %v680_v6 }
 0x208   : > { %v685_v47 = vsel %vm3332_vm14, %v3440_v51, %v682_v60  ;;  %1887 = vmatmul.msk.f32.gmra.mxu2 %vm1690_vm12, %v1677_v44 }
 0x209   : > { %v687_v26 = vmul.f32 %v685_v47, %v685_v47 }
 0x20b   : > { %v688_v2 = vmul.f32 -0.001358992, %v687_v26  ;;  %v695_v62 = vmul.f32 -0.00019511016, %v687_v26 }
 0x20d   : > { %v689_v9 = vadd.f32 0.041655596, %v688_v2  ;;  %v696_v22 = vadd.f32 0.008332121, %v695_v62 }
 0x20f   : > { %v690_v16 = vmul.f32 %v689_v9, %v687_v26  ;;  %v697_v23 = vmul.f32 %v696_v22, %v687_v26 }
 0x211   : > { %v691_v59 = vadd.f32 -0.4999988, %v690_v16  ;;  %v698_v27 = vadd.f32 -0.16666654, %v697_v23 }
 0x213   : > { %v692_v45 = vmul.f32 %v691_v59, %v687_v26  ;;  %v699_v38 = vmul.f32 %v698_v27, %v687_v26 }
 0x215   : > { %v693_v8 = vadd.f32 1.0, %v692_v45  ;;  %v700_v10 = vadd.f32 1.0, %v699_v38 }
 0x217   : > { %v701_v31 = vmul.f32 %v700_v10, %v685_v47  ;;  %v710_v34 = vxor.u32 2147483648, %v693_v8 }
 0x219   : > { %v707_v7 = vxor.u32 2147483648, %v701_v31  ;;  %v711_v46 = vsel %vm709_vm0, %v710_v34, %v701_v31 }
 0x21b   : > { %v708_v21 = vsel %vm706_vm15, %v693_v8, %v707_v7 }
 0x21c   : > { %v712_v57 = vsel %vm705_vm1, %v708_v21, %v711_v46 }
 0x21d   : > { %v713_v50 = vsel %vm702_vm2, nan, %v712_v57 }
 0x21e   : > { %v1669_v53 = vmul.f32 %v1979_v18, %v713_v50 }
 0x220   : > { %1735 = vmatpush.msrb.mxu3 %v1669_v53 }
 0x221   : > { %1888 = vmatmul.msk.f32.vlgmr.msrb.gmra.mxu3 %vm1690_vm12, %v1676_v17 }
 0x229   : > { %1889 = vmatmul.msk.f32.gmra.mxu3 %vm1690_vm12, %v1677_v44 }
 0x259   : > { %v1683_v58 = vpop.permute.xlu0 %1682 }
 0x261   : > { %v1688_v15 = vpop.permute.xlu0 %1687 }
 0x283   : > { %v1714_v32 = vpop.f32.mrf.mxu2 }
 0x284   : > { %v1715_v12 = vadd.f32 %v1714_v32, %v1683_v58 }
 0x286   : > { %v1743_v36 = vmax.f32 %v1715_v12, 0.0 }
 0x288   : > { %1747 = vst [vmem:[%s191_s6] sm:$0xff] %v1743_v36 }
 0x28b   : > { %v1717_v51 = vpop.f32.mrf.mxu2 }
 0x28c   : > { %v1718_v13 = vadd.f32 %v1717_v51, %v1688_v15 }
 0x28e   : > { %v1745_v56 = vmax.f32 %v1718_v13, 0.0 }
 0x290   : > { %1749 = vst [vmem:[%s191_s6 + $0x10] sm:$0xff] %v1745_v56 }
 0x2a4   : > { %v1737_v20 = vpop.f32.mrf.mxu3 }
 0x2a5   : > { %v1738_v24 = vadd.f32 %v1737_v20, %v1683_v58 }
 0x2a7   : > { %v1744_v14 = vmax.f32 %v1738_v24, 0.0 }
 0x2a9   : > { %1748 = vst [vmem:[%s191_s6 + $0x8] sm:$0xff] %v1744_v14 }
 0x2ac   : > { %v1740_v25 = vpop.f32.mrf.mxu3 }
 0x2ad   : > { %v1741_v19 = vadd.f32 %v1740_v25, %v1688_v15 }
 0x2af   : > { %v1746_v63 = vmax.f32 %v1741_v19, 0.0 }
 0x2b1   : > { %1750 = vst [vmem:[%s191_s6 + $0x18] sm:$0xff] %v1746_v63 }
 0x2b2   : > { %2007 = shalt.err (!%p2004_p3)
}
 0x2b3   : > { %s2051_s29 = smov 256   ;;  %s2052_s30 = smov 512  }
 0x2b4   : > { %s2053_s5 = smov 16  }
 0x2b5   : > { %1898 = dma.vmem_to_hbm [thread:$0]  (%p2117_p5), %s1765_s11, 512, %s1767_s12, %s1752_s13, %s2051_s29, %s2052_s30, %s2053_s5  }
 0x2b6 PF: > { %p1904_p4 = scmp.ge.s32.totalorder %s2042_s18, 2  ;;  %s1781_s6 = sand.u32 1, %s2030_s15  }
 0x2b7   : > { %s1782_s7 = scalar_lea.sflag [#allocation3], %s1781_s6 }
 0x2b8   : > { %p1901_p7 = pnand %p1904_p4, %p2121_p6 }
 0x2ba   : > { %p1902_p8 = pneg %p1901_p7 }
 0x2bc   : > { %2025 = dma.done.wait (%p1902_p8), %s1782_s7, 512  }
 0x2bd   : > { %2027 = vsyncadd (%p1902_p8), %s1782_s7, 4294966784  ;;  %p14_p9 = scmp.ge.s32.totalorder %s2104_s21, 4   ;;  %s3450_s15 = smov %s2034_s16 }
 0x2be   : > { %s3451_s16 = smov %s2038_s17  ;;  %s3452_s17 = smov %s2115_s24 }
 0x2bf   : > { %s3453_s18 = smov %s2104_s21  ;;  %16 = sbr.rel (!%p14_p9) target bundleno = 3 (0x3), region = 71 }
 0x2c4   :  { %1788 = vsyncpa [#allocation3], 1 }
 0x2c5   :  { %1790 = vsyncpa [#allocation3 + $0x1], 1 }

// kernel: tpu_custom_call.1
= control target key start
LH: loop header
LB: loop body
LE: loop exit
PB: predicated region body
PF: predicated region fallthrough
CT: control target
= control target key end

     0   :  { %9 = vsyncpa [#allocation3], 0  ;;  %s3930_s0 = inlined_call_operand.vmem [shape: f32[4,512], index: 0, kind: input, shape index: {}]   ;;  %s3931_s1 = inlined_call_operand.vmem [shape: f32[96,4], index: 1, kind: input, shape index: {}]   ;;  %s3932_s2 = inlined_call_operand.vmem [shape: f32[16,32], index: 2, kind: input, shape index: {}]   ;;  %s3933_s3 = inlined_call_operand.vmem [shape: f32[16,1], index: 3, kind: input, shape index: {}]   ;;  %s3934_s4 = inlined_call_operand.hbm [shape: f32[16,512], index: 4, kind: output, shape index: {}]  }
   0x1   :  { %11 = vsyncpa [#allocation3 + $0x1], 0  ;;  %s2352_s15 = smov 0   ;;  %s2354_s16 = smov 0  }
   0x2   :  { %s2356_s17 = smov 0   ;;  %s2358_s18 = smov 0  }
   0x3 LB: > { %s2373_s19 = sadd.s32 4294967295, %s2312_s18   ;;  %s2074_s20 = sadd.s32 4294967294, %s2312_s18   ;;  %s2312_s18 = sphi %s2358_s18, %s4039_s18   ;;  %s2308_s17 = sphi %s2356_s17, %s4038_s17   ;;  %s2304_s16 = sphi %s2354_s16, %s4037_s16   ;;  %s2300_s15 = sphi %s2352_s15, %s4036_s15  }
   0x4   : > { %s2377_s21 = sadd.s32 1, %s2312_s18   ;;  %s113_s22 = sadd.s32 1, %s2308_s17 }
   0x5   : > { %s110_s23 = ssub.s32 %s2312_s18, %s2377_s21  ;;  %p123_p0 = scmp.ne.s32.totalorder %s2308_s17, %s2304_s16 }
   0x6   : > { %p111_p1 = scmp.eq.s32.totalorder %s110_s23, 0  ;;  %p124_p2 = scmp.eq.s32.totalorder %s2373_s19, 1 }
   0x7   : > { %p129_p3 = scmp.ne.s32.totalorder %s2304_s16, %s2300_s15  ;;  %p130_p4 = scmp.eq.s32.totalorder %s2074_s20, 1 }
   0x8   : > { %s2388_s24 = scalar_select %p111_p1, %s2308_s17, %s113_s22  }
   0x9   : > { %p2390_p5 = por %p124_p2, %p123_p0  ;;  %p2394_p6 = por %p130_p4, %p129_p3 }
   0xa   : > { %p2077_p7 = scmp.ge.s32.totalorder %s2312_s18, 1  ;;  %p166_p8 = scmp.lt.s32.totalorder %s2312_s18, 3 }
   0xc   : > { %p167_p9 = pnand %p2077_p7, %p166_p8 }
   0xe   : > { %170 = sbr.rel (%p167_p9) target bundleno = 731 (0x2db), region = 36 }
  0x13   : > { %v207_v0 = vld [vmem:[%s3931_s1 + $0x38] sm:$0xff]  ;;  %v206_v1 = vld [vmem:[%s3931_s1 + $0x30] sm:$0xff]  ;;  %v2314_v2 = vmov 2   ;;  %v2315_v3 = vmov 1   ;;  %v3946_v4 = vmov 0   ;;  %v205_v5 = vld [vmem:[%s3931_s1 + $0x28] sm:$0xff] }
  0x14   : > { %2178 = vset.pattern.permute.xlu2 %v2314_v2  ;;  %2175 = vset.pattern.permute.xlu0 %v2315_v3  ;;  %v2317_v6 = vmov 3   ;;  %v204_v7 = vld [vmem:[%s3931_s1 + $0x20] sm:$0xff]  ;;  %v202_v8 = vld [vmem:[%s3931_s1 + $0x10] sm:$0xff]  ;;  %v203_v9 = vld [vmem:[%s3931_s1 + $0x18] sm:$0xff]  ;;  %s2079_s6 = sshll.u32 %s2373_s19, 1  ;;  %s189_s30 = sand.u32 1, %s2304_s16  }
  0x15   : > { %2176 = vset.pattern.permute.xlu1 %v3946_v4  ;;  %434 = vperm.xlu2 %2178, %v207_v0   ;;  %v2438_v10 = vld [vmem:[%s3931_s1 + $0x58] sm:$0xff]  ;;  %v201_v11 = vld [vmem:[%s3931_s1 + $0x8] sm:$0xff]  ;;  %v200_v13 = vld [vmem:[%s3931_s1] sm:$0xff]  ;;  %p193_p10 = scmp.lt.s32.totalorder %s2079_s6, 3  ;;  %s2078_s5 = sshll.u32 %s189_s30, 5 }
  0x16   : > { %332 = vperm.xlu0 %2175, %v207_v0   ;;  %244 = vperm.xlu1 %2176, %v206_v1   ;;  %v2450_v12 = vld [vmem:[%s3931_s1 + $0x48] sm:$0xff]  ;;  %v2462_v14 = vld [vmem:[%s3931_s1 + $0x40] sm:$0xff]  ;;  %v2486_v19 = vld [vmem:[%s3931_s1 + $0x50] sm:$0xff]  ;;  %s1997_s13 = scalar_lea.sflag [#allocation3], %s189_s30  ;;  %s2270_s23 = scalar_lea.hbm %s3934_s4, 64 }
  0x17   : > { %s4041_s6 = smov (!%p193_p10, %s2079_s6), 3 }
  0x18   : > { %s2080_s7 = sshll.u32 %s4041_s6, 2  ;;  %s191_s6 = scalar_lea.vmem [#allocation2], %s2078_s5 }
  0x19   : > { %s196_s10 = scalar_lea.vmem %s3930_s0, %s2080_s7  ;;  %s2114_s7 = sshll.u32 %s2373_s19, 4 }
  0x1a   : > { %v199_v18 = vld [vmem:[%s196_s10] sm:$0xff]  ;;  %s2008_s10 = scalar_lea.hbm %s3934_s4, %s2114_s7  ;;  %s2009_s11 = sshll.u32 %s191_s6, 4  ;;  %s2010_s11 = int_to_ptr.vmem [resolvable:$true] %s2009_s11 }
  0x1b   : > { %v273_v22 = vperm.slane %v199_v18, 0  ;;  %v274_v23 = vperm.slane %v199_v18, 4  ;;  %v351_v24 = vperm.slane %v199_v18, 1  ;;  %v352_v25 = vperm.slane %v199_v18, 5  ;;  %s2011_s12 = sshll.u32 %s2008_s10, 4  ;;  %s2012_s12 = int_to_ptr.hbm [resolvable:$true] %s2011_s12 }
  0x1c   : > { %v453_v26 = vperm.slane %v199_v18, 2  ;;  %v454_v27 = vperm.slane %v199_v18, 6  ;;  %v555_v29 = vperm.slane %v199_v18, 3  ;;  %v556_v30 = vperm.slane %v199_v18, 7  ;;  %s2264_s14 = sshra.s32 %s2012_s12, 4  ;;  %s2265_s14 = int_to_ptr.hbm [resolvable:$true] %s2264_s14 }
  0x1d   : > { %2179 = vset.pattern.permute.xlu2 %v3946_v4  ;;  %v2494_v31 = vperm.slane %v273_v22, 0  ;;  %v2496_v32 = vperm.slane %v274_v23, 0  ;;  %v2498_v33 = vperm.slane %v351_v24, 1  ;;  %v2500_v34 = vperm.slane %v352_v25, 1  ;;  %s2266_s19 = scalar_lea.hbm %s2265_s14, 32  ;;  %p2271_p0 = scmp.lt.s32.totalorder %s2265_s14, %s3934_s4 }
  0x1e   : > { %2181 = vset.pattern.permute.xlu0 %v2317_v6  ;;  %2177 = vset.pattern.permute.xlu1 %v2315_v3  ;;  %v2502_v35 = vperm.slane %v453_v26, 2  ;;  %v2504_v36 = vperm.slane %v454_v27, 2  ;;  %v2510_v41 = vperm.slane %v555_v29, 3  ;;  %v2512_v42 = vperm.slane %v556_v30, 3  ;;  %p2267_p11 = scmp.ne.s32.totalorder %s2265_s14, %s2266_s19  ;;  %p2272_p1 = scmp.lt.s32.totalorder %s2270_s23, %s2266_s19 }
  0x1f   : > { %536 = vperm.xlu0 %2181, %v207_v0   ;;  %328 = vperm.xlu1 %2177, %v206_v1  }
  0x20   : > { %239 = vperm.xlu2 %2179, %v205_v5   ;;  %p2268_p12 = pnand %p2267_p11, %p2390_p5  ;;  %p2273_p2 = por %p2272_p1, %p2271_p0 }
  0x22   : > { %p2269_p13 = pneg %p2268_p12 }
  0x24   : > { %p2274_p3 = pnand %p2273_p2, %p2269_p13 }
  0x27   : > { %2182 = vset.pattern.permute.xlu0 %v3946_v4  ;;  %324 = vperm.xlu1 %2177, %v205_v5  }
  0x28   : > { %2180 = vset.pattern.permute.xlu2 %v2314_v2  ;;  %249 = vperm.xlu0 %2182, %v207_v0  }
  0x29   : > { %430 = vperm.xlu2 %2180, %v206_v1  }
  0x2f   : > { %2183 = vset.pattern.permute.xlu1 %v3946_v4 }
  0x30   : > { %234 = vperm.xlu1 %2183, %v204_v7   ;;  %224 = vperm.xlu0 %2182, %v202_v8  }
  0x31   : > { %2184 = vset.pattern.permute.xlu2 %v2315_v3 }
  0x32   : > { %320 = vperm.xlu2 %2184, %v204_v7  }
  0x38   : > { %2185 = vset.pattern.permute.xlu1 %v2314_v2  ;;  %2190 = vset.pattern.permute.xlu0 %v2314_v2 }
  0x39   : > { %426 = vperm.xlu1 %2185, %v205_v5   ;;  %422 = vperm.xlu0 %2190, %v204_v7  }
  0x3a   : > { %2186 = vset.pattern.permute.xlu2 %v2317_v6 }
  0x3b   : > { %532 = vperm.xlu2 %2186, %v206_v1  }
  0x41   : > { %2187 = vset.pattern.permute.xlu1 %v2317_v6  ;;  %414 = vperm.xlu0 %2190, %v202_v8  }
  0x42   : > { %528 = vperm.xlu1 %2187, %v205_v5  }
  0x43   : > { %524 = vperm.xlu2 %2186, %v204_v7  }
  0x49   : > { %2199 = vset.pattern.permute.xlu0 %v2317_v6 }
  0x4a   : > { %2188 = vset.pattern.permute.xlu1 %v3946_v4  ;;  %516 = vperm.xlu0 %2199, %v202_v8  }
  0x4b   : > { %2189 = vset.pattern.permute.xlu2 %v2315_v3  ;;  %229 = vperm.xlu1 %2188, %v203_v9  }
  0x4c   : > { %316 = vperm.xlu2 %2189, %v203_v9  }
  0x52   : > { %2204 = vset.pattern.permute.xlu0 %v2315_v3 }
  0x53   : > { %2191 = vset.pattern.permute.xlu1 %v2315_v3  ;;  %348 = vperm.xlu0 %2204, %v2438_v10  }
  0x54   : > { %2192 = vset.pattern.permute.xlu2 %v2314_v2  ;;  %312 = vperm.xlu1 %2191, %v202_v8  }
  0x55   : > { %418 = vperm.xlu2 %2192, %v203_v9  }
  0x5b   : > { %340 = vperm.xlu0 %2204, %v2450_v12  }
  0x5c   : > { %2193 = vset.pattern.permute.xlu1 %v3946_v4 }
  0x5d   : > { %2194 = vset.pattern.permute.xlu2 %v2315_v3  ;;  %219 = vperm.xlu1 %2193, %v201_v11  }
  0x5e   : > { %308 = vperm.xlu2 %2194, %v201_v11  }
  0x63   : > { %2210 = vset.pattern.permute.xlu0 %v3946_v4 }
  0x64   : > { %254 = vperm.xlu0 %2210, %v2462_v14  }
  0x65   : > { %2195 = vset.pattern.permute.xlu1 %v2317_v6 }
  0x66   : > { %2196 = vset.pattern.permute.xlu2 %v3946_v4  ;;  %520 = vperm.xlu1 %2195, %v203_v9  }
  0x67   : > { %214 = vperm.xlu2 %2196, %v200_v13  }
  0x6c   : > { %2214 = vset.pattern.permute.xlu0 %v2317_v6 }
  0x6d   : > { %544 = vperm.xlu0 %2214, %v2450_v12  }
  0x6e   : > { %2197 = vset.pattern.permute.xlu1 %v2315_v3 }
  0x6f   : > { %2198 = vset.pattern.permute.xlu2 %v2314_v2  ;;  %304 = vperm.xlu1 %2197, %v200_v13   ;;  %v2471_v15 = vpop.permute.xlu2 %434 }
  0x70   : > { %410 = vperm.xlu2 %2198, %v201_v11  }
  0x75   : > { %2217 = vset.pattern.permute.xlu0 %v3946_v4 }
  0x77   : > { %2200 = vset.pattern.permute.xlu1 %v2314_v2 }
  0x78   : > { %2201 = vset.pattern.permute.xlu2 %v2317_v6  ;;  %406 = vperm.xlu1 %2200, %v200_v13  }
  0x79   : > { %512 = vperm.xlu2 %2201, %v201_v11  }
  0x7a   : > { %v240_v16 = vpop.permute.xlu2 %239 }
  0x7b   : > { %v289_v54 = vmul.f32 %v2494_v31, %v240_v16  ;;  %v290_v55 = vmul.f32 %v2496_v32, %v240_v16 }
  0x80   : > { %2202 = vset.pattern.permute.xlu1 %v2317_v6 }
  0x81   : > { %2203 = vset.pattern.permute.xlu2 %v3946_v4  ;;  %508 = vperm.xlu1 %2202, %v200_v13  }
  0x82   : > { %269 = vperm.xlu2 %2203, %v2438_v10  }
  0x83   : > { %v431_v17 = vpop.permute.xlu2 %430 }
  0x84   : > { %v471_v37 = vmul.f32 %v2502_v35, %v431_v17  ;;  %v472_v38 = vmul.f32 %v2504_v36, %v431_v17 }
  0x88   : > { %v245_v20 = vpop.permute.xlu1 %244  ;;  %v2488_v21 = vpop.permute.xlu0 %332 }
  0x89   : > { %2205 = vset.pattern.permute.xlu1 %v3946_v4  ;;  %v291_v43 = vmul.f32 %v2494_v31, %v245_v20  ;;  %v292_v44 = vmul.f32 %v2496_v32, %v245_v20 }
  0x8a   : > { %2206 = vset.pattern.permute.xlu2 %v2315_v3  ;;  %264 = vperm.xlu1 %2205, %v2486_v19  }
  0x8b   : > { %344 = vperm.xlu2 %2206, %v2486_v19  }
  0x8c   : > { %v321_v28 = vpop.permute.xlu2 %320 }
  0x8d   : > { %v365_v1 = vmul.f32 %v2498_v33, %v321_v28  ;;  %v366_v5 = vmul.f32 %v2500_v34, %v321_v28 }
  0x91   : > { %v329_v39 = vpop.permute.xlu1 %328  ;;  %v2508_v40 = vpop.permute.xlu0 %536 }
  0x92   : > { %v369_v45 = vmul.f32 %v2498_v33, %v329_v39  ;;  %v370_v46 = vmul.f32 %v2500_v34, %v329_v39  ;;  %2207 = vset.pattern.permute.xlu1 %v2314_v2 }
  0x93   : > { %2208 = vset.pattern.permute.xlu2 %v3946_v4  ;;  %450 = vperm.xlu1 %2207, %v2438_v10  }
  0x94   : > { %v393_v47 = vadd.f32 %v369_v45, %v291_v43  ;;  %v394_v48 = vadd.f32 %v370_v46, %v292_v44  ;;  %259 = vperm.xlu2 %2208, %v2450_v12   ;;  %v371_v44 = vmul.f32 %v2498_v33, %v2488_v21 }
  0x95   : > { %v533_v49 = vpop.permute.xlu2 %532 }
  0x96   : > { %v495_v50 = vadd.f32 %v471_v37, %v393_v47  ;;  %v496_v51 = vadd.f32 %v472_v38, %v394_v48  ;;  %v573_v52 = vmul.f32 %v2510_v41, %v533_v49  ;;  %v574_v53 = vmul.f32 %v2512_v42, %v533_v49 }
  0x97   : > { %v372_v49 = vmul.f32 %v2500_v34, %v2488_v21  ;;  %v474_v21 = vmul.f32 %v2504_v36, %v2471_v15 }
  0x98   : > { %v2526_v56 = vadd.f32 %v573_v52, %v495_v50  ;;  %v2528_v57 = vadd.f32 %v574_v53, %v496_v51  ;;  %v473_v50 = vmul.f32 %v2502_v35, %v2471_v15  ;;  %v575_v52 = vmul.f32 %v2510_v41, %v2508_v40 }
  0x99   : > { %v325_v58 = vpop.permute.xlu1 %324 }
  0x9a   : > { %v367_v59 = vmul.f32 %v2498_v33, %v325_v58  ;;  %v368_v60 = vmul.f32 %v2500_v34, %v325_v58  ;;  %v250_v61 = vpop.permute.xlu0 %249  ;;  %2218 = vrcp.f32 %v2526_v56 }
  0x9b   : > { %446 = vperm.xlu1 %2207, %v2486_v19   ;;  %v293_v45 = vmul.f32 %v2494_v31, %v250_v61  ;;  %2220 = vrcp.f32 %v2528_v57 }
  0x9c   : > { %v391_v62 = vadd.f32 %v367_v59, %v289_v54  ;;  %v392_v63 = vadd.f32 %v368_v60, %v290_v55  ;;  %2209 = vset.pattern.permute.xlu2 %v2317_v6  ;;  %v576_v60 = vmul.f32 %v2512_v42, %v2508_v40 }
  0x9d   : > { %552 = vperm.xlu2 %2209, %v2438_v10   ;;  %v525_v0 = vpop.permute.xlu2 %524  ;;  %v395_v47 = vadd.f32 %v371_v44, %v293_v45 }
  0x9e   : > { %v569_v17 = vmul.f32 %v2510_v41, %v525_v0  ;;  %v570_v18 = vmul.f32 %v2512_v42, %v525_v0 }
  0x9f   : > { %v497_v53 = vadd.f32 %v473_v50, %v395_v47 }
  0xa0   : > { %v2219_v59 = vpop.eup %2218 }
  0xa2   : > { %v235_v7 = vpop.permute.xlu1 %234  ;;  %v225_v8 = vpop.permute.xlu0 %224 }
  0xa3   : > { %v287_v9 = vmul.f32 %v2494_v31, %v235_v7  ;;  %v288_v11 = vmul.f32 %v2496_v32, %v235_v7  ;;  %2211 = vset.pattern.permute.xlu1 %v2315_v3  ;;  %v283_v55 = vmul.f32 %v2494_v31, %v225_v8  ;;  %v284_v58 = vmul.f32 %v2496_v32, %v225_v8  ;;  %v2221_v7 = vpop.eup %2220 }
  0xa4   : > { %336 = vperm.xlu1 %2211, %v2462_v14  }
  0xa5   : > { %v389_v13 = vadd.f32 %v365_v1, %v287_v9  ;;  %v390_v16 = vadd.f32 %v366_v5, %v288_v11  ;;  %2212 = vset.pattern.permute.xlu2 %v2314_v2  ;;  %v621_v9 = vmul.f32 %v2219_v59, %v2526_v56 }
  0xa6   : > { %442 = vperm.xlu2 %2212, %v2450_v12   ;;  %v2543_v10 = vpop.permute.xlu2 %316 }
  0xab   : > { %v427_v20 = vpop.permute.xlu1 %426  ;;  %v423_v22 = vpop.permute.xlu0 %422 }
  0xac   : > { %v469_v23 = vmul.f32 %v2502_v35, %v427_v20  ;;  %v470_v3 = vmul.f32 %v2504_v36, %v427_v20  ;;  %v467_v24 = vmul.f32 %v2502_v35, %v423_v22  ;;  %v468_v25 = vmul.f32 %v2504_v36, %v423_v22  ;;  %2213 = vset.pattern.permute.xlu1 %v2317_v6 }
  0xad   : > { %548 = vperm.xlu1 %2213, %v2486_v19  }
  0xae   : > { %v493_v2 = vadd.f32 %v469_v23, %v391_v62  ;;  %v494_v12 = vadd.f32 %v470_v3, %v392_v63  ;;  %v491_v26 = vadd.f32 %v467_v24, %v389_v13  ;;  %v492_v27 = vadd.f32 %v468_v25, %v390_v16  ;;  %438 = vperm.xlu2 %2212, %v2462_v14  }
  0xaf   : > { %v2554_v28 = vpop.permute.xlu2 %418  ;;  %v629_v3 = vsub.f32 2.0, %v621_v9 }
  0xb0   : > { %v2556_v29 = vadd.f32 %v569_v17, %v491_v26  ;;  %v2558_v30 = vadd.f32 %v570_v18, %v492_v27  ;;  %v622_v18 = vmul.f32 %v2221_v7, %v2528_v57 }
  0xb2   : > { %v630_v27 = vsub.f32 2.0, %v622_v18 }
  0xb3   : > { %v415_v48 = vpop.permute.xlu0 %414 }
  0xb4   : > { %v529_v37 = vpop.permute.xlu1 %528  ;;  %v463_v0 = vmul.f32 %v2502_v35, %v415_v48  ;;  %v464_v8 = vmul.f32 %v2504_v36, %v415_v48  ;;  %v2605_v48 = vmul.f32 %v2219_v59, %v629_v3  ;;  %v465_v59 = vmul.f32 %v2502_v35, %v2554_v28 }
  0xb5   : > { %v571_v38 = vmul.f32 %v2510_v41, %v529_v37  ;;  %v572_v39 = vmul.f32 %v2512_v42, %v529_v37  ;;  %540 = vperm.xlu1 %2213, %v2462_v14   ;;  %v294_v14 = vmul.f32 %v2496_v32, %v250_v61  ;;  %v599_v61 = vadd.f32 %v575_v52, %v497_v53 }
  0xb6   : > { %2215 = vset.pattern.permute.xlu2 %v3946_v4  ;;  %3975 = vst [vmem:[#allocation5_spill] sm:$0xff] %v2605_v48 }
  0xb7   : > { %v595_v6 = vadd.f32 %v571_v38, %v493_v2  ;;  %v596_v19 = vadd.f32 %v572_v39, %v494_v12  ;;  %v396_v54 = vadd.f32 %v372_v49, %v294_v14 }
  0xb8   : > { %v309_v43 = vpop.permute.xlu2 %308 }
  0xb9   : > { %2222 = vrcp.f32 %v595_v6  ;;  %v498_v63 = vadd.f32 %v474_v21, %v396_v54  ;;  %v359_v12 = vmul.f32 %v2498_v33, %v309_v43  ;;  %v360_v26 = vmul.f32 %v2500_v34, %v309_v43 }
  0xba   : > { %2224 = vrcp.f32 %v596_v19  ;;  %v2607_v54 = vmul.f32 %v2221_v7, %v630_v27 }
  0xbb   : > { %2226 = vrcp.f32 %v599_v61  ;;  %v600_v20 = vadd.f32 %v576_v60, %v498_v63 }
  0xbc   : > { %v517_v15 = vpop.permute.xlu0 %516  ;;  %3976 = vst [vmem:[#allocation6_spill] sm:$0xff] %v2607_v54 }
  0xbd   : > { %v2567_v46 = vpop.permute.xlu1 %229  ;;  %2216 = vset.pattern.permute.xlu1 %v3946_v4  ;;  %v565_v23 = vmul.f32 %v2510_v41, %v517_v15  ;;  %v566_v25 = vmul.f32 %v2512_v42, %v517_v15  ;;  %2228 = vrcp.f32 %v600_v20 }
  0xbe   : > { %2230 = vrcp.f32 %v2556_v29 }
  0xbf   : > { %v2223_v16 = vpop.eup %2222  ;;  %2232 = vrcp.f32 %v2558_v30 }
  0xc0   : > { %v2225_v17 = vpop.eup %2224  ;;  %v619_v2 = vmul.f32 %v2223_v16, %v595_v6  ;;  %v363_v6 = vmul.f32 %v2498_v33, %v2543_v10 }
  0xc1   : > { %v2576_v51 = vpop.permute.xlu2 %214  ;;  %v620_v56 = vmul.f32 %v2225_v17, %v596_v19  ;;  %v2227_v39 = vpop.eup %2226  ;;  %v285_v19 = vmul.f32 %v2494_v31, %v2567_v46 }
  0xc2   : > { %v627_v49 = vsub.f32 2.0, %v619_v2  ;;  %v623_v53 = vmul.f32 %v2227_v39, %v599_v61  ;;  %v466_v2 = vmul.f32 %v2504_v36, %v2554_v28 }
  0xc3   : > { %v628_v14 = vsub.f32 2.0, %v620_v56 }
  0xc4   : > { %v2620_v15 = vmul.f32 %v2223_v16, %v627_v49 }
  0xc5   : > { %v2622_v9 = vmul.f32 %v2225_v17, %v628_v14  ;;  %v279_v14 = vmul.f32 %v2494_v31, %v2576_v51 }
  0xc6   : > { %v313_v62 = vpop.permute.xlu1 %312 }
  0xc7   : > { %v361_v1 = vmul.f32 %v2498_v33, %v313_v62  ;;  %v362_v5 = vmul.f32 %v2500_v34, %v313_v62 }
  0xc9   : > { %v385_v11 = vadd.f32 %v361_v1, %v283_v55  ;;  %v386_v13 = vadd.f32 %v362_v5, %v284_v58  ;;  %v387_v1 = vadd.f32 %v363_v6, %v285_v19 }
  0xca   : > { %v411_v40 = vpop.permute.xlu2 %410 }
  0xcb   : > { %v487_v22 = vadd.f32 %v463_v0, %v385_v11  ;;  %v488_v24 = vadd.f32 %v464_v8, %v386_v13  ;;  %v461_v57 = vmul.f32 %v2502_v35, %v411_v40  ;;  %v462_v44 = vmul.f32 %v2504_v36, %v411_v40  ;;  %v2229_v0 = vpop.eup %2228 }
  0xcc   : > { %v364_v8 = vmul.f32 %v2500_v34, %v2543_v10  ;;  %v286_v13 = vmul.f32 %v2496_v32, %v2567_v46  ;;  %v489_v10 = vadd.f32 %v465_v59, %v387_v1  ;;  %v2231_v3 = vpop.eup %2230 }
  0xcd   : > { %v589_v37 = vadd.f32 %v565_v23, %v487_v22  ;;  %v590_v43 = vadd.f32 %v566_v25, %v488_v24  ;;  %v631_v22 = vsub.f32 2.0, %v623_v53  ;;  %v624_v24 = vmul.f32 %v2229_v0, %v600_v20  ;;  %v2233_v27 = vpop.eup %2232 }
  0xce   : > { %v388_v46 = vadd.f32 %v364_v8, %v286_v13 }
  0xcf   : > { %v220_v38 = vpop.permute.xlu1 %219  ;;  %v2610_v21 = vmul.f32 %v2605_v48, %v589_v37  ;;  %v2618_v61 = vmul.f32 %v2607_v54, %v590_v43  ;;  %v632_v6 = vsub.f32 2.0, %v624_v24 }
  0xd0   : > { %v281_v45 = vmul.f32 %v2494_v31, %v220_v38  ;;  %v282_v47 = vmul.f32 %v2496_v32, %v220_v38  ;;  %v617_v38 = vmul.f32 %v2231_v3, %v2556_v29  ;;  %v490_v28 = vadd.f32 %v466_v2, %v388_v46 }
  0xd1   : > { %3977 = vst [vmem:[#allocation7_spill] sm:$0xff] %v2618_v61  ;;  %v1272_v11 = vand.u32 2139095040, %v2610_v21  ;;  %v1427_v17 = vand.u32 2139095040, %v2618_v61 }
  0xd2   : > { %v383_v50 = vadd.f32 %v359_v12, %v281_v45  ;;  %v384_v52 = vadd.f32 %v360_v26, %v282_v47  ;;  %v2640_v12 = vmul.f32 %v2227_v39, %v631_v22  ;;  %v349_v45 = vpop.permute.xlu0 %348  ;;  %v618_v47 = vmul.f32 %v2233_v27, %v2558_v30 }
  0xd3   : > { %v513_v55 = vpop.permute.xlu2 %512  ;;  %v1273_v25 = vshrl.u32 %v1272_v11, 23  ;;  %v1428_v37 = vshrl.u32 %v1427_v17, 23  ;;  %v625_v49 = vsub.f32 2.0, %v617_v38 }
  0xd4   : > { %v485_v58 = vadd.f32 %v461_v57, %v383_v50  ;;  %v486_v60 = vadd.f32 %v462_v44, %v384_v52  ;;  %v563_v62 = vmul.f32 %v2510_v41, %v513_v55  ;;  %v564_v63 = vmul.f32 %v2512_v42, %v513_v55 }
  0xd5   : > { %v2093_v20 = vadd.s32 4294967169, %v1273_v25  ;;  %v2096_v19 = vadd.s32 4294967169, %v1428_v37  ;;  %v280_v52 = vmul.f32 %v2496_v32, %v2576_v51  ;;  %v2664_v8 = vmul.f32 %v2231_v3, %v625_v49 }
  0xd6   : > { %v587_v5 = vadd.f32 %v563_v62, %v485_v58  ;;  %v588_v7 = vadd.f32 %v564_v63, %v486_v60  ;;  %v626_v58 = vsub.f32 2.0, %v618_v47  ;;  %v2657_v60 = vmul.f32 %v2229_v0, %v632_v6 }
  0xd7   : > { %v1279_v53 = vadd.s32 1, %v2093_v20  ;;  %v1434_v62 = vadd.s32 1, %v2096_v19  ;;  %v2669_v0 = vmul.f32 %v2498_v33, %v349_v45  ;;  %v2675_v25 = vmul.f32 %v2500_v34, %v349_v45 }
  0xd8   : > { %v2631_v40 = vmul.f32 %v2620_v15, %v587_v5  ;;  %v2634_v18 = vmul.f32 %v2622_v9, %v588_v7  ;;  %v521_v16 = vpop.permute.xlu1 %520  ;;  %v2666_v11 = vmul.f32 %v2233_v27, %v626_v58 }
  0xd9   : > { %v567_v23 = vmul.f32 %v2510_v41, %v521_v16  ;;  %v568_v57 = vmul.f32 %v2512_v42, %v521_v16  ;;  %vm1280_vm0 = vcmp.gt.s32.totalorder %v1279_v53, 0  ;;  %vm1435_vm1 = vcmp.gt.s32.totalorder %v1434_v62, 0 }
  0xda   : > { %3978 = vst [vmem:[#allocation8_spill] sm:$0xff] %v2631_v40  ;;  %v341_v13 = vpop.permute.xlu0 %340  ;;  %v1281_v16 = vsel %vm1280_vm0, %v1279_v53, 0  ;;  %v962_v22 = vand.u32 2139095040, %v2631_v40  ;;  %v1117_v3 = vand.u32 2139095040, %v2634_v18  ;;  %v1436_v20 = vsel %vm1435_vm1, %v1434_v62, 0 }
  0xdb   : > { %3979 = vst [vmem:[#allocation9_spill] sm:$0xff] %v2634_v18  ;;  %v591_v56 = vadd.f32 %v567_v23, %v489_v10  ;;  %v592_v29 = vadd.f32 %v568_v57, %v490_v28  ;;  %v2681_v27 = vmul.f32 %v2498_v33, %v341_v13  ;;  %v2684_v37 = vmul.f32 %v2500_v34, %v341_v13 }
  0xdc   : > { %v2642_v26 = vpop.permute.xlu2 %269  ;;  %v2686_v38 = vshrl.u32 %v1281_v16, 5  ;;  %v2688_v57 = vand.u32 31, %v1281_v16  ;;  %v963_v47 = vshrl.u32 %v962_v22, 23  ;;  %v3940_v62 = vmov 920167782  }
  0xdd   : > { %v2647_v44 = vmul.f32 %v2640_v12, %v591_v56  ;;  %v2662_v7 = vmul.f32 %v2657_v60, %v592_v29  ;;  %v3936_v29 = vmov 2102212464   ;;  %v3944_v13 = vmov 1326507024  }
  0xde   : > { %3980 = vst [vmem:[#allocation10_spill] sm:$0xff] %v2686_v38  ;;  %v2711_v22 = vshrl.u32 %v1436_v20, 5 }
  0xdf   : > { %v1582_v39 = vand.u32 2139095040, %v2647_v44  ;;  %v1737_v23 = vand.u32 2139095040, %v2662_v7  ;;  %v3935_v2 = vand.u32 2147483647, %v2647_v44 }
  0xe0   : > { %3981 = vst [vmem:[#allocation11_spill] sm:$0xff] %v2711_v22 }
  0xe1   : > { %v305_v43 = vpop.permute.xlu1 %304  ;;  %v1583_v50 = vshrl.u32 %v1582_v39, 23  ;;  %v1738_v28 = vshrl.u32 %v1737_v23, 23  ;;  %v3948_v23 = vmov 683565275  }
  0xe2   : > { %v357_v55 = vmul.f32 %v2498_v33, %v305_v43  ;;  %v358_v30 = vmul.f32 %v2500_v34, %v305_v43  ;;  %v1118_v43 = vshrl.u32 %v1117_v3, 23 }
  0xe3   : > { %v2099_v63 = vadd.s32 4294967169, %v1583_v50 }
  0xe4   : > { %v381_v59 = vadd.f32 %v357_v55, %v279_v14  ;;  %v382_v1 = vadd.f32 %v358_v30, %v280_v52  ;;  %v1586_v14 = vand.u32 8388607, %v3935_v2  ;;  %v3942_v52 = vmov 2475754826  }
  0xe5   : > { %v2659_v5 = vpop.permute.xlu2 %344  ;;  %v1589_v51 = vadd.s32 1, %v2099_v63  ;;  %v3938_v55 = vmov 2131351028  }
  0xe6   : > { %v1587_v2 = vor.u32 8388608, %v1586_v14 }
  0xe7   : > { %vm1590_vm2 = vcmp.gt.s32.totalorder %v1589_v51, 0 }
  0xe8   : > { %v1591_v17 = vsel %vm1590_vm2, %v1589_v51, 0 }
  0xe9   : > { %v1593_v24 = vand.u32 31, %v1591_v17  ;;  %v2693_v49 = vshrl.u32 %v1591_v17, 5  ;;  %v2102_v17 = vadd.s32 4294967169, %v1738_v28  ;;  %v2725_v28 = vand.u32 31, %v1436_v20 }
  0xea   : > { %v407_v10 = vpop.permute.xlu1 %406 }
  0xeb   : > { %v459_v46 = vmul.f32 %v2502_v35, %v407_v10  ;;  %v460_v56 = vmul.f32 %v2504_v36, %v407_v10  ;;  %v2691_v45 = vsub.s32 32, %v1593_v24  ;;  %v1605_v50 = vshll.u32 %v3936_v29, %v1593_v24 }
  0xec   : > { %v1608_v51 = vshll.u32 %v3940_v62, %v1593_v24  ;;  %v1596_v10 = vshll.u32 %v3948_v23, %v1593_v24  ;;  %vm1614_vm3 = vcmp.lt.s32.totalorder %v2693_v49, 4  ;;  %vm1611_vm4 = vcmp.lt.s32.totalorder %v2693_v49, 1 }
  0xed   : > { %v483_v6 = vadd.f32 %v459_v46, %v381_v59  ;;  %v484_v39 = vadd.f32 %v460_v56, %v382_v1  ;;  %v1597_v53 = vshrl.u32 %v3942_v52, %v2691_v45  ;;  %v1600_v30 = vshrl.u32 %v3938_v55, %v2691_v45  ;;  %v2714_v56 = vpop.permute.xlu0 %254 }
  0xee   : > { %v260_v19 = vpop.permute.xlu2 %259  ;;  %v1603_v58 = vshrl.u32 %v3936_v29, %v2691_v45  ;;  %v1606_v63 = vshrl.u32 %v3940_v62, %v2691_v45  ;;  %v1599_v59 = vshll.u32 %v3942_v52, %v1593_v24  ;;  %v1602_v1 = vshll.u32 %v3938_v55, %v1593_v24 }
  0xef   : > { %v1609_v16 = vshrl.u32 %v3944_v13, %v2691_v45  ;;  %v2722_v4 = vor.u32 %v1597_v53, %v1596_v10  ;;  %v2087_v24 = vadd.s32 4294967169, %v963_v47  ;;  %vm1613_vm5 = vcmp.lt.s32.totalorder %v2693_v49, 3 }
  0xf0   : > { %v1607_v3 = vor.u32 %v1606_v63, %v1605_v50  ;;  %v2716_v29 = vor.u32 %v1600_v30, %v1599_v59  ;;  %v2718_v55 = vor.u32 %v1603_v58, %v1602_v1  ;;  %v2090_v50 = vadd.s32 4294967169, %v1118_v43 }
  0xf1   : > { %v1610_v62 = vor.u32 %v1609_v16, %v1608_v51  ;;  %v1744_v30 = vadd.s32 1, %v2102_v17  ;;  %v2739_v43 = vshll.u32 %v1587_v2, 8  ;;  %v2755_v1 = vsub.s32 32, %v2688_v57 }
  0xf2   : > { %v1620_v14 = vsel %vm1614_vm3, %v1607_v3, 920167782  ;;  %v1623_v20 = vsel %vm1611_vm4, %v2716_v29, %v2718_v55  ;;  %v377_v2 = vmul.f32 %v2498_v33, %v2659_v5  ;;  %vm1612_vm6 = vcmp.lt.s32.totalorder %v2693_v49, 2 }
  0xf3   : > { %v509_v46 = vpop.permute.xlu1 %508  ;;  %v1624_v47 = vsel %vm1614_vm3, %v1610_v62, 1326507024  ;;  %3984 = vst [vmem:[#allocation14_spill] sm:$0xff] %v2755_v1  ;;  %v378_v51 = vmul.f32 %v2500_v34, %v2659_v5  ;;  %v298_v16 = vmul.f32 %v2496_v32, %v260_v19  ;;  %vm1745_vm7 = vcmp.gt.s32.totalorder %v1744_v30, 0 }
  0xf4   : > { %v561_v52 = vmul.f32 %v2510_v41, %v509_v46  ;;  %v562_v13 = vmul.f32 %v2512_v42, %v509_v46  ;;  %v1625_v62 = vsel %vm1613_vm5, %v1607_v3, %v1624_v47  ;;  %v1628_v46 = vand.u32 65535, %v2739_v43 }
  0xf5   : > { %v1626_v17 = vsel %vm1612_vm6, %v1623_v20, %v1625_v62  ;;  %v1124_v3 = vadd.s32 1, %v2090_v50  ;;  %v301_v5 = vmul.f32 %v2494_v31, %v2642_v26  ;;  %v545_v20 = vpop.permute.xlu0 %544  ;;  %v2778_v62 = vshrl.u32 %v2739_v43, 16 }
  0xf6   : > { %v585_v63 = vadd.f32 %v561_v52, %v483_v6  ;;  %v586_v58 = vadd.f32 %v562_v13, %v484_v39  ;;  %v1619_v39 = vsel %vm1611_vm4, %v2722_v4, %v2716_v29  ;;  %v1621_v52 = vsel %vm1613_vm5, %v2718_v55, %v1620_v14 }
  0xf7   : > { %v2730_v59 = vpop.permute.xlu2 %552  ;;  %v297_v13 = vmul.f32 %v2494_v31, %v260_v19  ;;  %v2770_v10 = vsel %vm1612_vm6, %v1619_v39, %v1621_v52  ;;  %v1630_v14 = vand.u32 65535, %v1626_v17  ;;  %v1746_v48 = vsel %vm1745_vm7, %v1744_v30, 0 }
  0xf8   : > { %v2742_v53 = vmul.f32 %v2664_v8, %v585_v63  ;;  %v2745_v6 = vmul.f32 %v2666_v11, %v586_v58  ;;  %v1631_v63 = vshrl.u32 %v1626_v17, 16  ;;  %v969_v58 = vadd.s32 1, %v2087_v24 }
  0xf9   : > { %v399_v52 = vadd.f32 %v2681_v27, %v297_v13  ;;  %v400_v17 = vadd.f32 %v2684_v37, %v298_v16  ;;  %v1632_v24 = vmul.u32 %v1630_v14, %v1628_v46  ;;  %v1653_v50 = vshrl.u32 %v2770_v10, 16 }
  0xfa   : > { %3982 = vst [vmem:[#allocation12_spill] sm:$0xff] %v2742_v53  ;;  %v1633_v39 = vmul.u32 %v1631_v63, %v1628_v46  ;;  %v2788_v40 = vmul.u32 %v1630_v14, %v2778_v62  ;;  %vm970_vm8 = vcmp.gt.s32.totalorder %v969_v58, 0  ;;  %v579_v61 = vmul.f32 %v2510_v41, %v545_v20 }
  0xfb   : > { %3983 = vst [vmem:[#allocation13_spill] sm:$0xff] %v2745_v6  ;;  %v580_v27 = vmul.f32 %v2512_v42, %v545_v20  ;;  %vm1125_vm10 = vcmp.gt.s32.totalorder %v1124_v3, 0  ;;  %v1652_v16 = vand.u32 65535, %v2770_v10  ;;  %v2797_v14 = vmul.u32 %v1653_v50, %v1628_v46 }
  0xfc   : > { %v265_v47 = vpop.permute.xlu1 %264  ;;  %v2801_v20 = vand.u32 31, %v1746_v48  ;;  %v3993_v49 = vmov 2475754826  }
  0xfd   : > { %v299_v19 = vmul.f32 %v2494_v31, %v265_v47  ;;  %v300_v23 = vmul.f32 %v2496_v32, %v265_v47  ;;  %v1636_v47 = vshll.u32 %v1633_v39, 16 }
  0xff   : > { %v2783_v18 = vadd.f32 %v377_v2, %v299_v19  ;;  %v2785_v54 = vadd.f32 %v378_v51, %v300_v23  ;;  %vm1640_vm9 = vc.u32 %v1632_v24, %v1636_v47  ;;  %v1642_v2 = vadd.s32 %v1636_v47, %v1632_v24 }
 0x100   : > { %v443_v22 = vpop.permute.xlu2 %442  ;;  %v3987_v23 = vmov 0   ;;  %v1616_v24 = vsel %vm1614_vm3, %v2718_v55, 2102212464  ;;  %v3961_v47 = vand.u32 2147483647, %v2662_v7 }
 0x101   : > { %3985 = vst [vmem:[#allocation15_spill] sm:$0xff] %v2783_v18  ;;  %v477_v37 = vmul.f32 %v2502_v35, %v443_v22  ;;  %v478_v13 = vmul.f32 %v2504_v36, %v443_v22  ;;  %v1641_v51 = vsel %vm1640_vm9, 1, %v3987_v23  ;;  %v1638_v18 = vshll.u32 %v2788_v40, 16 }
 0x102   : > { %3986 = vst [vmem:[#allocation16_spill] sm:$0xff] %v2785_v54  ;;  %v1635_v54 = vmul.u32 %v1631_v63, %v2778_v62  ;;  %v302_v22 = vmul.f32 %v2496_v32, %v2642_v26  ;;  %v2812_v63 = vsel %vm970_vm8, %v969_v58, 0  ;;  %v3988_v26 = vmov 683565275  }
 0x103   : > { %v501_v19 = vadd.f32 %v477_v37, %v399_v52  ;;  %v502_v30 = vadd.f32 %v478_v13, %v400_v17  ;;  %vm1644_vm11 = vc.u32 %v1642_v2, %v1638_v18  ;;  %v2815_v17 = vsel %vm1125_vm10, %v1124_v3, 0 }
 0x104   : > { %v1643_v52 = vadd.s32 %v1641_v51, %v1635_v54  ;;  %v1595_v37 = vshrl.u32 %v3988_v26, %v2691_v45  ;;  %v1656_v13 = vmul.u32 %v1652_v16, %v2778_v62  ;;  %v1645_v54 = vsel %vm1644_vm11, 1, %v3987_v23 }
 0x105   : > { %v603_v10 = vadd.f32 %v579_v61, %v501_v19  ;;  %v604_v38 = vadd.f32 %v580_v27, %v502_v30  ;;  %v2809_v1 = vpop.permute.xlu1 %450  ;;  %v1658_v18 = vshll.u32 %v2797_v14, 16  ;;  %v1617_v45 = vsel %vm1613_vm5, %v2716_v29, %v1616_v24 }
 0x106   : > { %v1615_v58 = vsel %vm1611_vm4, %v1595_v37, %v2722_v4  ;;  %v1647_v3 = vadd.s32 %v1645_v54, %v1643_v52  ;;  %v2845_v27 = vadd.f32 %v2675_v25, %v302_v22  ;;  %v1654_v2 = vmul.u32 %v1652_v16, %v1628_v46 }
 0x107   : > { %v2821_v55 = vmul.f32 %v2620_v15, %v603_v10  ;;  %v2824_v61 = vmul.f32 %v2622_v9, %v604_v38  ;;  %v2836_v15 = vand.u32 8388607, %v3961_v47  ;;  %v2839_v9 = vsub.s32 32, %v2801_v20 }
 0x108   : > { %v2842_v38 = vadd.f32 %v2669_v0, %v301_v5  ;;  %v2848_v4 = vand.u32 31, %v2812_v63  ;;  %v2851_v29 = vand.u32 31, %v2815_v17  ;;  %v295_v51 = vmul.f32 %v2494_v31, %v2714_v56 }
 0x109   : > { %3989 = vst [vmem:[#allocation17_spill] sm:$0xff] %v2821_v55  ;;  %v1637_v19 = vshrl.u32 %v1633_v39, 16  ;;  %v2857_v30 = vsel %vm1612_vm6, %v1615_v58, %v1617_v45  ;;  %v1660_v0 = vshll.u32 %v1656_v13, 16  ;;  %vm1662_vm12 = vc.u32 %v1654_v2, %v1658_v18 }
 0x10a   : > { %3990 = vst [vmem:[#allocation18_spill] sm:$0xff] %v2824_v61  ;;  %v1664_v5 = vadd.s32 %v1658_v18, %v1654_v2  ;;  %v2859_v25 = vshrl.u32 %v1746_v48, 5  ;;  %v296_v46 = vmul.f32 %v2496_v32, %v2714_v56  ;;  %v1742_v22 = vor.u32 8388608, %v2836_v15 }
 0x10b   : > { %3991 = vst [vmem:[#allocation19_spill] sm:$0xff] %v2848_v4  ;;  %v1648_v16 = vadd.s32 %v1647_v3, %v1637_v19  ;;  %v1657_v31 = vmul.u32 %v1653_v50, %v2778_v62  ;;  %v1663_v39 = vsel %vm1662_vm12, 1, %v3987_v23  ;;  %v1752_v10 = vshrl.u32 %v3993_v49, %v2839_v9 }
 0x10c   : > { %3992 = vst [vmem:[#allocation20_spill] sm:$0xff] %v2851_v29  ;;  %vm1666_vm13 = vc.u32 %v1664_v5, %v1660_v0  ;;  %v2872_v48 = vmul.f32 %v2510_v41, %v2730_v59  ;;  %v2876_v32 = vmul.f32 %v2512_v42, %v2730_v59  ;;  %v1639_v56 = vshrl.u32 %v2788_v40, 16 }
 0x10d   : > { %v2864_v24 = vpop.permute.xlu1 %446  ;;  %v1672_v52 = vmul.u32 %v2739_v43, %v2857_v30  ;;  %v652_v62 = vand.u32 2139095040, %v2742_v53  ;;  %v1665_v50 = vadd.s32 %v1663_v39, %v1657_v31  ;;  %v1667_v37 = vsel %vm1666_vm13, 1, %v3987_v23 }
 0x10e   : > { %v1751_v54 = vshll.u32 %v3988_v26, %v2801_v20  ;;  %v807_v18 = vand.u32 2139095040, %v2745_v6  ;;  %v2886_v58 = vadd.s32 %v1648_v16, %v1639_v56  ;;  %v1659_v59 = vshrl.u32 %v2797_v14, 16 }
 0x10f   : > { %v1661_v45 = vshrl.u32 %v1656_v13, 16  ;;  %v1669_v3 = vadd.s32 %v1667_v37, %v1665_v50  ;;  %v1754_v43 = vshll.u32 %v3993_v49, %v2801_v20  ;;  %v3994_v15 = vmov 2131351028  }
 0x110   : > { %v2889_v40 = vor.u32 %v1752_v10, %v1751_v54  ;;  %v1755_v2 = vshrl.u32 %v3994_v15, %v2839_v9  ;;  %v1757_v19 = vshll.u32 %v3994_v15, %v2801_v20  ;;  %v3995_v30 = vmov 2102212464  }
 0x111   : > { %v1758_v31 = vshrl.u32 %v3995_v30, %v2839_v9  ;;  %v1760_v16 = vshll.u32 %v3995_v30, %v2801_v20  ;;  %v3996_v14 = vmov 920167782   ;;  %v1670_v39 = vadd.s32 %v1669_v3, %v1659_v59 }
 0x112   : > { %v1761_v13 = vshrl.u32 %v3996_v14, %v2839_v9  ;;  %v2903_v10 = vor.u32 %v1755_v2, %v1754_v43  ;;  %v1763_v56 = vshll.u32 %v3996_v14, %v2801_v20  ;;  %v3997_v50 = vmov 1326507024  }
 0x113   : > { %v1764_v37 = vshrl.u32 %v3997_v50, %v2839_v9  ;;  %v481_v54 = vmul.f32 %v2502_v35, %v2809_v1  ;;  %v2911_v47 = vadd.s32 %v1664_v5, %v1660_v0  ;;  %v2913_v61 = vor.u32 %v1758_v31, %v1757_v19 }
 0x114   : > { %v1762_v6 = vor.u32 %v1761_v13, %v1760_v16  ;;  %v482_v55 = vmul.f32 %v2504_v36, %v2809_v1  ;;  %v1671_v59 = vadd.s32 %v1670_v39, %v1661_v45  ;;  %vm1769_vm14 = vcmp.lt.s32.totalorder %v2859_v25, 4 }
 0x115   : > { %v1765_v3 = vor.u32 %v1764_v37, %v1763_v56  ;;  %vm1674_vm15 = vc.u32 %v2886_v58, %v2911_v47  ;;  %vm1766_vm0 = vcmp.lt.s32.totalorder %v2859_v25, 1  ;;  %vm1768_vm1 = vcmp.lt.s32.totalorder %v2859_v25, 3 }
 0x116   : > { %v337_v43 = vpop.permute.xlu1 %336  ;;  %v1775_v20 = vsel %vm1769_vm14, %v1762_v6, 920167782  ;;  %v1675_v1 = vadd.s32 1, %v1671_v59  ;;  %v1774_v45 = vsel %vm1766_vm0, %v2889_v40, %v2903_v10  ;;  %v1778_v19 = vsel %vm1766_vm0, %v2903_v10, %v2913_v61 }
 0x117   : > { %v373_v0 = vmul.f32 %v2498_v33, %v337_v43  ;;  %v374_v5 = vmul.f32 %v2500_v34, %v337_v43  ;;  %v1776_v2 = vsel %vm1768_vm1, %v2913_v61, %v1775_v20  ;;  %v1779_v33 = vsel %vm1769_vm14, %v1765_v3, 1326507024 }
 0x118   : > { %v2939_v31 = vshll.u32 %v1742_v22, 8  ;;  %v653_v34 = vshrl.u32 %v652_v62, 23  ;;  %v1676_v39 = vsel %vm1674_vm15, %v1675_v1, %v1671_v59  ;;  %v505_v56 = vadd.f32 %v481_v54, %v2842_v38  ;;  %v439_v59 = vpop.permute.xlu2 %438 }
 0x119   : > { %v397_v16 = vadd.f32 %v373_v0, %v295_v51  ;;  %v398_v13 = vadd.f32 %v374_v5, %v296_v46  ;;  %v1677_v37 = vadd.s32 %v1676_v39, %v1672_v52  ;;  %vm1767_vm2 = vcmp.lt.s32.totalorder %v2859_v25, 2 }
 0x11a   : > { %v1780_v43 = vsel %vm1768_vm1, %v1762_v6, %v1779_v33  ;;  %v808_v20 = vshrl.u32 %v807_v18, 23  ;;  %v506_v53 = vadd.f32 %v482_v55, %v2845_v27  ;;  %v1777_v3 = vsel %vm1767_vm2, %v1774_v45, %v1776_v2 }
 0x11b   : > { %v1781_v22 = vsel %vm1767_vm2, %v1778_v19, %v1780_v43  ;;  %v1678_v51 = vadd.s32 536870912, %v1677_v37  ;;  %v1783_v46 = vand.u32 65535, %v2939_v31  ;;  %v2952_v52 = vsub.s32 32, %v2725_v28 }
 0x11c   : > { %v1785_v62 = vand.u32 65535, %v1781_v22  ;;  %v1786_v38 = vshrl.u32 %v1781_v22, 16  ;;  %v2955_v54 = vshrl.u32 %v2812_v63, 5  ;;  %v2081_v6 = vadd.s32 4294967169, %v653_v34 }
 0x11d   : > { %v1784_v55 = vshrl.u32 %v2939_v31, 16  ;;  %v2959_v27 = vshrl.u32 %v2815_v17, 5  ;;  %v607_v18 = vadd.f32 %v2872_v48, %v505_v56  ;;  %v2962_v0 = vshrl.u32 %v1678_v51, 30 }
 0x11e   : > { %3998 = vst [vmem:[#allocation21_spill] sm:$0xff] %v2955_v54  ;;  %v1788_v5 = vmul.u32 %v1786_v38, %v1783_v46  ;;  %v2965_v1 = vsub.s32 32, %v2848_v4  ;;  %v2968_v45 = vsub.s32 32, %v2851_v29  ;;  %v1808_v19 = vshrl.u32 %v1777_v3, 16 }
 0x11f   : > { %3999 = vst [vmem:[#allocation22_spill] sm:$0xff] %v2959_v27  ;;  %v2970_v63 = vpop.permute.xlu1 %548  ;;  %v2972_v2 = vmul.u32 %v1785_v62, %v1784_v55  ;;  %v2974_v33 = vadd.s32 4294967169, %v808_v20  ;;  %v608_v17 = vadd.f32 %v2876_v32, %v506_v53  ;;  %v1680_v48 = vshll.u32 %v2962_v0, 30 }
 0x120   : > { %4000 = vst [vmem:[#allocation23_spill] sm:$0xff] %v2968_v45  ;;  %v1750_v34 = vshrl.u32 %v3988_v26, %v2839_v9  ;;  %v2980_v39 = vadd.s32 1, %v2081_v6  ;;  %v475_v56 = vmul.f32 %v2502_v35, %v439_v59  ;;  %v1787_v43 = vmul.u32 %v1785_v62, %v1783_v46 }
 0x121   : > { %v1791_v22 = vshll.u32 %v1788_v5, 16  ;;  %v1895_v51 = vmul.f32 %v2640_v12, %v607_v18  ;;  %v476_v27 = vmul.f32 %v2504_v36, %v439_v59  ;;  %v2985_v29 = vsub.s32 %v1677_v37, %v1680_v48 }
 0x122   : > { %v1807_v20 = vand.u32 65535, %v1777_v3  ;;  %v1793_v53 = vshll.u32 %v2972_v2, 16  ;;  %v1810_v45 = vmul.u32 %v1808_v19, %v1783_v46  ;;  %v1896_v9 = vmul.f32 %v2657_v60, %v608_v17 }
 0x123   : > { %vm1795_vm3 = vc.u32 %v1787_v43, %v1791_v22  ;;  %v1797_v32 = vadd.s32 %v1791_v22, %v1787_v43  ;;  %vm1682_vm4 = vcmp.lt.s32.totalorder %v2985_v29, 0  ;;  %v1683_v6 = vsub.s32 0, %v2985_v29 }
 0x124   : > { %v1790_v62 = vmul.u32 %v1786_v38, %v1784_v55  ;;  %v499_v54 = vadd.f32 %v475_v56, %v397_v16  ;;  %v1771_v12 = vsel %vm1769_vm14, %v2913_v61, 2102212464  ;;  %v1796_v37 = vsel %vm1795_vm3, 1, %v3987_v23 }
 0x125   : > { %vm1799_vm5 = vc.u32 %v1797_v32, %v1793_v53  ;;  %v500_v3 = vadd.f32 %v476_v27, %v398_v13  ;;  %v1684_v18 = vsel %vm1682_vm4, %v1683_v6, %v2985_v29  ;;  %v1811_v48 = vmul.u32 %v1807_v20, %v1784_v55 }
 0x126   : > { %v1798_v59 = vadd.s32 %v1796_v37, %v1790_v62  ;;  %vm1581_vm6 = vcmp.lt.s32.totalorder %v2647_v44, 0  ;;  %v1685_v60 = vclz %v1684_v18  ;;  %v1770_v16 = vsel %vm1766_vm0, %v1750_v34, %v2889_v40 }
 0x127   : > { %v541_v43 = vpop.permute.xlu1 %540  ;;  %v1800_v38 = vsel %vm1799_vm5, 1, %v3987_v23  ;;  %v1813_v17 = vshll.u32 %v1810_v45, 16  ;;  %v1792_v13 = vshrl.u32 %v1788_v5, 16  ;;  %v1772_v53 = vsel %vm1768_vm1, %v2903_v10, %v1771_v12 }
 0x128   : > { %v577_v61 = vmul.f32 %v2510_v41, %v541_v43  ;;  %v578_v56 = vmul.f32 %v2512_v42, %v541_v43  ;;  %v1802_v27 = vadd.s32 %v1800_v38, %v1798_v59  ;;  %v2100_v22 = vadd.s32 4294967294, %v1685_v60 }
 0x129   : > { %v1809_v32 = vmul.u32 %v1807_v20, %v1783_v46  ;;  %v1812_v6 = vmul.u32 %v1808_v19, %v1784_v55  ;;  %v4001_v40 = vand.u32 2147483647, %v2647_v44  ;;  %v1815_v4 = vshll.u32 %v1811_v48, 16 }
 0x12a   : > { %v601_v62 = vadd.f32 %v577_v61, %v499_v54  ;;  %v602_v37 = vadd.f32 %v578_v56, %v500_v3  ;;  %v1803_v18 = vadd.s32 %v1802_v27, %v1792_v13  ;;  %vm2101_vm8 = vcmp.lt.s32.totalorder %v2100_v22, 0 }
 0x12b   : > { %vm3008_vm7 = vcmp.le.f32.partialorder %v4001_v40, 0.7853982  ;;  %v1703_v5 = vsub.s32 4, %v2962_v0  ;;  %vm1817_vm9 = vc.u32 %v1809_v32, %v1813_v17  ;;  %v1819_v59 = vadd.s32 %v1813_v17, %v1809_v32 }
 0x12c   : > { %v3014_v43 = vmul.f32 %v2664_v8, %v601_v62  ;;  %v3017_v10 = vmul.f32 %v2666_v11, %v602_v37  ;;  %v1688_v46 = vsel %vm2101_vm8, 0, %v2100_v22  ;;  %v1794_v54 = vshrl.u32 %v2972_v2, 16 }
 0x12d   : > { %v1673_v55 = vadd.s32 %v2911_v47, %v2886_v58  ;;  %v1689_v19 = vsub.s32 32, %v1688_v46  ;;  %v1693_v20 = vsub.s32 4294967266, %v1688_v46  ;;  %v1818_v12 = vsel %vm1817_vm9, 1, %v3987_v23 }
 0x12e   : > { %v1773_v3 = vsel %vm1767_vm2, %v1770_v16, %v1772_v53  ;;  %v3025_v60 = vadd.s32 %v1803_v18, %v1794_v54  ;;  %v1820_v8 = vadd.s32 %v1818_v12, %v1812_v6  ;;  %vm1821_vm10 = vc.u32 %v1819_v59, %v1815_v4 }
 0x12f   : > { %v1690_v11 = vshll.u32 %v2985_v29, %v1688_v46  ;;  %v1691_v38 = vshrl.u32 %v1673_v55, %v1689_v19  ;;  %v1694_v17 = vadd.s32 127, %v1693_v20  ;;  %v1822_v2 = vsel %vm1821_vm10, 1, %v3987_v23 }
 0x130   : > { %v1909_v61 = vmul.f32 1.442695, %v1895_v51  ;;  %v1704_v47 = vsel %vm1581_vm6, %v1703_v5, %v2962_v0  ;;  %v1814_v58 = vshrl.u32 %v1810_v45, 16  ;;  %v1824_v56 = vadd.s32 %v1822_v2, %v1820_v8 }
 0x131   : > { %v3032_v13 = vmul.f32 1.442695, %v1896_v9  ;;  %v1692_v25 = vor.u32 %v1691_v38, %v1690_v11  ;;  %v1695_v16 = vshll.u32 %v1694_v17, 23  ;;  %v1823_v27 = vadd.s32 %v1819_v59, %v1815_v4  ;;  %v4004_v9 = vld [vmem:[#allocation14_spill] sm:$0xff] }
 0x132   : > { %v1816_v22 = vshrl.u32 %v1811_v48, 16  ;;  %v1825_v53 = vadd.s32 %v1824_v56, %v1814_v58  ;;  %v1827_v29 = vmul.u32 %v2939_v31, %v1773_v3  ;;  %v1269_v32 = vand.u32 2147483647, %v2610_v21 }
 0x133   : > { %v1696_v6 = vor.u32 4788187, %v1695_v16  ;;  %v1699_v62 = vcvt.s32.f32 %v1692_v25  ;;  %v1706_v51 = vsel %vm3008_vm7, 0, %v1704_v47  ;;  %vm1829_vm11 = vc.u32 %v3025_v60, %v1823_v27  ;;  %v4005_v16 = vld [vmem:[#allocation10_spill] sm:$0xff] }
 0x134   : > { %v1826_v0 = vadd.s32 %v1825_v53, %v1816_v22  ;;  %v1286_v45 = vshll.u32 %v3988_v26, %v2688_v57  ;;  %v1287_v4 = vshrl.u32 %v3993_v49, %v4004_v9  ;;  %v1289_v48 = vshll.u32 %v3993_v49, %v2688_v57 }
 0x135   : > { %v1697_v31 = vand.u32 2147483647, %v1696_v6  ;;  %v1290_v37 = vshrl.u32 %v3994_v15, %v4004_v9  ;;  %v1292_v40 = vshll.u32 %v3994_v15, %v2688_v57  ;;  %v1293_v18 = vshrl.u32 %v3995_v30, %v4004_v9  ;;  %v4006_v6 = vld [vmem:[#allocation15_spill] sm:$0xff] }
 0x136   : > { %v1830_v5 = vadd.s32 1, %v1826_v0  ;;  %v1276_v59 = vand.u32 8388607, %v1269_v32  ;;  %v1295_v46 = vshll.u32 %v3995_v30, %v2688_v57  ;;  %v1296_v54 = vshrl.u32 %v3996_v14, %v4004_v9 }
 0x137   : > { %v1700_v55 = vmul.f32 %v1699_v62, %v1697_v31  ;;  %v1288_v19 = vor.u32 %v1287_v4, %v1286_v45  ;;  %v3057_v20 = vor.u32 %v1290_v37, %v1289_v48  ;;  %v1294_v12 = vor.u32 %v1293_v18, %v1292_v40 }
 0x138   : > { %v1831_v3 = vsel %vm1829_vm11, %v1830_v5, %v1826_v0  ;;  %v1297_v8 = vor.u32 %v1296_v54, %v1295_v46  ;;  %v1298_v11 = vshll.u32 %v3996_v14, %v2688_v57  ;;  %v1299_v38 = vshrl.u32 %v3997_v50, %v4004_v9 }
 0x139   : > { %v479_v17 = vmul.f32 %v2502_v35, %v2864_v24  ;;  %v480_v2 = vmul.f32 %v2504_v36, %v2864_v24  ;;  %v1701_v47 = vxor.u32 2147483648, %v1700_v55  ;;  %v1832_v58 = vadd.s32 %v1831_v3, %v1827_v29 }
 0x13a   : > { %v1723_v56 = vadd.s32 3, %v1706_v51  ;;  %v1300_v25 = vor.u32 %v1299_v38, %v1298_v11  ;;  %vm1301_vm12 = vcmp.lt.s32.totalorder %v4005_v16, 1  ;;  %vm1304_vm13 = vcmp.lt.s32.totalorder %v4005_v16, 4  ;;  %v4007_v51 = vld [vmem:[#allocation16_spill] sm:$0xff] }
 0x13b   : > { %v1702_v57 = vsel %vm1581_vm6, %v1701_v47, %v1700_v55  ;;  %v1833_v22 = vadd.s32 536870912, %v1832_v58  ;;  %vm1303_vm14 = vcmp.lt.s32.totalorder %v4005_v16, 3  ;;  %v1310_v35 = vsel %vm1304_vm13, %v1297_v8, 920167782 }
 0x13c   : > { %v3079_v36 = vsel %vm3008_vm7, %v2647_v44, %v1702_v57  ;;  %v1277_v24 = vor.u32 8388608, %v1276_v59  ;;  %v1309_v53 = vsel %vm1301_vm12, %v1288_v19, %v3057_v20  ;;  %v1311_v29 = vsel %vm1303_vm14, %v1294_v12, %v1310_v35 }
 0x13d   : > { %v3087_v62 = vadd.f32 %v479_v17, %v4006_v6  ;;  %v3090_v0 = vadd.f32 %v480_v2, %v4007_v51  ;;  %v1707_v45 = vmul.f32 %v3079_v36, %v3079_v36  ;;  %v1834_v34 = vshrl.u32 %v1833_v22, 30 }
 0x13e   : > { %2234 = vpow2.f32 %v1909_v61  ;;  %vm1736_vm15 = vcmp.lt.s32.totalorder %v2662_v7, 0  ;;  %vm1302_vm0 = vcmp.lt.s32.totalorder %v4005_v16, 2  ;;  %v1313_v4 = vsel %vm1301_vm12, %v3057_v20, %v1294_v12 }
 0x13f   : > { %v1314_v48 = vsel %vm1304_vm13, %v1300_v25, 1326507024  ;;  %v1708_v31 = vmul.f32 -0.001358992, %v1707_v45  ;;  %v1715_v37 = vmul.f32 -0.00019511016, %v1707_v45  ;;  %v1312_v18 = vsel %vm1302_vm0, %v1309_v53, %v1311_v29 }
 0x140   : > { %v1835_v40 = vshll.u32 %v1834_v34, 30  ;;  %v3103_v5 = vand.u32 3, %v1723_v56  ;;  %v3106_v61 = vadd.s32 %v1823_v27, %v3025_v60  ;;  %v1315_v59 = vsel %vm1303_vm14, %v1297_v8, %v1314_v48 }
 0x141   : > { %v3110_v46 = vshll.u32 %v1277_v24, 8  ;;  %v1709_v54 = vadd.f32 0.041655596, %v1708_v31  ;;  %v1716_v55 = vadd.f32 0.008332121, %v1715_v37  ;;  %v1285_v11 = vshrl.u32 %v3988_v26, %v4004_v9 }
 0x142   : > { %v3112_v3 = vsub.s32 %v1832_v58, %v1835_v40  ;;  %v1858_v38 = vsub.s32 4, %v1834_v34  ;;  %v1306_v17 = vsel %vm1304_vm13, %v1294_v12, 2102212464  ;;  %v1316_v60 = vsel %vm1302_vm0, %v1313_v4, %v1315_v59 }
 0x143   : > { %v1343_v27 = vshrl.u32 %v1312_v18, 16  ;;  %v1710_v2 = vmul.f32 %v1709_v54, %v1707_v45  ;;  %v1717_v47 = vmul.f32 %v1716_v55, %v1707_v45  ;;  %v1318_v58 = vand.u32 65535, %v3110_v46 }
 0x144   : > { %vm1837_vm1 = vcmp.lt.s32.totalorder %v3112_v3, 0  ;;  %v1838_v8 = vsub.s32 0, %v3112_v3  ;;  %v2235_v56 = vpop.eup %2234  ;;  %v1320_v25 = vand.u32 65535, %v1316_v60  ;;  %v1321_v57 = vshrl.u32 %v1316_v60, 16 }
 0x145   : > { %v1342_v9 = vand.u32 65535, %v1312_v18  ;;  %v1711_v22 = vadd.f32 -0.4999988, %v1710_v2  ;;  %v1718_v35 = vadd.f32 -0.16666654, %v1717_v47  ;;  %vm1729_vm2 = vcmp.eq.s32.totalorder %v3103_v5, 2 }
 0x146   : > { %v1839_v12 = vsel %vm1837_vm1, %v1838_v8, %v3112_v3  ;;  %v1305_v24 = vsel %vm1301_vm12, %v1285_v11, %v1288_v19  ;;  %vm1726_vm3 = vcmp.eq.s32.totalorder %v3103_v5, 0  ;;  %v1319_v29 = vshrl.u32 %v3110_v46, 16 }
 0x147   : > { %v1840_v53 = vclz %v1839_v12  ;;  %v1323_v6 = vmul.u32 %v1321_v57, %v1318_v58  ;;  %v3129_v51 = vmul.u32 %v1343_v27, %v1318_v58  ;;  %v1712_v4 = vmul.f32 %v1711_v22, %v1707_v45 }
 0x148   : > { %v1719_v48 = vmul.f32 %v1718_v35, %v1707_v45  ;;  %vm1725_vm4 = vcmp.lt.s32.totalorder %v3103_v5, 2  ;;  %v3134_v31 = vsel %vm1736_vm15, %v1858_v38, %v1834_v34  ;;  %v1307_v19 = vsel %vm1303_vm14, %v3057_v20, %v1306_v17 }
 0x149   : > { %vm1722_vm5 = vweird.f32 %v2647_v44  ;;  %v2103_v37 = vadd.s32 4294967294, %v1840_v53  ;;  %v1322_v40 = vmul.u32 %v1320_v25, %v1318_v58  ;;  %v1344_v18 = vmul.u32 %v1342_v9, %v1318_v58 }
 0x14a   : > { %v3140_v59 = vmul.u32 %v1342_v9, %v1319_v29  ;;  %v1713_v54 = vadd.f32 1.0, %v1712_v4  ;;  %v1720_v55 = vadd.f32 1.0, %v1719_v48  ;;  %v1324_v45 = vmul.u32 %v1320_v25, %v1319_v29 }
 0x14b   : > { %v1326_v11 = vshll.u32 %v1323_v6, 16  ;;  %v4008_v60 = vand.u32 2147483647, %v2662_v7  ;;  %vm2104_vm7 = vcmp.lt.s32.totalorder %v2103_v37, 0  ;;  %v1325_v38 = vmul.u32 %v1321_v57, %v1319_v29 }
 0x14c   : > { %v1347_v20 = vmul.u32 %v1343_v27, %v1319_v29  ;;  %v1348_v17 = vshll.u32 %v3129_v51, 16  ;;  %v1721_v2 = vmul.f32 %v1720_v55, %v3079_v36  ;;  %v1730_v47 = vxor.u32 2147483648, %v1713_v54 }
 0x14d   : > { %vm3144_vm6 = vcmp.le.f32.partialorder %v4008_v60, 0.7853982  ;;  %v1843_v8 = vsel %vm2104_vm7, 0, %v2103_v37  ;;  %vm1330_vm8 = vc.u32 %v1322_v40, %v1326_v11  ;;  %v1327_v25 = vshrl.u32 %v1323_v6, 16 }
 0x14e   : > { %v1844_v58 = vsub.s32 32, %v1843_v8  ;;  %v1848_v9 = vsub.s32 4294967266, %v1843_v8  ;;  %v1331_v22 = vsel %vm1330_vm8, 1, %v3987_v23  ;;  %v1727_v35 = vxor.u32 2147483648, %v1721_v2 }
 0x14f   : > { %v1328_v12 = vshll.u32 %v1324_v45, 16  ;;  %v1332_v53 = vadd.s32 %v1326_v11, %v1322_v40  ;;  %v1333_v4 = vadd.s32 %v1331_v22, %v1325_v38  ;;  %v1731_v57 = vsel %vm1729_vm2, %v1730_v47, %v1721_v2 }
 0x150   : > { %v1845_v27 = vshll.u32 %v3112_v3, %v1843_v8  ;;  %v1846_v29 = vshrl.u32 %v3106_v61, %v1844_v58  ;;  %v1849_v36 = vadd.s32 127, %v1848_v9  ;;  %v1728_v48 = vsel %vm1726_vm3, %v1713_v54, %v1727_v35 }
 0x151   : > { %vm1334_vm9 = vc.u32 %v1332_v53, %v1328_v12  ;;  %v1350_v6 = vshll.u32 %v3140_v59, 16  ;;  %vm1352_vm10 = vc.u32 %v1344_v18, %v1348_v17  ;;  %v1732_v37 = vsel %vm1725_vm4, %v1728_v48, %v1731_v57 }
 0x152   : > { %v1847_v40 = vor.u32 %v1846_v29, %v1845_v27  ;;  %v1850_v55 = vshll.u32 %v1849_v36, 23  ;;  %v1335_v11 = vsel %vm1334_vm9, 1, %v3987_v23  ;;  %v1733_v3 = vsel %vm1722_vm5, nan, %v1732_v37 }
 0x153   : > { %v1337_v60 = vadd.s32 %v1335_v11, %v1333_v4  ;;  %v1353_v61 = vsel %vm1352_vm10, 1, %v3987_v23  ;;  %v1354_v38 = vadd.s32 %v1348_v17, %v1344_v18  ;;  %v1919_v2 = vmul.f32 %v2235_v56, %v1733_v3  ;;  %v4011_v18 = vld [vmem:[#allocation7_spill] sm:$0xff] }
 0x154   : > { %v1851_v54 = vor.u32 4788187, %v1850_v55  ;;  %v1308_v47 = vsel %vm1302_vm0, %v1305_v24, %v1307_v19  ;;  %v1355_v8 = vadd.s32 %v1353_v61, %v1347_v20  ;;  %v1861_v5 = vsel %vm3144_vm6, 0, %v3134_v31 }
 0x155   : > { %v1329_v58 = vshrl.u32 %v1324_v45, 16  ;;  %v1338_v9 = vadd.s32 %v1337_v60, %v1327_v25  ;;  %vm1356_vm11 = vc.u32 %v1354_v38, %v1350_v6  ;;  %1954 = vmatpush.msra.mxu0 %v1919_v2  ;;  %2115 = vmatpush.msra.mxu2 %v1919_v2  ;;  %v1854_v22 = vcvt.s32.f32 %v1847_v40 }
 0x156   : > { %v1852_v44 = vand.u32 2147483647, %v1851_v54  ;;  %v1357_v35 = vsel %vm1356_vm11, 1, %v3987_v23  ;;  %v1424_v56 = vand.u32 2147483647, %v4011_v18  ;;  %v581_v16 = vmul.f32 %v2510_v41, %v2970_v63 }
 0x157   : > { %v3173_v24 = vadd.s32 %v1338_v9, %v1329_v58  ;;  %v1349_v19 = vshrl.u32 %v3129_v51, 16  ;;  %v1359_v20 = vadd.s32 %v1357_v35, %v1355_v8  ;;  %v3178_v31 = vmul.f32 %v2512_v42, %v2970_v63  ;;  %v4012_v58 = vld [vmem:[#allocation11_spill] sm:$0xff] }
 0x158   : > { %v1855_v45 = vmul.f32 %v1854_v22, %v1852_v44  ;;  %v3180_v17 = vadd.s32 %v1354_v38, %v1350_v6  ;;  %v1362_v25 = vmul.u32 %v3110_v46, %v1308_v47  ;;  %v1878_v12 = vadd.s32 3, %v1861_v5 }
 0x159   : > { %v1351_v53 = vshrl.u32 %v3140_v59, 16  ;;  %v1360_v4 = vadd.s32 %v1359_v20, %v1349_v19  ;;  %v1441_v41 = vshll.u32 %v3988_v26, %v2725_v28  ;;  %v1431_v42 = vand.u32 8388607, %v1424_v56 }
 0x15a   : > { %v1856_v57 = vxor.u32 2147483648, %v1855_v45  ;;  %vm1364_vm12 = vc.u32 %v3173_v24, %v3180_v17  ;;  %v1442_v63 = vshrl.u32 %v3993_v49, %v2952_v52  ;;  %v1444_v46 = vshll.u32 %v3993_v49, %v2725_v28 }
 0x15b   : > { %v1361_v51 = vadd.s32 %v1360_v4, %v1351_v53  ;;  %v1445_v59 = vshrl.u32 %v3994_v15, %v2952_v52  ;;  %v1448_v27 = vshrl.u32 %v3995_v30, %v2952_v52  ;;  %v1447_v36 = vshll.u32 %v3994_v15, %v2725_v28 }
 0x15c   : > { %v1857_v29 = vsel %vm1736_vm15, %v1856_v57, %v1855_v45  ;;  %v1450_v48 = vshll.u32 %v3995_v30, %v2725_v28  ;;  %v1451_v6 = vshrl.u32 %v3996_v14, %v2952_v52  ;;  %v1453_v55 = vshll.u32 %v3996_v14, %v2725_v28  ;;  %v4013_v57 = vld [vmem:[#allocation5_spill] sm:$0xff] }
 0x15d   : > { %v3209_v37 = vsel %vm3144_vm6, %v2662_v7, %v1857_v29  ;;  %v1365_v40 = vadd.s32 1, %v1361_v51  ;;  %v1454_v11 = vshrl.u32 %v3997_v50, %v2952_v52  ;;  %v1432_v60 = vor.u32 8388608, %v1431_v42 }
 0x15e   : > { %v1862_v3 = vmul.f32 %v3209_v37, %v3209_v37  ;;  %v1443_v61 = vor.u32 %v1442_v63, %v1441_v41  ;;  %v1452_v38 = vor.u32 %v1451_v6, %v1450_v48  ;;  %v3220_v34 = vor.u32 %v1445_v59, %v1444_v46 }
 0x15f   : > { %v1366_v2 = vsel %vm1364_vm12, %v1365_v40, %v1361_v51  ;;  %v1449_v54 = vor.u32 %v1448_v27, %v1447_v36  ;;  %v1455_v47 = vor.u32 %v1454_v11, %v1453_v55  ;;  %vm1459_vm13 = vcmp.lt.s32.totalorder %v4012_v58, 4 }
 0x160   : > { %v1863_v8 = vmul.f32 -0.001358992, %v1862_v3  ;;  %v1870_v5 = vmul.f32 -0.00019511016, %v1862_v3  ;;  %v1367_v28 = vadd.s32 %v1366_v2, %v1362_v25  ;;  %v605_v9 = vadd.f32 %v581_v16, %v3087_v62 }
 0x161   : > { %v3224_v44 = vand.u32 3, %v1878_v12  ;;  %vm1456_vm14 = vcmp.lt.s32.totalorder %v4012_v58, 1  ;;  %v1465_v22 = vsel %vm1459_vm13, %v1452_v38, 920167782  ;;  %vm1458_vm15 = vcmp.lt.s32.totalorder %v4012_v58, 3 }
 0x162   : > { %v1864_v35 = vadd.f32 0.041655596, %v1863_v8  ;;  %v1871_v19 = vadd.f32 0.008332121, %v1870_v5  ;;  %v1368_v20 = vadd.s32 536870912, %v1367_v28  ;;  %v1464_v45 = vsel %vm1456_vm14, %v1443_v61, %v3220_v34 }
 0x163   : > { %v1466_v25 = vsel %vm1458_vm15, %v1449_v54, %v1465_v22  ;;  %v1469_v62 = vsel %vm1459_vm13, %v1455_v47, 1326507024  ;;  %v3237_v16 = vshll.u32 %v1432_v60, 8  ;;  %v1468_v41 = vsel %vm1456_vm14, %v3220_v34, %v1449_v54 }
 0x164   : > { %v1865_v12 = vmul.f32 %v1864_v35, %v1862_v3  ;;  %v1872_v53 = vmul.f32 %v1871_v19, %v1862_v3  ;;  %v3239_v4 = vshrl.u32 %v1368_v20, 30  ;;  %v3245_v42 = vmul.f32 %v4013_v57, %v605_v9 }
 0x165   : > { %2236 = vpow2.f32 %v3032_v13  ;;  %vm1457_vm0 = vcmp.lt.s32.totalorder %v4012_v58, 2  ;;  %v1470_v63 = vsel %vm1458_vm15, %v1452_v38, %v1469_v62  ;;  %vm1881_vm1 = vcmp.eq.s32.totalorder %v3224_v44, 0 }
 0x166   : > { %v1866_v51 = vadd.f32 -0.4999988, %v1865_v12  ;;  %v1873_v46 = vadd.f32 -0.16666654, %v1872_v53  ;;  %v1370_v59 = vshll.u32 %v3239_v4, 30  ;;  %v1467_v27 = vsel %vm1457_vm0, %v1464_v45, %v1466_v25 }
 0x167   : > { %v1440_v29 = vshrl.u32 %v3988_v26, %v2952_v52  ;;  %v1471_v13 = vsel %vm1457_vm0, %v1468_v41, %v1470_v63  ;;  %v1473_v36 = vand.u32 65535, %v3237_v16  ;;  %vm1880_vm2 = vcmp.lt.s32.totalorder %v3224_v44, 2 }
 0x168   : > { %v1867_v48 = vmul.f32 %v1866_v51, %v1862_v3  ;;  %v1874_v6 = vmul.f32 %v1873_v46, %v1862_v3  ;;  %v3261_v40 = vsub.s32 %v1367_v28, %v1370_v59  ;;  %v1474_v55 = vshrl.u32 %v3237_v16, 16 }
 0x169   : > { %vm1877_vm3 = vweird.f32 %v2662_v7  ;;  %v1475_v11 = vand.u32 65535, %v1471_v13  ;;  %v1476_v60 = vshrl.u32 %v1471_v13, 16  ;;  %v1497_v38 = vand.u32 65535, %v1467_v27 }
 0x16a   : > { %v1498_v2 = vshrl.u32 %v1467_v27, 16  ;;  %v1868_v52 = vadd.f32 1.0, %v1867_v48  ;;  %v1875_v47 = vadd.f32 1.0, %v1874_v6  ;;  %vm1271_vm4 = vcmp.lt.s32.totalorder %v2610_v21, 0 }
 0x16b   : > { %vm1372_vm5 = vcmp.lt.s32.totalorder %v3261_v40, 0  ;;  %v1373_v3 = vsub.s32 0, %v3261_v40  ;;  %v2237_v8 = vpop.eup %2236  ;;  %vm1884_vm6 = vcmp.eq.s32.totalorder %v3224_v44, 2  ;;  %v1363_v5 = vadd.s32 %v3180_v17, %v3173_v24 }
 0x16c   : > { %v1460_v28 = vsel %vm1456_vm14, %v1440_v29, %v1443_v61  ;;  %v1478_v9 = vmul.u32 %v1476_v60, %v1473_v36  ;;  %v1876_v22 = vmul.f32 %v1875_v47, %v3209_v37  ;;  %v1885_v35 = vxor.u32 2147483648, %v1868_v52 }
 0x16d   : > { %v1374_v19 = vsel %vm1372_vm5, %v1373_v3, %v3261_v40  ;;  %v1479_v20 = vmul.u32 %v1475_v11, %v1474_v55  ;;  %v1461_v25 = vsel %vm1459_vm13, %v1449_v54, 2102212464  ;;  %v3277_v12 = vmul.u32 %v1498_v2, %v1473_v36 }
 0x16e   : > { %v1375_v45 = vclz %v1374_v19  ;;  %v1481_v62 = vshll.u32 %v1478_v9, 16  ;;  %v1882_v53 = vxor.u32 2147483648, %v1876_v22  ;;  %v1393_v24 = vsub.s32 4, %v3239_v4 }
 0x16f   : > { %v1477_v17 = vmul.u32 %v1475_v11, %v1473_v36  ;;  %v1499_v41 = vmul.u32 %v1497_v38, %v1473_v36  ;;  %v1886_v61 = vsel %vm1884_vm6, %v1885_v35, %v1876_v22  ;;  %vm3284_vm7 = vcmp.le.f32.partialorder %v1269_v32, 0.7853982 }
 0x170   : > { %v2094_v57 = vadd.s32 4294967294, %v1375_v45  ;;  %v1480_v63 = vmul.u32 %v1476_v60, %v1474_v55  ;;  %v1501_v54 = vmul.u32 %v1497_v38, %v1474_v55  ;;  %v1883_v51 = vsel %vm1881_vm1, %v1868_v52, %v1882_v53 }
 0x171   : > { %v1483_v46 = vshll.u32 %v1479_v20, 16  ;;  %vm1485_vm8 = vc.u32 %v1477_v17, %v1481_v62  ;;  %v1487_v59 = vadd.s32 %v1481_v62, %v1477_v17  ;;  %v1887_v27 = vsel %vm1880_vm2, %v1883_v51, %v1886_v61  ;;  %v4016_v17 = vld [vmem:[#allocation8_spill] sm:$0xff] }
 0x172   : > { %vm2095_vm9 = vcmp.lt.s32.totalorder %v2094_v57, 0  ;;  %v1486_v29 = vsel %vm1485_vm8, 1, %v3987_v23  ;;  %v1503_v32 = vshll.u32 %v3277_v12, 16  ;;  %v1888_v13 = vsel %vm1877_vm3, nan, %v1887_v27 }
 0x173   : > { %v1378_v36 = vsel %vm2095_vm9, 0, %v2094_v57  ;;  %v1488_v48 = vadd.s32 %v1486_v29, %v1480_v63  ;;  %vm1489_vm10 = vc.u32 %v1487_v59, %v1483_v46  ;;  %v1920_v6 = vmul.f32 %v2237_v8, %v1888_v13 }
 0x174   : > { %v1379_v11 = vsub.s32 32, %v1378_v36  ;;  %v1383_v60 = vsub.s32 4294967266, %v1378_v36  ;;  %v1394_v38 = vsel %vm1271_vm4, %v1393_v24, %v3239_v4  ;;  %v1380_v44 = vshll.u32 %v3261_v40, %v1378_v36 }
 0x175   : > { %v1482_v52 = vshrl.u32 %v1478_v9, 16  ;;  %v1490_v47 = vsel %vm1489_vm10, 1, %v3987_v23  ;;  %v1502_v3 = vmul.u32 %v1498_v2, %v1474_v55  ;;  %1977 = vmatpush.msra.mxu1 %v1920_v6  ;;  %2119 = vmatpush.msra.mxu3 %v1920_v6  ;;  %vm1507_vm11 = vc.u32 %v1499_v41, %v1503_v32 }
 0x176   : > { %v1381_v7 = vshrl.u32 %v1363_v5, %v1379_v11  ;;  %v1384_v22 = vadd.s32 127, %v1383_v60  ;;  %v1492_v35 = vadd.s32 %v1490_v47, %v1488_v48  ;;  %v1462_v8 = vsel %vm1458_vm15, %v3220_v34, %v1461_v25 }
 0x177   : > { %v1505_v19 = vshll.u32 %v1501_v54, 16  ;;  %v1508_v45 = vsel %vm1507_vm11, 1, %v3987_v23  ;;  %v1509_v4 = vadd.s32 %v1503_v32, %v1499_v41  ;;  %v3306_v55 = vadd.s32 1, %v2974_v33 }
 0x178   : > { %v1382_v62 = vor.u32 %v1381_v7, %v1380_v44  ;;  %v1385_v40 = vshll.u32 %v1384_v22, 23  ;;  %v1493_v9 = vadd.s32 %v1492_v35, %v1482_v52  ;;  %v1510_v53 = vadd.s32 %v1508_v45, %v1502_v3 }
 0x179   : > { %v1396_v2 = vsel %vm3284_vm7, 0, %v1394_v38  ;;  %v1484_v5 = vshrl.u32 %v1479_v20, 16  ;;  %vm1511_vm12 = vc.u32 %v1509_v4, %v1505_v19  ;;  %v1463_v34 = vsel %vm1457_vm0, %v1460_v28, %v1462_v8 }
 0x17a   : > { %v1386_v24 = vor.u32 4788187, %v1385_v40  ;;  %v1512_v25 = vsel %vm1511_vm12, 1, %v3987_v23  ;;  %v959_v41 = vand.u32 2147483647, %v4016_v17  ;;  %v606_v61 = vadd.f32 %v3178_v31, %v3090_v0 }
 0x17b   : > { %v3316_v57 = vadd.s32 %v1493_v9, %v1484_v5  ;;  %v1504_v33 = vshrl.u32 %v3277_v12, 16  ;;  %v1514_v63 = vadd.s32 %v1512_v25, %v1510_v53  ;;  %vm660_vm13 = vcmp.gt.s32.totalorder %v2980_v39, 0  ;;  %v4018_v9 = vld [vmem:[#allocation21_spill] sm:$0xff] }
 0x17c   : > { %v1905_v20 = vmul.f32 1.442695, %v3245_v42  ;;  %v1387_v51 = vand.u32 2147483647, %v1386_v24  ;;  %v1389_v46 = vcvt.s32.f32 %v1382_v62  ;;  %v1413_v58 = vadd.s32 3, %v1396_v2 }
 0x17d   : > { %v1506_v28 = vshrl.u32 %v1501_v54, 16  ;;  %v3321_v59 = vadd.s32 %v1509_v4, %v1505_v19  ;;  %v1515_v27 = vadd.s32 %v1514_v63, %v1504_v33  ;;  %v1517_v29 = vmul.u32 %v3237_v16, %v1463_v34  ;;  %v4017_v54 = vld [vmem:[#allocation19_spill] sm:$0xff] }
 0x17e   : > { %v1390_v32 = vmul.f32 %v1389_v46, %v1387_v51  ;;  %v966_v0 = vand.u32 8388607, %v959_v41  ;;  %v980_v31 = vshrl.u32 %v3994_v15, %v2965_v1  ;;  %v983_v12 = vshrl.u32 %v3995_v30, %v2965_v1 }
 0x17f   : > { %v1516_v42 = vadd.s32 %v1515_v27, %v1506_v28  ;;  %vm1519_vm14 = vc.u32 %v3316_v57, %v3321_v59  ;;  %v985_v13 = vshll.u32 %v3995_v30, %v4017_v54  ;;  %v986_v16 = vshrl.u32 %v3996_v14, %v2965_v1 }
 0x180   : > { %v1391_v36 = vxor.u32 2147483648, %v1390_v32  ;;  %v977_v48 = vshrl.u32 %v3993_v49, %v2965_v1  ;;  %v979_v6 = vshll.u32 %v3993_v49, %v4017_v54  ;;  %v982_v11 = vshll.u32 %v3994_v15, %v4017_v54 }
 0x181   : > { %v1520_v60 = vadd.s32 1, %v1516_v42  ;;  %v987_v38 = vor.u32 %v986_v16, %v985_v13  ;;  %v988_v44 = vshll.u32 %v3996_v14, %v4017_v54  ;;  %v989_v52 = vshrl.u32 %v3997_v50, %v2965_v1 }
 0x182   : > { %v1392_v47 = vsel %vm1271_vm4, %v1391_v36, %v1390_v32  ;;  %v976_v3 = vshll.u32 %v3988_v26, %v4017_v54  ;;  %v3350_v7 = vor.u32 %v980_v31, %v979_v6  ;;  %v984_v22 = vor.u32 %v983_v12, %v982_v11 }
 0x183   : > { %v3355_v35 = vsel %vm3284_vm7, %v2610_v21, %v1392_v47  ;;  %v1521_v8 = vsel %vm1519_vm14, %v1520_v60, %v1516_v42  ;;  %v967_v19 = vor.u32 8388608, %v966_v0  ;;  %v990_v45 = vor.u32 %v989_v52, %v988_v44 }
 0x184   : > { %v1397_v4 = vmul.f32 %v3355_v35, %v3355_v35  ;;  %v1522_v62 = vadd.s32 %v1521_v8, %v1517_v29  ;;  %v3362_v40 = vor.u32 %v977_v48, %v976_v3  ;;  %vm994_vm15 = vcmp.lt.s32.totalorder %v4018_v9, 4  ;;  %v4019_v29 = vld [vmem:[#allocation6_spill] sm:$0xff] }
 0x185   : > { %vm991_vm0 = vcmp.lt.s32.totalorder %v4018_v9, 1  ;;  %vm993_vm1 = vcmp.lt.s32.totalorder %v4018_v9, 3  ;;  %v1000_v37 = vsel %vm994_vm15, %v987_v38, 920167782  ;;  %v1004_v53 = vsel %vm994_vm15, %v990_v45, 1326507024 }
 0x186   : > { %v1398_v2 = vmul.f32 -0.001358992, %v1397_v4  ;;  %v1405_v5 = vmul.f32 -0.00019511016, %v1397_v4  ;;  %v1523_v24 = vadd.s32 536870912, %v1522_v62  ;;  %v1003_v34 = vsel %vm991_vm0, %v3350_v7, %v984_v22 }
 0x187   : > { %v3377_v25 = vsel %vm660_vm13, %v2980_v39, 0  ;;  %v3379_v33 = vand.u32 3, %v1413_v58  ;;  %v1005_v63 = vsel %vm993_vm1, %v987_v38, %v1004_v53  ;;  %v3383_v51 = vshll.u32 %v967_v19, 8 }
 0x188   : > { %v1399_v46 = vadd.f32 0.041655596, %v1398_v2  ;;  %v1406_v28 = vadd.f32 0.008332121, %v1405_v5  ;;  %v3385_v27 = vshrl.u32 %v1523_v24, 30  ;;  %vm992_vm2 = vcmp.lt.s32.totalorder %v4018_v9, 2 }
 0x189   : > { %v3389_v32 = vmul.f32 %v4019_v29, %v606_v61  ;;  %v999_v39 = vsel %vm991_vm0, %v3362_v40, %v3350_v7  ;;  %v1001_v58 = vsel %vm993_vm1, %v984_v22, %v1000_v37  ;;  %v1006_v0 = vsel %vm992_vm2, %v1003_v34, %v1005_v63 }
 0x18a   : > { %2238 = vpow2.f32 %v1905_v20  ;;  %v1400_v31 = vmul.f32 %v1399_v46, %v1397_v4  ;;  %v1407_v12 = vmul.f32 %v1406_v28, %v1397_v4  ;;  %v1525_v42 = vshll.u32 %v3385_v27, 30 }
 0x18b   : > { %v1008_v54 = vand.u32 65535, %v3383_v51  ;;  %v3402_v61 = vshrl.u32 %v3383_v51, 16  ;;  %v1010_v13 = vand.u32 65535, %v1006_v0  ;;  %v1011_v16 = vshrl.u32 %v1006_v0, 16 }
 0x18c   : > { %v1401_v36 = vadd.f32 -0.4999988, %v1400_v31  ;;  %v1408_v48 = vadd.f32 -0.16666654, %v1407_v12  ;;  %vm1419_vm3 = vcmp.eq.s32.totalorder %v3379_v33, 2  ;;  %v3405_v6 = vsub.s32 %v1522_v62, %v1525_v42 }
 0x18d   : > { %v1002_v20 = vsel %vm992_vm2, %v999_v39, %v1001_v58  ;;  %vm1416_vm4 = vcmp.eq.s32.totalorder %v3379_v33, 0  ;;  %v1518_v11 = vadd.s32 %v3321_v59, %v3316_v57  ;;  %v975_v60 = vshrl.u32 %v3988_v26, %v2965_v1 }
 0x18e   : > { %v1013_v38 = vmul.u32 %v1011_v16, %v1008_v54  ;;  %v3415_v44 = vmul.u32 %v1010_v13, %v3402_v61  ;;  %v1402_v52 = vmul.f32 %v1401_v36, %v1397_v4  ;;  %v1409_v47 = vmul.f32 %v1408_v48, %v1397_v4 }
 0x18f   : > { %vm1415_vm5 = vcmp.lt.s32.totalorder %v3379_v33, 2  ;;  %vm1527_vm6 = vcmp.lt.s32.totalorder %v3405_v6, 0  ;;  %v1528_v3 = vsub.s32 0, %v3405_v6  ;;  %vm1412_vm7 = vweird.f32 %v2610_v21 }
 0x190   : > { %vm1426_vm8 = vcmp.lt.s32.totalorder %v4011_v18, 0  ;;  %v996_v57 = vsel %vm994_vm15, %v984_v22, 2102212464  ;;  %v1012_v1 = vmul.u32 %v1010_v13, %v1008_v54  ;;  %v1016_v59 = vshll.u32 %v1013_v38, 16  ;;  %v2239_v19 = vpop.eup %2238 }
 0x191   : > { %v1032_v8 = vand.u32 65535, %v1002_v20  ;;  %v1403_v45 = vadd.f32 1.0, %v1402_v52  ;;  %v1410_v62 = vadd.f32 1.0, %v1409_v47  ;;  %v1529_v4 = vsel %vm1527_vm6, %v1528_v3, %v3405_v6 }
 0x192   : > { %v1033_v37 = vshrl.u32 %v1002_v20, 16  ;;  %v1530_v53 = vclz %v1529_v4  ;;  %v1015_v2 = vmul.u32 %v1011_v16, %v3402_v61  ;;  %v1018_v5 = vshll.u32 %v3415_v44, 16 }
 0x193   : > { %vm1020_vm9 = vc.u32 %v1012_v1, %v1016_v59  ;;  %v1411_v24 = vmul.f32 %v1410_v62, %v3355_v35  ;;  %v1420_v34 = vxor.u32 2147483648, %v1403_v45  ;;  %v1022_v63 = vadd.s32 %v1016_v59, %v1012_v1 }
 0x194   : > { %v1021_v22 = vsel %vm1020_vm9, 1, %v3987_v23  ;;  %v2097_v46 = vadd.s32 4294967294, %v1530_v53  ;;  %v1548_v28 = vsub.s32 4, %v3385_v27  ;;  %v995_v29 = vsel %vm991_vm0, %v975_v60, %v3362_v40 }
 0x195   : > { %v997_v39 = vsel %vm993_vm1, %v3350_v7, %v996_v57  ;;  %v1417_v58 = vxor.u32 2147483648, %v1411_v24  ;;  %v1023_v0 = vadd.s32 %v1021_v22, %v1015_v2  ;;  %vm1024_vm10 = vc.u32 %v1022_v63, %v1018_v5 }
 0x196   : > { %v1034_v31 = vmul.u32 %v1032_v8, %v1008_v54  ;;  %v1421_v35 = vsel %vm1419_vm3, %v1420_v34, %v1411_v24  ;;  %vm2098_vm11 = vcmp.lt.s32.totalorder %v2097_v46, 0  ;;  %v1025_v12 = vsel %vm1024_vm10, 1, %v3987_v23  ;;  %v4022_v24 = vld [vmem:[#allocation9_spill] sm:$0xff] }
 0x197   : > { %v1035_v42 = vmul.u32 %v1033_v37, %v1008_v54  ;;  %v1418_v13 = vsel %vm1416_vm4, %v1403_v45, %v1417_v58  ;;  %v1533_v16 = vsel %vm2098_vm11, 0, %v2097_v46  ;;  %v1027_v40 = vadd.s32 %v1025_v12, %v1023_v0 }
 0x198   : > { %v1036_v36 = vmul.u32 %v1032_v8, %v3402_v61  ;;  %v1422_v7 = vsel %vm1415_vm5, %v1418_v13, %v1421_v35  ;;  %v1534_v48 = vsub.s32 32, %v1533_v16  ;;  %v1538_v20 = vsub.s32 4294967266, %v1533_v16 }
 0x199   : > { %v1017_v60 = vshrl.u32 %v1013_v38, 16  ;;  %v1423_v52 = vsel %vm1412_vm7, nan, %v1422_v7  ;;  %v1535_v47 = vshll.u32 %v3405_v6, %v1533_v16  ;;  %v1549_v54 = vsel %vm1426_vm8, %v1548_v28, %v3385_v27  ;;  %v4024_v16 = vld [vmem:[#allocation20_spill] sm:$0xff] }
 0x19a   : > { %v1038_v3 = vshll.u32 %v1035_v42, 16  ;;  %v1917_v57 = vmul.f32 %v2239_v19, %v1423_v52  ;;  %v1536_v1 = vshrl.u32 %v1518_v11, %v1534_v48  ;;  %v1539_v59 = vadd.s32 127, %v1538_v20 }
 0x19b   : > { %v1028_v8 = vadd.s32 %v1027_v40, %v1017_v60  ;;  %v1037_v33 = vmul.u32 %v1033_v37, %v3402_v61  ;;  %v1040_v45 = vshll.u32 %v1036_v36, 16  ;;  %v1019_v6 = vshrl.u32 %v3415_v44, 16 }
 0x19c   : > { %vm1042_vm12 = vc.u32 %v1034_v31, %v1038_v3  ;;  %v1044_v62 = vadd.s32 %v1038_v3, %v1034_v31  ;;  %1955 = vmatpush.msra.mxu0 %v1917_v57  ;;  %2116 = vmatpush.msra.mxu2 %v1917_v57  ;;  %v1537_v21 = vor.u32 %v1536_v1, %v1535_v47  ;;  %v1540_v38 = vshll.u32 %v1539_v59, 23  ;;  %v4023_v31 = vld [vmem:[#allocation23_spill] sm:$0xff] }
 0x19d   : > { %v1043_v4 = vsel %vm1042_vm12, 1, %v3987_v23  ;;  %vm3455_vm13 = vcmp.le.f32.partialorder %v1424_v56, 0.7853982  ;;  %v998_v61 = vsel %vm992_vm2, %v995_v29, %v997_v39  ;;  %v3463_v53 = vadd.s32 %v1028_v8, %v1019_v6  ;;  %v4025_v6 = vld [vmem:[#allocation22_spill] sm:$0xff] }
 0x19e   : > { %v1045_v11 = vadd.s32 %v1043_v4, %v1037_v33  ;;  %vm1046_vm14 = vc.u32 %v1044_v62, %v1040_v45  ;;  %v1541_v19 = vor.u32 4788187, %v1540_v38  ;;  %v1551_v37 = vsel %vm3455_vm13, 0, %v1549_v54 }
 0x19f   : > { %v1047_v44 = vsel %vm1046_vm14, 1, %v3987_v23  ;;  %v3467_v2 = vand.u32 31, %v3377_v25  ;;  %v1039_v56 = vshrl.u32 %v1035_v42, 16  ;;  %v1114_v34 = vand.u32 2147483647, %v4022_v24 }
 0x1a0   : > { %v1049_v5 = vadd.s32 %v1047_v44, %v1045_v11  ;;  %vm815_vm15 = vcmp.gt.s32.totalorder %v3306_v55, 0  ;;  %v1907_v9 = vmul.f32 1.442695, %v3389_v32  ;;  %v1542_v22 = vand.u32 2147483647, %v1541_v19 }
 0x1a1   : > { %v1544_v63 = vcvt.s32.f32 %v1537_v21  ;;  %v3472_v46 = vadd.s32 %v1044_v62, %v1040_v45  ;;  %v1568_v28 = vadd.s32 3, %v1551_v37  ;;  %v1041_v29 = vshrl.u32 %v1036_v36, 16 }
 0x1a2   : > { %v1050_v39 = vadd.s32 %v1049_v5, %v1039_v56  ;;  %v1052_v58 = vmul.u32 %v3383_v51, %v998_v61  ;;  %v1135_v35 = vshrl.u32 %v3994_v15, %v4023_v31  ;;  %v1138_v12 = vshrl.u32 %v3995_v30, %v4023_v31 }
 0x1a3   : > { %v1545_v0 = vmul.f32 %v1544_v63, %v1542_v22  ;;  %vm1054_vm0 = vc.u32 %v3463_v53, %v3472_v46  ;;  %v1121_v42 = vand.u32 8388607, %v1114_v34  ;;  %v1132_v13 = vshrl.u32 %v3993_v49, %v4023_v31 }
 0x1a4   : > { %v1051_v32 = vadd.s32 %v1050_v39, %v1041_v29  ;;  %v1134_v51 = vshll.u32 %v3993_v49, %v4024_v16  ;;  %v1137_v36 = vshll.u32 %v3994_v15, %v4024_v16  ;;  %v1140_v7 = vshll.u32 %v3995_v30, %v4024_v16 }
 0x1a5   : > { %v1546_v40 = vxor.u32 2147483648, %v1545_v0  ;;  %v1141_v48 = vshrl.u32 %v3996_v14, %v4023_v31  ;;  %v1131_v60 = vshll.u32 %v3988_v26, %v4024_v16  ;;  %v1143_v52 = vshll.u32 %v3996_v14, %v4024_v16 }
 0x1a6   : > { %v1055_v20 = vadd.s32 1, %v1051_v32  ;;  %v1144_v47 = vshrl.u32 %v3997_v50, %v4023_v31  ;;  %v3501_v3 = vor.u32 %v1135_v35, %v1134_v51  ;;  %v1139_v57 = vor.u32 %v1138_v12, %v1137_v36 }
 0x1a7   : > { %v1547_v54 = vsel %vm1426_vm8, %v1546_v40, %v1545_v0  ;;  %v1142_v1 = vor.u32 %v1141_v48, %v1140_v7  ;;  %v1122_v33 = vor.u32 8388608, %v1121_v42  ;;  %v3513_v38 = vor.u32 %v1132_v13, %v1131_v60 }
 0x1a8   : > { %v3506_v59 = vsel %vm3455_vm13, %v4011_v18, %v1547_v54  ;;  %v1056_v8 = vsel %vm1054_vm0, %v1055_v20, %v1051_v32  ;;  %v1145_v45 = vor.u32 %v1144_v47, %v1143_v52  ;;  %vm1149_vm1 = vcmp.lt.s32.totalorder %v4025_v6, 4 }
 0x1a9   : > { %v1552_v62 = vmul.f32 %v3506_v59, %v3506_v59  ;;  %v1057_v21 = vadd.s32 %v1056_v8, %v1052_v58  ;;  %vm1146_vm2 = vcmp.lt.s32.totalorder %v4025_v6, 1  ;;  %vm1148_vm3 = vcmp.lt.s32.totalorder %v4025_v6, 3 }
 0x1aa   : > { %v1155_v4 = vsel %vm1149_vm1, %v1142_v1, 920167782  ;;  %v1159_v27 = vsel %vm1149_vm1, %v1145_v45, 1326507024  ;;  %v1158_v37 = vsel %vm1146_vm2, %v3501_v3, %v1139_v57  ;;  %v3528_v44 = vsel %vm815_vm15, %v3306_v55, 0 }
 0x1ab   : > { %v1553_v61 = vmul.f32 -0.001358992, %v1552_v62  ;;  %v1560_v11 = vmul.f32 -0.00019511016, %v1552_v62  ;;  %v1058_v19 = vadd.s32 536870912, %v1057_v21  ;;  %v3530_v56 = vand.u32 3, %v1568_v28 }
 0x1ac   : > { %v1160_v5 = vsel %vm1148_vm3, %v1142_v1, %v1159_v27  ;;  %v3534_v22 = vshll.u32 %v1122_v33, 8  ;;  %vm1147_vm4 = vcmp.lt.s32.totalorder %v4025_v6, 2  ;;  %v3540_v58 = vsub.s32 32, %v3467_v2 }
 0x1ad   : > { %v1554_v63 = vadd.f32 0.041655596, %v1553_v61  ;;  %v1561_v29 = vadd.f32 0.008332121, %v1560_v11  ;;  %v3536_v39 = vshrl.u32 %v1058_v19, 30  ;;  %v1154_v55 = vsel %vm1146_vm2, %v3513_v38, %v3501_v3 }
 0x1ae   : > { %v1156_v28 = vsel %vm1148_vm3, %v1139_v57, %v1155_v4  ;;  %v1161_v0 = vsel %vm1147_vm4, %v1158_v37, %v1160_v5  ;;  %2240 = vpow2.f32 %v1907_v9  ;;  %v1163_v42 = vand.u32 65535, %v3534_v22 }
 0x1af   : > { %v1555_v35 = vmul.f32 %v1554_v63, %v1552_v62  ;;  %v1562_v12 = vmul.f32 %v1561_v29, %v1552_v62  ;;  %v1060_v32 = vshll.u32 %v3536_v39, 30  ;;  %v3553_v13 = vshrl.u32 %v3534_v22, 16 }
 0x1b0   : > { %v1165_v16 = vand.u32 65535, %v1161_v0  ;;  %v1166_v51 = vshrl.u32 %v1161_v0, 16  ;;  %vm1574_vm5 = vcmp.eq.s32.totalorder %v3530_v56, 2  ;;  %v1157_v9 = vsel %vm1147_vm4, %v1154_v55, %v1156_v28 }
 0x1b1   : > { %v1556_v40 = vadd.f32 -0.4999988, %v1555_v35  ;;  %v1563_v36 = vadd.f32 -0.16666654, %v1562_v12  ;;  %v3556_v7 = vsub.s32 %v1057_v21, %v1060_v32  ;;  %vm1571_vm6 = vcmp.eq.s32.totalorder %v3530_v56, 0 }
 0x1b2   : > { %v1053_v48 = vadd.s32 %v3472_v46, %v3463_v53  ;;  %v1130_v20 = vshrl.u32 %v3988_v26, %v4023_v31  ;;  %v1168_v60 = vmul.u32 %v1166_v51, %v1163_v42  ;;  %v3566_v52 = vmul.u32 %v1165_v16, %v3553_v13 }
 0x1b3   : > { %v1557_v47 = vmul.f32 %v1556_v40, %v1552_v62  ;;  %v1564_v54 = vmul.f32 %v1563_v36, %v1552_v62  ;;  %vm1570_vm7 = vcmp.lt.s32.totalorder %v3530_v56, 2  ;;  %vm1062_vm8 = vcmp.lt.s32.totalorder %v3556_v7, 0 }
 0x1b4   : > { %v1063_v1 = vsub.s32 0, %v3556_v7  ;;  %vm1567_vm9 = vweird.f32 %v4011_v18  ;;  %vm961_vm10 = vcmp.lt.s32.totalorder %v4016_v17, 0  ;;  %v1151_v53 = vsel %vm1149_vm1, %v1139_v57, 2102212464  ;;  %v2241_v33 = vpop.eup %2240 }
 0x1b5   : > { %v1167_v46 = vmul.u32 %v1165_v16, %v1163_v42  ;;  %v1171_v31 = vshll.u32 %v1168_v60, 16  ;;  %v1187_v8 = vand.u32 65535, %v1157_v9  ;;  %v1558_v45 = vadd.f32 1.0, %v1557_v47 }
 0x1b6   : > { %v1565_v21 = vadd.f32 1.0, %v1564_v54  ;;  %v1064_v62 = vsel %vm1062_vm8, %v1063_v1, %v3556_v7  ;;  %v1188_v4 = vshrl.u32 %v1157_v9, 16  ;;  %v1170_v61 = vmul.u32 %v1166_v51, %v3553_v13 }
 0x1b7   : > { %v1065_v27 = vclz %v1064_v62  ;;  %v1173_v11 = vshll.u32 %v3566_v52, 16  ;;  %vm1175_vm11 = vc.u32 %v1167_v46, %v1171_v31  ;;  %v1575_v37 = vxor.u32 2147483648, %v1558_v45 }
 0x1b8   : > { %v1566_v19 = vmul.f32 %v1565_v21, %v3506_v59  ;;  %v1176_v57 = vsel %vm1175_vm11, 1, %v3987_v23  ;;  %v1177_v5 = vadd.s32 %v1171_v31, %v1167_v46  ;;  %v1083_v29 = vsub.s32 4, %v3536_v39 }
 0x1b9   : > { %v2088_v63 = vadd.s32 4294967294, %v1065_v27  ;;  %v1150_v55 = vsel %vm1146_vm2, %v1130_v20, %v3513_v38  ;;  %v1152_v28 = vsel %vm1148_vm3, %v3501_v3, %v1151_v53  ;;  %v1178_v35 = vadd.s32 %v1176_v57, %v1170_v61 }
 0x1ba   : > { %v1572_v0 = vxor.u32 2147483648, %v1566_v19  ;;  %vm1179_vm12 = vc.u32 %v1177_v5, %v1173_v11  ;;  %v1189_v12 = vmul.u32 %v1187_v8, %v1163_v42  ;;  %v1576_v59 = vsel %vm1574_vm5, %v1575_v37, %v1566_v19  ;;  %v4028_v37 = vld [vmem:[#allocation12_spill] sm:$0xff]  ;;  %v4029_v5 = vld [vmem:[#allocation17_spill] sm:$0xff] }
 0x1bb   : > { %vm2089_vm13 = vcmp.lt.s32.totalorder %v2088_v63, 0  ;;  %v1180_v32 = vsel %vm1179_vm12, 1, %v3987_v23  ;;  %v1190_v16 = vmul.u32 %v1188_v4, %v1163_v42  ;;  %v1191_v36 = vmul.u32 %v1187_v8, %v3553_v13 }
 0x1bc   : > { %v1573_v51 = vsel %vm1571_vm6, %v1558_v45, %v1572_v0  ;;  %v1068_v40 = vsel %vm2089_vm13, 0, %v2088_v63  ;;  %v1182_v38 = vadd.s32 %v1180_v32, %v1178_v35  ;;  %v1172_v47 = vshrl.u32 %v1168_v60, 16 }
 0x1bd   : > { %v1577_v3 = vsel %vm1570_vm7, %v1573_v51, %v1576_v59  ;;  %v1069_v9 = vsub.s32 32, %v1068_v40  ;;  %v1073_v20 = vsub.s32 4294967266, %v1068_v40  ;;  %v1070_v1 = vshll.u32 %v3556_v7, %v1068_v40 }
 0x1be   : > { %v1578_v54 = vsel %vm1567_vm9, nan, %v1577_v3  ;;  %v1084_v42 = vsel %vm961_vm10, %v1083_v29, %v3536_v39  ;;  %v1193_v53 = vshll.u32 %v1190_v16, 16  ;;  %v1183_v8 = vadd.s32 %v1182_v38, %v1172_v47 }
 0x1bf   : > { %v1918_v46 = vmul.f32 %v2241_v33, %v1578_v54  ;;  %v1071_v31 = vshrl.u32 %v1053_v48, %v1069_v9  ;;  %v1074_v45 = vadd.s32 127, %v1073_v20  ;;  %v1192_v56 = vmul.u32 %v1188_v4, %v3553_v13 }
 0x1c0   : > { %v1195_v21 = vshll.u32 %v1191_v36, 16  ;;  %vm1197_vm14 = vc.u32 %v1189_v12, %v1193_v53  ;;  %v1199_v62 = vadd.s32 %v1193_v53, %v1189_v12  ;;  %v1174_v7 = vshrl.u32 %v3566_v52, 16 }
 0x1c1   : > { %1978 = vmatpush.msra.mxu1 %v1918_v46  ;;  %2120 = vmatpush.msra.mxu3 %v1918_v46  ;;  %v1072_v18 = vor.u32 %v1071_v31, %v1070_v1  ;;  %v1075_v60 = vshll.u32 %v1074_v45, 23  ;;  %v1198_v27 = vsel %vm1197_vm14, 1, %v3987_v23  ;;  %vm3606_vm15 = vcmp.le.f32.partialorder %v959_v41, 0.7853982 }
 0x1c2   : > { %v1153_v13 = vsel %vm1147_vm4, %v1150_v55, %v1152_v28  ;;  %v1200_v48 = vadd.s32 %v1198_v27, %v1192_v56  ;;  %vm1201_vm0 = vc.u32 %v1199_v62, %v1195_v21  ;;  %v1086_v4 = vsel %vm3606_vm15, 0, %v1084_v42 }
 0x1c3   : > { %v1076_v33 = vor.u32 4788187, %v1075_v60  ;;  %v3614_v61 = vadd.s32 %v1183_v8, %v1174_v7  ;;  %v1202_v52 = vsel %vm1201_vm0, 1, %v3987_v23  ;;  %v3618_v11 = vshrl.u32 %v3377_v25, 5 }
 0x1c4   : > { %v1194_v41 = vshrl.u32 %v1190_v16, 16  ;;  %v1204_v19 = vadd.s32 %v1202_v52, %v1200_v48  ;;  %v649_v57 = vand.u32 2147483647, %v4028_v37  ;;  %v1901_v6 = vmul.f32 1.442695, %v4029_v5 }
 0x1c5   : > { %v1077_v63 = vand.u32 2147483647, %v1076_v33  ;;  %v1079_v29 = vcvt.s32.f32 %v1072_v18  ;;  %v3622_v55 = vadd.s32 %v1199_v62, %v1195_v21  ;;  %v1103_v28 = vadd.s32 3, %v1086_v4 }
 0x1c6   : > { %v1196_v0 = vshrl.u32 %v1191_v36, 16  ;;  %v1205_v35 = vadd.s32 %v1204_v19, %v1194_v41  ;;  %v1207_v12 = vmul.u32 %v3534_v22, %v1153_v13  ;;  %v670_v25 = vshrl.u32 %v3994_v15, %v3540_v58 }
 0x1c7   : > { %v1080_v59 = vmul.f32 %v1079_v29, %v1077_v63  ;;  %vm1209_vm1 = vc.u32 %v3614_v61, %v3622_v55  ;;  %v673_v32 = vshrl.u32 %v3995_v30, %v3540_v58  ;;  %v656_v51 = vand.u32 8388607, %v649_v57 }
 0x1c8   : > { %v1206_v16 = vadd.s32 %v1205_v35, %v1196_v0  ;;  %v667_v40 = vshrl.u32 %v3993_v49, %v3540_v58  ;;  %v669_v22 = vshll.u32 %v3993_v49, %v3467_v2  ;;  %v672_v36 = vshll.u32 %v3994_v15, %v3467_v2 }
 0x1c9   : > { %v1081_v38 = vxor.u32 2147483648, %v1080_v59  ;;  %v675_v3 = vshll.u32 %v3995_v30, %v3467_v2  ;;  %v676_v9 = vshrl.u32 %v3996_v14, %v3540_v58  ;;  %v666_v47 = vshll.u32 %v3988_v26, %v3467_v2 }
 0x1ca   : > { %v1210_v20 = vadd.s32 1, %v1206_v16  ;;  %v678_v54 = vshll.u32 %v3996_v14, %v3467_v2  ;;  %v679_v1 = vshrl.u32 %v3997_v50, %v3540_v58  ;;  %v3651_v53 = vor.u32 %v670_v25, %v669_v22 }
 0x1cb   : > { %v1082_v42 = vsel %vm961_vm10, %v1081_v38, %v1080_v59  ;;  %v674_v46 = vor.u32 %v673_v32, %v672_v36  ;;  %v677_v31 = vor.u32 %v676_v9, %v675_v3  ;;  %v657_v2 = vor.u32 8388608, %v656_v51 }
 0x1cc   : > { %v3656_v45 = vsel %vm3606_vm15, %v4016_v17, %v1082_v42  ;;  %v1211_v8 = vsel %vm1209_vm1, %v1210_v20, %v1206_v16  ;;  %v680_v56 = vor.u32 %v679_v1, %v678_v54  ;;  %v3663_v18 = vor.u32 %v667_v40, %v666_v47 }
 0x1cd   : > { %v1087_v21 = vmul.f32 %v3656_v45, %v3656_v45  ;;  %v1212_v62 = vadd.s32 %v1211_v8, %v1207_v12  ;;  %vm684_vm2 = vcmp.lt.s32.totalorder %v3618_v11, 4  ;;  %vm681_vm3 = vcmp.lt.s32.totalorder %v3618_v11, 1 }
 0x1ce   : > { %vm683_vm4 = vcmp.lt.s32.totalorder %v3618_v11, 3  ;;  %v690_v60 = vsel %vm684_vm2, %v677_v31, 920167782  ;;  %v694_v7 = vsel %vm684_vm2, %v680_v56, 1326507024  ;;  %v693_v48 = vsel %vm681_vm3, %v3651_v53, %v674_v46 }
 0x1cf   : > { %v1088_v27 = vmul.f32 -0.001358992, %v1087_v21  ;;  %v1095_v39 = vmul.f32 -0.00019511016, %v1087_v21  ;;  %v1213_v13 = vadd.s32 536870912, %v1212_v62  ;;  %v3676_v33 = vshrl.u32 %v3528_v44, 5 }
 0x1d0   : > { %v3679_v4 = vand.u32 31, %v3528_v44  ;;  %v695_v52 = vsel %vm683_vm4, %v677_v31, %v694_v7  ;;  %v3683_v41 = vshll.u32 %v657_v2, 8  ;;  %vm682_vm5 = vcmp.lt.s32.totalorder %v3618_v11, 2 }
 0x1d1   : > { %v1089_v19 = vadd.f32 0.041655596, %v1088_v27  ;;  %v1096_v5 = vadd.f32 0.008332121, %v1095_v39  ;;  %v3685_v63 = vshrl.u32 %v1213_v13, 30  ;;  %v1104_v29 = vand.u32 3, %v1103_v28 }
 0x1d2   : > { %v689_v0 = vsel %vm681_vm3, %v3663_v18, %v3651_v53  ;;  %v691_v44 = vsel %vm683_vm4, %v674_v46, %v690_v60  ;;  %v696_v35 = vsel %vm682_vm5, %v693_v48, %v695_v52  ;;  %2242 = vpow2.f32 %v1901_v6 }
 0x1d3   : > { %v1090_v12 = vmul.f32 %v1089_v19, %v1087_v21  ;;  %v1097_v59 = vmul.f32 %v1096_v5, %v1087_v21  ;;  %v1215_v25 = vshll.u32 %v3685_v63, 30  ;;  %v698_v32 = vand.u32 65535, %v3683_v41 }
 0x1d4   : > { %v699_v28 = vshrl.u32 %v3683_v41, 16  ;;  %v700_v16 = vand.u32 65535, %v696_v35  ;;  %v701_v51 = vshrl.u32 %v696_v35, 16  ;;  %v692_v36 = vsel %vm682_vm5, %v689_v0, %v691_v44 }
 0x1d5   : > { %v1091_v40 = vadd.f32 -0.4999988, %v1090_v12  ;;  %v1098_v22 = vadd.f32 -0.16666654, %v1097_v59  ;;  %v3699_v38 = vsub.s32 %v1212_v62, %v1215_v25  ;;  %vm1106_vm6 = vcmp.eq.s32.totalorder %v1104_v29, 0 }
 0x1d6   : > { %v665_v6 = vshrl.u32 %v3988_v26, %v3540_v58  ;;  %v703_v3 = vmul.u32 %v701_v51, %v698_v32  ;;  %v3705_v9 = vmul.u32 %v700_v16, %v699_v28  ;;  %vm1105_vm7 = vcmp.lt.s32.totalorder %v1104_v29, 2 }
 0x1d7   : > { %v1092_v20 = vmul.f32 %v1091_v40, %v1087_v21  ;;  %v1099_v47 = vmul.f32 %v1098_v22, %v1087_v21  ;;  %vm1217_vm8 = vcmp.lt.s32.totalorder %v3699_v38, 0  ;;  %v1218_v54 = vsub.s32 0, %v3699_v38 }
 0x1d8   : > { %vm1102_vm9 = vweird.f32 %v4016_v17  ;;  %v686_v1 = vsel %vm684_vm2, %v674_v46, 2102212464  ;;  %v702_v42 = vmul.u32 %v700_v16, %v698_v32  ;;  %v706_v31 = vshll.u32 %v703_v3, 16  ;;  %v2243_v2 = vpop.eup %2242 }
 0x1d9   : > { %v722_v8 = vand.u32 65535, %v692_v36  ;;  %v1093_v58 = vadd.f32 1.0, %v1092_v20  ;;  %v1100_v56 = vadd.f32 1.0, %v1099_v47  ;;  %v1219_v62 = vsel %vm1217_vm8, %v1218_v54, %v3699_v38 }
 0x1da   : > { %v723_v60 = vshrl.u32 %v692_v36, 16  ;;  %v1220_v21 = vclz %v1219_v62  ;;  %v705_v7 = vmul.u32 %v701_v51, %v699_v28  ;;  %v708_v27 = vshll.u32 %v3705_v9, 16 }
 0x1db   : > { %vm710_vm10 = vc.u32 %v702_v42, %v706_v31  ;;  %v1101_v39 = vmul.f32 %v1100_v56, %v3656_v45  ;;  %v1110_v13 = vxor.u32 2147483648, %v1093_v58  ;;  %v712_v46 = vadd.s32 %v706_v31, %v702_v42 }
 0x1dc   : > { %v711_v48 = vsel %vm710_vm10, 1, %v3987_v23  ;;  %vm1109_vm11 = vcmp.eq.s32.totalorder %v1104_v29, 2  ;;  %v1208_v52 = vadd.s32 %v3622_v55, %v3614_v61  ;;  %v2091_v19 = vadd.s32 4294967294, %v1220_v21 }
 0x1dd   : > { %v685_v5 = vsel %vm681_vm3, %v665_v6, %v3663_v18  ;;  %v1107_v0 = vxor.u32 2147483648, %v1101_v39  ;;  %v687_v44 = vsel %vm683_vm4, %v3651_v53, %v686_v1  ;;  %v713_v35 = vadd.s32 %v711_v48, %v705_v7 }
 0x1de   : > { %vm714_vm12 = vc.u32 %v712_v46, %v708_v27  ;;  %v1111_v45 = vsel %vm1109_vm11, %v1110_v13, %v1101_v39  ;;  %vm2092_vm13 = vcmp.lt.s32.totalorder %v2091_v19, 0  ;;  %v725_v59 = vmul.u32 %v723_v60, %v698_v32  ;;  %v4030_v27 = vld [vmem:[#allocation13_spill] sm:$0xff] }
 0x1df   : > { %v715_v12 = vsel %vm714_vm12, 1, %v3987_v23  ;;  %v1108_v25 = vsel %vm1106_vm6, %v1093_v58, %v1107_v0  ;;  %v1223_v61 = vsel %vm2092_vm13, 0, %v2091_v19  ;;  %v726_v16 = vmul.u32 %v722_v8, %v699_v28 }
 0x1e0   : > { %v717_v55 = vadd.s32 %v715_v12, %v713_v35  ;;  %v1112_v51 = vsel %vm1105_vm7, %v1108_v25, %v1111_v45  ;;  %v1224_v18 = vsub.s32 32, %v1223_v61  ;;  %v1228_v40 = vsub.s32 4294967266, %v1223_v61 }
 0x1e1   : > { %v707_v22 = vshrl.u32 %v703_v3, 16  ;;  %v1113_v53 = vsel %vm1102_vm9, nan, %v1112_v51  ;;  %v1225_v36 = vshll.u32 %v3699_v38, %v1223_v61  ;;  %v724_v6 = vmul.u32 %v722_v8, %v698_v32 }
 0x1e2   : > { %v728_v20 = vshll.u32 %v725_v59, 16  ;;  %v1915_v47 = vmul.f32 %v2243_v2, %v1113_v53  ;;  %v1226_v54 = vshrl.u32 %v1208_v52, %v1224_v18  ;;  %v1229_v1 = vadd.s32 127, %v1228_v40 }
 0x1e3   : > { %v718_v42 = vadd.s32 %v717_v55, %v707_v22  ;;  %v727_v31 = vmul.u32 %v723_v60, %v699_v28  ;;  %v730_v58 = vshll.u32 %v726_v16, 16  ;;  %v709_v3 = vshrl.u32 %v3705_v9, 16 }
 0x1e4   : > { %vm732_vm14 = vc.u32 %v724_v6, %v728_v20  ;;  %v734_v56 = vadd.s32 %v728_v20, %v724_v6  ;;  %1956 = vmatpush.msra.mxu0 %v1915_v47  ;;  %2117 = vmatpush.msra.mxu2 %v1915_v47  ;;  %v1227_v29 = vor.u32 %v1226_v54, %v1225_v36  ;;  %v1230_v62 = vshll.u32 %v1229_v1, 23 }
 0x1e5   : > { %v733_v17 = vsel %vm732_vm14, 1, %v3987_v23  ;;  %v3733_v38 = vsub.s32 32, %v3679_v4  ;;  %v1238_v32 = vsub.s32 4, %v3685_v63  ;;  %v688_v28 = vsel %vm682_vm5, %v685_v5, %v687_v44 }
 0x1e6   : > { %v735_v8 = vadd.s32 %v733_v17, %v727_v31  ;;  %vm736_vm15 = vc.u32 %v734_v56, %v730_v58  ;;  %v1231_v2 = vor.u32 4788187, %v1230_v62  ;;  %v3738_v60 = vadd.s32 %v718_v42, %v709_v3 }
 0x1e7   : > { %v737_v21 = vsel %vm736_vm15, 1, %v3987_v23  ;;  %vm1116_vm0 = vcmp.lt.s32.totalorder %v4022_v24, 0  ;;  %v729_v9 = vshrl.u32 %v725_v59, 16  ;;  %v804_v39 = vand.u32 2147483647, %v4030_v27 }
 0x1e8   : > { %v739_v7 = vadd.s32 %v737_v21, %v735_v8  ;;  %vm3745_vm1 = vcmp.le.f32.partialorder %v1114_v34, 0.7853982  ;;  %v1232_v48 = vand.u32 2147483647, %v1231_v2  ;;  %v1234_v46 = vcvt.s32.f32 %v1227_v29  ;;  %v4033_v8 = vld [vmem:[#allocation18_spill] sm:$0xff] }
 0x1e9   : > { %v3749_v11 = vadd.s32 %v734_v56, %v730_v58  ;;  %v1239_v52 = vsel %vm1116_vm0, %v1238_v32, %v3685_v63  ;;  %v731_v19 = vshrl.u32 %v726_v16, 16  ;;  %v742_v0 = vmul.u32 %v3683_v41, %v688_v28 }
 0x1ea   : > { %v740_v5 = vadd.s32 %v739_v7, %v729_v9  ;;  %v1235_v44 = vmul.f32 %v1234_v46, %v1232_v48  ;;  %v825_v34 = vshrl.u32 %v3994_v15, %v3733_v38  ;;  %v828_v35 = vshrl.u32 %v3995_v30, %v3733_v38 }
 0x1eb   : > { %vm744_vm2 = vc.u32 %v3738_v60, %v3749_v11  ;;  %v811_v12 = vand.u32 8388607, %v804_v39  ;;  %v822_v63 = vshrl.u32 %v3993_v49, %v3733_v38  ;;  %v824_v41 = vshll.u32 %v3993_v49, %v3679_v4 }
 0x1ec   : > { %v741_v45 = vadd.s32 %v740_v5, %v731_v19  ;;  %v1236_v59 = vxor.u32 2147483648, %v1235_v44  ;;  %v827_v25 = vshll.u32 %v3994_v15, %v3679_v4  ;;  %v830_v61 = vshll.u32 %v3995_v30, %v3679_v4 }
 0x1ed   : > { %v831_v55 = vshrl.u32 %v3996_v14, %v3733_v38  ;;  %v821_v51 = vshll.u32 %v3988_v26, %v3679_v4  ;;  %v833_v18 = vshll.u32 %v3996_v14, %v3679_v4  ;;  %v834_v49 = vshrl.u32 %v3997_v50, %v3733_v38 }
 0x1ee   : > { %v745_v16 = vadd.s32 1, %v741_v45  ;;  %v1237_v40 = vsel %vm1116_vm0, %v1236_v59, %v1235_v44  ;;  %v3781_v15 = vor.u32 %v825_v34, %v824_v41  ;;  %v3783_v22 = vor.u32 %v828_v35, %v827_v25 }
 0x1ef   : > { %v832_v30 = vor.u32 %v831_v55, %v830_v61  ;;  %v1240_v53 = vsel %vm3745_vm1, %v4022_v24, %v1237_v40  ;;  %v812_v14 = vor.u32 8388608, %v811_v12  ;;  %v835_v4 = vor.u32 %v834_v49, %v833_v18 }
 0x1f0   : > { %v746_v36 = vsel %vm744_vm2, %v745_v16, %v741_v45  ;;  %v1242_v6 = vmul.f32 %v1240_v53, %v1240_v53  ;;  %v3791_v20 = vor.u32 %v822_v63, %v821_v51  ;;  %vm839_vm3 = vcmp.lt.s32.totalorder %v3676_v33, 4 }
 0x1f1   : > { %v747_v50 = vadd.s32 %v746_v36, %v742_v0  ;;  %vm836_vm4 = vcmp.lt.s32.totalorder %v3676_v33, 1  ;;  %vm838_vm5 = vcmp.lt.s32.totalorder %v3676_v33, 3  ;;  %v845_v47 = vsel %vm839_vm3, %v832_v30, 920167782 }
 0x1f2   : > { %v849_v54 = vsel %vm839_vm3, %v835_v4, 1326507024  ;;  %v1243_v1 = vmul.f32 -0.001358992, %v1242_v6  ;;  %v1250_v42 = vmul.f32 -0.00019511016, %v1242_v6  ;;  %v848_v58 = vsel %vm836_vm4, %v3781_v15, %v3783_v22 }
 0x1f3   : > { %v748_v31 = vadd.s32 536870912, %v747_v50  ;;  %v1241_v56 = vsel %vm3745_vm1, 0, %v1239_v52  ;;  %v850_v29 = vsel %vm838_vm5, %v832_v30, %v849_v54  ;;  %v3808_v62 = vshll.u32 %v812_v14, 8 }
 0x1f4   : > { %v1244_v3 = vadd.f32 0.041655596, %v1243_v1  ;;  %v1251_v17 = vadd.f32 0.008332121, %v1250_v42  ;;  %vm837_vm6 = vcmp.lt.s32.totalorder %v3676_v33, 2  ;;  %v844_v28 = vsel %vm836_vm4, %v3791_v20, %v3781_v15 }
 0x1f5   : > { %v3810_v32 = vshrl.u32 %v748_v31, 30  ;;  %v1903_v2 = vmul.f32 1.442695, %v4033_v8  ;;  %v846_v21 = vsel %vm838_vm5, %v3783_v22, %v845_v47  ;;  %v851_v9 = vsel %vm837_vm6, %v848_v58, %v850_v29 }
 0x1f6   : > { %v1245_v7 = vmul.f32 %v1244_v3, %v1242_v6  ;;  %v1252_v13 = vmul.f32 %v1251_v17, %v1242_v6  ;;  %v1258_v48 = vadd.s32 3, %v1241_v56  ;;  %v853_v52 = vand.u32 65535, %v3808_v62 }
 0x1f7   : > { %v750_v46 = vshll.u32 %v3810_v32, 30  ;;  %v854_v19 = vshrl.u32 %v3808_v62, 16  ;;  %v855_v5 = vand.u32 65535, %v851_v9  ;;  %v856_v0 = vshrl.u32 %v851_v9, 16 }
 0x1f8   : > { %v1246_v44 = vadd.f32 -0.4999988, %v1245_v7  ;;  %v1253_v34 = vadd.f32 -0.16666654, %v1252_v13  ;;  %v847_v45 = vsel %vm837_vm6, %v844_v28, %v846_v21  ;;  %2244 = vpow2.f32 %v1903_v2 }
 0x1f9   : > { %v751_v35 = vsub.s32 %v747_v50, %v750_v46  ;;  %v858_v12 = vmul.u32 %v856_v0, %v853_v52  ;;  %v3828_v63 = vmul.u32 %v855_v5, %v854_v19  ;;  %v1259_v61 = vand.u32 3, %v1258_v48 }
 0x1fa   : > { %v1247_v41 = vmul.f32 %v1246_v44, %v1242_v6  ;;  %v1254_v59 = vmul.f32 %v1253_v34, %v1242_v6  ;;  %v857_v55 = vmul.u32 %v855_v5, %v853_v52  ;;  %v877_v51 = vand.u32 65535, %v847_v45 }
 0x1fb   : > { %vm752_vm7 = vcmp.lt.s32.totalorder %v751_v35, 0  ;;  %v753_v25 = vsub.s32 0, %v751_v35  ;;  %v861_v16 = vshll.u32 %v858_v12, 16  ;;  %v878_v30 = vshrl.u32 %v847_v45, 16 }
 0x1fc   : > { %v1248_v18 = vadd.f32 1.0, %v1247_v41  ;;  %v1255_v49 = vadd.f32 1.0, %v1254_v59  ;;  %v860_v14 = vmul.u32 %v856_v0, %v854_v19  ;;  %v863_v4 = vshll.u32 %v3828_v63, 16 }
 0x1fd   : > { %v754_v40 = vsel %vm752_vm7, %v753_v25, %v751_v35  ;;  %vm865_vm8 = vc.u32 %v857_v55, %v861_v16  ;;  %v867_v6 = vadd.s32 %v861_v16, %v857_v55  ;;  %vm1257_vm9 = vweird.f32 %v4022_v24 }
 0x1fe   : > { %v755_v36 = vclz %v754_v40  ;;  %v1256_v50 = vmul.f32 %v1255_v49, %v1240_v53  ;;  %v1265_v47 = vxor.u32 2147483648, %v1248_v18  ;;  %v866_v54 = vsel %vm865_vm8, 1, %v3987_v23  ;;  %v2245_v1 = vpop.eup %2244 }
 0x1ff   : > { %vm1260_vm10 = vcmp.lt.s32.totalorder %v1259_v61, 2  ;;  %vm1261_vm11 = vcmp.eq.s32.totalorder %v1259_v61, 0  ;;  %vm1264_vm12 = vcmp.eq.s32.totalorder %v1259_v61, 2  ;;  %v868_v58 = vadd.s32 %v866_v54, %v860_v14 }
 0x200   : > { %v2082_v42 = vadd.s32 4294967294, %v755_v36  ;;  %v1262_v31 = vxor.u32 2147483648, %v1256_v50  ;;  %vm869_vm13 = vc.u32 %v867_v6, %v863_v4  ;;  %v743_v56 = vadd.s32 %v3749_v11, %v3738_v60 }
 0x201   : > { %v870_v53 = vsel %vm869_vm13, 1, %v3987_v23  ;;  %v880_v29 = vmul.u32 %v878_v30, %v853_v52  ;;  %v1266_v17 = vsel %vm1264_vm12, %v1265_v47, %v1256_v50  ;;  %v881_v2 = vmul.u32 %v877_v51, %v854_v19 }
 0x202   : > { %vm2083_vm14 = vcmp.lt.s32.totalorder %v2082_v42, 0  ;;  %v1263_v3 = vsel %vm1261_vm11, %v1248_v18, %v1262_v31  ;;  %v872_v7 = vadd.s32 %v870_v53, %v868_v58  ;;  %v862_v48 = vshrl.u32 %v858_v12, 16 }
 0x203   : > { %v758_v8 = vsel %vm2083_vm14, 0, %v2082_v42  ;;  %v1267_v28 = vsel %vm1260_vm10, %v1263_v3, %v1266_v17  ;;  %v879_v46 = vmul.u32 %v877_v51, %v853_v52  ;;  %v883_v5 = vshll.u32 %v880_v29, 16 }
 0x204   : > { %v759_v21 = vsub.s32 32, %v758_v8  ;;  %v763_v9 = vsub.s32 4294967266, %v758_v8  ;;  %v1268_v13 = vsel %vm1257_vm9, nan, %v1267_v28  ;;  %v760_v60 = vshll.u32 %v751_v35, %v758_v8 }
 0x205   : > { %v1916_v0 = vmul.f32 %v2245_v1, %v1268_v13  ;;  %v882_v34 = vmul.u32 %v878_v30, %v854_v19  ;;  %v885_v45 = vshll.u32 %v881_v2, 16  ;;  %vm887_vm15 = vc.u32 %v879_v46, %v883_v5 }
 0x206   : > { %v761_v11 = vshrl.u32 %v743_v56, %v759_v21  ;;  %v764_v44 = vadd.s32 127, %v763_v9  ;;  %v889_v41 = vadd.s32 %v883_v5, %v879_v46  ;;  %v873_v61 = vadd.s32 %v872_v7, %v862_v48 }
 0x207   : > { %1979 = vmatpush.msra.mxu1 %v1916_v0  ;;  %2121 = vmatpush.msra.mxu3 %v1916_v0  ;;  %v888_v55 = vsel %vm887_vm15, 1, %v3987_v23  ;;  %v820_v24 = vshrl.u32 %v3988_v26, %v3733_v38  ;;  %v841_v52 = vsel %vm839_vm3, %v3783_v22, 2102212464  ;;  %v864_v12 = vshrl.u32 %v3828_v63, 16 }
 0x208   : > { %v762_v59 = vor.u32 %v761_v11, %v760_v60  ;;  %v765_v25 = vshll.u32 %v764_v44, 23  ;;  %v890_v35 = vadd.s32 %v888_v55, %v882_v34  ;;  %vm891_vm0 = vc.u32 %v889_v41, %v885_v45 }
 0x209   : > { %v892_v16 = vsel %vm891_vm0, 1, %v3987_v23  ;;  %v840_v51 = vsel %vm836_vm4, %v820_v24, %v3791_v20  ;;  %v884_v18 = vshrl.u32 %v880_v29, 16  ;;  %v842_v26 = vsel %vm838_vm5, %v3781_v15, %v841_v52 }
 0x20a   : > { %v766_v19 = vor.u32 4788187, %v765_v25  ;;  %v894_v49 = vadd.s32 %v892_v16, %v890_v35  ;;  %v769_v30 = vcvt.s32.f32 %v762_v59  ;;  %v874_v38 = vadd.s32 %v873_v61, %v864_v12 }
 0x20b   : > { %v886_v22 = vshrl.u32 %v881_v2, 16  ;;  %v893_v4 = vadd.s32 %v889_v41, %v885_v45  ;;  %v843_v23 = vsel %vm837_vm6, %v840_v51, %v842_v26  ;;  %vm651_vm2 = vcmp.lt.s32.totalorder %v4028_v37, 0 }
 0x20c   : > { %v767_v40 = vand.u32 2147483647, %v766_v19  ;;  %v895_v36 = vadd.s32 %v894_v49, %v884_v18  ;;  %vm3857_vm3 = vcmp.le.f32.partialorder %v649_v57, 0.7853982  ;;  %v897_v54 = vmul.u32 %v3808_v62, %v843_v23  ;;  %v1923_v23 = vld [vmem:[%s3933_s3] sm:$0xff] }
 0x20d   : > { %vm899_vm1 = vc.u32 %v874_v38, %v893_v4  ;;  %v773_v6 = vsub.s32 4, %v3810_v32  ;;  %v1897_v13 = vmul.f32 1.442695, %v3014_v43  ;;  %vm792_vm5 = vweird.f32 %v4028_v37  ;;  %1927 = vperm.xlu2 %2215, %v1923_v23  }
 0x20e   : > { %v770_v14 = vmul.f32 %v769_v30, %v767_v40  ;;  %v896_v63 = vadd.s32 %v895_v36, %v886_v22  ;;  %v898_v52 = vadd.s32 %v893_v4, %v874_v38  ;;  %v1922_v22 = vld [vmem:[%s3932_s2 + $0x8] sm:$0xff]  ;;  %vm1935_vm10 = vcmask 261120  }
 0x20f   : > { %v774_v57 = vsel %vm651_vm2, %v773_v6, %v3810_v32  ;;  %2246 = vpow2.f32 %v1897_v13  ;;  %v1924_v4 = vld [vmem:[%s3933_s3 + $0x8] sm:$0xff]  ;;  %vm806_vm11 = vcmp.lt.s32.totalorder %v4030_v27, 0  ;;  %vm805_vm12 = vcmp.le.f32.partialorder %v804_v39, 0.7853982 }
 0x210   : > { %v771_v50 = vxor.u32 2147483648, %v770_v14  ;;  %v900_v20 = vadd.s32 1, %v896_v63  ;;  %v776_v62 = vsel %vm3857_vm3, 0, %v774_v57  ;;  %1932 = vperm.xlu1 %2216, %v1924_v4   ;;  %v1899_v39 = vmul.f32 1.442695, %v3017_v10 }
 0x211   : > { %v793_v48 = vadd.s32 3, %v776_v62  ;;  %vm947_vm0 = vweird.f32 %v4030_v27 }
 0x212   : > { %v772_v15 = vsel %vm651_vm2, %v771_v50, %v770_v14  ;;  %v901_v1 = vsel %vm899_vm1, %v900_v20, %v896_v63  ;;  %v1921_v14 = vld [vmem:[%s3932_s2] sm:$0xff]  ;;  %2248 = vpow2.f32 %v1899_v39 }
 0x213   : > { %v775_v33 = vsel %vm3857_vm3, %v4028_v37, %v772_v15  ;;  %v902_v31 = vadd.s32 %v901_v1, %v897_v54  ;;  %v794_v44 = vand.u32 3, %v793_v48 }
 0x214   : > { %v777_v42 = vmul.f32 %v775_v33, %v775_v33 }
 0x215   : > { %v903_v53 = vadd.s32 536870912, %v902_v31  ;;  %vm796_vm6 = vcmp.eq.s32.totalorder %v794_v44, 0  ;;  %vm799_vm7 = vcmp.eq.s32.totalorder %v794_v44, 2  ;;  %vm795_vm9 = vcmp.lt.s32.totalorder %v794_v44, 2  ;;  %v2247_v12 = vpop.eup %2246 }
 0x216   : > { %v778_v58 = vmul.f32 -0.001358992, %v777_v42  ;;  %v785_v56 = vmul.f32 -0.00019511016, %v777_v42 }
 0x217   : > { %v3867_v17 = vshrl.u32 %v903_v53, 30 }
 0x218   : > { %v779_v29 = vadd.f32 0.041655596, %v778_v58  ;;  %v786_v3 = vadd.f32 0.008332121, %v785_v56 }
 0x219   : > { %v905_v28 = vshll.u32 %v3867_v17, 30  ;;  %v928_v47 = vsub.s32 4, %v3867_v17 }
 0x21a   : > { %v780_v8 = vmul.f32 %v779_v29, %v777_v42  ;;  %v787_v2 = vmul.f32 %v786_v3, %v777_v42 }
 0x21b   : > { %v906_v7 = vsub.s32 %v902_v31, %v905_v28  ;;  %v929_v1 = vsel %vm806_vm11, %v928_v47, %v3867_v17 }
 0x21c   : > { %v781_v21 = vadd.f32 -0.4999988, %v780_v8  ;;  %v788_v9 = vadd.f32 -0.16666654, %v787_v2  ;;  %v931_v58 = vsel %vm805_vm12, 0, %v929_v1 }
 0x21d   : > { %vm907_vm4 = vcmp.lt.s32.totalorder %v906_v7, 0  ;;  %v908_v32 = vsub.s32 0, %v906_v7  ;;  %v948_v3 = vadd.s32 3, %v931_v58 }
 0x21e   : > { %v782_v46 = vmul.f32 %v781_v21, %v777_v42  ;;  %v789_v5 = vmul.f32 %v788_v9, %v777_v42 }
 0x21f   : > { %v909_v11 = vsel %vm907_vm4, %v908_v32, %v906_v7  ;;  %v949_v21 = vand.u32 3, %v948_v3 }
 0x220   : > { %v783_v0 = vadd.f32 1.0, %v782_v46  ;;  %v790_v60 = vadd.f32 1.0, %v789_v5  ;;  %v910_v34 = vclz %v909_v11  ;;  %v2249_v5 = vpop.eup %2248 }
 0x221   : > { %vm951_vm13 = vcmp.eq.s32.totalorder %v949_v21, 0  ;;  %vm954_vm14 = vcmp.eq.s32.totalorder %v949_v21, 2  ;;  %vm950_vm15 = vcmp.lt.s32.totalorder %v949_v21, 2 }
 0x222   : > { %v791_v45 = vmul.f32 %v790_v60, %v775_v33  ;;  %v800_v41 = vxor.u32 2147483648, %v783_v0  ;;  %v2085_v59 = vadd.s32 4294967294, %v910_v34 }
 0x224   : > { %v797_v25 = vxor.u32 2147483648, %v791_v45  ;;  %vm2086_vm8 = vcmp.lt.s32.totalorder %v2085_v59, 0  ;;  %v801_v61 = vsel %vm799_vm7, %v800_v41, %v791_v45 }
 0x225   : > { %v913_v55 = vsel %vm2086_vm8, 0, %v2085_v59 }
 0x226   : > { %v798_v43 = vsel %vm796_vm6, %v783_v0, %v797_v25  ;;  %v914_v35 = vsub.s32 32, %v913_v55  ;;  %v918_v19 = vsub.s32 4294967266, %v913_v55  ;;  %v915_v18 = vshll.u32 %v906_v7, %v913_v55 }
 0x227   : > { %v802_v24 = vsel %vm795_vm9, %v798_v43, %v801_v61 }
 0x228   : > { %v803_v16 = vsel %vm792_vm5, nan, %v802_v24  ;;  %v916_v49 = vshrl.u32 %v898_v52, %v914_v35  ;;  %v919_v40 = vadd.s32 127, %v918_v19 }
 0x229   : > { %v1913_v51 = vmul.f32 %v2247_v12, %v803_v16 }
 0x22a   : > { %v917_v37 = vor.u32 %v916_v49, %v915_v18  ;;  %v920_v30 = vshll.u32 %v919_v40, 23 }
 0x22b   : > { %1957 = vmatpush.msra.mxu0 %v1913_v51  ;;  %2118 = vmatpush.msra.mxu2 %v1913_v51 }
 0x22c   : > { %v921_v26 = vor.u32 4788187, %v920_v30  ;;  %v924_v38 = vcvt.s32.f32 %v917_v37  ;;  %2106 = vmatmul.msk.f32.vlgmr.msra.gmra.mxu2 %vm1935_vm10, %v1922_v22  ;;  %2105 = vmatmul.msk.f32.vlgmr.msra.gmra.mxu0 %vm1935_vm10, %v1921_v14 }
 0x22e   : > { %v922_v36 = vand.u32 2147483647, %v921_v26 }
 0x230   : > { %v925_v63 = vmul.f32 %v924_v38, %v922_v36 }
 0x232   : > { %v926_v50 = vxor.u32 2147483648, %v925_v63 }
 0x234   : > { %v927_v20 = vsel %vm806_vm11, %v926_v50, %v925_v63 }
 0x235   : > { %v930_v15 = vsel %vm805_vm12, %v4030_v27, %v927_v20 }
 0x236   : > { %v932_v54 = vmul.f32 %v930_v15, %v930_v15 }
 0x238   : > { %v933_v6 = vmul.f32 -0.001358992, %v932_v54  ;;  %v940_v33 = vmul.f32 -0.00019511016, %v932_v54 }
 0x23a   : > { %v934_v42 = vadd.f32 0.041655596, %v933_v6  ;;  %v941_v31 = vadd.f32 0.008332121, %v940_v33 }
 0x23c   : > { %v935_v56 = vmul.f32 %v934_v42, %v932_v54  ;;  %v942_v53 = vmul.f32 %v941_v31, %v932_v54 }
 0x23e   : > { %v936_v57 = vadd.f32 -0.4999988, %v935_v56  ;;  %v943_v29 = vadd.f32 -0.16666654, %v942_v53 }
 0x240   : > { %v937_v62 = vmul.f32 %v936_v57, %v932_v54  ;;  %v944_v8 = vmul.f32 %v943_v29, %v932_v54 }
 0x242   : > { %v938_v2 = vadd.f32 1.0, %v937_v62  ;;  %v945_v28 = vadd.f32 1.0, %v944_v8 }
 0x244   : > { %v946_v9 = vmul.f32 %v945_v28, %v930_v15  ;;  %v955_v7 = vxor.u32 2147483648, %v938_v2 }
 0x246   : > { %v952_v17 = vxor.u32 2147483648, %v946_v9  ;;  %v956_v48 = vsel %vm954_vm14, %v955_v7, %v946_v9 }
 0x248   : > { %v953_v13 = vsel %vm951_vm13, %v938_v2, %v952_v17 }
 0x249   : > { %v957_v46 = vsel %vm950_vm15, %v953_v13, %v956_v48 }
 0x24a   : > { %v958_v10 = vsel %vm947_vm0, nan, %v957_v46 }
 0x24b   : > { %v1914_v32 = vmul.f32 %v2249_v5, %v958_v10 }
 0x24d   : > { %1980 = vmatpush.msra.mxu1 %v1914_v32  ;;  %2122 = vmatpush.msra.mxu3 %v1914_v32 }
 0x24e   : > { %2108 = vmatmul.msk.f32.vlgmr.msra.gmra.mxu3 %vm1935_vm10, %v1922_v22  ;;  %2107 = vmatmul.msk.f32.vlgmr.msra.gmra.mxu1 %vm1935_vm10, %v1921_v14 }
 0x267   : > { %v1928_v0 = vpop.permute.xlu2 %1927 }
 0x282   : > { %v1933_v44 = vpop.permute.xlu1 %1932 }
 0x2a9   : > { %v1959_v60 = vpop.f32.mrf.mxu0 }
 0x2aa   : > { %v1960_v11 = vadd.f32 %v1959_v60, %v1928_v0 }
 0x2ac   : > { %v1988_v34 = vmax.f32 %v1960_v11, 0.0 }
 0x2ae   : > { %1992 = vst [vmem:[%s191_s6] sm:$0xff] %v1988_v34 }
 0x2af   : > { %v1962_v27 = vpop.f32.mrf.mxu2 }
 0x2b0   : > { %v1963_v45 = vadd.f32 %v1962_v27, %v1933_v44 }
 0x2b2   : > { %v1990_v41 = vmax.f32 %v1963_v45, 0.0 }
 0x2b4   : > { %1994 = vst [vmem:[%s191_s6 + $0x10] sm:$0xff] %v1990_v41 }
 0x2cb   : > { %v1982_v59 = vpop.f32.mrf.mxu1 }
 0x2cc   : > { %v1983_v25 = vadd.f32 %v1982_v59, %v1928_v0 }
 0x2ce   : > { %v1989_v43 = vmax.f32 %v1983_v25, 0.0 }
 0x2d0   : > { %1993 = vst [vmem:[%s191_s6 + $0x8] sm:$0xff] %v1989_v43 }
 0x2d1   : > { %v1985_v61 = vpop.f32.mrf.mxu3 }
 0x2d2   : > { %v1986_v55 = vadd.f32 %v1985_v61, %v1933_v44 }
 0x2d4   : > { %v1991_v24 = vmax.f32 %v1986_v55, 0.0 }
 0x2d6   : > { %1995 = vst [vmem:[%s191_s6 + $0x18] sm:$0xff] %v1991_v24 }
 0x2d7   : > { %2277 = shalt.err (!%p2274_p3)
}
 0x2d8   : > { %s2324_s29 = smov 256   ;;  %s2325_s30 = smov 512  }
 0x2d9   : > { %s2326_s5 = smov 16  }
 0x2da   : > { %2123 = dma.vmem_to_hbm [thread:$0]  (%p2390_p5), %s2010_s11, 512, %s2012_s12, %s1997_s13, %s2324_s29, %s2325_s30, %s2326_s5  }
 0x2db PF: > { %p2129_p4 = scmp.ge.s32.totalorder %s2312_s18, 2  ;;  %s2026_s6 = sand.u32 1, %s2300_s15  }
 0x2dc   : > { %s2027_s7 = scalar_lea.sflag [#allocation3], %s2026_s6 }
 0x2dd   : > { %p2126_p7 = pnand %p2129_p4, %p2394_p6 }
 0x2df   : > { %p2127_p8 = pneg %p2126_p7 }
 0x2e1   : > { %2295 = dma.done.wait (%p2127_p8), %s2027_s7, 512  }
 0x2e2   : > { %2297 = vsyncadd (%p2127_p8), %s2027_s7, 4294966784  ;;  %p14_p9 = scmp.ge.s32.totalorder %s2377_s21, 4   ;;  %s4036_s15 = smov %s2304_s16 }
 0x2e3   : > { %s4037_s16 = smov %s2308_s17  ;;  %s4038_s17 = smov %s2388_s24 }
 0x2e4   : > { %s4039_s18 = smov %s2377_s21  ;;  %16 = sbr.rel (!%p14_p9) target bundleno = 3 (0x3), region = 71 }
 0x2e9   :  { %2033 = vsyncpa [#allocation3], 1 }
 0x2ea   :  { %2035 = vsyncpa [#allocation3 + $0x1], 1 }

</bundles_post_ra>
